<compile_context>
chip_gen: v7x
topology: tpu7x:2x2x1
jax: 0.10.0
libtpu: 0.0.40
codegen_flags: <defaults>
</compile_context>

<pallas_src>
import functools

import jax
import jax.numpy as jnp
from jax.experimental import pallas as pl
from jax.experimental.pallas import tpu as pltpu


def _round_up(x, m):
    return (x + m - 1) // m * m


# ---------------------------------------------------------------------------
# Pallas matmul kernel with fused scale/shift (+ residual, + ReLU) epilogue
# ---------------------------------------------------------------------------

def _matmul_fused_kernel(a_ref, w_ref, scale_ref, shift_ref, *rest,
                         apply_relu, has_residual):
    """out = act((A @ W) * scale + shift [+ residual]); K is the last grid axis."""
    if has_residual:
        res_ref, o_ref, acc_ref = rest
    else:
        res_ref = None
        o_ref, acc_ref = rest

    k = pl.program_id(2)

    @pl.when(k == 0)
    def _():
        acc_ref[...] = jnp.zeros_like(acc_ref)

    acc_ref[...] += jnp.dot(a_ref[...], w_ref[...],
                            preferred_element_type=jnp.float32)

    @pl.when(k == pl.num_programs(2) - 1)
    def _():
        y = acc_ref[...] * scale_ref[...] + shift_ref[...]
        if has_residual:
            y = y + res_ref[...]
        if apply_relu:
            y = jnp.maximum(y, 0.0)
        o_ref[...] = y.astype(o_ref.dtype)


def _pick_k_tile(K):
    """Pick a K tile: single step when small, else a 128-multiple divisor."""
    if K <= 1024:
        return K, K                       # one K step, no padding needed
    for cand in (512, 384, 256, 128):
        if K % cand == 0:
            return cand, K
    tk = 256
    return tk, _round_up(K, tk)           # fallback: pad K (reduction-safe)


def matmul_fused(a, w, scale, shift, *, relu, residual=None):
    """Tiled Pallas matmul, bf16 operands, f32 accumulate, fused epilogue.

    a: (M, K), w: (K, N), scale/shift: (N,), residual: optional (M, N).
    Only K is ever padded (required for reduction correctness); M/N use
    adaptive tiles + cdiv grids, so no full-matrix padding round trips.
    """
    M, K = a.shape
    K2, N = w.shape
    assert K == K2

    tm = M if M <= 512 else 512           # multiple of 8 or equal to full M
    tn = N if N <= 256 else 256           # multiple of 128 or equal to full N
    tk, Kp = _pick_k_tile(K)

    if Kp != K:
        a = jnp.pad(a, ((0, 0), (0, Kp - K)))
        w = jnp.pad(w, ((0, Kp - K), (0, 0)))

    a = a.astype(jnp.bfloat16)
    w = w.astype(jnp.bfloat16)
    scale2 = scale.reshape(1, N).astype(jnp.float32)
    shift2 = shift.reshape(1, N).astype(jnp.float32)

    grid = (pl.cdiv(M, tm), pl.cdiv(N, tn), Kp // tk)

    in_specs = [
        pl.BlockSpec((tm, tk), lambda i, j, k: (i, k)),
        pl.BlockSpec((tk, tn), lambda i, j, k: (k, j)),
        pl.BlockSpec((1, tn), lambda i, j, k: (0, j)),
        pl.BlockSpec((1, tn), lambda i, j, k: (0, j)),
    ]
    operands = [a, w, scale2, shift2]
    has_residual = residual is not None
    if has_residual:
        # Same (i, j) block for every K step -> Pallas skips the re-fetch.
        in_specs.append(pl.BlockSpec((tm, tn), lambda i, j, k: (i, j)))
        operands.append(residual.astype(jnp.float32))

    kernel = functools.partial(_matmul_fused_kernel, apply_relu=relu,
                               has_residual=has_residual)
    out = pl.pallas_call(
        kernel,
        out_shape=jax.ShapeDtypeStruct((M, N), jnp.float32),
        grid_spec=pltpu.PrefetchScalarGridSpec(
            num_scalar_prefetch=0,
            grid=grid,
            in_specs=in_specs,
            out_specs=pl.BlockSpec((tm, tn), lambda i, j, k: (i, j)),
            scratch_shapes=[pltpu.VMEM((tm, tn), jnp.float32)],
        ),
        compiler_params=pltpu.CompilerParams(
            dimension_semantics=("parallel", "parallel", "arbitrary")),
    )(*operands)
    return out


# ---------------------------------------------------------------------------
# Global average pool (small batch-gridded Pallas reduction)
# ---------------------------------------------------------------------------

def _avgpool_kernel(x_ref, o_ref):
    o_ref[...] = jnp.mean(x_ref[...], axis=1, keepdims=True)


def global_avgpool(x):
    N, H, W, C = x.shape
    xr = x.reshape(N, H * W, C)
    out = pl.pallas_call(
        _avgpool_kernel,
        out_shape=jax.ShapeDtypeStruct((N, 1, C), x.dtype),
        grid_spec=pltpu.PrefetchScalarGridSpec(
            num_scalar_prefetch=0,
            grid=(N,),
            in_specs=[pl.BlockSpec((1, H * W, C), lambda b: (b, 0, 0))],
            out_specs=pl.BlockSpec((1, 1, C), lambda b: (b, 0, 0)),
        ),
        compiler_params=pltpu.CompilerParams(dimension_semantics=("parallel",)),
    )(xr)
    return out.reshape(N, C)


# ---------------------------------------------------------------------------
# Conv / pool wrappers (im2col glue in JAX, compute in Pallas)
# ---------------------------------------------------------------------------

def _im2col(x, kh, kw, stride, pad):
    """x: NHWC -> (N*Ho*Wo, kh*kw*C) patches, flattened (kh, kw, C)-major."""
    N, H, W, C = x.shape
    Ho = (H + 2 * pad - kh) // stride + 1
    Wo = (W + 2 * pad - kw) // stride + 1
    xp = jnp.pad(x, ((0, 0), (pad, pad), (pad, pad), (0, 0)))
    cols = []
    for i in range(kh):
        for j in range(kw):
            cols.append(xp[:, i:i + stride * Ho:stride,
                           j:j + stride * Wo:stride, :])
    patches = jnp.concatenate(cols, axis=-1)  # (N, Ho, Wo, kh*kw*C)
    return patches.reshape(N * Ho * Wo, kh * kw * C), (N, Ho, Wo)


def conv2d(x, conv_params, *, stride, pad, scale=None, shift=None, relu=False,
           residual=None):
    """Conv (PyTorch layout (Cout,Cin,KH,KW)) + fused scale/shift/residual/ReLU."""
    w, b = conv_params["w"], conv_params["b"]
    Cout, Cin, KH, KW = w.shape
    # bf16 patches halve the HBM footprint of the dominant im2col operand.
    a, (N, Ho, Wo) = _im2col(x.astype(jnp.bfloat16), KH, KW, stride, pad)
    w2 = jnp.transpose(w, (2, 3, 1, 0)).reshape(KH * KW * Cin, Cout)
    if scale is None:
        scale = jnp.ones((Cout,), jnp.float32)
        shift = b
    res2 = None if residual is None else residual.reshape(N * Ho * Wo, Cout)
    out = matmul_fused(a, w2, scale, shift, relu=relu, residual=res2)
    return out.reshape(N, Ho, Wo, Cout)


def maxpool_3x3_s2_p1(x):
    """3x3/s2/p1 max-pool as an XLA-fused shifted-max tree (no 9x copies)."""
    N, H, W, C = x.shape
    Ho = (H + 2 - 3) // 2 + 1
    Wo = (W + 2 - 3) // 2 + 1
    neg = jnp.asarray(-1e30, x.dtype)
    xp = jnp.pad(x, ((0, 0), (1, 1), (1, 1), (0, 0)), constant_values=neg)
    out = None
    for i in range(3):
        for j in range(3):
            win = xp[:, i:i + 2 * Ho:2, j:j + 2 * Wo:2, :]
            out = win if out is None else jnp.maximum(out, win)
    return out


# ---------------------------------------------------------------------------
# Parameter initialization (deterministic, synthetic)
# ---------------------------------------------------------------------------

def _init_conv(key, cout, cin, kh, kw):
    k1, k2 = jax.random.split(key)
    fan_in = cin * kh * kw
    w = jax.random.normal(k1, (cout, cin, kh, kw), jnp.float32) / jnp.sqrt(fan_in)
    b = 0.01 * jax.random.normal(k2, (cout,), jnp.float32)
    return {"w": w, "b": b}


def _init_bn(key, c):
    k1, k2, k3, k4 = jax.random.split(key, 4)
    return {
        "gamma": 1.0 + 0.1 * jax.random.normal(k1, (c,), jnp.float32),
        "beta": 0.1 * jax.random.normal(k2, (c,), jnp.float32),
        "mean": 0.1 * jax.random.normal(k3, (c,), jnp.float32),
        "var": 1.0 + 0.1 * jnp.abs(jax.random.normal(k4, (c,), jnp.float32)),
    }


def _init_block(key, cin, cout, use_1x1):
    ks = jax.random.split(key, 5)
    return {
        "conv1": _init_conv(ks[0], cout, cin, 3, 3),
        "conv2": _init_conv(ks[1], cout, cout, 3, 3),
        "bn1": _init_bn(ks[2], cout),
        "bn2": _init_bn(ks[3], cout),
        "conv3": _init_conv(ks[4], cout, cin, 1, 1) if use_1x1 else None,
    }


def init_resnet18(key, num_class):
    ks = jax.random.split(key, 12)
    return {
        "conv1": _init_conv(ks[0], 64, 3, 7, 7),
        "bn1": _init_bn(ks[1], 64),
        "layer1": [_init_block(ks[2], 64, 64, False),
                   _init_block(ks[3], 64, 64, False)],
        "layer2": [_init_block(ks[4], 64, 128, True),
                   _init_block(ks[5], 128, 128, False)],
        "layer3": [_init_block(ks[6], 128, 256, True),
                   _init_block(ks[7], 256, 256, False)],
        "layer4": [_init_block(ks[8], 256, 512, True),
                   _init_block(ks[9], 512, 512, False)],
        "fc": {
            "w": 0.05 * jax.random.normal(ks[10], (num_class, 512), jnp.float32),
            "b": 0.01 * jax.random.normal(ks[11], (num_class,), jnp.float32),
        },
    }


# Static architecture config (kept OUT of the jitted params pytree so that
# strides remain Python ints, never tracers).
_LAYER_STRIDES = {
    "layer1": (1, 1),
    "layer2": (2, 1),
    "layer3": (2, 1),
    "layer4": (2, 1),
}


# ---------------------------------------------------------------------------
# Forward pass
# ---------------------------------------------------------------------------

def _bn_scale_shift(conv_bias, bn, eps=1e-5):
    s = bn["gamma"] / jnp.sqrt(bn["var"] + eps)
    t = (conv_bias - bn["mean"]) * s + bn["beta"]
    return s, t


def residual_block(x, p, *, stride):
    s1, t1 = _bn_scale_shift(p["conv1"]["b"], p["bn1"])
    y = conv2d(x, p["conv1"], stride=stride, pad=1,
               scale=s1, shift=t1, relu=True)
    if p["conv3"] is not None:
        identity = conv2d(x, p["conv3"], stride=stride, pad=0, relu=False)
    else:
        identity = x
    s2, t2 = _bn_scale_shift(p["conv2"]["b"], p["bn2"])
    # conv2 + bn2 + residual add + ReLU all fused into one matmul epilogue.
    return conv2d(y, p["conv2"], stride=1, pad=1, scale=s2, shift=t2,
                  relu=True, residual=identity)


def resnet18_forward(x_nchw, params):
    x = jnp.transpose(x_nchw, (0, 2, 3, 1)).astype(jnp.float32)  # NCHW -> NHWC
    # Stem: conv1 + bn1 (the reference forward applies NO relu here).
    s, t = _bn_scale_shift(params["conv1"]["b"], params["bn1"])
    x = conv2d(x, params["conv1"], stride=2, pad=3, scale=s, shift=t, relu=False)
    x = maxpool_3x3_s2_p1(x)
    for layer in ("layer1", "layer2", "layer3", "layer4"):
        for blk, stride in zip(params[layer], _LAYER_STRIDES[layer]):
            x = residual_block(x, blk, stride=stride)
    x = global_avgpool(x)                                    # (N, 512)
    fc = params["fc"]
    ones = jnp.ones((fc["w"].shape[0],), jnp.float32)
    out = matmul_fused(x, fc["w"].T, ones, fc["b"], relu=False)
    return out                                               # (N, num_class)


# ---------------------------------------------------------------------------

if __name__ == "__main__":
    num_class = 10
    key = jax.random.PRNGKey(0)
    kx, kp = jax.random.split(key)
    # Small-shape analogue of torch.randn(1, 3, 224, 224): (2, 3, 32, 32), NCHW.
    x = jax.random.normal(kx, (2, 3, 32, 32), jnp.float32)
    params = init_resnet18(kp, num_class)

    fwd = jax.jit(resnet18_forward)
    out = fwd(x, params)
    out = jax.block_until_ready(out)
    assert out.shape == (2, num_class)
    assert bool(jnp.all(jnp.isfinite(out)))
    print("KERNEL_OK")
</pallas_src>

<mosaic_0001>
module attributes {stable_mosaic.version = 11 : i64} {
  func.func @_matmul_fused_kernel(%arg0: i32, %arg1: i32, %arg2: i32, %arg3: memref<512x147xbf16, #tpu.memory_space<vmem>>, %arg4: memref<147x64xbf16, #tpu.memory_space<vmem>>, %arg5: memref<1x64xf32, #tpu.memory_space<vmem>>, %arg6: memref<1x64xf32, #tpu.memory_space<vmem>>, %arg7: memref<512x64xf32, #tpu.memory_space<vmem>>, %arg8: memref<512x64xf32, #tpu.memory_space<vmem>>) attributes {dimension_semantics = [#tpu.dimension_semantics<parallel>, #tpu.dimension_semantics<parallel>, #tpu.dimension_semantics<arbitrary>], iteration_bounds = array<i64: 1, 1, 1>, scalar_prefetch = 0 : i64, scratch_operands = 1 : i64, tpu.core_type = #tpu.core_type<tc>, window_params = [{transform_indices = @transform_0, window_bounds = array<i64: 512, 147>}, {transform_indices = @transform_1, window_bounds = array<i64: 147, 64>}, {transform_indices = @transform_2, window_bounds = array<i64: 1, 64>}, {transform_indices = @transform_3, window_bounds = array<i64: 1, 64>}, {transform_indices = @transform_4, window_bounds = array<i64: 512, 64>}]} {
    %c0_i32 = arith.constant 0 : i32
    %0 = arith.cmpi eq, %arg2, %c0_i32 : i32
    %1 = arith.extui %0 : i1 to i32
    %c0_i32_0 = arith.constant 0 : i32
    %2 = arith.cmpi ne, %1, %c0_i32_0 : i32
    scf.if %2 {
      %cst_10 = arith.constant 0.000000e+00 : f32
      %12 = vector.broadcast %cst_10 : f32 to vector<512x64xf32>
      %c0_11 = arith.constant 0 : index
      %c0_12 = arith.constant 0 : index
      %13 = vector.load %arg8[%c0_11, %c0_12] : memref<512x64xf32, #tpu.memory_space<vmem>>, vector<512x64xf32>
      tpu.vector_store %arg8[%c0_11, %c0_12], %12 {strides = array<i32>} : memref<512x64xf32, #tpu.memory_space<vmem>>, vector<512x64xf32>,
    } else {
    }
    %c0 = arith.constant 0 : index
    %c0_1 = arith.constant 0 : index
    %3 = vector.load %arg8[%c0, %c0_1] : memref<512x64xf32, #tpu.memory_space<vmem>>, vector<512x64xf32>
    %c0_2 = arith.constant 0 : index
    %c0_3 = arith.constant 0 : index
    %4 = vector.load %arg3[%c0_2, %c0_3] : memref<512x147xbf16, #tpu.memory_space<vmem>>, vector<512x147xbf16>
    %c0_4 = arith.constant 0 : index
    %c0_5 = arith.constant 0 : index
    %5 = vector.load %arg4[%c0_4, %c0_5] : memref<147x64xbf16, #tpu.memory_space<vmem>>, vector<147x64xbf16>
    %cst = arith.constant dense<0.000000e+00> : vector<512x64xf32>
    %6 = tpu.matmul %4, %5, %cst {dimension_numbers = #tpu.dot_dimension_numbers<[1], [0], [0], [1], [0, 0, 1, 1], [], []>} : vector<512x147xbf16>, vector<147x64xbf16>, vector<512x64xf32> -> vector<512x64xf32>
    %7 = arith.addf %3, %6 : vector<512x64xf32>
    %c0_6 = arith.constant 0 : index
    %c0_7 = arith.constant 0 : index
    %8 = vector.load %arg8[%c0_6, %c0_7] : memref<512x64xf32, #tpu.memory_space<vmem>>, vector<512x64xf32>
    tpu.vector_store %arg8[%c0_6, %c0_7], %7 {strides = array<i32>} : memref<512x64xf32, #tpu.memory_space<vmem>>, vector<512x64xf32>,
    %c0_i32_8 = arith.constant 0 : i32
    %9 = arith.cmpi eq, %arg2, %c0_i32_8 : i32
    %10 = arith.extui %9 : i1 to i32
    %c0_i32_9 = arith.constant 0 : i32
    %11 = arith.cmpi ne, %10, %c0_i32_9 : i32
    scf.if %11 {
      %c0_10 = arith.constant 0 : index
      %c0_11 = arith.constant 0 : index
      %12 = vector.load %arg8[%c0_10, %c0_11] : memref<512x64xf32, #tpu.memory_space<vmem>>, vector<512x64xf32>
      %c0_12 = arith.constant 0 : index
      %c0_13 = arith.constant 0 : index
      %13 = vector.load %arg5[%c0_12, %c0_13] : memref<1x64xf32, #tpu.memory_space<vmem>>, vector<1x64xf32>
      %14 = vector.broadcast %13 : vector<1x64xf32> to vector<512x64xf32>
      %15 = arith.mulf %12, %14 : vector<512x64xf32>
      %c0_14 = arith.constant 0 : index
      %c0_15 = arith.constant 0 : index
      %16 = vector.load %arg6[%c0_14, %c0_15] : memref<1x64xf32, #tpu.memory_space<vmem>>, vector<1x64xf32>
      %17 = vector.broadcast %16 : vector<1x64xf32> to vector<512x64xf32>
      %18 = arith.addf %15, %17 : vector<512x64xf32>
      %c0_16 = arith.constant 0 : index
      %c0_17 = arith.constant 0 : index
      %19 = vector.load %arg7[%c0_16, %c0_17] : memref<512x64xf32, #tpu.memory_space<vmem>>, vector<512x64xf32>
      tpu.vector_store %arg7[%c0_16, %c0_17], %18 {strides = array<i32>} : memref<512x64xf32, #tpu.memory_space<vmem>>, vector<512x64xf32>,
    } else {
    }
    return
  }
  func.func @transform_0(%arg0: i32, %arg1: i32, %arg2: i32) -> (i32, i32) {
    %c0_i32 = arith.constant 0 : i32
    return %arg0, %arg2 : i32, i32
  }
  func.func @transform_1(%arg0: i32, %arg1: i32, %arg2: i32) -> (i32, i32) {
    %c0_i32 = arith.constant 0 : i32
    return %arg2, %arg1 : i32, i32
  }
  func.func @transform_2(%arg0: i32, %arg1: i32, %arg2: i32) -> (i32, i32) {
    %c0_i32 = arith.constant 0 : i32
    %c0_i32_0 = arith.constant 0 : i32
    return %c0_i32, %arg1 : i32, i32
  }
  func.func @transform_3(%arg0: i32, %arg1: i32, %arg2: i32) -> (i32, i32) {
    %c0_i32 = arith.constant 0 : i32
    %c0_i32_0 = arith.constant 0 : i32
    return %c0_i32, %arg1 : i32, i32
  }
  func.func @transform_4(%arg0: i32, %arg1: i32, %arg2: i32) -> (i32, i32) {
    %c0_i32 = arith.constant 0 : i32
    return %arg0, %arg1 : i32, i32
  }
}

module attributes {stable_mosaic.version = 11 : i64} {
  func.func @_matmul_fused_kernel(%arg0: i32, %arg1: i32, %arg2: i32, %arg3: memref<128x576xbf16, #tpu.memory_space<vmem>>, %arg4: memref<576x64xbf16, #tpu.memory_space<vmem>>, %arg5: memref<1x64xf32, #tpu.memory_space<vmem>>, %arg6: memref<1x64xf32, #tpu.memory_space<vmem>>, %arg7: memref<128x64xf32, #tpu.memory_space<vmem>>, %arg8: memref<128x64xf32, #tpu.memory_space<vmem>>) attributes {dimension_semantics = [#tpu.dimension_semantics<parallel>, #tpu.dimension_semantics<parallel>, #tpu.dimension_semantics<arbitrary>], iteration_bounds = array<i64: 1, 1, 1>, scalar_prefetch = 0 : i64, scratch_operands = 1 : i64, tpu.core_type = #tpu.core_type<tc>, window_params = [{transform_indices = @transform_0, window_bounds = array<i64: 128, 576>}, {transform_indices = @transform_1, window_bounds = array<i64: 576, 64>}, {transform_indices = @transform_2, window_bounds = array<i64: 1, 64>}, {transform_indices = @transform_3, window_bounds = array<i64: 1, 64>}, {transform_indices = @transform_4, window_bounds = array<i64: 128, 64>}]} {
    %c0_i32 = arith.constant 0 : i32
    %0 = arith.cmpi eq, %arg2, %c0_i32 : i32
    %1 = arith.extui %0 : i1 to i32
    %c0_i32_0 = arith.constant 0 : i32
    %2 = arith.cmpi ne, %1, %c0_i32_0 : i32
    scf.if %2 {
      %cst_10 = arith.constant 0.000000e+00 : f32
      %12 = vector.broadcast %cst_10 : f32 to vector<128x64xf32>
      %c0_11 = arith.constant 0 : index
      %c0_12 = arith.constant 0 : index
      %13 = vector.load %arg8[%c0_11, %c0_12] : memref<128x64xf32, #tpu.memory_space<vmem>>, vector<128x64xf32>
      tpu.vector_store %arg8[%c0_11, %c0_12], %12 {strides = array<i32>} : memref<128x64xf32, #tpu.memory_space<vmem>>, vector<128x64xf32>,
    } else {
    }
    %c0 = arith.constant 0 : index
    %c0_1 = arith.constant 0 : index
    %3 = vector.load %arg8[%c0, %c0_1] : memref<128x64xf32, #tpu.memory_space<vmem>>, vector<128x64xf32>
    %c0_2 = arith.constant 0 : index
    %c0_3 = arith.constant 0 : index
    %4 = vector.load %arg3[%c0_2, %c0_3] : memref<128x576xbf16, #tpu.memory_space<vmem>>, vector<128x576xbf16>
    %c0_4 = arith.constant 0 : index
    %c0_5 = arith.constant 0 : index
    %5 = vector.load %arg4[%c0_4, %c0_5] : memref<576x64xbf16, #tpu.memory_space<vmem>>, vector<576x64xbf16>
    %cst = arith.constant dense<0.000000e+00> : vector<128x64xf32>
    %6 = tpu.matmul %4, %5, %cst {dimension_numbers = #tpu.dot_dimension_numbers<[1], [0], [0], [1], [0, 0, 1, 1], [], []>} : vector<128x576xbf16>, vector<576x64xbf16>, vector<128x64xf32> -> vector<128x64xf32>
    %7 = arith.addf %3, %6 : vector<128x64xf32>
    %c0_6 = arith.constant 0 : index
    %c0_7 = arith.constant 0 : index
    %8 = vector.load %arg8[%c0_6, %c0_7] : memref<128x64xf32, #tpu.memory_space<vmem>>, vector<128x64xf32>
    tpu.vector_store %arg8[%c0_6, %c0_7], %7 {strides = array<i32>} : memref<128x64xf32, #tpu.memory_space<vmem>>, vector<128x64xf32>,
    %c0_i32_8 = arith.constant 0 : i32
    %9 = arith.cmpi eq, %arg2, %c0_i32_8 : i32
    %10 = arith.extui %9 : i1 to i32
    %c0_i32_9 = arith.constant 0 : i32
    %11 = arith.cmpi ne, %10, %c0_i32_9 : i32
    scf.if %11 {
      %c0_10 = arith.constant 0 : index
      %c0_11 = arith.constant 0 : index
      %12 = vector.load %arg8[%c0_10, %c0_11] : memref<128x64xf32, #tpu.memory_space<vmem>>, vector<128x64xf32>
      %c0_12 = arith.constant 0 : index
      %c0_13 = arith.constant 0 : index
      %13 = vector.load %arg5[%c0_12, %c0_13] : memref<1x64xf32, #tpu.memory_space<vmem>>, vector<1x64xf32>
      %14 = vector.broadcast %13 : vector<1x64xf32> to vector<128x64xf32>
      %15 = arith.mulf %12, %14 : vector<128x64xf32>
      %c0_14 = arith.constant 0 : index
      %c0_15 = arith.constant 0 : index
      %16 = vector.load %arg6[%c0_14, %c0_15] : memref<1x64xf32, #tpu.memory_space<vmem>>, vector<1x64xf32>
      %17 = vector.broadcast %16 : vector<1x64xf32> to vector<128x64xf32>
      %18 = arith.addf %15, %17 : vector<128x64xf32>
      %cst_16 = arith.constant 0.000000e+00 : f32
      %19 = vector.broadcast %cst_16 : f32 to vector<128x64xf32>
      %20 = arith.maximumf %18, %19 : vector<128x64xf32>
      %c0_17 = arith.constant 0 : index
      %c0_18 = arith.constant 0 : index
      %21 = vector.load %arg7[%c0_17, %c0_18] : memref<128x64xf32, #tpu.memory_space<vmem>>, vector<128x64xf32>
      tpu.vector_store %arg7[%c0_17, %c0_18], %20 {strides = array<i32>} : memref<128x64xf32, #tpu.memory_space<vmem>>, vector<128x64xf32>,
    } else {
    }
    return
  }
  func.func @transform_0(%arg0: i32, %arg1: i32, %arg2: i32) -> (i32, i32) {
    %c0_i32 = arith.constant 0 : i32
    return %arg0, %arg2 : i32, i32
  }
  func.func @transform_1(%arg0: i32, %arg1: i32, %arg2: i32) -> (i32, i32) {
    %c0_i32 = arith.constant 0 : i32
    return %arg2, %arg1 : i32, i32
  }
  func.func @transform_2(%arg0: i32, %arg1: i32, %arg2: i32) -> (i32, i32) {
    %c0_i32 = arith.constant 0 : i32
    %c0_i32_0 = arith.constant 0 : i32
    return %c0_i32, %arg1 : i32, i32
  }
  func.func @transform_3(%arg0: i32, %arg1: i32, %arg2: i32) -> (i32, i32) {
    %c0_i32 = arith.constant 0 : i32
    %c0_i32_0 = arith.constant 0 : i32
    return %c0_i32, %arg1 : i32, i32
  }
  func.func @transform_4(%arg0: i32, %arg1: i32, %arg2: i32) -> (i32, i32) {
    %c0_i32 = arith.constant 0 : i32
    return %arg0, %arg1 : i32, i32
  }
}

module attributes {stable_mosaic.version = 11 : i64} {
  func.func @_matmul_fused_kernel(%arg0: i32, %arg1: i32, %arg2: i32, %arg3: memref<128x576xbf16, #tpu.memory_space<vmem>>, %arg4: memref<576x64xbf16, #tpu.memory_space<vmem>>, %arg5: memref<1x64xf32, #tpu.memory_space<vmem>>, %arg6: memref<1x64xf32, #tpu.memory_space<vmem>>, %arg7: memref<128x64xf32, #tpu.memory_space<vmem>>, %arg8: memref<128x64xf32, #tpu.memory_space<vmem>>, %arg9: memref<128x64xf32, #tpu.memory_space<vmem>>) attributes {dimension_semantics = [#tpu.dimension_semantics<parallel>, #tpu.dimension_semantics<parallel>, #tpu.dimension_semantics<arbitrary>], iteration_bounds = array<i64: 1, 1, 1>, scalar_prefetch = 0 : i64, scratch_operands = 1 : i64, tpu.core_type = #tpu.core_type<tc>, window_params = [{transform_indices = @transform_0, window_bounds = array<i64: 128, 576>}, {transform_indices = @transform_1, window_bounds = array<i64: 576, 64>}, {transform_indices = @transform_2, window_bounds = array<i64: 1, 64>}, {transform_indices = @transform_3, window_bounds = array<i64: 1, 64>}, {transform_indices = @transform_4, window_bounds = array<i64: 128, 64>}, {transform_indices = @transform_5, window_bounds = array<i64: 128, 64>}]} {
    %c0_i32 = arith.constant 0 : i32
    %0 = arith.cmpi eq, %arg2, %c0_i32 : i32
    %1 = arith.extui %0 : i1 to i32
    %c0_i32_0 = arith.constant 0 : i32
    %2 = arith.cmpi ne, %1, %c0_i32_0 : i32
    scf.if %2 {
      %cst_10 = arith.constant 0.000000e+00 : f32
      %12 = vector.broadcast %cst_10 : f32 to vector<128x64xf32>
      %c0_11 = arith.constant 0 : index
      %c0_12 = arith.constant 0 : index
      %13 = vector.load %arg9[%c0_11, %c0_12] : memref<128x64xf32, #tpu.memory_space<vmem>>, vector<128x64xf32>
      tpu.vector_store %arg9[%c0_11, %c0_12], %12 {strides = array<i32>} : memref<128x64xf32, #tpu.memory_space<vmem>>, vector<128x64xf32>,
    } else {
    }
    %c0 = arith.constant 0 : index
    %c0_1 = arith.constant 0 : index
    %3 = vector.load %arg9[%c0, %c0_1] : memref<128x64xf32, #tpu.memory_space<vmem>>, vector<128x64xf32>
    %c0_2 = arith.constant 0 : index
    %c0_3 = arith.constant 0 : index
    %4 = vector.load %arg3[%c0_2, %c0_3] : memref<128x576xbf16, #tpu.memory_space<vmem>>, vector<128x576xbf16>
    %c0_4 = arith.constant 0 : index
    %c0_5 = arith.constant 0 : index
    %5 = vector.load %arg4[%c0_4, %c0_5] : memref<576x64xbf16, #tpu.memory_space<vmem>>, vector<576x64xbf16>
    %cst = arith.constant dense<0.000000e+00> : vector<128x64xf32>
    %6 = tpu.matmul %4, %5, %cst {dimension_numbers = #tpu.dot_dimension_numbers<[1], [0], [0], [1], [0, 0, 1, 1], [], []>} : vector<128x576xbf16>, vector<576x64xbf16>, vector<128x64xf32> -> vector<128x64xf32>
    %7 = arith.addf %3, %6 : vector<128x64xf32>
    %c0_6 = arith.constant 0 : index
    %c0_7 = arith.constant 0 : index
    %8 = vector.load %arg9[%c0_6, %c0_7] : memref<128x64xf32, #tpu.memory_space<vmem>>, vector<128x64xf32>
    tpu.vector_store %arg9[%c0_6, %c0_7], %7 {strides = array<i32>} : memref<128x64xf32, #tpu.memory_space<vmem>>, vector<128x64xf32>,
    %c0_i32_8 = arith.constant 0 : i32
    %9 = arith.cmpi eq, %arg2, %c0_i32_8 : i32
    %10 = arith.extui %9 : i1 to i32
    %c0_i32_9 = arith.constant 0 : i32
    %11 = arith.cmpi ne, %10, %c0_i32_9 : i32
    scf.if %11 {
      %c0_10 = arith.constant 0 : index
      %c0_11 = arith.constant 0 : index
      %12 = vector.load %arg9[%c0_10, %c0_11] : memref<128x64xf32, #tpu.memory_space<vmem>>, vector<128x64xf32>
      %c0_12 = arith.constant 0 : index
      %c0_13 = arith.constant 0 : index
      %13 = vector.load %arg5[%c0_12, %c0_13] : memref<1x64xf32, #tpu.memory_space<vmem>>, vector<1x64xf32>
      %14 = vector.broadcast %13 : vector<1x64xf32> to vector<128x64xf32>
      %15 = arith.mulf %12, %14 : vector<128x64xf32>
      %c0_14 = arith.constant 0 : index
      %c0_15 = arith.constant 0 : index
      %16 = vector.load %arg6[%c0_14, %c0_15] : memref<1x64xf32, #tpu.memory_space<vmem>>, vector<1x64xf32>
      %17 = vector.broadcast %16 : vector<1x64xf32> to vector<128x64xf32>
      %18 = arith.addf %15, %17 : vector<128x64xf32>
      %c0_16 = arith.constant 0 : index
      %c0_17 = arith.constant 0 : index
      %19 = vector.load %arg7[%c0_16, %c0_17] : memref<128x64xf32, #tpu.memory_space<vmem>>, vector<128x64xf32>
      %20 = arith.addf %18, %19 : vector<128x64xf32>
      %cst_18 = arith.constant 0.000000e+00 : f32
      %21 = vector.broadcast %cst_18 : f32 to vector<128x64xf32>
      %22 = arith.maximumf %20, %21 : vector<128x64xf32>
      %c0_19 = arith.constant 0 : index
      %c0_20 = arith.constant 0 : index
      %23 = vector.load %arg8[%c0_19, %c0_20] : memref<128x64xf32, #tpu.memory_space<vmem>>, vector<128x64xf32>
      tpu.vector_store %arg8[%c0_19, %c0_20], %22 {strides = array<i32>} : memref<128x64xf32, #tpu.memory_space<vmem>>, vector<128x64xf32>,
    } else {
    }
    return
  }
  func.func @transform_0(%arg0: i32, %arg1: i32, %arg2: i32) -> (i32, i32) {
    %c0_i32 = arith.constant 0 : i32
    return %arg0, %arg2 : i32, i32
  }
  func.func @transform_1(%arg0: i32, %arg1: i32, %arg2: i32) -> (i32, i32) {
    %c0_i32 = arith.constant 0 : i32
    return %arg2, %arg1 : i32, i32
  }
  func.func @transform_2(%arg0: i32, %arg1: i32, %arg2: i32) -> (i32, i32) {
    %c0_i32 = arith.constant 0 : i32
    %c0_i32_0 = arith.constant 0 : i32
    return %c0_i32, %arg1 : i32, i32
  }
  func.func @transform_3(%arg0: i32, %arg1: i32, %arg2: i32) -> (i32, i32) {
    %c0_i32 = arith.constant 0 : i32
    %c0_i32_0 = arith.constant 0 : i32
    return %c0_i32, %arg1 : i32, i32
  }
  func.func @transform_4(%arg0: i32, %arg1: i32, %arg2: i32) -> (i32, i32) {
    %c0_i32 = arith.constant 0 : i32
    return %arg0, %arg1 : i32, i32
  }
  func.func @transform_5(%arg0: i32, %arg1: i32, %arg2: i32) -> (i32, i32) {
    %c0_i32 = arith.constant 0 : i32
    return %arg0, %arg1 : i32, i32
  }
}

module attributes {stable_mosaic.version = 11 : i64} {
  func.func @_matmul_fused_kernel(%arg0: i32, %arg1: i32, %arg2: i32, %arg3: memref<32x576xbf16, #tpu.memory_space<vmem>>, %arg4: memref<576x128xbf16, #tpu.memory_space<vmem>>, %arg5: memref<1x128xf32, #tpu.memory_space<vmem>>, %arg6: memref<1x128xf32, #tpu.memory_space<vmem>>, %arg7: memref<32x128xf32, #tpu.memory_space<vmem>>, %arg8: memref<32x128xf32, #tpu.memory_space<vmem>>) attributes {dimension_semantics = [#tpu.dimension_semantics<parallel>, #tpu.dimension_semantics<parallel>, #tpu.dimension_semantics<arbitrary>], iteration_bounds = array<i64: 1, 1, 1>, scalar_prefetch = 0 : i64, scratch_operands = 1 : i64, tpu.core_type = #tpu.core_type<tc>, window_params = [{transform_indices = @transform_0, window_bounds = array<i64: 32, 576>}, {transform_indices = @transform_1, window_bounds = array<i64: 576, 128>}, {transform_indices = @transform_2, window_bounds = array<i64: 1, 128>}, {transform_indices = @transform_3, window_bounds = array<i64: 1, 128>}, {transform_indices = @transform_4, window_bounds = array<i64: 32, 128>}]} {
    %c0_i32 = arith.constant 0 : i32
    %0 = arith.cmpi eq, %arg2, %c0_i32 : i32
    %1 = arith.extui %0 : i1 to i32
    %c0_i32_0 = arith.constant 0 : i32
    %2 = arith.cmpi ne, %1, %c0_i32_0 : i32
    scf.if %2 {
      %cst_10 = arith.constant 0.000000e+00 : f32
      %12 = vector.broadcast %cst_10 : f32 to vector<32x128xf32>
      %c0_11 = arith.constant 0 : index
      %c0_12 = arith.constant 0 : index
      %13 = vector.load %arg8[%c0_11, %c0_12] : memref<32x128xf32, #tpu.memory_space<vmem>>, vector<32x128xf32>
      tpu.vector_store %arg8[%c0_11, %c0_12], %12 {strides = array<i32>} : memref<32x128xf32, #tpu.memory_space<vmem>>, vector<32x128xf32>,
    } else {
    }
    %c0 = arith.constant 0 : index
    %c0_1 = arith.constant 0 : index
    %3 = vector.load %arg8[%c0, %c0_1] : memref<32x128xf32, #tpu.memory_space<vmem>>, vector<32x128xf32>
    %c0_2 = arith.constant 0 : index
    %c0_3 = arith.constant 0 : index
    %4 = vector.load %arg3[%c0_2, %c0_3] : memref<32x576xbf16, #tpu.memory_space<vmem>>, vector<32x576xbf16>
    %c0_4 = arith.constant 0 : index
    %c0_5 = arith.constant 0 : index
    %5 = vector.load %arg4[%c0_4, %c0_5] : memref<576x128xbf16, #tpu.memory_space<vmem>>, vector<576x128xbf16>
    %cst = arith.constant dense<0.000000e+00> : vector<32x128xf32>
    %6 = tpu.matmul %4, %5, %cst {dimension_numbers = #tpu.dot_dimension_numbers<[1], [0], [0], [1], [0, 0, 1, 1], [], []>} : vector<32x576xbf16>, vector<576x128xbf16>, vector<32x128xf32> -> vector<32x128xf32>
    %7 = arith.addf %3, %6 : vector<32x128xf32>
    %c0_6 = arith.constant 0 : index
    %c0_7 = arith.constant 0 : index
    %8 = vector.load %arg8[%c0_6, %c0_7] : memref<32x128xf32, #tpu.memory_space<vmem>>, vector<32x128xf32>
    tpu.vector_store %arg8[%c0_6, %c0_7], %7 {strides = array<i32>} : memref<32x128xf32, #tpu.memory_space<vmem>>, vector<32x128xf32>,
    %c0_i32_8 = arith.constant 0 : i32
    %9 = arith.cmpi eq, %arg2, %c0_i32_8 : i32
    %10 = arith.extui %9 : i1 to i32
    %c0_i32_9 = arith.constant 0 : i32
    %11 = arith.cmpi ne, %10, %c0_i32_9 : i32
    scf.if %11 {
      %c0_10 = arith.constant 0 : index
      %c0_11 = arith.constant 0 : index
      %12 = vector.load %arg8[%c0_10, %c0_11] : memref<32x128xf32, #tpu.memory_space<vmem>>, vector<32x128xf32>
      %c0_12 = arith.constant 0 : index
      %c0_13 = arith.constant 0 : index
      %13 = vector.load %arg5[%c0_12, %c0_13] : memref<1x128xf32, #tpu.memory_space<vmem>>, vector<1x128xf32>
      %14 = vector.broadcast %13 : vector<1x128xf32> to vector<32x128xf32>
      %15 = arith.mulf %12, %14 : vector<32x128xf32>
      %c0_14 = arith.constant 0 : index
      %c0_15 = arith.constant 0 : index
      %16 = vector.load %arg6[%c0_14, %c0_15] : memref<1x128xf32, #tpu.memory_space<vmem>>, vector<1x128xf32>
      %17 = vector.broadcast %16 : vector<1x128xf32> to vector<32x128xf32>
      %18 = arith.addf %15, %17 : vector<32x128xf32>
      %cst_16 = arith.constant 0.000000e+00 : f32
      %19 = vector.broadcast %cst_16 : f32 to vector<32x128xf32>
      %20 = arith.maximumf %18, %19 : vector<32x128xf32>
      %c0_17 = arith.constant 0 : index
      %c0_18 = arith.constant 0 : index
      %21 = vector.load %arg7[%c0_17, %c0_18] : memref<32x128xf32, #tpu.memory_space<vmem>>, vector<32x128xf32>
      tpu.vector_store %arg7[%c0_17, %c0_18], %20 {strides = array<i32>} : memref<32x128xf32, #tpu.memory_space<vmem>>, vector<32x128xf32>,
    } else {
    }
    return
  }
  func.func @transform_0(%arg0: i32, %arg1: i32, %arg2: i32) -> (i32, i32) {
    %c0_i32 = arith.constant 0 : i32
    return %arg0, %arg2 : i32, i32
  }
  func.func @transform_1(%arg0: i32, %arg1: i32, %arg2: i32) -> (i32, i32) {
    %c0_i32 = arith.constant 0 : i32
    return %arg2, %arg1 : i32, i32
  }
  func.func @transform_2(%arg0: i32, %arg1: i32, %arg2: i32) -> (i32, i32) {
    %c0_i32 = arith.constant 0 : i32
    %c0_i32_0 = arith.constant 0 : i32
    return %c0_i32, %arg1 : i32, i32
  }
  func.func @transform_3(%arg0: i32, %arg1: i32, %arg2: i32) -> (i32, i32) {
    %c0_i32 = arith.constant 0 : i32
    %c0_i32_0 = arith.constant 0 : i32
    return %c0_i32, %arg1 : i32, i32
  }
  func.func @transform_4(%arg0: i32, %arg1: i32, %arg2: i32) -> (i32, i32) {
    %c0_i32 = arith.constant 0 : i32
    return %arg0, %arg1 : i32, i32
  }
}

module attributes {stable_mosaic.version = 11 : i64} {
  func.func @_matmul_fused_kernel(%arg0: i32, %arg1: i32, %arg2: i32, %arg3: memref<32x64xbf16, #tpu.memory_space<vmem>>, %arg4: memref<64x128xbf16, #tpu.memory_space<vmem>>, %arg5: memref<1x128xf32, #tpu.memory_space<vmem>>, %arg6: memref<1x128xf32, #tpu.memory_space<vmem>>, %arg7: memref<32x128xf32, #tpu.memory_space<vmem>>, %arg8: memref<32x128xf32, #tpu.memory_space<vmem>>) attributes {dimension_semantics = [#tpu.dimension_semantics<parallel>, #tpu.dimension_semantics<parallel>, #tpu.dimension_semantics<arbitrary>], iteration_bounds = array<i64: 1, 1, 1>, scalar_prefetch = 0 : i64, scratch_operands = 1 : i64, tpu.core_type = #tpu.core_type<tc>, window_params = [{transform_indices = @transform_0, window_bounds = array<i64: 32, 64>}, {transform_indices = @transform_1, window_bounds = array<i64: 64, 128>}, {transform_indices = @transform_2, window_bounds = array<i64: 1, 128>}, {transform_indices = @transform_3, window_bounds = array<i64: 1, 128>}, {transform_indices = @transform_4, window_bounds = array<i64: 32, 128>}]} {
    %c0_i32 = arith.constant 0 : i32
    %0 = arith.cmpi eq, %arg2, %c0_i32 : i32
    %1 = arith.extui %0 : i1 to i32
    %c0_i32_0 = arith.constant 0 : i32
    %2 = arith.cmpi ne, %1, %c0_i32_0 : i32
    scf.if %2 {
      %cst_10 = arith.constant 0.000000e+00 : f32
      %12 = vector.broadcast %cst_10 : f32 to vector<32x128xf32>
      %c0_11 = arith.constant 0 : index
      %c0_12 = arith.constant 0 : index
      %13 = vector.load %arg8[%c0_11, %c0_12] : memref<32x128xf32, #tpu.memory_space<vmem>>, vector<32x128xf32>
      tpu.vector_store %arg8[%c0_11, %c0_12], %12 {strides = array<i32>} : memref<32x128xf32, #tpu.memory_space<vmem>>, vector<32x128xf32>,
    } else {
    }
    %c0 = arith.constant 0 : index
    %c0_1 = arith.constant 0 : index
    %3 = vector.load %arg8[%c0, %c0_1] : memref<32x128xf32, #tpu.memory_space<vmem>>, vector<32x128xf32>
    %c0_2 = arith.constant 0 : index
    %c0_3 = arith.constant 0 : index
    %4 = vector.load %arg3[%c0_2, %c0_3] : memref<32x64xbf16, #tpu.memory_space<vmem>>, vector<32x64xbf16>
    %c0_4 = arith.constant 0 : index
    %c0_5 = arith.constant 0 : index
    %5 = vector.load %arg4[%c0_4, %c0_5] : memref<64x128xbf16, #tpu.memory_space<vmem>>, vector<64x128xbf16>
    %cst = arith.constant dense<0.000000e+00> : vector<32x128xf32>
    %6 = tpu.matmul %4, %5, %cst {dimension_numbers = #tpu.dot_dimension_numbers<[1], [0], [0], [1], [0, 0, 1, 1], [], []>} : vector<32x64xbf16>, vector<64x128xbf16>, vector<32x128xf32> -> vector<32x128xf32>
    %7 = arith.addf %3, %6 : vector<32x128xf32>
    %c0_6 = arith.constant 0 : index
    %c0_7 = arith.constant 0 : index
    %8 = vector.load %arg8[%c0_6, %c0_7] : memref<32x128xf32, #tpu.memory_space<vmem>>, vector<32x128xf32>
    tpu.vector_store %arg8[%c0_6, %c0_7], %7 {strides = array<i32>} : memref<32x128xf32, #tpu.memory_space<vmem>>, vector<32x128xf32>,
    %c0_i32_8 = arith.constant 0 : i32
    %9 = arith.cmpi eq, %arg2, %c0_i32_8 : i32
    %10 = arith.extui %9 : i1 to i32
    %c0_i32_9 = arith.constant 0 : i32
    %11 = arith.cmpi ne, %10, %c0_i32_9 : i32
    scf.if %11 {
      %c0_10 = arith.constant 0 : index
      %c0_11 = arith.constant 0 : index
      %12 = vector.load %arg8[%c0_10, %c0_11] : memref<32x128xf32, #tpu.memory_space<vmem>>, vector<32x128xf32>
      %c0_12 = arith.constant 0 : index
      %c0_13 = arith.constant 0 : index
      %13 = vector.load %arg5[%c0_12, %c0_13] : memref<1x128xf32, #tpu.memory_space<vmem>>, vector<1x128xf32>
      %14 = vector.broadcast %13 : vector<1x128xf32> to vector<32x128xf32>
      %15 = arith.mulf %12, %14 : vector<32x128xf32>
      %c0_14 = arith.constant 0 : index
      %c0_15 = arith.constant 0 : index
      %16 = vector.load %arg6[%c0_14, %c0_15] : memref<1x128xf32, #tpu.memory_space<vmem>>, vector<1x128xf32>
      %17 = vector.broadcast %16 : vector<1x128xf32> to vector<32x128xf32>
      %18 = arith.addf %15, %17 : vector<32x128xf32>
      %c0_16 = arith.constant 0 : index
      %c0_17 = arith.constant 0 : index
      %19 = vector.load %arg7[%c0_16, %c0_17] : memref<32x128xf32, #tpu.memory_space<vmem>>, vector<32x128xf32>
      tpu.vector_store %arg7[%c0_16, %c0_17], %18 {strides = array<i32>} : memref<32x128xf32, #tpu.memory_space<vmem>>, vector<32x128xf32>,
    } else {
    }
    return
  }
  func.func @transform_0(%arg0: i32, %arg1: i32, %arg2: i32) -> (i32, i32) {
    %c0_i32 = arith.constant 0 : i32
    return %arg0, %arg2 : i32, i32
  }
  func.func @transform_1(%arg0: i32, %arg1: i32, %arg2: i32) -> (i32, i32) {
    %c0_i32 = arith.constant 0 : i32
    return %arg2, %arg1 : i32, i32
  }
  func.func @transform_2(%arg0: i32, %arg1: i32, %arg2: i32) -> (i32, i32) {
    %c0_i32 = arith.constant 0 : i32
    %c0_i32_0 = arith.constant 0 : i32
    return %c0_i32, %arg1 : i32, i32
  }
  func.func @transform_3(%arg0: i32, %arg1: i32, %arg2: i32) -> (i32, i32) {
    %c0_i32 = arith.constant 0 : i32
    %c0_i32_0 = arith.constant 0 : i32
    return %c0_i32, %arg1 : i32, i32
  }
  func.func @transform_4(%arg0: i32, %arg1: i32, %arg2: i32) -> (i32, i32) {
    %c0_i32 = arith.constant 0 : i32
    return %arg0, %arg1 : i32, i32
  }
}

module attributes {stable_mosaic.version = 11 : i64} {
  func.func @_matmul_fused_kernel(%arg0: i32, %arg1: i32, %arg2: i32, %arg3: memref<32x384xbf16, #tpu.memory_space<vmem>>, %arg4: memref<384x128xbf16, #tpu.memory_space<vmem>>, %arg5: memref<1x128xf32, #tpu.memory_space<vmem>>, %arg6: memref<1x128xf32, #tpu.memory_space<vmem>>, %arg7: memref<32x128xf32, #tpu.memory_space<vmem>>, %arg8: memref<32x128xf32, #tpu.memory_space<vmem>>, %arg9: memref<32x128xf32, #tpu.memory_space<vmem>>) attributes {dimension_semantics = [#tpu.dimension_semantics<parallel>, #tpu.dimension_semantics<parallel>, #tpu.dimension_semantics<arbitrary>], iteration_bounds = array<i64: 1, 1, 3>, scalar_prefetch = 0 : i64, scratch_operands = 1 : i64, tpu.core_type = #tpu.core_type<tc>, window_params = [{transform_indices = @transform_0, window_bounds = array<i64: 32, 384>}, {transform_indices = @transform_1, window_bounds = array<i64: 384, 128>}, {transform_indices = @transform_2, window_bounds = array<i64: 1, 128>}, {transform_indices = @transform_3, window_bounds = array<i64: 1, 128>}, {transform_indices = @transform_4, window_bounds = array<i64: 32, 128>}, {transform_indices = @transform_5, window_bounds = array<i64: 32, 128>}]} {
    %c0_i32 = arith.constant 0 : i32
    %0 = arith.cmpi eq, %arg2, %c0_i32 : i32
    %1 = arith.extui %0 : i1 to i32
    %c0_i32_0 = arith.constant 0 : i32
    %2 = arith.cmpi ne, %1, %c0_i32_0 : i32
    scf.if %2 {
      %cst_9 = arith.constant 0.000000e+00 : f32
      %12 = vector.broadcast %cst_9 : f32 to vector<32x128xf32>
      %c0_10 = arith.constant 0 : index
      %c0_11 = arith.constant 0 : index
      %13 = vector.load %arg9[%c0_10, %c0_11] : memref<32x128xf32, #tpu.memory_space<vmem>>, vector<32x128xf32>
      tpu.vector_store %arg9[%c0_10, %c0_11], %12 {strides = array<i32>} : memref<32x128xf32, #tpu.memory_space<vmem>>, vector<32x128xf32>,
    } else {
    }
    %c0 = arith.constant 0 : index
    %c0_1 = arith.constant 0 : index
    %3 = vector.load %arg9[%c0, %c0_1] : memref<32x128xf32, #tpu.memory_space<vmem>>, vector<32x128xf32>
    %c0_2 = arith.constant 0 : index
    %c0_3 = arith.constant 0 : index
    %4 = vector.load %arg3[%c0_2, %c0_3] : memref<32x384xbf16, #tpu.memory_space<vmem>>, vector<32x384xbf16>
    %c0_4 = arith.constant 0 : index
    %c0_5 = arith.constant 0 : index
    %5 = vector.load %arg4[%c0_4, %c0_5] : memref<384x128xbf16, #tpu.memory_space<vmem>>, vector<384x128xbf16>
    %cst = arith.constant dense<0.000000e+00> : vector<32x128xf32>
    %6 = tpu.matmul %4, %5, %cst {dimension_numbers = #tpu.dot_dimension_numbers<[1], [0], [0], [1], [0, 0, 1, 1], [], []>} : vector<32x384xbf16>, vector<384x128xbf16>, vector<32x128xf32> -> vector<32x128xf32>
    %7 = arith.addf %3, %6 : vector<32x128xf32>
    %c0_6 = arith.constant 0 : index
    %c0_7 = arith.constant 0 : index
    %8 = vector.load %arg9[%c0_6, %c0_7] : memref<32x128xf32, #tpu.memory_space<vmem>>, vector<32x128xf32>
    tpu.vector_store %arg9[%c0_6, %c0_7], %7 {strides = array<i32>} : memref<32x128xf32, #tpu.memory_space<vmem>>, vector<32x128xf32>,
    %c2_i32 = arith.constant 2 : i32
    %9 = arith.cmpi eq, %arg2, %c2_i32 : i32
    %10 = arith.extui %9 : i1 to i32
    %c0_i32_8 = arith.constant 0 : i32
    %11 = arith.cmpi ne, %10, %c0_i32_8 : i32
    scf.if %11 {
      %c0_9 = arith.constant 0 : index
      %c0_10 = arith.constant 0 : index
      %12 = vector.load %arg9[%c0_9, %c0_10] : memref<32x128xf32, #tpu.memory_space<vmem>>, vector<32x128xf32>
      %c0_11 = arith.constant 0 : index
      %c0_12 = arith.constant 0 : index
      %13 = vector.load %arg5[%c0_11, %c0_12] : memref<1x128xf32, #tpu.memory_space<vmem>>, vector<1x128xf32>
      %14 = vector.broadcast %13 : vector<1x128xf32> to vector<32x128xf32>
      %15 = arith.mulf %12, %14 : vector<32x128xf32>
      %c0_13 = arith.constant 0 : index
      %c0_14 = arith.constant 0 : index
      %16 = vector.load %arg6[%c0_13, %c0_14] : memref<1x128xf32, #tpu.memory_space<vmem>>, vector<1x128xf32>
      %17 = vector.broadcast %16 : vector<1x128xf32> to vector<32x128xf32>
      %18 = arith.addf %15, %17 : vector<32x128xf32>
      %c0_15 = arith.constant 0 : index
      %c0_16 = arith.constant 0 : index
      %19 = vector.load %arg7[%c0_15, %c0_16] : memref<32x128xf32, #tpu.memory_space<vmem>>, vector<32x128xf32>
      %20 = arith.addf %18, %19 : vector<32x128xf32>
      %cst_17 = arith.constant 0.000000e+00 : f32
      %21 = vector.broadcast %cst_17 : f32 to vector<32x128xf32>
      %22 = arith.maximumf %20, %21 : vector<32x128xf32>
      %c0_18 = arith.constant 0 : index
      %c0_19 = arith.constant 0 : index
      %23 = vector.load %arg8[%c0_18, %c0_19] : memref<32x128xf32, #tpu.memory_space<vmem>>, vector<32x128xf32>
      tpu.vector_store %arg8[%c0_18, %c0_19], %22 {strides = array<i32>} : memref<32x128xf32, #tpu.memory_space<vmem>>, vector<32x128xf32>,
    } else {
    }
    return
  }
  func.func @transform_0(%arg0: i32, %arg1: i32, %arg2: i32) -> (i32, i32) {
    %c0_i32 = arith.constant 0 : i32
    return %arg0, %arg2 : i32, i32
  }
  func.func @transform_1(%arg0: i32, %arg1: i32, %arg2: i32) -> (i32, i32) {
    %c0_i32 = arith.constant 0 : i32
    return %arg2, %arg1 : i32, i32
  }
  func.func @transform_2(%arg0: i32, %arg1: i32, %arg2: i32) -> (i32, i32) {
    %c0_i32 = arith.constant 0 : i32
    %c0_i32_0 = arith.constant 0 : i32
    return %c0_i32, %arg1 : i32, i32
  }
  func.func @transform_3(%arg0: i32, %arg1: i32, %arg2: i32) -> (i32, i32) {
    %c0_i32 = arith.constant 0 : i32
    %c0_i32_0 = arith.constant 0 : i32
    return %c0_i32, %arg1 : i32, i32
  }
  func.func @transform_4(%arg0: i32, %arg1: i32, %arg2: i32) -> (i32, i32) {
    %c0_i32 = arith.constant 0 : i32
    return %arg0, %arg1 : i32, i32
  }
  func.func @transform_5(%arg0: i32, %arg1: i32, %arg2: i32) -> (i32, i32) {
    %c0_i32 = arith.constant 0 : i32
    return %arg0, %arg1 : i32, i32
  }
}

module attributes {stable_mosaic.version = 11 : i64} {
  func.func @_matmul_fused_kernel(%arg0: i32, %arg1: i32, %arg2: i32, %arg3: memref<32x384xbf16, #tpu.memory_space<vmem>>, %arg4: memref<384x128xbf16, #tpu.memory_space<vmem>>, %arg5: memref<1x128xf32, #tpu.memory_space<vmem>>, %arg6: memref<1x128xf32, #tpu.memory_space<vmem>>, %arg7: memref<32x128xf32, #tpu.memory_space<vmem>>, %arg8: memref<32x128xf32, #tpu.memory_space<vmem>>) attributes {dimension_semantics = [#tpu.dimension_semantics<parallel>, #tpu.dimension_semantics<parallel>, #tpu.dimension_semantics<arbitrary>], iteration_bounds = array<i64: 1, 1, 3>, scalar_prefetch = 0 : i64, scratch_operands = 1 : i64, tpu.core_type = #tpu.core_type<tc>, window_params = [{transform_indices = @transform_0, window_bounds = array<i64: 32, 384>}, {transform_indices = @transform_1, window_bounds = array<i64: 384, 128>}, {transform_indices = @transform_2, window_bounds = array<i64: 1, 128>}, {transform_indices = @transform_3, window_bounds = array<i64: 1, 128>}, {transform_indices = @transform_4, window_bounds = array<i64: 32, 128>}]} {
    %c0_i32 = arith.constant 0 : i32
    %0 = arith.cmpi eq, %arg2, %c0_i32 : i32
    %1 = arith.extui %0 : i1 to i32
    %c0_i32_0 = arith.constant 0 : i32
    %2 = arith.cmpi ne, %1, %c0_i32_0 : i32
    scf.if %2 {
      %cst_9 = arith.constant 0.000000e+00 : f32
      %12 = vector.broadcast %cst_9 : f32 to vector<32x128xf32>
      %c0_10 = arith.constant 0 : index
      %c0_11 = arith.constant 0 : index
      %13 = vector.load %arg8[%c0_10, %c0_11] : memref<32x128xf32, #tpu.memory_space<vmem>>, vector<32x128xf32>
      tpu.vector_store %arg8[%c0_10, %c0_11], %12 {strides = array<i32>} : memref<32x128xf32, #tpu.memory_space<vmem>>, vector<32x128xf32>,
    } else {
    }
    %c0 = arith.constant 0 : index
    %c0_1 = arith.constant 0 : index
    %3 = vector.load %arg8[%c0, %c0_1] : memref<32x128xf32, #tpu.memory_space<vmem>>, vector<32x128xf32>
    %c0_2 = arith.constant 0 : index
    %c0_3 = arith.constant 0 : index
    %4 = vector.load %arg3[%c0_2, %c0_3] : memref<32x384xbf16, #tpu.memory_space<vmem>>, vector<32x384xbf16>
    %c0_4 = arith.constant 0 : index
    %c0_5 = arith.constant 0 : index
    %5 = vector.load %arg4[%c0_4, %c0_5] : memref<384x128xbf16, #tpu.memory_space<vmem>>, vector<384x128xbf16>
    %cst = arith.constant dense<0.000000e+00> : vector<32x128xf32>
    %6 = tpu.matmul %4, %5, %cst {dimension_numbers = #tpu.dot_dimension_numbers<[1], [0], [0], [1], [0, 0, 1, 1], [], []>} : vector<32x384xbf16>, vector<384x128xbf16>, vector<32x128xf32> -> vector<32x128xf32>
    %7 = arith.addf %3, %6 : vector<32x128xf32>
    %c0_6 = arith.constant 0 : index
    %c0_7 = arith.constant 0 : index
    %8 = vector.load %arg8[%c0_6, %c0_7] : memref<32x128xf32, #tpu.memory_space<vmem>>, vector<32x128xf32>
    tpu.vector_store %arg8[%c0_6, %c0_7], %7 {strides = array<i32>} : memref<32x128xf32, #tpu.memory_space<vmem>>, vector<32x128xf32>,
    %c2_i32 = arith.constant 2 : i32
    %9 = arith.cmpi eq, %arg2, %c2_i32 : i32
    %10 = arith.extui %9 : i1 to i32
    %c0_i32_8 = arith.constant 0 : i32
    %11 = arith.cmpi ne, %10, %c0_i32_8 : i32
    scf.if %11 {
      %c0_9 = arith.constant 0 : index
      %c0_10 = arith.constant 0 : index
      %12 = vector.load %arg8[%c0_9, %c0_10] : memref<32x128xf32, #tpu.memory_space<vmem>>, vector<32x128xf32>
      %c0_11 = arith.constant 0 : index
      %c0_12 = arith.constant 0 : index
      %13 = vector.load %arg5[%c0_11, %c0_12] : memref<1x128xf32, #tpu.memory_space<vmem>>, vector<1x128xf32>
      %14 = vector.broadcast %13 : vector<1x128xf32> to vector<32x128xf32>
      %15 = arith.mulf %12, %14 : vector<32x128xf32>
      %c0_13 = arith.constant 0 : index
      %c0_14 = arith.constant 0 : index
      %16 = vector.load %arg6[%c0_13, %c0_14] : memref<1x128xf32, #tpu.memory_space<vmem>>, vector<1x128xf32>
      %17 = vector.broadcast %16 : vector<1x128xf32> to vector<32x128xf32>
      %18 = arith.addf %15, %17 : vector<32x128xf32>
      %cst_15 = arith.constant 0.000000e+00 : f32
      %19 = vector.broadcast %cst_15 : f32 to vector<32x128xf32>
      %20 = arith.maximumf %18, %19 : vector<32x128xf32>
      %c0_16 = arith.constant 0 : index
      %c0_17 = arith.constant 0 : index
      %21 = vector.load %arg7[%c0_16, %c0_17] : memref<32x128xf32, #tpu.memory_space<vmem>>, vector<32x128xf32>
      tpu.vector_store %arg7[%c0_16, %c0_17], %20 {strides = array<i32>} : memref<32x128xf32, #tpu.memory_space<vmem>>, vector<32x128xf32>,
    } else {
    }
    return
  }
  func.func @transform_0(%arg0: i32, %arg1: i32, %arg2: i32) -> (i32, i32) {
    %c0_i32 = arith.constant 0 : i32
    return %arg0, %arg2 : i32, i32
  }
  func.func @transform_1(%arg0: i32, %arg1: i32, %arg2: i32) -> (i32, i32) {
    %c0_i32 = arith.constant 0 : i32
    return %arg2, %arg1 : i32, i32
  }
  func.func @transform_2(%arg0: i32, %arg1: i32, %arg2: i32) -> (i32, i32) {
    %c0_i32 = arith.constant 0 : i32
    %c0_i32_0 = arith.constant 0 : i32
    return %c0_i32, %arg1 : i32, i32
  }
  func.func @transform_3(%arg0: i32, %arg1: i32, %arg2: i32) -> (i32, i32) {
    %c0_i32 = arith.constant 0 : i32
    %c0_i32_0 = arith.constant 0 : i32
    return %c0_i32, %arg1 : i32, i32
  }
  func.func @transform_4(%arg0: i32, %arg1: i32, %arg2: i32) -> (i32, i32) {
    %c0_i32 = arith.constant 0 : i32
    return %arg0, %arg1 : i32, i32
  }
}

module attributes {stable_mosaic.version = 11 : i64} {
  func.func @_matmul_fused_kernel(%arg0: i32, %arg1: i32, %arg2: i32, %arg3: memref<8x384xbf16, #tpu.memory_space<vmem>>, %arg4: memref<384x256xbf16, #tpu.memory_space<vmem>>, %arg5: memref<1x256xf32, #tpu.memory_space<vmem>>, %arg6: memref<1x256xf32, #tpu.memory_space<vmem>>, %arg7: memref<8x256xf32, #tpu.memory_space<vmem>>, %arg8: memref<8x256xf32, #tpu.memory_space<vmem>>) attributes {dimension_semantics = [#tpu.dimension_semantics<parallel>, #tpu.dimension_semantics<parallel>, #tpu.dimension_semantics<arbitrary>], iteration_bounds = array<i64: 1, 1, 3>, scalar_prefetch = 0 : i64, scratch_operands = 1 : i64, tpu.core_type = #tpu.core_type<tc>, window_params = [{transform_indices = @transform_0, window_bounds = array<i64: 8, 384>}, {transform_indices = @transform_1, window_bounds = array<i64: 384, 256>}, {transform_indices = @transform_2, window_bounds = array<i64: 1, 256>}, {transform_indices = @transform_3, window_bounds = array<i64: 1, 256>}, {transform_indices = @transform_4, window_bounds = array<i64: 8, 256>}]} {
    %c0_i32 = arith.constant 0 : i32
    %0 = arith.cmpi eq, %arg2, %c0_i32 : i32
    %1 = arith.extui %0 : i1 to i32
    %c0_i32_0 = arith.constant 0 : i32
    %2 = arith.cmpi ne, %1, %c0_i32_0 : i32
    scf.if %2 {
      %cst_9 = arith.constant 0.000000e+00 : f32
      %12 = vector.broadcast %cst_9 : f32 to vector<8x256xf32>
      %c0_10 = arith.constant 0 : index
      %c0_11 = arith.constant 0 : index
      %13 = vector.load %arg8[%c0_10, %c0_11] : memref<8x256xf32, #tpu.memory_space<vmem>>, vector<8x256xf32>
      tpu.vector_store %arg8[%c0_10, %c0_11], %12 {strides = array<i32>} : memref<8x256xf32, #tpu.memory_space<vmem>>, vector<8x256xf32>,
    } else {
    }
    %c0 = arith.constant 0 : index
    %c0_1 = arith.constant 0 : index
    %3 = vector.load %arg8[%c0, %c0_1] : memref<8x256xf32, #tpu.memory_space<vmem>>, vector<8x256xf32>
    %c0_2 = arith.constant 0 : index
    %c0_3 = arith.constant 0 : index
    %4 = vector.load %arg3[%c0_2, %c0_3] : memref<8x384xbf16, #tpu.memory_space<vmem>>, vector<8x384xbf16>
    %c0_4 = arith.constant 0 : index
    %c0_5 = arith.constant 0 : index
    %5 = vector.load %arg4[%c0_4, %c0_5] : memref<384x256xbf16, #tpu.memory_space<vmem>>, vector<384x256xbf16>
    %cst = arith.constant dense<0.000000e+00> : vector<8x256xf32>
    %6 = tpu.matmul %4, %5, %cst {dimension_numbers = #tpu.dot_dimension_numbers<[1], [0], [0], [1], [0, 0, 1, 1], [], []>} : vector<8x384xbf16>, vector<384x256xbf16>, vector<8x256xf32> -> vector<8x256xf32>
    %7 = arith.addf %3, %6 : vector<8x256xf32>
    %c0_6 = arith.constant 0 : index
    %c0_7 = arith.constant 0 : index
    %8 = vector.load %arg8[%c0_6, %c0_7] : memref<8x256xf32, #tpu.memory_space<vmem>>, vector<8x256xf32>
    tpu.vector_store %arg8[%c0_6, %c0_7], %7 {strides = array<i32>} : memref<8x256xf32, #tpu.memory_space<vmem>>, vector<8x256xf32>,
    %c2_i32 = arith.constant 2 : i32
    %9 = arith.cmpi eq, %arg2, %c2_i32 : i32
    %10 = arith.extui %9 : i1 to i32
    %c0_i32_8 = arith.constant 0 : i32
    %11 = arith.cmpi ne, %10, %c0_i32_8 : i32
    scf.if %11 {
      %c0_9 = arith.constant 0 : index
      %c0_10 = arith.constant 0 : index
      %12 = vector.load %arg8[%c0_9, %c0_10] : memref<8x256xf32, #tpu.memory_space<vmem>>, vector<8x256xf32>
      %c0_11 = arith.constant 0 : index
      %c0_12 = arith.constant 0 : index
      %13 = vector.load %arg5[%c0_11, %c0_12] : memref<1x256xf32, #tpu.memory_space<vmem>>, vector<1x256xf32>
      %14 = vector.broadcast %13 : vector<1x256xf32> to vector<8x256xf32>
      %15 = arith.mulf %12, %14 : vector<8x256xf32>
      %c0_13 = arith.constant 0 : index
      %c0_14 = arith.constant 0 : index
      %16 = vector.load %arg6[%c0_13, %c0_14] : memref<1x256xf32, #tpu.memory_space<vmem>>, vector<1x256xf32>
      %17 = vector.broadcast %16 : vector<1x256xf32> to vector<8x256xf32>
      %18 = arith.addf %15, %17 : vector<8x256xf32>
      %cst_15 = arith.constant 0.000000e+00 : f32
      %19 = vector.broadcast %cst_15 : f32 to vector<8x256xf32>
      %20 = arith.maximumf %18, %19 : vector<8x256xf32>
      %c0_16 = arith.constant 0 : index
      %c0_17 = arith.constant 0 : index
      %21 = vector.load %arg7[%c0_16, %c0_17] : memref<8x256xf32, #tpu.memory_space<vmem>>, vector<8x256xf32>
      tpu.vector_store %arg7[%c0_16, %c0_17], %20 {strides = array<i32>} : memref<8x256xf32, #tpu.memory_space<vmem>>, vector<8x256xf32>,
    } else {
    }
    return
  }
  func.func @transform_0(%arg0: i32, %arg1: i32, %arg2: i32) -> (i32, i32) {
    %c0_i32 = arith.constant 0 : i32
    return %arg0, %arg2 : i32, i32
  }
  func.func @transform_1(%arg0: i32, %arg1: i32, %arg2: i32) -> (i32, i32) {
    %c0_i32 = arith.constant 0 : i32
    return %arg2, %arg1 : i32, i32
  }
  func.func @transform_2(%arg0: i32, %arg1: i32, %arg2: i32) -> (i32, i32) {
    %c0_i32 = arith.constant 0 : i32
    %c0_i32_0 = arith.constant 0 : i32
    return %c0_i32, %arg1 : i32, i32
  }
  func.func @transform_3(%arg0: i32, %arg1: i32, %arg2: i32) -> (i32, i32) {
    %c0_i32 = arith.constant 0 : i32
    %c0_i32_0 = arith.constant 0 : i32
    return %c0_i32, %arg1 : i32, i32
  }
  func.func @transform_4(%arg0: i32, %arg1: i32, %arg2: i32) -> (i32, i32) {
    %c0_i32 = arith.constant 0 : i32
    return %arg0, %arg1 : i32, i32
  }
}

module attributes {stable_mosaic.version = 11 : i64} {
  func.func @_matmul_fused_kernel(%arg0: i32, %arg1: i32, %arg2: i32, %arg3: memref<8x128xbf16, #tpu.memory_space<vmem>>, %arg4: memref<128x256xbf16, #tpu.memory_space<vmem>>, %arg5: memref<1x256xf32, #tpu.memory_space<vmem>>, %arg6: memref<1x256xf32, #tpu.memory_space<vmem>>, %arg7: memref<8x256xf32, #tpu.memory_space<vmem>>, %arg8: memref<8x256xf32, #tpu.memory_space<vmem>>) attributes {dimension_semantics = [#tpu.dimension_semantics<parallel>, #tpu.dimension_semantics<parallel>, #tpu.dimension_semantics<arbitrary>], iteration_bounds = array<i64: 1, 1, 1>, scalar_prefetch = 0 : i64, scratch_operands = 1 : i64, tpu.core_type = #tpu.core_type<tc>, window_params = [{transform_indices = @transform_0, window_bounds = array<i64: 8, 128>}, {transform_indices = @transform_1, window_bounds = array<i64: 128, 256>}, {transform_indices = @transform_2, window_bounds = array<i64: 1, 256>}, {transform_indices = @transform_3, window_bounds = array<i64: 1, 256>}, {transform_indices = @transform_4, window_bounds = array<i64: 8, 256>}]} {
    %c0_i32 = arith.constant 0 : i32
    %0 = arith.cmpi eq, %arg2, %c0_i32 : i32
    %1 = arith.extui %0 : i1 to i32
    %c0_i32_0 = arith.constant 0 : i32
    %2 = arith.cmpi ne, %1, %c0_i32_0 : i32
    scf.if %2 {
      %cst_10 = arith.constant 0.000000e+00 : f32
      %12 = vector.broadcast %cst_10 : f32 to vector<8x256xf32>
      %c0_11 = arith.constant 0 : index
      %c0_12 = arith.constant 0 : index
      %13 = vector.load %arg8[%c0_11, %c0_12] : memref<8x256xf32, #tpu.memory_space<vmem>>, vector<8x256xf32>
      tpu.vector_store %arg8[%c0_11, %c0_12], %12 {strides = array<i32>} : memref<8x256xf32, #tpu.memory_space<vmem>>, vector<8x256xf32>,
    } else {
    }
    %c0 = arith.constant 0 : index
    %c0_1 = arith.constant 0 : index
    %3 = vector.load %arg8[%c0, %c0_1] : memref<8x256xf32, #tpu.memory_space<vmem>>, vector<8x256xf32>
    %c0_2 = arith.constant 0 : index
    %c0_3 = arith.constant 0 : index
    %4 = vector.load %arg3[%c0_2, %c0_3] : memref<8x128xbf16, #tpu.memory_space<vmem>>, vector<8x128xbf16>
    %c0_4 = arith.constant 0 : index
    %c0_5 = arith.constant 0 : index
    %5 = vector.load %arg4[%c0_4, %c0_5] : memref<128x256xbf16, #tpu.memory_space<vmem>>, vector<128x256xbf16>
    %cst = arith.constant dense<0.000000e+00> : vector<8x256xf32>
    %6 = tpu.matmul %4, %5, %cst {dimension_numbers = #tpu.dot_dimension_numbers<[1], [0], [0], [1], [0, 0, 1, 1], [], []>} : vector<8x128xbf16>, vector<128x256xbf16>, vector<8x256xf32> -> vector<8x256xf32>
    %7 = arith.addf %3, %6 : vector<8x256xf32>
    %c0_6 = arith.constant 0 : index
    %c0_7 = arith.constant 0 : index
    %8 = vector.load %arg8[%c0_6, %c0_7] : memref<8x256xf32, #tpu.memory_space<vmem>>, vector<8x256xf32>
    tpu.vector_store %arg8[%c0_6, %c0_7], %7 {strides = array<i32>} : memref<8x256xf32, #tpu.memory_space<vmem>>, vector<8x256xf32>,
    %c0_i32_8 = arith.constant 0 : i32
    %9 = arith.cmpi eq, %arg2, %c0_i32_8 : i32
    %10 = arith.extui %9 : i1 to i32
    %c0_i32_9 = arith.constant 0 : i32
    %11 = arith.cmpi ne, %10, %c0_i32_9 : i32
    scf.if %11 {
      %c0_10 = arith.constant 0 : index
      %c0_11 = arith.constant 0 : index
      %12 = vector.load %arg8[%c0_10, %c0_11] : memref<8x256xf32, #tpu.memory_space<vmem>>, vector<8x256xf32>
      %c0_12 = arith.constant 0 : index
      %c0_13 = arith.constant 0 : index
      %13 = vector.load %arg5[%c0_12, %c0_13] : memref<1x256xf32, #tpu.memory_space<vmem>>, vector<1x256xf32>
      %14 = vector.broadcast %13 : vector<1x256xf32> to vector<8x256xf32>
      %15 = arith.mulf %12, %14 : vector<8x256xf32>
      %c0_14 = arith.constant 0 : index
      %c0_15 = arith.constant 0 : index
      %16 = vector.load %arg6[%c0_14, %c0_15] : memref<1x256xf32, #tpu.memory_space<vmem>>, vector<1x256xf32>
      %17 = vector.broadcast %16 : vector<1x256xf32> to vector<8x256xf32>
      %18 = arith.addf %15, %17 : vector<8x256xf32>
      %c0_16 = arith.constant 0 : index
      %c0_17 = arith.constant 0 : index
      %19 = vector.load %arg7[%c0_16, %c0_17] : memref<8x256xf32, #tpu.memory_space<vmem>>, vector<8x256xf32>
      tpu.vector_store %arg7[%c0_16, %c0_17], %18 {strides = array<i32>} : memref<8x256xf32, #tpu.memory_space<vmem>>, vector<8x256xf32>,
    } else {
    }
    return
  }
  func.func @transform_0(%arg0: i32, %arg1: i32, %arg2: i32) -> (i32, i32) {
    %c0_i32 = arith.constant 0 : i32
    return %arg0, %arg2 : i32, i32
  }
  func.func @transform_1(%arg0: i32, %arg1: i32, %arg2: i32) -> (i32, i32) {
    %c0_i32 = arith.constant 0 : i32
    return %arg2, %arg1 : i32, i32
  }
  func.func @transform_2(%arg0: i32, %arg1: i32, %arg2: i32) -> (i32, i32) {
    %c0_i32 = arith.constant 0 : i32
    %c0_i32_0 = arith.constant 0 : i32
    return %c0_i32, %arg1 : i32, i32
  }
  func.func @transform_3(%arg0: i32, %arg1: i32, %arg2: i32) -> (i32, i32) {
    %c0_i32 = arith.constant 0 : i32
    %c0_i32_0 = arith.constant 0 : i32
    return %c0_i32, %arg1 : i32, i32
  }
  func.func @transform_4(%arg0: i32, %arg1: i32, %arg2: i32) -> (i32, i32) {
    %c0_i32 = arith.constant 0 : i32
    return %arg0, %arg1 : i32, i32
  }
}

module attributes {stable_mosaic.version = 11 : i64} {
  func.func @_matmul_fused_kernel(%arg0: i32, %arg1: i32, %arg2: i32, %arg3: memref<8x384xbf16, #tpu.memory_space<vmem>>, %arg4: memref<384x256xbf16, #tpu.memory_space<vmem>>, %arg5: memref<1x256xf32, #tpu.memory_space<vmem>>, %arg6: memref<1x256xf32, #tpu.memory_space<vmem>>, %arg7: memref<8x256xf32, #tpu.memory_space<vmem>>, %arg8: memref<8x256xf32, #tpu.memory_space<vmem>>, %arg9: memref<8x256xf32, #tpu.memory_space<vmem>>) attributes {dimension_semantics = [#tpu.dimension_semantics<parallel>, #tpu.dimension_semantics<parallel>, #tpu.dimension_semantics<arbitrary>], iteration_bounds = array<i64: 1, 1, 6>, scalar_prefetch = 0 : i64, scratch_operands = 1 : i64, tpu.core_type = #tpu.core_type<tc>, window_params = [{transform_indices = @transform_0, window_bounds = array<i64: 8, 384>}, {transform_indices = @transform_1, window_bounds = array<i64: 384, 256>}, {transform_indices = @transform_2, window_bounds = array<i64: 1, 256>}, {transform_indices = @transform_3, window_bounds = array<i64: 1, 256>}, {transform_indices = @transform_4, window_bounds = array<i64: 8, 256>}, {transform_indices = @transform_5, window_bounds = array<i64: 8, 256>}]} {
    %c0_i32 = arith.constant 0 : i32
    %0 = arith.cmpi eq, %arg2, %c0_i32 : i32
    %1 = arith.extui %0 : i1 to i32
    %c0_i32_0 = arith.constant 0 : i32
    %2 = arith.cmpi ne, %1, %c0_i32_0 : i32
    scf.if %2 {
      %cst_9 = arith.constant 0.000000e+00 : f32
      %12 = vector.broadcast %cst_9 : f32 to vector<8x256xf32>
      %c0_10 = arith.constant 0 : index
      %c0_11 = arith.constant 0 : index
      %13 = vector.load %arg9[%c0_10, %c0_11] : memref<8x256xf32, #tpu.memory_space<vmem>>, vector<8x256xf32>
      tpu.vector_store %arg9[%c0_10, %c0_11], %12 {strides = array<i32>} : memref<8x256xf32, #tpu.memory_space<vmem>>, vector<8x256xf32>,
    } else {
    }
    %c0 = arith.constant 0 : index
    %c0_1 = arith.constant 0 : index
    %3 = vector.load %arg9[%c0, %c0_1] : memref<8x256xf32, #tpu.memory_space<vmem>>, vector<8x256xf32>
    %c0_2 = arith.constant 0 : index
    %c0_3 = arith.constant 0 : index
    %4 = vector.load %arg3[%c0_2, %c0_3] : memref<8x384xbf16, #tpu.memory_space<vmem>>, vector<8x384xbf16>
    %c0_4 = arith.constant 0 : index
    %c0_5 = arith.constant 0 : index
    %5 = vector.load %arg4[%c0_4, %c0_5] : memref<384x256xbf16, #tpu.memory_space<vmem>>, vector<384x256xbf16>
    %cst = arith.constant dense<0.000000e+00> : vector<8x256xf32>
    %6 = tpu.matmul %4, %5, %cst {dimension_numbers = #tpu.dot_dimension_numbers<[1], [0], [0], [1], [0, 0, 1, 1], [], []>} : vector<8x384xbf16>, vector<384x256xbf16>, vector<8x256xf32> -> vector<8x256xf32>
    %7 = arith.addf %3, %6 : vector<8x256xf32>
    %c0_6 = arith.constant 0 : index
    %c0_7 = arith.constant 0 : index
    %8 = vector.load %arg9[%c0_6, %c0_7] : memref<8x256xf32, #tpu.memory_space<vmem>>, vector<8x256xf32>
    tpu.vector_store %arg9[%c0_6, %c0_7], %7 {strides = array<i32>} : memref<8x256xf32, #tpu.memory_space<vmem>>, vector<8x256xf32>,
    %c5_i32 = arith.constant 5 : i32
    %9 = arith.cmpi eq, %arg2, %c5_i32 : i32
    %10 = arith.extui %9 : i1 to i32
    %c0_i32_8 = arith.constant 0 : i32
    %11 = arith.cmpi ne, %10, %c0_i32_8 : i32
    scf.if %11 {
      %c0_9 = arith.constant 0 : index
      %c0_10 = arith.constant 0 : index
      %12 = vector.load %arg9[%c0_9, %c0_10] : memref<8x256xf32, #tpu.memory_space<vmem>>, vector<8x256xf32>
      %c0_11 = arith.constant 0 : index
      %c0_12 = arith.constant 0 : index
      %13 = vector.load %arg5[%c0_11, %c0_12] : memref<1x256xf32, #tpu.memory_space<vmem>>, vector<1x256xf32>
      %14 = vector.broadcast %13 : vector<1x256xf32> to vector<8x256xf32>
      %15 = arith.mulf %12, %14 : vector<8x256xf32>
      %c0_13 = arith.constant 0 : index
      %c0_14 = arith.constant 0 : index
      %16 = vector.load %arg6[%c0_13, %c0_14] : memref<1x256xf32, #tpu.memory_space<vmem>>, vector<1x256xf32>
      %17 = vector.broadcast %16 : vector<1x256xf32> to vector<8x256xf32>
      %18 = arith.addf %15, %17 : vector<8x256xf32>
      %c0_15 = arith.constant 0 : index
      %c0_16 = arith.constant 0 : index
      %19 = vector.load %arg7[%c0_15, %c0_16] : memref<8x256xf32, #tpu.memory_space<vmem>>, vector<8x256xf32>
      %20 = arith.addf %18, %19 : vector<8x256xf32>
      %cst_17 = arith.constant 0.000000e+00 : f32
      %21 = vector.broadcast %cst_17 : f32 to vector<8x256xf32>
      %22 = arith.maximumf %20, %21 : vector<8x256xf32>
      %c0_18 = arith.constant 0 : index
      %c0_19 = arith.constant 0 : index
      %23 = vector.load %arg8[%c0_18, %c0_19] : memref<8x256xf32, #tpu.memory_space<vmem>>, vector<8x256xf32>
      tpu.vector_store %arg8[%c0_18, %c0_19], %22 {strides = array<i32>} : memref<8x256xf32, #tpu.memory_space<vmem>>, vector<8x256xf32>,
    } else {
    }
    return
  }
  func.func @transform_0(%arg0: i32, %arg1: i32, %arg2: i32) -> (i32, i32) {
    %c0_i32 = arith.constant 0 : i32
    return %arg0, %arg2 : i32, i32
  }
  func.func @transform_1(%arg0: i32, %arg1: i32, %arg2: i32) -> (i32, i32) {
    %c0_i32 = arith.constant 0 : i32
    return %arg2, %arg1 : i32, i32
  }
  func.func @transform_2(%arg0: i32, %arg1: i32, %arg2: i32) -> (i32, i32) {
    %c0_i32 = arith.constant 0 : i32
    %c0_i32_0 = arith.constant 0 : i32
    return %c0_i32, %arg1 : i32, i32
  }
  func.func @transform_3(%arg0: i32, %arg1: i32, %arg2: i32) -> (i32, i32) {
    %c0_i32 = arith.constant 0 : i32
    %c0_i32_0 = arith.constant 0 : i32
    return %c0_i32, %arg1 : i32, i32
  }
  func.func @transform_4(%arg0: i32, %arg1: i32, %arg2: i32) -> (i32, i32) {
    %c0_i32 = arith.constant 0 : i32
    return %arg0, %arg1 : i32, i32
  }
  func.func @transform_5(%arg0: i32, %arg1: i32, %arg2: i32) -> (i32, i32) {
    %c0_i32 = arith.constant 0 : i32
    return %arg0, %arg1 : i32, i32
  }
}

module attributes {stable_mosaic.version = 11 : i64} {
  func.func @_matmul_fused_kernel(%arg0: i32, %arg1: i32, %arg2: i32, %arg3: memref<8x384xbf16, #tpu.memory_space<vmem>>, %arg4: memref<384x256xbf16, #tpu.memory_space<vmem>>, %arg5: memref<1x256xf32, #tpu.memory_space<vmem>>, %arg6: memref<1x256xf32, #tpu.memory_space<vmem>>, %arg7: memref<8x256xf32, #tpu.memory_space<vmem>>, %arg8: memref<8x256xf32, #tpu.memory_space<vmem>>) attributes {dimension_semantics = [#tpu.dimension_semantics<parallel>, #tpu.dimension_semantics<parallel>, #tpu.dimension_semantics<arbitrary>], iteration_bounds = array<i64: 1, 1, 6>, scalar_prefetch = 0 : i64, scratch_operands = 1 : i64, tpu.core_type = #tpu.core_type<tc>, window_params = [{transform_indices = @transform_0, window_bounds = array<i64: 8, 384>}, {transform_indices = @transform_1, window_bounds = array<i64: 384, 256>}, {transform_indices = @transform_2, window_bounds = array<i64: 1, 256>}, {transform_indices = @transform_3, window_bounds = array<i64: 1, 256>}, {transform_indices = @transform_4, window_bounds = array<i64: 8, 256>}]} {
    %c0_i32 = arith.constant 0 : i32
    %0 = arith.cmpi eq, %arg2, %c0_i32 : i32
    %1 = arith.extui %0 : i1 to i32
    %c0_i32_0 = arith.constant 0 : i32
    %2 = arith.cmpi ne, %1, %c0_i32_0 : i32
    scf.if %2 {
      %cst_9 = arith.constant 0.000000e+00 : f32
      %12 = vector.broadcast %cst_9 : f32 to vector<8x256xf32>
      %c0_10 = arith.constant 0 : index
      %c0_11 = arith.constant 0 : index
      %13 = vector.load %arg8[%c0_10, %c0_11] : memref<8x256xf32, #tpu.memory_space<vmem>>, vector<8x256xf32>
      tpu.vector_store %arg8[%c0_10, %c0_11], %12 {strides = array<i32>} : memref<8x256xf32, #tpu.memory_space<vmem>>, vector<8x256xf32>,
    } else {
    }
    %c0 = arith.constant 0 : index
    %c0_1 = arith.constant 0 : index
    %3 = vector.load %arg8[%c0, %c0_1] : memref<8x256xf32, #tpu.memory_space<vmem>>, vector<8x256xf32>
    %c0_2 = arith.constant 0 : index
    %c0_3 = arith.constant 0 : index
    %4 = vector.load %arg3[%c0_2, %c0_3] : memref<8x384xbf16, #tpu.memory_space<vmem>>, vector<8x384xbf16>
    %c0_4 = arith.constant 0 : index
    %c0_5 = arith.constant 0 : index
    %5 = vector.load %arg4[%c0_4, %c0_5] : memref<384x256xbf16, #tpu.memory_space<vmem>>, vector<384x256xbf16>
    %cst = arith.constant dense<0.000000e+00> : vector<8x256xf32>
    %6 = tpu.matmul %4, %5, %cst {dimension_numbers = #tpu.dot_dimension_numbers<[1], [0], [0], [1], [0, 0, 1, 1], [], []>} : vector<8x384xbf16>, vector<384x256xbf16>, vector<8x256xf32> -> vector<8x256xf32>
    %7 = arith.addf %3, %6 : vector<8x256xf32>
    %c0_6 = arith.constant 0 : index
    %c0_7 = arith.constant 0 : index
    %8 = vector.load %arg8[%c0_6, %c0_7] : memref<8x256xf32, #tpu.memory_space<vmem>>, vector<8x256xf32>
    tpu.vector_store %arg8[%c0_6, %c0_7], %7 {strides = array<i32>} : memref<8x256xf32, #tpu.memory_space<vmem>>, vector<8x256xf32>,
    %c5_i32 = arith.constant 5 : i32
    %9 = arith.cmpi eq, %arg2, %c5_i32 : i32
    %10 = arith.extui %9 : i1 to i32
    %c0_i32_8 = arith.constant 0 : i32
    %11 = arith.cmpi ne, %10, %c0_i32_8 : i32
    scf.if %11 {
      %c0_9 = arith.constant 0 : index
      %c0_10 = arith.constant 0 : index
      %12 = vector.load %arg8[%c0_9, %c0_10] : memref<8x256xf32, #tpu.memory_space<vmem>>, vector<8x256xf32>
      %c0_11 = arith.constant 0 : index
      %c0_12 = arith.constant 0 : index
      %13 = vector.load %arg5[%c0_11, %c0_12] : memref<1x256xf32, #tpu.memory_space<vmem>>, vector<1x256xf32>
      %14 = vector.broadcast %13 : vector<1x256xf32> to vector<8x256xf32>
      %15 = arith.mulf %12, %14 : vector<8x256xf32>
      %c0_13 = arith.constant 0 : index
      %c0_14 = arith.constant 0 : index
      %16 = vector.load %arg6[%c0_13, %c0_14] : memref<1x256xf32, #tpu.memory_space<vmem>>, vector<1x256xf32>
      %17 = vector.broadcast %16 : vector<1x256xf32> to vector<8x256xf32>
      %18 = arith.addf %15, %17 : vector<8x256xf32>
      %cst_15 = arith.constant 0.000000e+00 : f32
      %19 = vector.broadcast %cst_15 : f32 to vector<8x256xf32>
      %20 = arith.maximumf %18, %19 : vector<8x256xf32>
      %c0_16 = arith.constant 0 : index
      %c0_17 = arith.constant 0 : index
      %21 = vector.load %arg7[%c0_16, %c0_17] : memref<8x256xf32, #tpu.memory_space<vmem>>, vector<8x256xf32>
      tpu.vector_store %arg7[%c0_16, %c0_17], %20 {strides = array<i32>} : memref<8x256xf32, #tpu.memory_space<vmem>>, vector<8x256xf32>,
    } else {
    }
    return
  }
  func.func @transform_0(%arg0: i32, %arg1: i32, %arg2: i32) -> (i32, i32) {
    %c0_i32 = arith.constant 0 : i32
    return %arg0, %arg2 : i32, i32
  }
  func.func @transform_1(%arg0: i32, %arg1: i32, %arg2: i32) -> (i32, i32) {
    %c0_i32 = arith.constant 0 : i32
    return %arg2, %arg1 : i32, i32
  }
  func.func @transform_2(%arg0: i32, %arg1: i32, %arg2: i32) -> (i32, i32) {
    %c0_i32 = arith.constant 0 : i32
    %c0_i32_0 = arith.constant 0 : i32
    return %c0_i32, %arg1 : i32, i32
  }
  func.func @transform_3(%arg0: i32, %arg1: i32, %arg2: i32) -> (i32, i32) {
    %c0_i32 = arith.constant 0 : i32
    %c0_i32_0 = arith.constant 0 : i32
    return %c0_i32, %arg1 : i32, i32
  }
  func.func @transform_4(%arg0: i32, %arg1: i32, %arg2: i32) -> (i32, i32) {
    %c0_i32 = arith.constant 0 : i32
    return %arg0, %arg1 : i32, i32
  }
}

module attributes {stable_mosaic.version = 11 : i64} {
  func.func @_matmul_fused_kernel(%arg0: i32, %arg1: i32, %arg2: i32, %arg3: memref<2x384xbf16, #tpu.memory_space<vmem>>, %arg4: memref<384x256xbf16, #tpu.memory_space<vmem>>, %arg5: memref<1x256xf32, #tpu.memory_space<vmem>>, %arg6: memref<1x256xf32, #tpu.memory_space<vmem>>, %arg7: memref<2x256xf32, #tpu.memory_space<vmem>>, %arg8: memref<2x256xf32, #tpu.memory_space<vmem>>) attributes {dimension_semantics = [#tpu.dimension_semantics<parallel>, #tpu.dimension_semantics<parallel>, #tpu.dimension_semantics<arbitrary>], iteration_bounds = array<i64: 1, 2, 6>, scalar_prefetch = 0 : i64, scratch_operands = 1 : i64, tpu.core_type = #tpu.core_type<tc>, window_params = [{transform_indices = @transform_0, window_bounds = array<i64: 2, 384>}, {transform_indices = @transform_1, window_bounds = array<i64: 384, 256>}, {transform_indices = @transform_2, window_bounds = array<i64: 1, 256>}, {transform_indices = @transform_3, window_bounds = array<i64: 1, 256>}, {transform_indices = @transform_4, window_bounds = array<i64: 2, 256>}]} {
    %c0_i32 = arith.constant 0 : i32
    %0 = arith.cmpi eq, %arg2, %c0_i32 : i32
    %1 = arith.extui %0 : i1 to i32
    %c0_i32_0 = arith.constant 0 : i32
    %2 = arith.cmpi ne, %1, %c0_i32_0 : i32
    scf.if %2 {
      %cst_9 = arith.constant 0.000000e+00 : f32
      %12 = vector.broadcast %cst_9 : f32 to vector<2x256xf32>
      %c0_10 = arith.constant 0 : index
      %c0_11 = arith.constant 0 : index
      %13 = vector.load %arg8[%c0_10, %c0_11] : memref<2x256xf32, #tpu.memory_space<vmem>>, vector<2x256xf32>
      tpu.vector_store %arg8[%c0_10, %c0_11], %12 {strides = array<i32>} : memref<2x256xf32, #tpu.memory_space<vmem>>, vector<2x256xf32>,
    } else {
    }
    %c0 = arith.constant 0 : index
    %c0_1 = arith.constant 0 : index
    %3 = vector.load %arg8[%c0, %c0_1] : memref<2x256xf32, #tpu.memory_space<vmem>>, vector<2x256xf32>
    %c0_2 = arith.constant 0 : index
    %c0_3 = arith.constant 0 : index
    %4 = vector.load %arg3[%c0_2, %c0_3] : memref<2x384xbf16, #tpu.memory_space<vmem>>, vector<2x384xbf16>
    %c0_4 = arith.constant 0 : index
    %c0_5 = arith.constant 0 : index
    %5 = vector.load %arg4[%c0_4, %c0_5] : memref<384x256xbf16, #tpu.memory_space<vmem>>, vector<384x256xbf16>
    %cst = arith.constant dense<0.000000e+00> : vector<2x256xf32>
    %6 = tpu.matmul %4, %5, %cst {dimension_numbers = #tpu.dot_dimension_numbers<[1], [0], [0], [1], [0, 0, 1, 1], [], []>} : vector<2x384xbf16>, vector<384x256xbf16>, vector<2x256xf32> -> vector<2x256xf32>
    %7 = arith.addf %3, %6 : vector<2x256xf32>
    %c0_6 = arith.constant 0 : index
    %c0_7 = arith.constant 0 : index
    %8 = vector.load %arg8[%c0_6, %c0_7] : memref<2x256xf32, #tpu.memory_space<vmem>>, vector<2x256xf32>
    tpu.vector_store %arg8[%c0_6, %c0_7], %7 {strides = array<i32>} : memref<2x256xf32, #tpu.memory_space<vmem>>, vector<2x256xf32>,
    %c5_i32 = arith.constant 5 : i32
    %9 = arith.cmpi eq, %arg2, %c5_i32 : i32
    %10 = arith.extui %9 : i1 to i32
    %c0_i32_8 = arith.constant 0 : i32
    %11 = arith.cmpi ne, %10, %c0_i32_8 : i32
    scf.if %11 {
      %c0_9 = arith.constant 0 : index
      %c0_10 = arith.constant 0 : index
      %12 = vector.load %arg8[%c0_9, %c0_10] : memref<2x256xf32, #tpu.memory_space<vmem>>, vector<2x256xf32>
      %c0_11 = arith.constant 0 : index
      %c0_12 = arith.constant 0 : index
      %13 = vector.load %arg5[%c0_11, %c0_12] : memref<1x256xf32, #tpu.memory_space<vmem>>, vector<1x256xf32>
      %14 = vector.broadcast %13 : vector<1x256xf32> to vector<2x256xf32>
      %15 = arith.mulf %12, %14 : vector<2x256xf32>
      %c0_13 = arith.constant 0 : index
      %c0_14 = arith.constant 0 : index
      %16 = vector.load %arg6[%c0_13, %c0_14] : memref<1x256xf32, #tpu.memory_space<vmem>>, vector<1x256xf32>
      %17 = vector.broadcast %16 : vector<1x256xf32> to vector<2x256xf32>
      %18 = arith.addf %15, %17 : vector<2x256xf32>
      %cst_15 = arith.constant 0.000000e+00 : f32
      %19 = vector.broadcast %cst_15 : f32 to vector<2x256xf32>
      %20 = arith.maximumf %18, %19 : vector<2x256xf32>
      %c0_16 = arith.constant 0 : index
      %c0_17 = arith.constant 0 : index
      %21 = vector.load %arg7[%c0_16, %c0_17] : memref<2x256xf32, #tpu.memory_space<vmem>>, vector<2x256xf32>
      tpu.vector_store %arg7[%c0_16, %c0_17], %20 {strides = array<i32>} : memref<2x256xf32, #tpu.memory_space<vmem>>, vector<2x256xf32>,
    } else {
    }
    return
  }
  func.func @transform_0(%arg0: i32, %arg1: i32, %arg2: i32) -> (i32, i32) {
    %c0_i32 = arith.constant 0 : i32
    return %arg0, %arg2 : i32, i32
  }
  func.func @transform_1(%arg0: i32, %arg1: i32, %arg2: i32) -> (i32, i32) {
    %c0_i32 = arith.constant 0 : i32
    return %arg2, %arg1 : i32, i32
  }
  func.func @transform_2(%arg0: i32, %arg1: i32, %arg2: i32) -> (i32, i32) {
    %c0_i32 = arith.constant 0 : i32
    %c0_i32_0 = arith.constant 0 : i32
    return %c0_i32, %arg1 : i32, i32
  }
  func.func @transform_3(%arg0: i32, %arg1: i32, %arg2: i32) -> (i32, i32) {
    %c0_i32 = arith.constant 0 : i32
    %c0_i32_0 = arith.constant 0 : i32
    return %c0_i32, %arg1 : i32, i32
  }
  func.func @transform_4(%arg0: i32, %arg1: i32, %arg2: i32) -> (i32, i32) {
    %c0_i32 = arith.constant 0 : i32
    return %arg0, %arg1 : i32, i32
  }
}

module attributes {stable_mosaic.version = 11 : i64} {
  func.func @_matmul_fused_kernel(%arg0: i32, %arg1: i32, %arg2: i32, %arg3: memref<2x256xbf16, #tpu.memory_space<vmem>>, %arg4: memref<256x256xbf16, #tpu.memory_space<vmem>>, %arg5: memref<1x256xf32, #tpu.memory_space<vmem>>, %arg6: memref<1x256xf32, #tpu.memory_space<vmem>>, %arg7: memref<2x256xf32, #tpu.memory_space<vmem>>, %arg8: memref<2x256xf32, #tpu.memory_space<vmem>>) attributes {dimension_semantics = [#tpu.dimension_semantics<parallel>, #tpu.dimension_semantics<parallel>, #tpu.dimension_semantics<arbitrary>], iteration_bounds = array<i64: 1, 2, 1>, scalar_prefetch = 0 : i64, scratch_operands = 1 : i64, tpu.core_type = #tpu.core_type<tc>, window_params = [{transform_indices = @transform_0, window_bounds = array<i64: 2, 256>}, {transform_indices = @transform_1, window_bounds = array<i64: 256, 256>}, {transform_indices = @transform_2, window_bounds = array<i64: 1, 256>}, {transform_indices = @transform_3, window_bounds = array<i64: 1, 256>}, {transform_indices = @transform_4, window_bounds = array<i64: 2, 256>}]} {
    %c0_i32 = arith.constant 0 : i32
    %0 = arith.cmpi eq, %arg2, %c0_i32 : i32
    %1 = arith.extui %0 : i1 to i32
    %c0_i32_0 = arith.constant 0 : i32
    %2 = arith.cmpi ne, %1, %c0_i32_0 : i32
    scf.if %2 {
      %cst_10 = arith.constant 0.000000e+00 : f32
      %12 = vector.broadcast %cst_10 : f32 to vector<2x256xf32>
      %c0_11 = arith.constant 0 : index
      %c0_12 = arith.constant 0 : index
      %13 = vector.load %arg8[%c0_11, %c0_12] : memref<2x256xf32, #tpu.memory_space<vmem>>, vector<2x256xf32>
      tpu.vector_store %arg8[%c0_11, %c0_12], %12 {strides = array<i32>} : memref<2x256xf32, #tpu.memory_space<vmem>>, vector<2x256xf32>,
    } else {
    }
    %c0 = arith.constant 0 : index
    %c0_1 = arith.constant 0 : index
    %3 = vector.load %arg8[%c0, %c0_1] : memref<2x256xf32, #tpu.memory_space<vmem>>, vector<2x256xf32>
    %c0_2 = arith.constant 0 : index
    %c0_3 = arith.constant 0 : index
    %4 = vector.load %arg3[%c0_2, %c0_3] : memref<2x256xbf16, #tpu.memory_space<vmem>>, vector<2x256xbf16>
    %c0_4 = arith.constant 0 : index
    %c0_5 = arith.constant 0 : index
    %5 = vector.load %arg4[%c0_4, %c0_5] : memref<256x256xbf16, #tpu.memory_space<vmem>>, vector<256x256xbf16>
    %cst = arith.constant dense<0.000000e+00> : vector<2x256xf32>
    %6 = tpu.matmul %4, %5, %cst {dimension_numbers = #tpu.dot_dimension_numbers<[1], [0], [0], [1], [0, 0, 1, 1], [], []>} : vector<2x256xbf16>, vector<256x256xbf16>, vector<2x256xf32> -> vector<2x256xf32>
    %7 = arith.addf %3, %6 : vector<2x256xf32>
    %c0_6 = arith.constant 0 : index
    %c0_7 = arith.constant 0 : index
    %8 = vector.load %arg8[%c0_6, %c0_7] : memref<2x256xf32, #tpu.memory_space<vmem>>, vector<2x256xf32>
    tpu.vector_store %arg8[%c0_6, %c0_7], %7 {strides = array<i32>} : memref<2x256xf32, #tpu.memory_space<vmem>>, vector<2x256xf32>,
    %c0_i32_8 = arith.constant 0 : i32
    %9 = arith.cmpi eq, %arg2, %c0_i32_8 : i32
    %10 = arith.extui %9 : i1 to i32
    %c0_i32_9 = arith.constant 0 : i32
    %11 = arith.cmpi ne, %10, %c0_i32_9 : i32
    scf.if %11 {
      %c0_10 = arith.constant 0 : index
      %c0_11 = arith.constant 0 : index
      %12 = vector.load %arg8[%c0_10, %c0_11] : memref<2x256xf32, #tpu.memory_space<vmem>>, vector<2x256xf32>
      %c0_12 = arith.constant 0 : index
      %c0_13 = arith.constant 0 : index
      %13 = vector.load %arg5[%c0_12, %c0_13] : memref<1x256xf32, #tpu.memory_space<vmem>>, vector<1x256xf32>
      %14 = vector.broadcast %13 : vector<1x256xf32> to vector<2x256xf32>
      %15 = arith.mulf %12, %14 : vector<2x256xf32>
      %c0_14 = arith.constant 0 : index
      %c0_15 = arith.constant 0 : index
      %16 = vector.load %arg6[%c0_14, %c0_15] : memref<1x256xf32, #tpu.memory_space<vmem>>, vector<1x256xf32>
      %17 = vector.broadcast %16 : vector<1x256xf32> to vector<2x256xf32>
      %18 = arith.addf %15, %17 : vector<2x256xf32>
      %c0_16 = arith.constant 0 : index
      %c0_17 = arith.constant 0 : index
      %19 = vector.load %arg7[%c0_16, %c0_17] : memref<2x256xf32, #tpu.memory_space<vmem>>, vector<2x256xf32>
      tpu.vector_store %arg7[%c0_16, %c0_17], %18 {strides = array<i32>} : memref<2x256xf32, #tpu.memory_space<vmem>>, vector<2x256xf32>,
    } else {
    }
    return
  }
  func.func @transform_0(%arg0: i32, %arg1: i32, %arg2: i32) -> (i32, i32) {
    %c0_i32 = arith.constant 0 : i32
    return %arg0, %arg2 : i32, i32
  }
  func.func @transform_1(%arg0: i32, %arg1: i32, %arg2: i32) -> (i32, i32) {
    %c0_i32 = arith.constant 0 : i32
    return %arg2, %arg1 : i32, i32
  }
  func.func @transform_2(%arg0: i32, %arg1: i32, %arg2: i32) -> (i32, i32) {
    %c0_i32 = arith.constant 0 : i32
    %c0_i32_0 = arith.constant 0 : i32
    return %c0_i32, %arg1 : i32, i32
  }
  func.func @transform_3(%arg0: i32, %arg1: i32, %arg2: i32) -> (i32, i32) {
    %c0_i32 = arith.constant 0 : i32
    %c0_i32_0 = arith.constant 0 : i32
    return %c0_i32, %arg1 : i32, i32
  }
  func.func @transform_4(%arg0: i32, %arg1: i32, %arg2: i32) -> (i32, i32) {
    %c0_i32 = arith.constant 0 : i32
    return %arg0, %arg1 : i32, i32
  }
}

module attributes {stable_mosaic.version = 11 : i64} {
  func.func @_matmul_fused_kernel(%arg0: i32, %arg1: i32, %arg2: i32, %arg3: memref<2x512xbf16, #tpu.memory_space<vmem>>, %arg4: memref<512x256xbf16, #tpu.memory_space<vmem>>, %arg5: memref<1x256xf32, #tpu.memory_space<vmem>>, %arg6: memref<1x256xf32, #tpu.memory_space<vmem>>, %arg7: memref<2x256xf32, #tpu.memory_space<vmem>>, %arg8: memref<2x256xf32, #tpu.memory_space<vmem>>, %arg9: memref<2x256xf32, #tpu.memory_space<vmem>>) attributes {dimension_semantics = [#tpu.dimension_semantics<parallel>, #tpu.dimension_semantics<parallel>, #tpu.dimension_semantics<arbitrary>], iteration_bounds = array<i64: 1, 2, 9>, scalar_prefetch = 0 : i64, scratch_operands = 1 : i64, tpu.core_type = #tpu.core_type<tc>, window_params = [{transform_indices = @transform_0, window_bounds = array<i64: 2, 512>}, {transform_indices = @transform_1, window_bounds = array<i64: 512, 256>}, {transform_indices = @transform_2, window_bounds = array<i64: 1, 256>}, {transform_indices = @transform_3, window_bounds = array<i64: 1, 256>}, {transform_indices = @transform_4, window_bounds = array<i64: 2, 256>}, {transform_indices = @transform_5, window_bounds = array<i64: 2, 256>}]} {
    %c0_i32 = arith.constant 0 : i32
    %0 = arith.cmpi eq, %arg2, %c0_i32 : i32
    %1 = arith.extui %0 : i1 to i32
    %c0_i32_0 = arith.constant 0 : i32
    %2 = arith.cmpi ne, %1, %c0_i32_0 : i32
    scf.if %2 {
      %cst_9 = arith.constant 0.000000e+00 : f32
      %12 = vector.broadcast %cst_9 : f32 to vector<2x256xf32>
      %c0_10 = arith.constant 0 : index
      %c0_11 = arith.constant 0 : index
      %13 = vector.load %arg9[%c0_10, %c0_11] : memref<2x256xf32, #tpu.memory_space<vmem>>, vector<2x256xf32>
      tpu.vector_store %arg9[%c0_10, %c0_11], %12 {strides = array<i32>} : memref<2x256xf32, #tpu.memory_space<vmem>>, vector<2x256xf32>,
    } else {
    }
    %c0 = arith.constant 0 : index
    %c0_1 = arith.constant 0 : index
    %3 = vector.load %arg9[%c0, %c0_1] : memref<2x256xf32, #tpu.memory_space<vmem>>, vector<2x256xf32>
    %c0_2 = arith.constant 0 : index
    %c0_3 = arith.constant 0 : index
    %4 = vector.load %arg3[%c0_2, %c0_3] : memref<2x512xbf16, #tpu.memory_space<vmem>>, vector<2x512xbf16>
    %c0_4 = arith.constant 0 : index
    %c0_5 = arith.constant 0 : index
    %5 = vector.load %arg4[%c0_4, %c0_5] : memref<512x256xbf16, #tpu.memory_space<vmem>>, vector<512x256xbf16>
    %cst = arith.constant dense<0.000000e+00> : vector<2x256xf32>
    %6 = tpu.matmul %4, %5, %cst {dimension_numbers = #tpu.dot_dimension_numbers<[1], [0], [0], [1], [0, 0, 1, 1], [], []>} : vector<2x512xbf16>, vector<512x256xbf16>, vector<2x256xf32> -> vector<2x256xf32>
    %7 = arith.addf %3, %6 : vector<2x256xf32>
    %c0_6 = arith.constant 0 : index
    %c0_7 = arith.constant 0 : index
    %8 = vector.load %arg9[%c0_6, %c0_7] : memref<2x256xf32, #tpu.memory_space<vmem>>, vector<2x256xf32>
    tpu.vector_store %arg9[%c0_6, %c0_7], %7 {strides = array<i32>} : memref<2x256xf32, #tpu.memory_space<vmem>>, vector<2x256xf32>,
    %c8_i32 = arith.constant 8 : i32
    %9 = arith.cmpi eq, %arg2, %c8_i32 : i32
    %10 = arith.extui %9 : i1 to i32
    %c0_i32_8 = arith.constant 0 : i32
    %11 = arith.cmpi ne, %10, %c0_i32_8 : i32
    scf.if %11 {
      %c0_9 = arith.constant 0 : index
      %c0_10 = arith.constant 0 : index
      %12 = vector.load %arg9[%c0_9, %c0_10] : memref<2x256xf32, #tpu.memory_space<vmem>>, vector<2x256xf32>
      %c0_11 = arith.constant 0 : index
      %c0_12 = arith.constant 0 : index
      %13 = vector.load %arg5[%c0_11, %c0_12] : memref<1x256xf32, #tpu.memory_space<vmem>>, vector<1x256xf32>
      %14 = vector.broadcast %13 : vector<1x256xf32> to vector<2x256xf32>
      %15 = arith.mulf %12, %14 : vector<2x256xf32>
      %c0_13 = arith.constant 0 : index
      %c0_14 = arith.constant 0 : index
      %16 = vector.load %arg6[%c0_13, %c0_14] : memref<1x256xf32, #tpu.memory_space<vmem>>, vector<1x256xf32>
      %17 = vector.broadcast %16 : vector<1x256xf32> to vector<2x256xf32>
      %18 = arith.addf %15, %17 : vector<2x256xf32>
      %c0_15 = arith.constant 0 : index
      %c0_16 = arith.constant 0 : index
      %19 = vector.load %arg7[%c0_15, %c0_16] : memref<2x256xf32, #tpu.memory_space<vmem>>, vector<2x256xf32>
      %20 = arith.addf %18, %19 : vector<2x256xf32>
      %cst_17 = arith.constant 0.000000e+00 : f32
      %21 = vector.broadcast %cst_17 : f32 to vector<2x256xf32>
      %22 = arith.maximumf %20, %21 : vector<2x256xf32>
      %c0_18 = arith.constant 0 : index
      %c0_19 = arith.constant 0 : index
      %23 = vector.load %arg8[%c0_18, %c0_19] : memref<2x256xf32, #tpu.memory_space<vmem>>, vector<2x256xf32>
      tpu.vector_store %arg8[%c0_18, %c0_19], %22 {strides = array<i32>} : memref<2x256xf32, #tpu.memory_space<vmem>>, vector<2x256xf32>,
    } else {
    }
    return
  }
  func.func @transform_0(%arg0: i32, %arg1: i32, %arg2: i32) -> (i32, i32) {
    %c0_i32 = arith.constant 0 : i32
    return %arg0, %arg2 : i32, i32
  }
  func.func @transform_1(%arg0: i32, %arg1: i32, %arg2: i32) -> (i32, i32) {
    %c0_i32 = arith.constant 0 : i32
    return %arg2, %arg1 : i32, i32
  }
  func.func @transform_2(%arg0: i32, %arg1: i32, %arg2: i32) -> (i32, i32) {
    %c0_i32 = arith.constant 0 : i32
    %c0_i32_0 = arith.constant 0 : i32
    return %c0_i32, %arg1 : i32, i32
  }
  func.func @transform_3(%arg0: i32, %arg1: i32, %arg2: i32) -> (i32, i32) {
    %c0_i32 = arith.constant 0 : i32
    %c0_i32_0 = arith.constant 0 : i32
    return %c0_i32, %arg1 : i32, i32
  }
  func.func @transform_4(%arg0: i32, %arg1: i32, %arg2: i32) -> (i32, i32) {
    %c0_i32 = arith.constant 0 : i32
    return %arg0, %arg1 : i32, i32
  }
  func.func @transform_5(%arg0: i32, %arg1: i32, %arg2: i32) -> (i32, i32) {
    %c0_i32 = arith.constant 0 : i32
    return %arg0, %arg1 : i32, i32
  }
}

module attributes {stable_mosaic.version = 11 : i64} {
  func.func @_matmul_fused_kernel(%arg0: i32, %arg1: i32, %arg2: i32, %arg3: memref<2x512xbf16, #tpu.memory_space<vmem>>, %arg4: memref<512x256xbf16, #tpu.memory_space<vmem>>, %arg5: memref<1x256xf32, #tpu.memory_space<vmem>>, %arg6: memref<1x256xf32, #tpu.memory_space<vmem>>, %arg7: memref<2x256xf32, #tpu.memory_space<vmem>>, %arg8: memref<2x256xf32, #tpu.memory_space<vmem>>) attributes {dimension_semantics = [#tpu.dimension_semantics<parallel>, #tpu.dimension_semantics<parallel>, #tpu.dimension_semantics<arbitrary>], iteration_bounds = array<i64: 1, 2, 9>, scalar_prefetch = 0 : i64, scratch_operands = 1 : i64, tpu.core_type = #tpu.core_type<tc>, window_params = [{transform_indices = @transform_0, window_bounds = array<i64: 2, 512>}, {transform_indices = @transform_1, window_bounds = array<i64: 512, 256>}, {transform_indices = @transform_2, window_bounds = array<i64: 1, 256>}, {transform_indices = @transform_3, window_bounds = array<i64: 1, 256>}, {transform_indices = @transform_4, window_bounds = array<i64: 2, 256>}]} {
    %c0_i32 = arith.constant 0 : i32
    %0 = arith.cmpi eq, %arg2, %c0_i32 : i32
    %1 = arith.extui %0 : i1 to i32
    %c0_i32_0 = arith.constant 0 : i32
    %2 = arith.cmpi ne, %1, %c0_i32_0 : i32
    scf.if %2 {
      %cst_9 = arith.constant 0.000000e+00 : f32
      %12 = vector.broadcast %cst_9 : f32 to vector<2x256xf32>
      %c0_10 = arith.constant 0 : index
      %c0_11 = arith.constant 0 : index
      %13 = vector.load %arg8[%c0_10, %c0_11] : memref<2x256xf32, #tpu.memory_space<vmem>>, vector<2x256xf32>
      tpu.vector_store %arg8[%c0_10, %c0_11], %12 {strides = array<i32>} : memref<2x256xf32, #tpu.memory_space<vmem>>, vector<2x256xf32>,
    } else {
    }
    %c0 = arith.constant 0 : index
    %c0_1 = arith.constant 0 : index
    %3 = vector.load %arg8[%c0, %c0_1] : memref<2x256xf32, #tpu.memory_space<vmem>>, vector<2x256xf32>
    %c0_2 = arith.constant 0 : index
    %c0_3 = arith.constant 0 : index
    %4 = vector.load %arg3[%c0_2, %c0_3] : memref<2x512xbf16, #tpu.memory_space<vmem>>, vector<2x512xbf16>
    %c0_4 = arith.constant 0 : index
    %c0_5 = arith.constant 0 : index
    %5 = vector.load %arg4[%c0_4, %c0_5] : memref<512x256xbf16, #tpu.memory_space<vmem>>, vector<512x256xbf16>
    %cst = arith.constant dense<0.000000e+00> : vector<2x256xf32>
    %6 = tpu.matmul %4, %5, %cst {dimension_numbers = #tpu.dot_dimension_numbers<[1], [0], [0], [1], [0, 0, 1, 1], [], []>} : vector<2x512xbf16>, vector<512x256xbf16>, vector<2x256xf32> -> vector<2x256xf32>
    %7 = arith.addf %3, %6 : vector<2x256xf32>
    %c0_6 = arith.constant 0 : index
    %c0_7 = arith.constant 0 : index
    %8 = vector.load %arg8[%c0_6, %c0_7] : memref<2x256xf32, #tpu.memory_space<vmem>>, vector<2x256xf32>
    tpu.vector_store %arg8[%c0_6, %c0_7], %7 {strides = array<i32>} : memref<2x256xf32, #tpu.memory_space<vmem>>, vector<2x256xf32>,
    %c8_i32 = arith.constant 8 : i32
    %9 = arith.cmpi eq, %arg2, %c8_i32 : i32
    %10 = arith.extui %9 : i1 to i32
    %c0_i32_8 = arith.constant 0 : i32
    %11 = arith.cmpi ne, %10, %c0_i32_8 : i32
    scf.if %11 {
      %c0_9 = arith.constant 0 : index
      %c0_10 = arith.constant 0 : index
      %12 = vector.load %arg8[%c0_9, %c0_10] : memref<2x256xf32, #tpu.memory_space<vmem>>, vector<2x256xf32>
      %c0_11 = arith.constant 0 : index
      %c0_12 = arith.constant 0 : index
      %13 = vector.load %arg5[%c0_11, %c0_12] : memref<1x256xf32, #tpu.memory_space<vmem>>, vector<1x256xf32>
      %14 = vector.broadcast %13 : vector<1x256xf32> to vector<2x256xf32>
      %15 = arith.mulf %12, %14 : vector<2x256xf32>
      %c0_13 = arith.constant 0 : index
      %c0_14 = arith.constant 0 : index
      %16 = vector.load %arg6[%c0_13, %c0_14] : memref<1x256xf32, #tpu.memory_space<vmem>>, vector<1x256xf32>
      %17 = vector.broadcast %16 : vector<1x256xf32> to vector<2x256xf32>
      %18 = arith.addf %15, %17 : vector<2x256xf32>
      %cst_15 = arith.constant 0.000000e+00 : f32
      %19 = vector.broadcast %cst_15 : f32 to vector<2x256xf32>
      %20 = arith.maximumf %18, %19 : vector<2x256xf32>
      %c0_16 = arith.constant 0 : index
      %c0_17 = arith.constant 0 : index
      %21 = vector.load %arg7[%c0_16, %c0_17] : memref<2x256xf32, #tpu.memory_space<vmem>>, vector<2x256xf32>
      tpu.vector_store %arg7[%c0_16, %c0_17], %20 {strides = array<i32>} : memref<2x256xf32, #tpu.memory_space<vmem>>, vector<2x256xf32>,
    } else {
    }
    return
  }
  func.func @transform_0(%arg0: i32, %arg1: i32, %arg2: i32) -> (i32, i32) {
    %c0_i32 = arith.constant 0 : i32
    return %arg0, %arg2 : i32, i32
  }
  func.func @transform_1(%arg0: i32, %arg1: i32, %arg2: i32) -> (i32, i32) {
    %c0_i32 = arith.constant 0 : i32
    return %arg2, %arg1 : i32, i32
  }
  func.func @transform_2(%arg0: i32, %arg1: i32, %arg2: i32) -> (i32, i32) {
    %c0_i32 = arith.constant 0 : i32
    %c0_i32_0 = arith.constant 0 : i32
    return %c0_i32, %arg1 : i32, i32
  }
  func.func @transform_3(%arg0: i32, %arg1: i32, %arg2: i32) -> (i32, i32) {
    %c0_i32 = arith.constant 0 : i32
    %c0_i32_0 = arith.constant 0 : i32
    return %c0_i32, %arg1 : i32, i32
  }
  func.func @transform_4(%arg0: i32, %arg1: i32, %arg2: i32) -> (i32, i32) {
    %c0_i32 = arith.constant 0 : i32
    return %arg0, %arg1 : i32, i32
  }
}

module attributes {stable_mosaic.version = 11 : i64} {
  func.func @_avgpool_kernel(%arg0: i32, %arg1: memref<1x1x512xf32, #tpu.memory_space<vmem>>, %arg2: memref<1x1x512xf32, #tpu.memory_space<vmem>>) attributes {dimension_semantics = [#tpu.dimension_semantics<parallel>], iteration_bounds = array<i64: 2>, scalar_prefetch = 0 : i64, scratch_operands = 0 : i64, tpu.core_type = #tpu.core_type<tc>, window_params = [{transform_indices = @transform_0, window_bounds = array<i64: 1, 1, 512>}, {transform_indices = @transform_1, window_bounds = array<i64: 1, 1, 512>}]} {
    %c0 = arith.constant 0 : index
    %c0_0 = arith.constant 0 : index
    %c0_1 = arith.constant 0 : index
    %0 = vector.load %arg1[%c0, %c0_0, %c0_1] : memref<1x1x512xf32, #tpu.memory_space<vmem>>, vector<1x1x512xf32>
    %cst = arith.constant dense<0.000000e+00> : vector<1x512xf32>
    %1 = vector.multi_reduction <add>, %0, %cst [1] : vector<1x1x512xf32> to vector<1x512xf32>
    %2 = vector.shape_cast %1 : vector<1x512xf32> to vector<1x1x512xf32>
    %cst_2 = arith.constant 1.000000e+00 : f32
    %3 = vector.broadcast %cst_2 : f32 to vector<1x1x512xf32>
    %4 = arith.divf %2, %3 : vector<1x1x512xf32>
    %c0_3 = arith.constant 0 : index
    %c0_4 = arith.constant 0 : index
    %c0_5 = arith.constant 0 : index
    %5 = vector.load %arg2[%c0_3, %c0_4, %c0_5] : memref<1x1x512xf32, #tpu.memory_space<vmem>>, vector<1x1x512xf32>
    tpu.vector_store %arg2[%c0_3, %c0_4, %c0_5], %4 {strides = array<i32>} : memref<1x1x512xf32, #tpu.memory_space<vmem>>, vector<1x1x512xf32>,
    return
  }
  func.func @transform_0(%arg0: i32) -> (i32, i32, i32) {
    %c0_i32 = arith.constant 0 : i32
    %c0_i32_0 = arith.constant 0 : i32
    %c0_i32_1 = arith.constant 0 : i32
    return %arg0, %c0_i32, %c0_i32_0 : i32, i32, i32
  }
  func.func @transform_1(%arg0: i32) -> (i32, i32, i32) {
    %c0_i32 = arith.constant 0 : i32
    %c0_i32_0 = arith.constant 0 : i32
    %c0_i32_1 = arith.constant 0 : i32
    return %arg0, %c0_i32, %c0_i32_0 : i32, i32, i32
  }
}

module attributes {stable_mosaic.version = 11 : i64} {
  func.func @_matmul_fused_kernel(%arg0: i32, %arg1: i32, %arg2: i32, %arg3: memref<2x512xbf16, #tpu.memory_space<vmem>>, %arg4: memref<512x10xbf16, #tpu.memory_space<vmem>>, %arg5: memref<1x10xf32, #tpu.memory_space<vmem>>, %arg6: memref<1x10xf32, #tpu.memory_space<vmem>>, %arg7: memref<2x10xf32, #tpu.memory_space<vmem>>, %arg8: memref<2x10xf32, #tpu.memory_space<vmem>>) attributes {dimension_semantics = [#tpu.dimension_semantics<parallel>, #tpu.dimension_semantics<parallel>, #tpu.dimension_semantics<arbitrary>], iteration_bounds = array<i64: 1, 1, 1>, scalar_prefetch = 0 : i64, scratch_operands = 1 : i64, tpu.core_type = #tpu.core_type<tc>, window_params = [{transform_indices = @transform_0, window_bounds = array<i64: 2, 512>}, {transform_indices = @transform_1, window_bounds = array<i64: 512, 10>}, {transform_indices = @transform_2, window_bounds = array<i64: 1, 10>}, {transform_indices = @transform_3, window_bounds = array<i64: 1, 10>}, {transform_indices = @transform_4, window_bounds = array<i64: 2, 10>}]} {
    %c0_i32 = arith.constant 0 : i32
    %0 = arith.cmpi eq, %arg2, %c0_i32 : i32
    %1 = arith.extui %0 : i1 to i32
    %c0_i32_0 = arith.constant 0 : i32
    %2 = arith.cmpi ne, %1, %c0_i32_0 : i32
    scf.if %2 {
      %cst_10 = arith.constant 0.000000e+00 : f32
      %12 = vector.broadcast %cst_10 : f32 to vector<2x10xf32>
      %c0_11 = arith.constant 0 : index
      %c0_12 = arith.constant 0 : index
      %13 = vector.load %arg8[%c0_11, %c0_12] : memref<2x10xf32, #tpu.memory_space<vmem>>, vector<2x10xf32>
      tpu.vector_store %arg8[%c0_11, %c0_12], %12 {strides = array<i32>} : memref<2x10xf32, #tpu.memory_space<vmem>>, vector<2x10xf32>,
    } else {
    }
    %c0 = arith.constant 0 : index
    %c0_1 = arith.constant 0 : index
    %3 = vector.load %arg8[%c0, %c0_1] : memref<2x10xf32, #tpu.memory_space<vmem>>, vector<2x10xf32>
    %c0_2 = arith.constant 0 : index
    %c0_3 = arith.constant 0 : index
    %4 = vector.load %arg3[%c0_2, %c0_3] : memref<2x512xbf16, #tpu.memory_space<vmem>>, vector<2x512xbf16>
    %c0_4 = arith.constant 0 : index
    %c0_5 = arith.constant 0 : index
    %5 = vector.load %arg4[%c0_4, %c0_5] : memref<512x10xbf16, #tpu.memory_space<vmem>>, vector<512x10xbf16>
    %cst = arith.constant dense<0.000000e+00> : vector<2x10xf32>
    %6 = tpu.matmul %4, %5, %cst {dimension_numbers = #tpu.dot_dimension_numbers<[1], [0], [0], [1], [0, 0, 1, 1], [], []>} : vector<2x512xbf16>, vector<512x10xbf16>, vector<2x10xf32> -> vector<2x10xf32>
    %7 = arith.addf %3, %6 : vector<2x10xf32>
    %c0_6 = arith.constant 0 : index
    %c0_7 = arith.constant 0 : index
    %8 = vector.load %arg8[%c0_6, %c0_7] : memref<2x10xf32, #tpu.memory_space<vmem>>, vector<2x10xf32>
    tpu.vector_store %arg8[%c0_6, %c0_7], %7 {strides = array<i32>} : memref<2x10xf32, #tpu.memory_space<vmem>>, vector<2x10xf32>,
    %c0_i32_8 = arith.constant 0 : i32
    %9 = arith.cmpi eq, %arg2, %c0_i32_8 : i32
    %10 = arith.extui %9 : i1 to i32
    %c0_i32_9 = arith.constant 0 : i32
    %11 = arith.cmpi ne, %10, %c0_i32_9 : i32
    scf.if %11 {
      %c0_10 = arith.constant 0 : index
      %c0_11 = arith.constant 0 : index
      %12 = vector.load %arg8[%c0_10, %c0_11] : memref<2x10xf32, #tpu.memory_space<vmem>>, vector<2x10xf32>
      %c0_12 = arith.constant 0 : index
      %c0_13 = arith.constant 0 : index
      %13 = vector.load %arg5[%c0_12, %c0_13] : memref<1x10xf32, #tpu.memory_space<vmem>>, vector<1x10xf32>
      %14 = vector.broadcast %13 : vector<1x10xf32> to vector<2x10xf32>
      %15 = arith.mulf %12, %14 : vector<2x10xf32>
      %c0_14 = arith.constant 0 : index
      %c0_15 = arith.constant 0 : index
      %16 = vector.load %arg6[%c0_14, %c0_15] : memref<1x10xf32, #tpu.memory_space<vmem>>, vector<1x10xf32>
      %17 = vector.broadcast %16 : vector<1x10xf32> to vector<2x10xf32>
      %18 = arith.addf %15, %17 : vector<2x10xf32>
      %c0_16 = arith.constant 0 : index
      %c0_17 = arith.constant 0 : index
      %19 = vector.load %arg7[%c0_16, %c0_17] : memref<2x10xf32, #tpu.memory_space<vmem>>, vector<2x10xf32>
      tpu.vector_store %arg7[%c0_16, %c0_17], %18 {strides = array<i32>} : memref<2x10xf32, #tpu.memory_space<vmem>>, vector<2x10xf32>,
    } else {
    }
    return
  }
  func.func @transform_0(%arg0: i32, %arg1: i32, %arg2: i32) -> (i32, i32) {
    %c0_i32 = arith.constant 0 : i32
    return %arg0, %arg2 : i32, i32
  }
  func.func @transform_1(%arg0: i32, %arg1: i32, %arg2: i32) -> (i32, i32) {
    %c0_i32 = arith.constant 0 : i32
    return %arg2, %arg1 : i32, i32
  }
  func.func @transform_2(%arg0: i32, %arg1: i32, %arg2: i32) -> (i32, i32) {
    %c0_i32 = arith.constant 0 : i32
    %c0_i32_0 = arith.constant 0 : i32
    return %c0_i32, %arg1 : i32, i32
  }
  func.func @transform_3(%arg0: i32, %arg1: i32, %arg2: i32) -> (i32, i32) {
    %c0_i32 = arith.constant 0 : i32
    %c0_i32_0 = arith.constant 0 : i32
    return %c0_i32, %arg1 : i32, i32
  }
  func.func @transform_4(%arg0: i32, %arg1: i32, %arg2: i32) -> (i32, i32) {
    %c0_i32 = arith.constant 0 : i32
    return %arg0, %arg1 : i32, i32
  }
}

</mosaic_0001>

<bundles_post_ra>
// kernel: resnet18_forward.22
= control target key start
LH: loop header
LB: loop body
LE: loop exit
PB: predicated region body
PF: predicated region fallthrough
CT: control target
= control target key end

     0   :  { %v1617_v0 = vmov 0   ;;  %vm579_vm0 = vcmask 154624   ;;  %vm676_vm1 = vcmask 1040384   ;;  %vm677_vm2 = vcmask 1041408   ;;  %s2479_s1 = inlined_call_operand.vmem [shape: bf16[147,64], index: 1, kind: input, shape index: {}]   ;;  %s2480_s0 = inlined_call_operand.vmem [shape: bf16[512,147], index: 0, kind: input, shape index: {}]   ;;  %s2481_s2 = inlined_call_operand.vmem [shape: f32[1,64], index: 2, kind: input, shape index: {}]   ;;  %s2482_s3 = inlined_call_operand.vmem [shape: f32[1,64], index: 3, kind: input, shape index: {}]   ;;  %s2483_s4 = inlined_call_operand.vmem [shape: f32[512,64], index: 4, kind: output, shape index: {}]  }
   0x1   :  { %683 = vmatprep.subr.bf16.mxu0 %v1617_v0  ;;  %1486 = vmatprep.subr.bf16.mxu1 %v1617_v0  ;;  %v1509_v1 = vld [vmem:[%s2479_s1] sm:$0xff]   ;;  %v1510_v2 = vld [vmem:[%s2479_s1 + $0x8] sm:$0xff]   ;;  %v1511_v3 = vld [vmem:[%s2479_s1 + $0x10] sm:$0xff]   ;;  %v1618_v11 = vmov 65535   ;;  %vm22_vm3 = vcmask 523264   ;;  %v1619_v17 = vmov 0.0  }
   0x2   :  { %684 = vmatpush1.bf16.msra.mxu0 %v1509_v1  ;;  %1496 = vmatpush1.bf16.msra.mxu1 %v1509_v1  ;;  %v1512_v4 = vld [vmem:[%s2479_s1 + $0x18] sm:$0xff]   ;;  %v1521_v5 = vld [vmem:[%s2480_s0 + $0x4] ss:$8 sps:$4 sm:$0xff]   ;;  %v1515_v9 = vld [vmem:[%s2479_s1 + $0x30] sm:$0xff]   ;;  %v678_v12 = vsel %vm676_vm1, 4294967295, %v1618_v11  ;;  %23 = vst.msk [vmem:[#allocation2] sm:$0xff] %vm22_vm3, %v1619_v17 }
   0x3   :  { %685 = vmatprep.subr.bf16.mxu0 %v1617_v0  ;;  %1487 = vmatprep.subr.bf16.mxu1 %v1617_v0  ;;  %v1524_v6 = vld [vmem:[%s2480_s0 + $0x104] ss:$8 sps:$4 sm:$0xff]   ;;  %v1516_v10 = vld [vmem:[%s2479_s1 + $0x38] sm:$0xff]   ;;  %v1518_v14 = vld [vmem:[%s2479_s1 + $0x48] ss:$0 sps:$4 sm:$0x33]  }
   0x4   :  { %1452 = vmatprep.mubr.msk.bf16.mxu0 %vm579_vm0, %v1521_v5  ;;  %v1513_v7 = vld [vmem:[%s2479_s1 + $0x20] sm:$0xff]   ;;  %1468 = vmatprep.mubr.msk.bf16.mxu1 %vm579_vm0, %v1524_v6  ;;  %v1514_v8 = vld [vmem:[%s2479_s1 + $0x28] sm:$0xff]   ;;  %v679_v15 = vsel %vm677_vm2, %v678_v12, 0  ;;  %24 = vst.msk [vmem:[#allocation2 + $0x8] sm:$0xff] %vm22_vm3, %v1619_v17  ;;  %25 = vst.msk [vmem:[#allocation2 + $0x10] sm:$0xff] %vm22_vm3, %v1619_v17 }
   0x5   :  { %v1517_v13 = vld [vmem:[%s2479_s1 + $0x40] sm:$0xff]   ;;  %v1683_v16 = vand.u32 %v1518_v14, %v679_v15  ;;  %26 = vst.msk [vmem:[#allocation2 + $0x18] sm:$0xff] %vm22_vm3, %v1619_v17  ;;  %27 = vst.msk [vmem:[#allocation2 + $0x20] sm:$0xff] %vm22_vm3, %v1619_v17  ;;  %v1525_v20 = vld [vmem:[%s2480_s0 + $0x14] ss:$8 sps:$4 sm:$0xff]  }
   0x6   :  { %686 = vmatpush1.bf16.msra.mxu0 %v1510_v2  ;;  %1497 = vmatpush1.bf16.msra.mxu1 %v1510_v2  ;;  %28 = vst.msk [vmem:[#allocation2 + $0x28] sm:$0xff] %vm22_vm3, %v1619_v17  ;;  %29 = vst.msk [vmem:[#allocation2 + $0x30] sm:$0xff] %vm22_vm3, %v1619_v17  ;;  %v1519_v18 = vld [vmem:[%s2480_s0] ss:$8 sps:$4 sm:$0xff]   ;;  %v1527_v21 = vld [vmem:[%s2480_s0 + $0x114] ss:$8 sps:$4 sm:$0xff]  }
   0x7   :  { %687 = vmatprep.subr.bf16.mxu0 %v1617_v0  ;;  %1488 = vmatprep.subr.bf16.mxu1 %v1617_v0  ;;  %30 = vst.msk [vmem:[#allocation2 + $0x38] sm:$0xff] %vm22_vm3, %v1619_v17  ;;  %31 = vst.msk [vmem:[#allocation2 + $0x40] sm:$0xff] %vm22_vm3, %v1619_v17  ;;  %v1522_v19 = vld [vmem:[%s2480_s0 + $0x100] ss:$8 sps:$4 sm:$0xff]   ;;  %v1529_v22 = vld [vmem:[%s2480_s0 + $0x10] ss:$8 sps:$4 sm:$0xff]  }
   0x8   :  { %32 = vst.msk [vmem:[#allocation2 + $0x48] sm:$0xff] %vm22_vm3, %v1619_v17  ;;  %33 = vst.msk [vmem:[#allocation2 + $0x50] sm:$0xff] %vm22_vm3, %v1619_v17  ;;  %v1530_v23 = vld [vmem:[%s2480_s0 + $0x110] ss:$8 sps:$4 sm:$0xff]   ;;  %v1531_v24 = vld [vmem:[%s2480_s0 + $0x24] ss:$8 sps:$4 sm:$0xff]  }
   0x9   :  { %34 = vst.msk [vmem:[#allocation2 + $0x58] sm:$0xff] %vm22_vm3, %v1619_v17  ;;  %35 = vst.msk [vmem:[#allocation2 + $0x60] sm:$0xff] %vm22_vm3, %v1619_v17  ;;  %v1533_v25 = vld [vmem:[%s2480_s0 + $0x124] ss:$8 sps:$4 sm:$0xff]   ;;  %v1535_v26 = vld [vmem:[%s2480_s0 + $0x20] ss:$8 sps:$4 sm:$0xff]  }
   0xa   :  { %688 = vmatpush1.bf16.msra.mxu0 %v1511_v3  ;;  %1498 = vmatpush1.bf16.msra.mxu1 %v1511_v3  ;;  %36 = vst.msk [vmem:[#allocation2 + $0x68] sm:$0xff] %vm22_vm3, %v1619_v17  ;;  %37 = vst.msk [vmem:[#allocation2 + $0x70] sm:$0xff] %vm22_vm3, %v1619_v17  ;;  %v1536_v27 = vld [vmem:[%s2480_s0 + $0x120] ss:$8 sps:$4 sm:$0xff]   ;;  %v1537_v28 = vld [vmem:[%s2480_s0 + $0x34] ss:$8 sps:$4 sm:$0xff]  }
   0xb   :  { %689 = vmatprep.subr.bf16.mxu0 %v1617_v0  ;;  %1489 = vmatprep.subr.bf16.mxu1 %v1617_v0  ;;  %38 = vst.msk [vmem:[#allocation2 + $0x78] sm:$0xff] %vm22_vm3, %v1619_v17  ;;  %39 = vst.msk [vmem:[#allocation2 + $0x80] sm:$0xff] %vm22_vm3, %v1619_v17  ;;  %v1539_v29 = vld [vmem:[%s2480_s0 + $0x134] ss:$8 sps:$4 sm:$0xff]   ;;  %v1541_v30 = vld [vmem:[%s2480_s0 + $0x30] ss:$8 sps:$4 sm:$0xff]  }
   0xc   :  { %40 = vst.msk [vmem:[#allocation2 + $0x88] sm:$0xff] %vm22_vm3, %v1619_v17  ;;  %41 = vst.msk [vmem:[#allocation2 + $0x90] sm:$0xff] %vm22_vm3, %v1619_v17  ;;  %v1542_v31 = vld [vmem:[%s2480_s0 + $0x130] ss:$8 sps:$4 sm:$0xff]   ;;  %v1543_v32 = vld [vmem:[%s2480_s0 + $0x44] ss:$8 sps:$4 sm:$0xff]  }
   0xd   :  { %42 = vst.msk [vmem:[#allocation2 + $0x98] sm:$0xff] %vm22_vm3, %v1619_v17  ;;  %43 = vst.msk [vmem:[#allocation2 + $0xa0] sm:$0xff] %vm22_vm3, %v1619_v17  ;;  %v1545_v33 = vld [vmem:[%s2480_s0 + $0x144] ss:$8 sps:$4 sm:$0xff]   ;;  %v1547_v34 = vld [vmem:[%s2480_s0 + $0x40] ss:$8 sps:$4 sm:$0xff]  }
   0xe   :  { %690 = vmatpush1.bf16.msra.mxu0 %v1512_v4  ;;  %1499 = vmatpush1.bf16.msra.mxu1 %v1512_v4  ;;  %44 = vst.msk [vmem:[#allocation2 + $0xa8] sm:$0xff] %vm22_vm3, %v1619_v17  ;;  %45 = vst.msk [vmem:[#allocation2 + $0xb0] sm:$0xff] %vm22_vm3, %v1619_v17  ;;  %v1548_v35 = vld [vmem:[%s2480_s0 + $0x140] ss:$8 sps:$4 sm:$0xff]   ;;  %v1549_v36 = vld [vmem:[%s2480_s0 + $0x54] ss:$8 sps:$4 sm:$0xff]  }
   0xf   :  { %691 = vmatprep.subr.bf16.mxu0 %v1617_v0  ;;  %1490 = vmatprep.subr.bf16.mxu1 %v1617_v0  ;;  %46 = vst.msk [vmem:[#allocation2 + $0xb8] sm:$0xff] %vm22_vm3, %v1619_v17  ;;  %47 = vst.msk [vmem:[#allocation2 + $0xc0] sm:$0xff] %vm22_vm3, %v1619_v17  ;;  %v1551_v37 = vld [vmem:[%s2480_s0 + $0x154] ss:$8 sps:$4 sm:$0xff]   ;;  %v1553_v38 = vld [vmem:[%s2480_s0 + $0x50] ss:$8 sps:$4 sm:$0xff]  }
  0x10   :  { %48 = vst.msk [vmem:[#allocation2 + $0xc8] sm:$0xff] %vm22_vm3, %v1619_v17  ;;  %49 = vst.msk [vmem:[#allocation2 + $0xd0] sm:$0xff] %vm22_vm3, %v1619_v17  ;;  %v1554_v39 = vld [vmem:[%s2480_s0 + $0x150] ss:$8 sps:$4 sm:$0xff]   ;;  %v1555_v40 = vld [vmem:[%s2480_s0 + $0x64] ss:$8 sps:$4 sm:$0xff]  }
  0x11   :  { %50 = vst.msk [vmem:[#allocation2 + $0xd8] sm:$0xff] %vm22_vm3, %v1619_v17  ;;  %51 = vst.msk [vmem:[#allocation2 + $0xe0] sm:$0xff] %vm22_vm3, %v1619_v17  ;;  %v1557_v41 = vld [vmem:[%s2480_s0 + $0x164] ss:$8 sps:$4 sm:$0xff]   ;;  %v1559_v42 = vld [vmem:[%s2480_s0 + $0x60] ss:$8 sps:$4 sm:$0xff]  }
  0x12   :  { %692 = vmatpush1.bf16.msra.mxu0 %v1513_v7  ;;  %1500 = vmatpush1.bf16.msra.mxu1 %v1513_v7  ;;  %52 = vst.msk [vmem:[#allocation2 + $0xe8] sm:$0xff] %vm22_vm3, %v1619_v17  ;;  %53 = vst.msk [vmem:[#allocation2 + $0xf0] sm:$0xff] %vm22_vm3, %v1619_v17  ;;  %v1560_v43 = vld [vmem:[%s2480_s0 + $0x160] ss:$8 sps:$4 sm:$0xff]   ;;  %v1561_v44 = vld [vmem:[%s2480_s0 + $0x74] ss:$8 sps:$4 sm:$0xff]  }
  0x13   :  { %693 = vmatprep.subr.bf16.mxu0 %v1617_v0  ;;  %1491 = vmatprep.subr.bf16.mxu1 %v1617_v0  ;;  %54 = vst.msk [vmem:[#allocation2 + $0xf8] sm:$0xff] %vm22_vm3, %v1619_v17  ;;  %55 = vst.msk [vmem:[#allocation2 + $0x100] sm:$0xff] %vm22_vm3, %v1619_v17  ;;  %v1563_v45 = vld [vmem:[%s2480_s0 + $0x174] ss:$8 sps:$4 sm:$0xff]   ;;  %v1565_v46 = vld [vmem:[%s2480_s0 + $0x70] ss:$8 sps:$4 sm:$0xff]  }
  0x14   :  { %56 = vst.msk [vmem:[#allocation2 + $0x108] sm:$0xff] %vm22_vm3, %v1619_v17  ;;  %57 = vst.msk [vmem:[#allocation2 + $0x110] sm:$0xff] %vm22_vm3, %v1619_v17  ;;  %v1566_v47 = vld [vmem:[%s2480_s0 + $0x170] ss:$8 sps:$4 sm:$0xff]   ;;  %v1567_v48 = vld [vmem:[%s2480_s0 + $0x84] ss:$8 sps:$4 sm:$0xff]  }
  0x15   :  { %58 = vst.msk [vmem:[#allocation2 + $0x118] sm:$0xff] %vm22_vm3, %v1619_v17  ;;  %59 = vst.msk [vmem:[#allocation2 + $0x120] sm:$0xff] %vm22_vm3, %v1619_v17  ;;  %v1569_v49 = vld [vmem:[%s2480_s0 + $0x184] ss:$8 sps:$4 sm:$0xff]   ;;  %v1571_v50 = vld [vmem:[%s2480_s0 + $0x80] ss:$8 sps:$4 sm:$0xff]  }
  0x16   :  { %694 = vmatpush1.bf16.msra.mxu0 %v1514_v8  ;;  %1501 = vmatpush1.bf16.msra.mxu1 %v1514_v8  ;;  %60 = vst.msk [vmem:[#allocation2 + $0x128] sm:$0xff] %vm22_vm3, %v1619_v17  ;;  %61 = vst.msk [vmem:[#allocation2 + $0x130] sm:$0xff] %vm22_vm3, %v1619_v17  ;;  %v1572_v51 = vld [vmem:[%s2480_s0 + $0x180] ss:$8 sps:$4 sm:$0xff]   ;;  %v1573_v52 = vld [vmem:[%s2480_s0 + $0x94] ss:$8 sps:$4 sm:$0xff]  }
  0x17   :  { %695 = vmatprep.subr.bf16.mxu0 %v1617_v0  ;;  %1492 = vmatprep.subr.bf16.mxu1 %v1617_v0  ;;  %62 = vst.msk [vmem:[#allocation2 + $0x138] sm:$0xff] %vm22_vm3, %v1619_v17  ;;  %63 = vst.msk [vmem:[#allocation2 + $0x140] sm:$0xff] %vm22_vm3, %v1619_v17  ;;  %v1575_v53 = vld [vmem:[%s2480_s0 + $0x194] ss:$8 sps:$4 sm:$0xff]   ;;  %v1577_v54 = vld [vmem:[%s2480_s0 + $0x90] ss:$8 sps:$4 sm:$0xff]  }
  0x18   :  { %64 = vst.msk [vmem:[#allocation2 + $0x148] sm:$0xff] %vm22_vm3, %v1619_v17  ;;  %65 = vst.msk [vmem:[#allocation2 + $0x150] sm:$0xff] %vm22_vm3, %v1619_v17  ;;  %v1578_v55 = vld [vmem:[%s2480_s0 + $0x190] ss:$8 sps:$4 sm:$0xff]   ;;  %v1579_v56 = vld [vmem:[%s2480_s0 + $0xa4] ss:$8 sps:$4 sm:$0xff]  }
  0x19   :  { %66 = vst.msk [vmem:[#allocation2 + $0x158] sm:$0xff] %vm22_vm3, %v1619_v17  ;;  %67 = vst.msk [vmem:[#allocation2 + $0x160] sm:$0xff] %vm22_vm3, %v1619_v17  ;;  %v1581_v57 = vld [vmem:[%s2480_s0 + $0x1a4] ss:$8 sps:$4 sm:$0xff]   ;;  %v1583_v58 = vld [vmem:[%s2480_s0 + $0xa0] ss:$8 sps:$4 sm:$0xff]  }
  0x1a   :  { %696 = vmatpush1.bf16.msra.mxu0 %v1515_v9  ;;  %1502 = vmatpush1.bf16.msra.mxu1 %v1515_v9  ;;  %68 = vst.msk [vmem:[#allocation2 + $0x168] sm:$0xff] %vm22_vm3, %v1619_v17  ;;  %69 = vst.msk [vmem:[#allocation2 + $0x170] sm:$0xff] %vm22_vm3, %v1619_v17  ;;  %v1584_v59 = vld [vmem:[%s2480_s0 + $0x1a0] ss:$8 sps:$4 sm:$0xff]   ;;  %v1585_v60 = vld [vmem:[%s2480_s0 + $0xb4] ss:$8 sps:$4 sm:$0xff]  }
  0x1b   :  { %697 = vmatprep.subr.bf16.mxu0 %v1617_v0  ;;  %1493 = vmatprep.subr.bf16.mxu1 %v1617_v0  ;;  %70 = vst.msk [vmem:[#allocation2 + $0x178] sm:$0xff] %vm22_vm3, %v1619_v17  ;;  %71 = vst.msk [vmem:[#allocation2 + $0x180] sm:$0xff] %vm22_vm3, %v1619_v17  ;;  %v1587_v61 = vld [vmem:[%s2480_s0 + $0x1b4] ss:$8 sps:$4 sm:$0xff]   ;;  %v1589_v62 = vld [vmem:[%s2480_s0 + $0xb0] ss:$8 sps:$4 sm:$0xff]  }
  0x1c   :  { %72 = vst.msk [vmem:[#allocation2 + $0x188] sm:$0xff] %vm22_vm3, %v1619_v17  ;;  %73 = vst.msk [vmem:[#allocation2 + $0x190] sm:$0xff] %vm22_vm3, %v1619_v17  ;;  %v1590_v63 = vld [vmem:[%s2480_s0 + $0x1b0] ss:$8 sps:$4 sm:$0xff]   ;;  %v1593_v1 = vld [vmem:[%s2480_s0 + $0x1c4] ss:$8 sps:$4 sm:$0xff]  }
  0x1d   :  { %74 = vst.msk [vmem:[#allocation2 + $0x198] sm:$0xff] %vm22_vm3, %v1619_v17  ;;  %75 = vst.msk [vmem:[#allocation2 + $0x1a0] sm:$0xff] %vm22_vm3, %v1619_v17  ;;  %v1595_v2 = vld [vmem:[%s2480_s0 + $0xc0] ss:$8 sps:$4 sm:$0xff]   ;;  %v1597_v4 = vld [vmem:[%s2480_s0 + $0xd4] ss:$8 sps:$4 sm:$0xff]  }
  0x1e   :  { %698 = vmatpush1.bf16.msra.mxu0 %v1516_v10  ;;  %1503 = vmatpush1.bf16.msra.mxu1 %v1516_v10  ;;  %76 = vst.msk [vmem:[#allocation2 + $0x1a8] sm:$0xff] %vm22_vm3, %v1619_v17  ;;  %77 = vst.msk [vmem:[#allocation2 + $0x1b0] sm:$0xff] %vm22_vm3, %v1619_v17  ;;  %v1596_v3 = vld [vmem:[%s2480_s0 + $0x1c0] ss:$8 sps:$4 sm:$0xff]   ;;  %v1599_v5 = vld [vmem:[%s2480_s0 + $0x1d4] ss:$8 sps:$4 sm:$0xff]  }
  0x1f   :  { %699 = vmatprep.subr.bf16.mxu0 %v1617_v0  ;;  %1494 = vmatprep.subr.bf16.mxu1 %v1617_v0  ;;  %78 = vst.msk [vmem:[#allocation2 + $0x1b8] sm:$0xff] %vm22_vm3, %v1619_v17  ;;  %79 = vst.msk [vmem:[#allocation2 + $0x1c0] sm:$0xff] %vm22_vm3, %v1619_v17  ;;  %v1601_v6 = vld [vmem:[%s2480_s0 + $0xd0] ss:$8 sps:$4 sm:$0xff]   ;;  %v1603_v8 = vld [vmem:[%s2480_s0 + $0xe4] ss:$8 sps:$4 sm:$0xff]  }
  0x20   :  { %80 = vst.msk [vmem:[#allocation2 + $0x1c8] sm:$0xff] %vm22_vm3, %v1619_v17  ;;  %81 = vst.msk [vmem:[#allocation2 + $0x1d0] sm:$0xff] %vm22_vm3, %v1619_v17  ;;  %v1602_v7 = vld [vmem:[%s2480_s0 + $0x1d0] ss:$8 sps:$4 sm:$0xff]   ;;  %v1605_v9 = vld [vmem:[%s2480_s0 + $0x1e4] ss:$8 sps:$4 sm:$0xff]  }
  0x21   :  { %82 = vst.msk [vmem:[#allocation2 + $0x1d8] sm:$0xff] %vm22_vm3, %v1619_v17  ;;  %83 = vst.msk [vmem:[#allocation2 + $0x1e0] sm:$0xff] %vm22_vm3, %v1619_v17  ;;  %v1607_v10 = vld [vmem:[%s2480_s0 + $0xe0] ss:$8 sps:$4 sm:$0xff]   ;;  %v1609_v12 = vld [vmem:[%s2480_s0 + $0xf4] ss:$8 sps:$4 sm:$0xff]  }
  0x22   :  { %700 = vmatpush1.bf16.msra.mxu0 %v1517_v13  ;;  %1504 = vmatpush1.bf16.msra.mxu1 %v1517_v13  ;;  %84 = vst.msk [vmem:[#allocation2 + $0x1e8] sm:$0xff] %vm22_vm3, %v1619_v17  ;;  %85 = vst.msk [vmem:[#allocation2 + $0x1f0] sm:$0xff] %vm22_vm3, %v1619_v17  ;;  %v1608_v11 = vld [vmem:[%s2480_s0 + $0x1e0] ss:$8 sps:$4 sm:$0xff]   ;;  %v1611_v13 = vld [vmem:[%s2480_s0 + $0x1f4] ss:$8 sps:$4 sm:$0xff]  }
  0x23   :  { %701 = vmatprep.subr.bf16.mxu0 %v1617_v0  ;;  %1495 = vmatprep.subr.bf16.mxu1 %v1617_v0  ;;  %86 = vst.msk [vmem:[#allocation2 + $0x1f8] sm:$0xff] %vm22_vm3, %v1619_v17  ;;  %v1591_v0 = vld [vmem:[%s2480_s0 + $0xc4] ss:$8 sps:$4 sm:$0xff]   ;;  %v1613_v14 = vld [vmem:[%s2480_s0 + $0xf0] ss:$8 sps:$4 sm:$0xff]  }
  0x24   :  { %v1614_v15 = vld [vmem:[%s2480_s0 + $0x1f0] ss:$8 sps:$4 sm:$0xff]   ;;  %v119_v17 = vld [vmem:[#allocation2 + $0x100] sm:$0xff] }
  0x26   :  { %702 = vmatpush1.bf16.msra.mxu0 %v1683_v16  ;;  %1505 = vmatpush1.bf16.msra.mxu1 %v1683_v16  ;;  %v87_v16 = vld [vmem:[#allocation2] sm:$0xff] }
  0x29   :  { %716 = vmatmul.mubr.bf16.vlgmr.msra.gmra.mrb[0].mxu0 %v1519_v18  ;;  %844 = vmatmul.mubr.bf16.vlgmr.msra.gmra.mrb[0].mxu1 %v1522_v19 }
  0x2a   :  { %1453 = vmatprep.mubr.msk.bf16.mxu0 %vm579_vm0, %v1525_v20  ;;  %1469 = vmatprep.mubr.msk.bf16.mxu1 %vm579_vm0, %v1527_v21  ;;  %v88_v20 = vld [vmem:[#allocation2 + $0x8] sm:$0xff] }
  0x2b   :  { %v120_v21 = vld [vmem:[#allocation2 + $0x108] sm:$0xff] }
  0x31   :  { %724 = vmatmul.mubr.bf16.gmra.mrb[4].mxu0 %v1529_v22  ;;  %852 = vmatmul.mubr.bf16.gmra.mrb[4].mxu1 %v1530_v23 }
  0x32   :  { %1454 = vmatprep.mubr.msk.bf16.mxu0 %vm579_vm0, %v1531_v24  ;;  %1470 = vmatprep.mubr.msk.bf16.mxu1 %vm579_vm0, %v1533_v25 }
  0x39   :  { %732 = vmatmul.mubr.bf16.gmra.mrb[8].mxu0 %v1535_v26  ;;  %860 = vmatmul.mubr.bf16.gmra.mrb[8].mxu1 %v1536_v27 }
  0x3a   :  { %1455 = vmatprep.mubr.msk.bf16.mxu0 %vm579_vm0, %v1537_v28  ;;  %1471 = vmatprep.mubr.msk.bf16.mxu1 %vm579_vm0, %v1539_v29 }
  0x41   :  { %740 = vmatmul.mubr.bf16.gmra.mrb[12].mxu0 %v1541_v30  ;;  %868 = vmatmul.mubr.bf16.gmra.mrb[12].mxu1 %v1542_v31 }
  0x42   :  { %1456 = vmatprep.mubr.msk.bf16.mxu0 %vm579_vm0, %v1543_v32  ;;  %1472 = vmatprep.mubr.msk.bf16.mxu1 %vm579_vm0, %v1545_v33  ;;  %v89_v32 = vld [vmem:[#allocation2 + $0x10] sm:$0xff] }
  0x43   :  { %v121_v33 = vld [vmem:[#allocation2 + $0x110] sm:$0xff] }
  0x49   :  { %748 = vmatmul.mubr.bf16.gmra.mrb[16].mxu0 %v1547_v34  ;;  %876 = vmatmul.mubr.bf16.gmra.mrb[16].mxu1 %v1548_v35  ;;  %v2038_v34 = vld [vmem:[%s2481_s2] ss:$0 sm:$0xff] }
  0x4a   :  { %1457 = vmatprep.mubr.msk.bf16.mxu0 %vm579_vm0, %v1549_v36  ;;  %1473 = vmatprep.mubr.msk.bf16.mxu1 %vm579_vm0, %v1551_v37  ;;  %v90_v37 = vld [vmem:[#allocation2 + $0x18] sm:$0xff] }
  0x51   :  { %756 = vmatmul.mubr.bf16.gmra.mrb[20].mxu0 %v1553_v38  ;;  %884 = vmatmul.mubr.bf16.gmra.mrb[20].mxu1 %v1554_v39  ;;  %v122_v38 = vld [vmem:[#allocation2 + $0x118] sm:$0xff] }
  0x52   :  { %1458 = vmatprep.mubr.msk.bf16.mxu0 %vm579_vm0, %v1555_v40  ;;  %1474 = vmatprep.mubr.msk.bf16.mxu1 %vm579_vm0, %v1557_v41 }
  0x59   :  { %764 = vmatmul.mubr.bf16.gmra.mrb[24].mxu0 %v1559_v42  ;;  %892 = vmatmul.mubr.bf16.gmra.mrb[24].mxu1 %v1560_v43 }
  0x5a   :  { %1459 = vmatprep.mubr.msk.bf16.mxu0 %vm579_vm0, %v1561_v44  ;;  %1475 = vmatprep.mubr.msk.bf16.mxu1 %vm579_vm0, %v1563_v45  ;;  %v2043_v44 = vld [vmem:[%s2482_s3] ss:$0 sm:$0xff] }
  0x61   :  { %772 = vmatmul.mubr.bf16.gmra.mrb[28].mxu0 %v1565_v46  ;;  %900 = vmatmul.mubr.bf16.gmra.mrb[28].mxu1 %v1566_v47 }
  0x62   :  { %1460 = vmatprep.mubr.msk.bf16.mxu0 %vm579_vm0, %v1567_v48  ;;  %1476 = vmatprep.mubr.msk.bf16.mxu1 %vm579_vm0, %v1569_v49 }
  0x69   :  { %780 = vmatmul.mubr.bf16.gmra.mrb[32].mxu0 %v1571_v50  ;;  %908 = vmatmul.mubr.bf16.gmra.mrb[32].mxu1 %v1572_v51 }
  0x6a   :  { %1461 = vmatprep.mubr.msk.bf16.mxu0 %vm579_vm0, %v1573_v52  ;;  %1477 = vmatprep.mubr.msk.bf16.mxu1 %vm579_vm0, %v1575_v53 }
  0x71   :  { %788 = vmatmul.mubr.bf16.gmra.mrb[36].mxu0 %v1577_v54  ;;  %916 = vmatmul.mubr.bf16.gmra.mrb[36].mxu1 %v1578_v55 }
  0x72   :  { %1462 = vmatprep.mubr.msk.bf16.mxu0 %vm579_vm0, %v1579_v56  ;;  %1478 = vmatprep.mubr.msk.bf16.mxu1 %vm579_vm0, %v1581_v57 }
  0x79   :  { %796 = vmatmul.mubr.bf16.gmra.mrb[40].mxu0 %v1583_v58  ;;  %924 = vmatmul.mubr.bf16.gmra.mrb[40].mxu1 %v1584_v59 }
  0x7a   :  { %1463 = vmatprep.mubr.msk.bf16.mxu0 %vm579_vm0, %v1585_v60  ;;  %1479 = vmatprep.mubr.msk.bf16.mxu1 %vm579_vm0, %v1587_v61  ;;  %v91_v60 = vld [vmem:[#allocation2 + $0x20] sm:$0xff] }
  0x7b   :  { %v123_v61 = vld [vmem:[#allocation2 + $0x120] sm:$0xff] }
  0x81   :  { %804 = vmatmul.mubr.bf16.gmra.mrb[44].mxu0 %v1589_v62  ;;  %932 = vmatmul.mubr.bf16.gmra.mrb[44].mxu1 %v1590_v63 }
  0x82   :  { %1464 = vmatprep.mubr.msk.bf16.mxu0 %vm579_vm0, %v1591_v0  ;;  %1480 = vmatprep.mubr.msk.bf16.mxu1 %vm579_vm0, %v1593_v1 }
  0x89   :  { %812 = vmatmul.mubr.bf16.gmra.mrb[48].mxu0 %v1595_v2  ;;  %940 = vmatmul.mubr.bf16.gmra.mrb[48].mxu1 %v1596_v3  ;;  %v92_v2 = vld [vmem:[#allocation2 + $0x28] sm:$0xff] }
  0x8a   :  { %1465 = vmatprep.mubr.msk.bf16.mxu0 %vm579_vm0, %v1597_v4  ;;  %1481 = vmatprep.mubr.msk.bf16.mxu1 %vm579_vm0, %v1599_v5  ;;  %v124_v3 = vld [vmem:[#allocation2 + $0x128] sm:$0xff] }
  0x91   :  { %820 = vmatmul.mubr.bf16.gmra.mrb[52].mxu0 %v1601_v6  ;;  %948 = vmatmul.mubr.bf16.gmra.mrb[52].mxu1 %v1602_v7 }
  0x92   :  { %1466 = vmatprep.mubr.msk.bf16.mxu0 %vm579_vm0, %v1603_v8  ;;  %1482 = vmatprep.mubr.msk.bf16.mxu1 %vm579_vm0, %v1605_v9 }
  0x99   :  { %828 = vmatmul.mubr.bf16.gmra.mrb[56].mxu0 %v1607_v10  ;;  %956 = vmatmul.mubr.bf16.gmra.mrb[56].mxu1 %v1608_v11 }
  0x9a   :  { %1467 = vmatprep.mubr.msk.bf16.mxu0 %vm579_vm0, %v1609_v12  ;;  %1483 = vmatprep.mubr.msk.bf16.mxu1 %vm579_vm0, %v1611_v13 }
  0xa1   :  { %836 = vmatmul.mubr.bf16.gmra.mrb[60].mxu0 %v1613_v14  ;;  %964 = vmatmul.mubr.bf16.gmra.mrb[60].mxu1 %v1614_v15 }
  0xfc   :  { %v717_v18 = vpop.f32.mrb[0].mxu0  ;;  %v845_v19 = vpop.f32.mrb[0].mxu1 }
  0xfd   :  { %v972_v22 = vadd.f32 %v717_v18, %v87_v16  ;;  %v1004_v23 = vadd.f32 %v845_v19, %v119_v17  ;;  %v719_v24 = vpop.f32.mrb[1].mxu0  ;;  %v847_v25 = vpop.f32.mrb[1].mxu1 }
  0xfe   :  { %v720_v26 = vpop.f32.mrb[2].mxu0  ;;  %v848_v27 = vpop.f32.mrb[2].mxu1  ;;  %v93_v24 = vld [vmem:[#allocation2 + $0x30] sm:$0xff] }
  0xff   :  { %1037 = vst.msk [vmem:[#allocation2] sm:$0xff] %vm22_vm3, %v972_v22  ;;  %1069 = vst.msk [vmem:[#allocation2 + $0x100] sm:$0xff] %vm22_vm3, %v1004_v23  ;;  %v973_v28 = vadd.f32 %v720_v26, %v88_v20  ;;  %v1005_v29 = vadd.f32 %v848_v27, %v120_v21  ;;  %v722_v30 = vpop.f32.mrb[3].mxu0  ;;  %v850_v31 = vpop.f32.mrb[3].mxu1  ;;  %v125_v25 = vld [vmem:[#allocation2 + $0x130] sm:$0xff] }
 0x100   :  { %v94_v30 = vld [vmem:[#allocation2 + $0x38] sm:$0xff] }
 0x101   :  { %1038 = vst.msk [vmem:[#allocation2 + $0x8] sm:$0xff] %vm22_vm3, %v973_v28  ;;  %1070 = vst.msk [vmem:[#allocation2 + $0x108] sm:$0xff] %vm22_vm3, %v1005_v29  ;;  %v126_v31 = vld [vmem:[#allocation2 + $0x138] sm:$0xff] }
 0x104   :  { %v725_v35 = vpop.f32.mrb[4].mxu0  ;;  %v853_v36 = vpop.f32.mrb[4].mxu1 }
 0x105   :  { %v974_v39 = vadd.f32 %v725_v35, %v89_v32  ;;  %v1006_v40 = vadd.f32 %v853_v36, %v121_v33  ;;  %v727_v41 = vpop.f32.mrb[5].mxu0  ;;  %v855_v42 = vpop.f32.mrb[5].mxu1 }
 0x106   :  { %v1104_v43 = vld [vmem:[#allocation2] sm:$0xff]  ;;  %v728_v46 = vpop.f32.mrb[6].mxu0  ;;  %v856_v47 = vpop.f32.mrb[6].mxu1 }
 0x107   :  { %v1136_v45 = vld [vmem:[#allocation2 + $0x100] sm:$0xff]  ;;  %v1175_v48 = vmul.f32 %v2038_v34, %v1104_v43  ;;  %1039 = vst.msk [vmem:[#allocation2 + $0x10] sm:$0xff] %vm22_vm3, %v974_v39  ;;  %1071 = vst.msk [vmem:[#allocation2 + $0x110] sm:$0xff] %vm22_vm3, %v1006_v40  ;;  %v975_v50 = vadd.f32 %v728_v46, %v90_v37  ;;  %v1007_v51 = vadd.f32 %v856_v47, %v122_v38  ;;  %v730_v52 = vpop.f32.mrb[7].mxu0  ;;  %v858_v53 = vpop.f32.mrb[7].mxu1 }
 0x108   :  { %v1207_v49 = vmul.f32 %v2038_v34, %v1136_v45  ;;  %v1105_v54 = vld [vmem:[#allocation2 + $0x8] sm:$0xff] }
 0x109   :  { %v1137_v55 = vld [vmem:[#allocation2 + $0x108] sm:$0xff]  ;;  %v1246_v56 = vadd.f32 %v2043_v44, %v1175_v48  ;;  %v1176_v58 = vmul.f32 %v2038_v34, %v1105_v54  ;;  %1040 = vst.msk [vmem:[#allocation2 + $0x18] sm:$0xff] %vm22_vm3, %v975_v50  ;;  %1072 = vst.msk [vmem:[#allocation2 + $0x118] sm:$0xff] %vm22_vm3, %v1007_v51  ;;  %v95_v54 = vld [vmem:[#allocation2 + $0x40] sm:$0xff] }
 0x10a   :  { %v1278_v57 = vadd.f32 %v2043_v44, %v1207_v49  ;;  %v1208_v59 = vmul.f32 %v2038_v34, %v1137_v55  ;;  %v127_v55 = vld [vmem:[#allocation2 + $0x140] sm:$0xff] }
 0x10b   :  { %1310 = vst.msk [vmem:[%s2483_s4] sm:$0xff] %vm22_vm3, %v1246_v56  ;;  %v1247_v62 = vadd.f32 %v2043_v44, %v1176_v58 }
 0x10c   :  { %1342 = vst.msk [vmem:[%s2483_s4 + $0x100] sm:$0xff] %vm22_vm3, %v1278_v57  ;;  %v1279_v63 = vadd.f32 %v2043_v44, %v1208_v59  ;;  %v733_v0 = vpop.f32.mrb[8].mxu0  ;;  %v861_v1 = vpop.f32.mrb[8].mxu1 }
 0x10d   :  { %1311 = vst.msk [vmem:[%s2483_s4 + $0x8] sm:$0xff] %vm22_vm3, %v1247_v62  ;;  %v976_v4 = vadd.f32 %v733_v0, %v91_v60  ;;  %v1008_v5 = vadd.f32 %v861_v1, %v123_v61  ;;  %v735_v6 = vpop.f32.mrb[9].mxu0  ;;  %v863_v7 = vpop.f32.mrb[9].mxu1  ;;  %v96_v60 = vld [vmem:[#allocation2 + $0x48] sm:$0xff] }
 0x10e   :  { %1343 = vst.msk [vmem:[%s2483_s4 + $0x108] sm:$0xff] %vm22_vm3, %v1279_v63  ;;  %v1106_v8 = vld [vmem:[#allocation2 + $0x10] sm:$0xff]  ;;  %v736_v10 = vpop.f32.mrb[10].mxu0  ;;  %v864_v11 = vpop.f32.mrb[10].mxu1  ;;  %v128_v61 = vld [vmem:[#allocation2 + $0x148] sm:$0xff] }
 0x10f   :  { %v1138_v9 = vld [vmem:[#allocation2 + $0x110] sm:$0xff]  ;;  %v1177_v12 = vmul.f32 %v2038_v34, %v1106_v8  ;;  %1041 = vst.msk [vmem:[#allocation2 + $0x20] sm:$0xff] %vm22_vm3, %v976_v4  ;;  %1073 = vst.msk [vmem:[#allocation2 + $0x120] sm:$0xff] %vm22_vm3, %v1008_v5  ;;  %v977_v14 = vadd.f32 %v736_v10, %v92_v2  ;;  %v1009_v15 = vadd.f32 %v864_v11, %v124_v3  ;;  %v738_v16 = vpop.f32.mrb[11].mxu0  ;;  %v866_v17 = vpop.f32.mrb[11].mxu1 }
 0x110   :  { %v1209_v13 = vmul.f32 %v2038_v34, %v1138_v9  ;;  %v1107_v18 = vld [vmem:[#allocation2 + $0x18] sm:$0xff] }
 0x111   :  { %v1139_v19 = vld [vmem:[#allocation2 + $0x118] sm:$0xff]  ;;  %v1248_v20 = vadd.f32 %v2043_v44, %v1177_v12  ;;  %v1178_v22 = vmul.f32 %v2038_v34, %v1107_v18  ;;  %1042 = vst.msk [vmem:[#allocation2 + $0x28] sm:$0xff] %vm22_vm3, %v977_v14  ;;  %1074 = vst.msk [vmem:[#allocation2 + $0x128] sm:$0xff] %vm22_vm3, %v1009_v15  ;;  %v97_v18 = vld [vmem:[#allocation2 + $0x50] sm:$0xff] }
 0x112   :  { %v1280_v21 = vadd.f32 %v2043_v44, %v1209_v13  ;;  %v1210_v23 = vmul.f32 %v2038_v34, %v1139_v19  ;;  %v129_v19 = vld [vmem:[#allocation2 + $0x150] sm:$0xff] }
 0x113   :  { %1312 = vst.msk [vmem:[%s2483_s4 + $0x10] sm:$0xff] %vm22_vm3, %v1248_v20  ;;  %v1249_v26 = vadd.f32 %v2043_v44, %v1178_v22 }
 0x114   :  { %1344 = vst.msk [vmem:[%s2483_s4 + $0x110] sm:$0xff] %vm22_vm3, %v1280_v21  ;;  %v1281_v27 = vadd.f32 %v2043_v44, %v1210_v23  ;;  %v741_v28 = vpop.f32.mrb[12].mxu0  ;;  %v869_v29 = vpop.f32.mrb[12].mxu1 }
 0x115   :  { %1313 = vst.msk [vmem:[%s2483_s4 + $0x18] sm:$0xff] %vm22_vm3, %v1249_v26  ;;  %v978_v32 = vadd.f32 %v741_v28, %v93_v24  ;;  %v1010_v33 = vadd.f32 %v869_v29, %v125_v25  ;;  %v743_v35 = vpop.f32.mrb[13].mxu0  ;;  %v871_v36 = vpop.f32.mrb[13].mxu1  ;;  %v98_v24 = vld [vmem:[#allocation2 + $0x58] sm:$0xff] }
 0x116   :  { %1345 = vst.msk [vmem:[%s2483_s4 + $0x118] sm:$0xff] %vm22_vm3, %v1281_v27  ;;  %v1108_v37 = vld [vmem:[#allocation2 + $0x20] sm:$0xff]  ;;  %v744_v39 = vpop.f32.mrb[14].mxu0  ;;  %v872_v40 = vpop.f32.mrb[14].mxu1  ;;  %v130_v25 = vld [vmem:[#allocation2 + $0x158] sm:$0xff] }
 0x117   :  { %v1140_v38 = vld [vmem:[#allocation2 + $0x120] sm:$0xff]  ;;  %v1179_v41 = vmul.f32 %v2038_v34, %v1108_v37  ;;  %1043 = vst.msk [vmem:[#allocation2 + $0x30] sm:$0xff] %vm22_vm3, %v978_v32  ;;  %1075 = vst.msk [vmem:[#allocation2 + $0x130] sm:$0xff] %vm22_vm3, %v1010_v33  ;;  %v979_v43 = vadd.f32 %v744_v39, %v94_v30  ;;  %v1011_v45 = vadd.f32 %v872_v40, %v126_v31  ;;  %v746_v46 = vpop.f32.mrb[15].mxu0  ;;  %v874_v47 = vpop.f32.mrb[15].mxu1 }
 0x118   :  { %v1211_v42 = vmul.f32 %v2038_v34, %v1140_v38  ;;  %v1109_v48 = vld [vmem:[#allocation2 + $0x28] sm:$0xff] }
 0x119   :  { %v1141_v49 = vld [vmem:[#allocation2 + $0x128] sm:$0xff]  ;;  %v1250_v50 = vadd.f32 %v2043_v44, %v1179_v41  ;;  %v1180_v52 = vmul.f32 %v2038_v34, %v1109_v48  ;;  %1044 = vst.msk [vmem:[#allocation2 + $0x38] sm:$0xff] %vm22_vm3, %v979_v43  ;;  %1076 = vst.msk [vmem:[#allocation2 + $0x138] sm:$0xff] %vm22_vm3, %v1011_v45  ;;  %v99_v48 = vld [vmem:[#allocation2 + $0x60] sm:$0xff] }
 0x11a   :  { %v1282_v51 = vadd.f32 %v2043_v44, %v1211_v42  ;;  %v1212_v53 = vmul.f32 %v2038_v34, %v1141_v49  ;;  %v131_v49 = vld [vmem:[#allocation2 + $0x160] sm:$0xff] }
 0x11b   :  { %1314 = vst.msk [vmem:[%s2483_s4 + $0x20] sm:$0xff] %vm22_vm3, %v1250_v50  ;;  %v1251_v56 = vadd.f32 %v2043_v44, %v1180_v52 }
 0x11c   :  { %1346 = vst.msk [vmem:[%s2483_s4 + $0x120] sm:$0xff] %vm22_vm3, %v1282_v51  ;;  %v1283_v57 = vadd.f32 %v2043_v44, %v1212_v53  ;;  %v749_v58 = vpop.f32.mrb[16].mxu0  ;;  %v877_v59 = vpop.f32.mrb[16].mxu1 }
 0x11d   :  { %1315 = vst.msk [vmem:[%s2483_s4 + $0x28] sm:$0xff] %vm22_vm3, %v1251_v56  ;;  %v980_v62 = vadd.f32 %v749_v58, %v95_v54  ;;  %v1012_v63 = vadd.f32 %v877_v59, %v127_v55  ;;  %v751_v0 = vpop.f32.mrb[17].mxu0  ;;  %v879_v1 = vpop.f32.mrb[17].mxu1  ;;  %v100_v54 = vld [vmem:[#allocation2 + $0x68] sm:$0xff] }
 0x11e   :  { %1347 = vst.msk [vmem:[%s2483_s4 + $0x128] sm:$0xff] %vm22_vm3, %v1283_v57  ;;  %v1110_v2 = vld [vmem:[#allocation2 + $0x30] sm:$0xff]  ;;  %v752_v4 = vpop.f32.mrb[18].mxu0  ;;  %v880_v5 = vpop.f32.mrb[18].mxu1  ;;  %v132_v55 = vld [vmem:[#allocation2 + $0x168] sm:$0xff] }
 0x11f   :  { %v1142_v3 = vld [vmem:[#allocation2 + $0x130] sm:$0xff]  ;;  %v1181_v6 = vmul.f32 %v2038_v34, %v1110_v2  ;;  %1045 = vst.msk [vmem:[#allocation2 + $0x40] sm:$0xff] %vm22_vm3, %v980_v62  ;;  %1077 = vst.msk [vmem:[#allocation2 + $0x140] sm:$0xff] %vm22_vm3, %v1012_v63  ;;  %v981_v8 = vadd.f32 %v752_v4, %v96_v60  ;;  %v1013_v9 = vadd.f32 %v880_v5, %v128_v61  ;;  %v754_v10 = vpop.f32.mrb[19].mxu0  ;;  %v882_v11 = vpop.f32.mrb[19].mxu1 }
 0x120   :  { %v1213_v7 = vmul.f32 %v2038_v34, %v1142_v3  ;;  %v1111_v12 = vld [vmem:[#allocation2 + $0x38] sm:$0xff] }
 0x121   :  { %v1143_v13 = vld [vmem:[#allocation2 + $0x138] sm:$0xff]  ;;  %v1252_v14 = vadd.f32 %v2043_v44, %v1181_v6  ;;  %v1182_v16 = vmul.f32 %v2038_v34, %v1111_v12  ;;  %1046 = vst.msk [vmem:[#allocation2 + $0x48] sm:$0xff] %vm22_vm3, %v981_v8  ;;  %1078 = vst.msk [vmem:[#allocation2 + $0x148] sm:$0xff] %vm22_vm3, %v1013_v9  ;;  %v101_v12 = vld [vmem:[#allocation2 + $0x70] sm:$0xff] }
 0x122   :  { %v1284_v15 = vadd.f32 %v2043_v44, %v1213_v7  ;;  %v1214_v17 = vmul.f32 %v2038_v34, %v1143_v13  ;;  %v133_v13 = vld [vmem:[#allocation2 + $0x170] sm:$0xff] }
 0x123   :  { %1316 = vst.msk [vmem:[%s2483_s4 + $0x30] sm:$0xff] %vm22_vm3, %v1252_v14  ;;  %v1253_v20 = vadd.f32 %v2043_v44, %v1182_v16 }
 0x124   :  { %1348 = vst.msk [vmem:[%s2483_s4 + $0x130] sm:$0xff] %vm22_vm3, %v1284_v15  ;;  %v1285_v21 = vadd.f32 %v2043_v44, %v1214_v17  ;;  %v757_v22 = vpop.f32.mrb[20].mxu0  ;;  %v885_v23 = vpop.f32.mrb[20].mxu1 }
 0x125   :  { %1317 = vst.msk [vmem:[%s2483_s4 + $0x38] sm:$0xff] %vm22_vm3, %v1253_v20  ;;  %v982_v26 = vadd.f32 %v757_v22, %v97_v18  ;;  %v1014_v27 = vadd.f32 %v885_v23, %v129_v19  ;;  %v759_v28 = vpop.f32.mrb[21].mxu0  ;;  %v887_v29 = vpop.f32.mrb[21].mxu1  ;;  %v102_v18 = vld [vmem:[#allocation2 + $0x78] sm:$0xff] }
 0x126   :  { %1349 = vst.msk [vmem:[%s2483_s4 + $0x138] sm:$0xff] %vm22_vm3, %v1285_v21  ;;  %v1112_v30 = vld [vmem:[#allocation2 + $0x40] sm:$0xff]  ;;  %v760_v32 = vpop.f32.mrb[22].mxu0  ;;  %v888_v33 = vpop.f32.mrb[22].mxu1  ;;  %v134_v19 = vld [vmem:[#allocation2 + $0x178] sm:$0xff] }
 0x127   :  { %v1144_v31 = vld [vmem:[#allocation2 + $0x140] sm:$0xff]  ;;  %v1183_v35 = vmul.f32 %v2038_v34, %v1112_v30  ;;  %1047 = vst.msk [vmem:[#allocation2 + $0x50] sm:$0xff] %vm22_vm3, %v982_v26  ;;  %1079 = vst.msk [vmem:[#allocation2 + $0x150] sm:$0xff] %vm22_vm3, %v1014_v27  ;;  %v983_v37 = vadd.f32 %v760_v32, %v98_v24  ;;  %v1015_v38 = vadd.f32 %v888_v33, %v130_v25  ;;  %v762_v39 = vpop.f32.mrb[23].mxu0  ;;  %v890_v40 = vpop.f32.mrb[23].mxu1 }
 0x128   :  { %v1215_v36 = vmul.f32 %v2038_v34, %v1144_v31  ;;  %v1113_v41 = vld [vmem:[#allocation2 + $0x48] sm:$0xff] }
 0x129   :  { %v1145_v42 = vld [vmem:[#allocation2 + $0x148] sm:$0xff]  ;;  %v1254_v43 = vadd.f32 %v2043_v44, %v1183_v35  ;;  %v1184_v46 = vmul.f32 %v2038_v34, %v1113_v41  ;;  %1048 = vst.msk [vmem:[#allocation2 + $0x58] sm:$0xff] %vm22_vm3, %v983_v37  ;;  %1080 = vst.msk [vmem:[#allocation2 + $0x158] sm:$0xff] %vm22_vm3, %v1015_v38  ;;  %v103_v41 = vld [vmem:[#allocation2 + $0x80] sm:$0xff] }
 0x12a   :  { %v1286_v45 = vadd.f32 %v2043_v44, %v1215_v36  ;;  %v1216_v47 = vmul.f32 %v2038_v34, %v1145_v42  ;;  %v135_v42 = vld [vmem:[#allocation2 + $0x180] sm:$0xff] }
 0x12b   :  { %1318 = vst.msk [vmem:[%s2483_s4 + $0x40] sm:$0xff] %vm22_vm3, %v1254_v43  ;;  %v1255_v50 = vadd.f32 %v2043_v44, %v1184_v46 }
 0x12c   :  { %1350 = vst.msk [vmem:[%s2483_s4 + $0x140] sm:$0xff] %vm22_vm3, %v1286_v45  ;;  %v1287_v51 = vadd.f32 %v2043_v44, %v1216_v47  ;;  %v765_v52 = vpop.f32.mrb[24].mxu0  ;;  %v893_v53 = vpop.f32.mrb[24].mxu1 }
 0x12d   :  { %1319 = vst.msk [vmem:[%s2483_s4 + $0x48] sm:$0xff] %vm22_vm3, %v1255_v50  ;;  %v984_v56 = vadd.f32 %v765_v52, %v99_v48  ;;  %v1016_v57 = vadd.f32 %v893_v53, %v131_v49  ;;  %v767_v58 = vpop.f32.mrb[25].mxu0  ;;  %v895_v59 = vpop.f32.mrb[25].mxu1  ;;  %v104_v48 = vld [vmem:[#allocation2 + $0x88] sm:$0xff] }
 0x12e   :  { %1351 = vst.msk [vmem:[%s2483_s4 + $0x148] sm:$0xff] %vm22_vm3, %v1287_v51  ;;  %v1114_v60 = vld [vmem:[#allocation2 + $0x50] sm:$0xff]  ;;  %v768_v62 = vpop.f32.mrb[26].mxu0  ;;  %v896_v63 = vpop.f32.mrb[26].mxu1  ;;  %v136_v49 = vld [vmem:[#allocation2 + $0x188] sm:$0xff] }
 0x12f   :  { %v1146_v61 = vld [vmem:[#allocation2 + $0x150] sm:$0xff]  ;;  %v1185_v0 = vmul.f32 %v2038_v34, %v1114_v60  ;;  %1049 = vst.msk [vmem:[#allocation2 + $0x60] sm:$0xff] %vm22_vm3, %v984_v56  ;;  %1081 = vst.msk [vmem:[#allocation2 + $0x160] sm:$0xff] %vm22_vm3, %v1016_v57  ;;  %v985_v2 = vadd.f32 %v768_v62, %v100_v54  ;;  %v1017_v3 = vadd.f32 %v896_v63, %v132_v55  ;;  %v770_v4 = vpop.f32.mrb[27].mxu0  ;;  %v898_v5 = vpop.f32.mrb[27].mxu1 }
 0x130   :  { %v1217_v1 = vmul.f32 %v2038_v34, %v1146_v61  ;;  %v1115_v6 = vld [vmem:[#allocation2 + $0x58] sm:$0xff] }
 0x131   :  { %v1147_v7 = vld [vmem:[#allocation2 + $0x158] sm:$0xff]  ;;  %v1256_v8 = vadd.f32 %v2043_v44, %v1185_v0  ;;  %v1186_v10 = vmul.f32 %v2038_v34, %v1115_v6  ;;  %1050 = vst.msk [vmem:[#allocation2 + $0x68] sm:$0xff] %vm22_vm3, %v985_v2  ;;  %1082 = vst.msk [vmem:[#allocation2 + $0x168] sm:$0xff] %vm22_vm3, %v1017_v3  ;;  %v105_v6 = vld [vmem:[#allocation2 + $0x90] sm:$0xff] }
 0x132   :  { %v1288_v9 = vadd.f32 %v2043_v44, %v1217_v1  ;;  %v1218_v11 = vmul.f32 %v2038_v34, %v1147_v7  ;;  %v137_v7 = vld [vmem:[#allocation2 + $0x190] sm:$0xff] }
 0x133   :  { %1320 = vst.msk [vmem:[%s2483_s4 + $0x50] sm:$0xff] %vm22_vm3, %v1256_v8  ;;  %v1257_v14 = vadd.f32 %v2043_v44, %v1186_v10 }
 0x134   :  { %1352 = vst.msk [vmem:[%s2483_s4 + $0x150] sm:$0xff] %vm22_vm3, %v1288_v9  ;;  %v1289_v15 = vadd.f32 %v2043_v44, %v1218_v11  ;;  %v773_v16 = vpop.f32.mrb[28].mxu0  ;;  %v901_v17 = vpop.f32.mrb[28].mxu1 }
 0x135   :  { %1321 = vst.msk [vmem:[%s2483_s4 + $0x58] sm:$0xff] %vm22_vm3, %v1257_v14  ;;  %v986_v20 = vadd.f32 %v773_v16, %v101_v12  ;;  %v1018_v21 = vadd.f32 %v901_v17, %v133_v13  ;;  %v775_v22 = vpop.f32.mrb[29].mxu0  ;;  %v903_v23 = vpop.f32.mrb[29].mxu1  ;;  %v106_v12 = vld [vmem:[#allocation2 + $0x98] sm:$0xff] }
 0x136   :  { %1353 = vst.msk [vmem:[%s2483_s4 + $0x158] sm:$0xff] %vm22_vm3, %v1289_v15  ;;  %v1116_v24 = vld [vmem:[#allocation2 + $0x60] sm:$0xff]  ;;  %v776_v26 = vpop.f32.mrb[30].mxu0  ;;  %v904_v27 = vpop.f32.mrb[30].mxu1  ;;  %v138_v13 = vld [vmem:[#allocation2 + $0x198] sm:$0xff] }
 0x137   :  { %v1148_v25 = vld [vmem:[#allocation2 + $0x160] sm:$0xff]  ;;  %v1187_v28 = vmul.f32 %v2038_v34, %v1116_v24  ;;  %1051 = vst.msk [vmem:[#allocation2 + $0x70] sm:$0xff] %vm22_vm3, %v986_v20  ;;  %1083 = vst.msk [vmem:[#allocation2 + $0x170] sm:$0xff] %vm22_vm3, %v1018_v21  ;;  %v987_v30 = vadd.f32 %v776_v26, %v102_v18  ;;  %v1019_v31 = vadd.f32 %v904_v27, %v134_v19  ;;  %v778_v32 = vpop.f32.mrb[31].mxu0  ;;  %v906_v33 = vpop.f32.mrb[31].mxu1 }
 0x138   :  { %v1219_v29 = vmul.f32 %v2038_v34, %v1148_v25  ;;  %v1117_v35 = vld [vmem:[#allocation2 + $0x68] sm:$0xff] }
 0x139   :  { %v1149_v36 = vld [vmem:[#allocation2 + $0x168] sm:$0xff]  ;;  %v1258_v37 = vadd.f32 %v2043_v44, %v1187_v28  ;;  %v1188_v39 = vmul.f32 %v2038_v34, %v1117_v35  ;;  %1052 = vst.msk [vmem:[#allocation2 + $0x78] sm:$0xff] %vm22_vm3, %v987_v30  ;;  %1084 = vst.msk [vmem:[#allocation2 + $0x178] sm:$0xff] %vm22_vm3, %v1019_v31  ;;  %v107_v35 = vld [vmem:[#allocation2 + $0xa0] sm:$0xff] }
 0x13a   :  { %v1290_v38 = vadd.f32 %v2043_v44, %v1219_v29  ;;  %v1220_v40 = vmul.f32 %v2038_v34, %v1149_v36  ;;  %v139_v36 = vld [vmem:[#allocation2 + $0x1a0] sm:$0xff] }
 0x13b   :  { %1322 = vst.msk [vmem:[%s2483_s4 + $0x60] sm:$0xff] %vm22_vm3, %v1258_v37  ;;  %v1259_v43 = vadd.f32 %v2043_v44, %v1188_v39 }
 0x13c   :  { %1354 = vst.msk [vmem:[%s2483_s4 + $0x160] sm:$0xff] %vm22_vm3, %v1290_v38  ;;  %v1291_v45 = vadd.f32 %v2043_v44, %v1220_v40  ;;  %v781_v46 = vpop.f32.mrb[32].mxu0  ;;  %v909_v47 = vpop.f32.mrb[32].mxu1 }
 0x13d   :  { %1323 = vst.msk [vmem:[%s2483_s4 + $0x68] sm:$0xff] %vm22_vm3, %v1259_v43  ;;  %v988_v50 = vadd.f32 %v781_v46, %v103_v41  ;;  %v1020_v51 = vadd.f32 %v909_v47, %v135_v42  ;;  %v783_v52 = vpop.f32.mrb[33].mxu0  ;;  %v911_v53 = vpop.f32.mrb[33].mxu1  ;;  %v108_v41 = vld [vmem:[#allocation2 + $0xa8] sm:$0xff] }
 0x13e   :  { %1355 = vst.msk [vmem:[%s2483_s4 + $0x168] sm:$0xff] %vm22_vm3, %v1291_v45  ;;  %v1118_v54 = vld [vmem:[#allocation2 + $0x70] sm:$0xff]  ;;  %v784_v56 = vpop.f32.mrb[34].mxu0  ;;  %v912_v57 = vpop.f32.mrb[34].mxu1  ;;  %v140_v42 = vld [vmem:[#allocation2 + $0x1a8] sm:$0xff] }
 0x13f   :  { %v1150_v55 = vld [vmem:[#allocation2 + $0x170] sm:$0xff]  ;;  %v1189_v58 = vmul.f32 %v2038_v34, %v1118_v54  ;;  %1053 = vst.msk [vmem:[#allocation2 + $0x80] sm:$0xff] %vm22_vm3, %v988_v50  ;;  %1085 = vst.msk [vmem:[#allocation2 + $0x180] sm:$0xff] %vm22_vm3, %v1020_v51  ;;  %v989_v60 = vadd.f32 %v784_v56, %v104_v48  ;;  %v1021_v61 = vadd.f32 %v912_v57, %v136_v49  ;;  %v786_v62 = vpop.f32.mrb[35].mxu0  ;;  %v914_v63 = vpop.f32.mrb[35].mxu1 }
 0x140   :  { %v1221_v59 = vmul.f32 %v2038_v34, %v1150_v55  ;;  %v1119_v0 = vld [vmem:[#allocation2 + $0x78] sm:$0xff] }
 0x141   :  { %v1151_v1 = vld [vmem:[#allocation2 + $0x178] sm:$0xff]  ;;  %v1260_v2 = vadd.f32 %v2043_v44, %v1189_v58  ;;  %v1190_v4 = vmul.f32 %v2038_v34, %v1119_v0  ;;  %1054 = vst.msk [vmem:[#allocation2 + $0x88] sm:$0xff] %vm22_vm3, %v989_v60  ;;  %1086 = vst.msk [vmem:[#allocation2 + $0x188] sm:$0xff] %vm22_vm3, %v1021_v61  ;;  %v109_v0 = vld [vmem:[#allocation2 + $0xb0] sm:$0xff] }
 0x142   :  { %v1292_v3 = vadd.f32 %v2043_v44, %v1221_v59  ;;  %v1222_v5 = vmul.f32 %v2038_v34, %v1151_v1  ;;  %v141_v1 = vld [vmem:[#allocation2 + $0x1b0] sm:$0xff] }
 0x143   :  { %1324 = vst.msk [vmem:[%s2483_s4 + $0x70] sm:$0xff] %vm22_vm3, %v1260_v2  ;;  %v1261_v8 = vadd.f32 %v2043_v44, %v1190_v4 }
 0x144   :  { %1356 = vst.msk [vmem:[%s2483_s4 + $0x170] sm:$0xff] %vm22_vm3, %v1292_v3  ;;  %v1293_v9 = vadd.f32 %v2043_v44, %v1222_v5  ;;  %v789_v10 = vpop.f32.mrb[36].mxu0  ;;  %v917_v11 = vpop.f32.mrb[36].mxu1 }
 0x145   :  { %1325 = vst.msk [vmem:[%s2483_s4 + $0x78] sm:$0xff] %vm22_vm3, %v1261_v8  ;;  %v990_v14 = vadd.f32 %v789_v10, %v105_v6  ;;  %v1022_v15 = vadd.f32 %v917_v11, %v137_v7  ;;  %v791_v16 = vpop.f32.mrb[37].mxu0  ;;  %v919_v17 = vpop.f32.mrb[37].mxu1  ;;  %v110_v6 = vld [vmem:[#allocation2 + $0xb8] sm:$0xff] }
 0x146   :  { %1357 = vst.msk [vmem:[%s2483_s4 + $0x178] sm:$0xff] %vm22_vm3, %v1293_v9  ;;  %v1120_v18 = vld [vmem:[#allocation2 + $0x80] sm:$0xff]  ;;  %v792_v20 = vpop.f32.mrb[38].mxu0  ;;  %v920_v21 = vpop.f32.mrb[38].mxu1  ;;  %v142_v7 = vld [vmem:[#allocation2 + $0x1b8] sm:$0xff] }
 0x147   :  { %v1152_v19 = vld [vmem:[#allocation2 + $0x180] sm:$0xff]  ;;  %v1191_v22 = vmul.f32 %v2038_v34, %v1120_v18  ;;  %1055 = vst.msk [vmem:[#allocation2 + $0x90] sm:$0xff] %vm22_vm3, %v990_v14  ;;  %1087 = vst.msk [vmem:[#allocation2 + $0x190] sm:$0xff] %vm22_vm3, %v1022_v15  ;;  %v991_v24 = vadd.f32 %v792_v20, %v106_v12  ;;  %v1023_v25 = vadd.f32 %v920_v21, %v138_v13  ;;  %v794_v26 = vpop.f32.mrb[39].mxu0  ;;  %v922_v27 = vpop.f32.mrb[39].mxu1 }
 0x148   :  { %v1223_v23 = vmul.f32 %v2038_v34, %v1152_v19  ;;  %v1121_v28 = vld [vmem:[#allocation2 + $0x88] sm:$0xff] }
 0x149   :  { %v1153_v29 = vld [vmem:[#allocation2 + $0x188] sm:$0xff]  ;;  %v1262_v30 = vadd.f32 %v2043_v44, %v1191_v22  ;;  %v1192_v32 = vmul.f32 %v2038_v34, %v1121_v28  ;;  %1056 = vst.msk [vmem:[#allocation2 + $0x98] sm:$0xff] %vm22_vm3, %v991_v24  ;;  %1088 = vst.msk [vmem:[#allocation2 + $0x198] sm:$0xff] %vm22_vm3, %v1023_v25  ;;  %v111_v28 = vld [vmem:[#allocation2 + $0xc0] sm:$0xff] }
 0x14a   :  { %v1294_v31 = vadd.f32 %v2043_v44, %v1223_v23  ;;  %v1224_v33 = vmul.f32 %v2038_v34, %v1153_v29  ;;  %v143_v29 = vld [vmem:[#allocation2 + $0x1c0] sm:$0xff] }
 0x14b   :  { %1326 = vst.msk [vmem:[%s2483_s4 + $0x80] sm:$0xff] %vm22_vm3, %v1262_v30  ;;  %v1263_v37 = vadd.f32 %v2043_v44, %v1192_v32 }
 0x14c   :  { %1358 = vst.msk [vmem:[%s2483_s4 + $0x180] sm:$0xff] %vm22_vm3, %v1294_v31  ;;  %v1295_v38 = vadd.f32 %v2043_v44, %v1224_v33  ;;  %v797_v39 = vpop.f32.mrb[40].mxu0  ;;  %v925_v40 = vpop.f32.mrb[40].mxu1 }
 0x14d   :  { %1327 = vst.msk [vmem:[%s2483_s4 + $0x88] sm:$0xff] %vm22_vm3, %v1263_v37  ;;  %v992_v43 = vadd.f32 %v797_v39, %v107_v35  ;;  %v1024_v45 = vadd.f32 %v925_v40, %v139_v36  ;;  %v799_v46 = vpop.f32.mrb[41].mxu0  ;;  %v927_v47 = vpop.f32.mrb[41].mxu1  ;;  %v112_v35 = vld [vmem:[#allocation2 + $0xc8] sm:$0xff] }
 0x14e   :  { %1359 = vst.msk [vmem:[%s2483_s4 + $0x188] sm:$0xff] %vm22_vm3, %v1295_v38  ;;  %v1122_v48 = vld [vmem:[#allocation2 + $0x90] sm:$0xff]  ;;  %v800_v50 = vpop.f32.mrb[42].mxu0  ;;  %v928_v51 = vpop.f32.mrb[42].mxu1  ;;  %v144_v36 = vld [vmem:[#allocation2 + $0x1c8] sm:$0xff] }
 0x14f   :  { %v1154_v49 = vld [vmem:[#allocation2 + $0x190] sm:$0xff]  ;;  %v1193_v52 = vmul.f32 %v2038_v34, %v1122_v48  ;;  %1057 = vst.msk [vmem:[#allocation2 + $0xa0] sm:$0xff] %vm22_vm3, %v992_v43  ;;  %1089 = vst.msk [vmem:[#allocation2 + $0x1a0] sm:$0xff] %vm22_vm3, %v1024_v45  ;;  %v993_v54 = vadd.f32 %v800_v50, %v108_v41  ;;  %v1025_v55 = vadd.f32 %v928_v51, %v140_v42  ;;  %v802_v56 = vpop.f32.mrb[43].mxu0  ;;  %v930_v57 = vpop.f32.mrb[43].mxu1 }
 0x150   :  { %v1225_v53 = vmul.f32 %v2038_v34, %v1154_v49  ;;  %v1123_v58 = vld [vmem:[#allocation2 + $0x98] sm:$0xff] }
 0x151   :  { %v1155_v59 = vld [vmem:[#allocation2 + $0x198] sm:$0xff]  ;;  %v1264_v60 = vadd.f32 %v2043_v44, %v1193_v52  ;;  %v1194_v62 = vmul.f32 %v2038_v34, %v1123_v58  ;;  %1058 = vst.msk [vmem:[#allocation2 + $0xa8] sm:$0xff] %vm22_vm3, %v993_v54  ;;  %1090 = vst.msk [vmem:[#allocation2 + $0x1a8] sm:$0xff] %vm22_vm3, %v1025_v55  ;;  %v113_v58 = vld [vmem:[#allocation2 + $0xd0] sm:$0xff] }
 0x152   :  { %v1296_v61 = vadd.f32 %v2043_v44, %v1225_v53  ;;  %v1226_v63 = vmul.f32 %v2038_v34, %v1155_v59  ;;  %v145_v59 = vld [vmem:[#allocation2 + $0x1d0] sm:$0xff] }
 0x153   :  { %1328 = vst.msk [vmem:[%s2483_s4 + $0x90] sm:$0xff] %vm22_vm3, %v1264_v60  ;;  %v1265_v2 = vadd.f32 %v2043_v44, %v1194_v62 }
 0x154   :  { %1360 = vst.msk [vmem:[%s2483_s4 + $0x190] sm:$0xff] %vm22_vm3, %v1296_v61  ;;  %v1297_v3 = vadd.f32 %v2043_v44, %v1226_v63  ;;  %v805_v4 = vpop.f32.mrb[44].mxu0  ;;  %v933_v5 = vpop.f32.mrb[44].mxu1 }
 0x155   :  { %1329 = vst.msk [vmem:[%s2483_s4 + $0x98] sm:$0xff] %vm22_vm3, %v1265_v2  ;;  %v994_v8 = vadd.f32 %v805_v4, %v109_v0  ;;  %v1026_v9 = vadd.f32 %v933_v5, %v141_v1  ;;  %v807_v10 = vpop.f32.mrb[45].mxu0  ;;  %v935_v11 = vpop.f32.mrb[45].mxu1  ;;  %v114_v0 = vld [vmem:[#allocation2 + $0xd8] sm:$0xff] }
 0x156   :  { %1361 = vst.msk [vmem:[%s2483_s4 + $0x198] sm:$0xff] %vm22_vm3, %v1297_v3  ;;  %v1124_v12 = vld [vmem:[#allocation2 + $0xa0] sm:$0xff]  ;;  %v808_v14 = vpop.f32.mrb[46].mxu0  ;;  %v936_v15 = vpop.f32.mrb[46].mxu1  ;;  %v146_v1 = vld [vmem:[#allocation2 + $0x1d8] sm:$0xff] }
 0x157   :  { %v1156_v13 = vld [vmem:[#allocation2 + $0x1a0] sm:$0xff]  ;;  %v1195_v16 = vmul.f32 %v2038_v34, %v1124_v12  ;;  %1059 = vst.msk [vmem:[#allocation2 + $0xb0] sm:$0xff] %vm22_vm3, %v994_v8  ;;  %1091 = vst.msk [vmem:[#allocation2 + $0x1b0] sm:$0xff] %vm22_vm3, %v1026_v9  ;;  %v995_v18 = vadd.f32 %v808_v14, %v110_v6  ;;  %v1027_v19 = vadd.f32 %v936_v15, %v142_v7  ;;  %v810_v20 = vpop.f32.mrb[47].mxu0  ;;  %v938_v21 = vpop.f32.mrb[47].mxu1 }
 0x158   :  { %v1227_v17 = vmul.f32 %v2038_v34, %v1156_v13  ;;  %v1125_v22 = vld [vmem:[#allocation2 + $0xa8] sm:$0xff] }
 0x159   :  { %v1157_v23 = vld [vmem:[#allocation2 + $0x1a8] sm:$0xff]  ;;  %v1266_v24 = vadd.f32 %v2043_v44, %v1195_v16  ;;  %v1196_v26 = vmul.f32 %v2038_v34, %v1125_v22  ;;  %1060 = vst.msk [vmem:[#allocation2 + $0xb8] sm:$0xff] %vm22_vm3, %v995_v18  ;;  %1092 = vst.msk [vmem:[#allocation2 + $0x1b8] sm:$0xff] %vm22_vm3, %v1027_v19  ;;  %v115_v22 = vld [vmem:[#allocation2 + $0xe0] sm:$0xff] }
 0x15a   :  { %v1298_v25 = vadd.f32 %v2043_v44, %v1227_v17  ;;  %v1228_v27 = vmul.f32 %v2038_v34, %v1157_v23  ;;  %v147_v23 = vld [vmem:[#allocation2 + $0x1e0] sm:$0xff] }
 0x15b   :  { %1330 = vst.msk [vmem:[%s2483_s4 + $0xa0] sm:$0xff] %vm22_vm3, %v1266_v24  ;;  %v1267_v30 = vadd.f32 %v2043_v44, %v1196_v26 }
 0x15c   :  { %1362 = vst.msk [vmem:[%s2483_s4 + $0x1a0] sm:$0xff] %vm22_vm3, %v1298_v25  ;;  %v1299_v31 = vadd.f32 %v2043_v44, %v1228_v27  ;;  %v813_v32 = vpop.f32.mrb[48].mxu0  ;;  %v941_v33 = vpop.f32.mrb[48].mxu1 }
 0x15d   :  { %1331 = vst.msk [vmem:[%s2483_s4 + $0xa8] sm:$0xff] %vm22_vm3, %v1267_v30  ;;  %v996_v37 = vadd.f32 %v813_v32, %v111_v28  ;;  %v1028_v38 = vadd.f32 %v941_v33, %v143_v29  ;;  %v815_v39 = vpop.f32.mrb[49].mxu0  ;;  %v943_v40 = vpop.f32.mrb[49].mxu1  ;;  %v116_v28 = vld [vmem:[#allocation2 + $0xe8] sm:$0xff] }
 0x15e   :  { %1363 = vst.msk [vmem:[%s2483_s4 + $0x1a8] sm:$0xff] %vm22_vm3, %v1299_v31  ;;  %v1126_v41 = vld [vmem:[#allocation2 + $0xb0] sm:$0xff]  ;;  %v816_v43 = vpop.f32.mrb[50].mxu0  ;;  %v944_v45 = vpop.f32.mrb[50].mxu1  ;;  %v148_v29 = vld [vmem:[#allocation2 + $0x1e8] sm:$0xff] }
 0x15f   :  { %v1158_v42 = vld [vmem:[#allocation2 + $0x1b0] sm:$0xff]  ;;  %v1197_v46 = vmul.f32 %v2038_v34, %v1126_v41  ;;  %1061 = vst.msk [vmem:[#allocation2 + $0xc0] sm:$0xff] %vm22_vm3, %v996_v37  ;;  %1093 = vst.msk [vmem:[#allocation2 + $0x1c0] sm:$0xff] %vm22_vm3, %v1028_v38  ;;  %v997_v48 = vadd.f32 %v816_v43, %v112_v35  ;;  %v1029_v49 = vadd.f32 %v944_v45, %v144_v36  ;;  %v818_v50 = vpop.f32.mrb[51].mxu0  ;;  %v946_v51 = vpop.f32.mrb[51].mxu1 }
 0x160   :  { %v1229_v47 = vmul.f32 %v2038_v34, %v1158_v42  ;;  %v1127_v52 = vld [vmem:[#allocation2 + $0xb8] sm:$0xff] }
 0x161   :  { %v1159_v53 = vld [vmem:[#allocation2 + $0x1b8] sm:$0xff]  ;;  %v1268_v54 = vadd.f32 %v2043_v44, %v1197_v46  ;;  %v1198_v56 = vmul.f32 %v2038_v34, %v1127_v52  ;;  %1062 = vst.msk [vmem:[#allocation2 + $0xc8] sm:$0xff] %vm22_vm3, %v997_v48  ;;  %1094 = vst.msk [vmem:[#allocation2 + $0x1c8] sm:$0xff] %vm22_vm3, %v1029_v49  ;;  %v117_v52 = vld [vmem:[#allocation2 + $0xf0] sm:$0xff] }
 0x162   :  { %v1300_v55 = vadd.f32 %v2043_v44, %v1229_v47  ;;  %v1230_v57 = vmul.f32 %v2038_v34, %v1159_v53  ;;  %v149_v53 = vld [vmem:[#allocation2 + $0x1f0] sm:$0xff] }
 0x163   :  { %1332 = vst.msk [vmem:[%s2483_s4 + $0xb0] sm:$0xff] %vm22_vm3, %v1268_v54  ;;  %v1269_v60 = vadd.f32 %v2043_v44, %v1198_v56 }
 0x164   :  { %1364 = vst.msk [vmem:[%s2483_s4 + $0x1b0] sm:$0xff] %vm22_vm3, %v1300_v55  ;;  %v1301_v61 = vadd.f32 %v2043_v44, %v1230_v57  ;;  %v821_v62 = vpop.f32.mrb[52].mxu0  ;;  %v949_v63 = vpop.f32.mrb[52].mxu1  ;;  %v118_v57 = vld [vmem:[#allocation2 + $0xf8] sm:$0xff] }
 0x165   :  { %1333 = vst.msk [vmem:[%s2483_s4 + $0xb8] sm:$0xff] %vm22_vm3, %v1269_v60  ;;  %v998_v2 = vadd.f32 %v821_v62, %v113_v58  ;;  %v1030_v3 = vadd.f32 %v949_v63, %v145_v59  ;;  %v823_v4 = vpop.f32.mrb[53].mxu0  ;;  %v951_v5 = vpop.f32.mrb[53].mxu1  ;;  %v150_v58 = vld [vmem:[#allocation2 + $0x1f8] sm:$0xff] }
 0x166   :  { %1365 = vst.msk [vmem:[%s2483_s4 + $0x1b8] sm:$0xff] %vm22_vm3, %v1301_v61  ;;  %v1128_v6 = vld [vmem:[#allocation2 + $0xc0] sm:$0xff]  ;;  %v824_v8 = vpop.f32.mrb[54].mxu0  ;;  %v952_v9 = vpop.f32.mrb[54].mxu1 }
 0x167   :  { %v1160_v7 = vld [vmem:[#allocation2 + $0x1c0] sm:$0xff]  ;;  %v1199_v10 = vmul.f32 %v2038_v34, %v1128_v6  ;;  %1063 = vst.msk [vmem:[#allocation2 + $0xd0] sm:$0xff] %vm22_vm3, %v998_v2  ;;  %1095 = vst.msk [vmem:[#allocation2 + $0x1d0] sm:$0xff] %vm22_vm3, %v1030_v3  ;;  %v999_v12 = vadd.f32 %v824_v8, %v114_v0  ;;  %v1031_v13 = vadd.f32 %v952_v9, %v146_v1  ;;  %v826_v14 = vpop.f32.mrb[55].mxu0  ;;  %v954_v15 = vpop.f32.mrb[55].mxu1 }
 0x168   :  { %v1231_v11 = vmul.f32 %v2038_v34, %v1160_v7  ;;  %v1129_v16 = vld [vmem:[#allocation2 + $0xc8] sm:$0xff]  ;;  %v1615_v2 = vld [vmem:[%s2481_s2] ss:$0 sm:$0xff] }
 0x169   :  { %v1161_v17 = vld [vmem:[#allocation2 + $0x1c8] sm:$0xff]  ;;  %v1270_v18 = vadd.f32 %v2043_v44, %v1199_v10  ;;  %v1200_v20 = vmul.f32 %v2038_v34, %v1129_v16  ;;  %1064 = vst.msk [vmem:[#allocation2 + $0xd8] sm:$0xff] %vm22_vm3, %v999_v12  ;;  %1096 = vst.msk [vmem:[#allocation2 + $0x1d8] sm:$0xff] %vm22_vm3, %v1031_v13 }
 0x16a   :  { %v1302_v19 = vadd.f32 %v2043_v44, %v1231_v11  ;;  %v1232_v21 = vmul.f32 %v2038_v34, %v1161_v17  ;;  %v1616_v11 = vld [vmem:[%s2482_s3] ss:$0 sm:$0xff] }
 0x16b   :  { %1334 = vst.msk [vmem:[%s2483_s4 + $0xc0] sm:$0xff] %vm22_vm3, %v1270_v18  ;;  %v1271_v24 = vadd.f32 %v2043_v44, %v1200_v20 }
 0x16c   :  { %1366 = vst.msk [vmem:[%s2483_s4 + $0x1c0] sm:$0xff] %vm22_vm3, %v1302_v19  ;;  %v1303_v25 = vadd.f32 %v2043_v44, %v1232_v21  ;;  %v829_v26 = vpop.f32.mrb[56].mxu0  ;;  %v957_v27 = vpop.f32.mrb[56].mxu1 }
 0x16d   :  { %1335 = vst.msk [vmem:[%s2483_s4 + $0xc8] sm:$0xff] %vm22_vm3, %v1271_v24  ;;  %v1000_v30 = vadd.f32 %v829_v26, %v115_v22  ;;  %v1032_v31 = vadd.f32 %v957_v27, %v147_v23  ;;  %v831_v32 = vpop.f32.mrb[57].mxu0  ;;  %v959_v33 = vpop.f32.mrb[57].mxu1 }
 0x16e   :  { %1367 = vst.msk [vmem:[%s2483_s4 + $0x1c8] sm:$0xff] %vm22_vm3, %v1303_v25  ;;  %v1130_v35 = vld [vmem:[#allocation2 + $0xd0] sm:$0xff]  ;;  %v832_v37 = vpop.f32.mrb[58].mxu0  ;;  %v960_v38 = vpop.f32.mrb[58].mxu1 }
 0x16f   :  { %v1162_v36 = vld [vmem:[#allocation2 + $0x1d0] sm:$0xff]  ;;  %v1201_v39 = vmul.f32 %v2038_v34, %v1130_v35  ;;  %1065 = vst.msk [vmem:[#allocation2 + $0xe0] sm:$0xff] %vm22_vm3, %v1000_v30  ;;  %1097 = vst.msk [vmem:[#allocation2 + $0x1e0] sm:$0xff] %vm22_vm3, %v1032_v31  ;;  %v1001_v41 = vadd.f32 %v832_v37, %v116_v28  ;;  %v1033_v42 = vadd.f32 %v960_v38, %v148_v29  ;;  %v834_v43 = vpop.f32.mrb[59].mxu0  ;;  %v962_v45 = vpop.f32.mrb[59].mxu1 }
 0x170   :  { %v1233_v40 = vmul.f32 %v2038_v34, %v1162_v36  ;;  %v1131_v46 = vld [vmem:[#allocation2 + $0xd8] sm:$0xff] }
 0x171   :  { %v1163_v47 = vld [vmem:[#allocation2 + $0x1d8] sm:$0xff]  ;;  %v1272_v48 = vadd.f32 %v2043_v44, %v1201_v39  ;;  %v1202_v50 = vmul.f32 %v2038_v34, %v1131_v46  ;;  %1066 = vst.msk [vmem:[#allocation2 + $0xe8] sm:$0xff] %vm22_vm3, %v1001_v41  ;;  %1098 = vst.msk [vmem:[#allocation2 + $0x1e8] sm:$0xff] %vm22_vm3, %v1033_v42 }
 0x172   :  { %v1304_v49 = vadd.f32 %v2043_v44, %v1233_v40  ;;  %v1234_v51 = vmul.f32 %v2038_v34, %v1163_v47 }
 0x173   :  { %1336 = vst.msk [vmem:[%s2483_s4 + $0xd0] sm:$0xff] %vm22_vm3, %v1272_v48  ;;  %v1273_v54 = vadd.f32 %v2043_v44, %v1202_v50 }
 0x174   :  { %1368 = vst.msk [vmem:[%s2483_s4 + $0x1d0] sm:$0xff] %vm22_vm3, %v1304_v49  ;;  %v1305_v34 = vadd.f32 %v2043_v44, %v1234_v51  ;;  %v837_v55 = vpop.f32.mrb[60].mxu0  ;;  %v965_v56 = vpop.f32.mrb[60].mxu1 }
 0x175   :  { %1337 = vst.msk [vmem:[%s2483_s4 + $0xd8] sm:$0xff] %vm22_vm3, %v1273_v54  ;;  %v1002_v59 = vadd.f32 %v837_v55, %v117_v52  ;;  %v1034_v60 = vadd.f32 %v965_v56, %v149_v53  ;;  %v839_v61 = vpop.f32.mrb[61].mxu0  ;;  %v967_v62 = vpop.f32.mrb[61].mxu1 }
 0x176   :  { %1369 = vst.msk [vmem:[%s2483_s4 + $0x1d8] sm:$0xff] %vm22_vm3, %v1305_v34  ;;  %v1132_v63 = vld [vmem:[#allocation2 + $0xe0] sm:$0xff]  ;;  %v840_v0 = vpop.f32.mrb[62].mxu0  ;;  %v968_v1 = vpop.f32.mrb[62].mxu1 }
 0x177   :  { %v1164_v44 = vld [vmem:[#allocation2 + $0x1e0] sm:$0xff]  ;;  %v1203_v3 = vmul.f32 %v1615_v2, %v1132_v63  ;;  %1067 = vst.msk [vmem:[#allocation2 + $0xf0] sm:$0xff] %vm22_vm3, %v1002_v59  ;;  %1099 = vst.msk [vmem:[#allocation2 + $0x1f0] sm:$0xff] %vm22_vm3, %v1034_v60  ;;  %v1003_v5 = vadd.f32 %v840_v0, %v118_v57  ;;  %v1035_v6 = vadd.f32 %v968_v1, %v150_v58  ;;  %v842_v7 = vpop.f32.mrb[63].mxu0  ;;  %v970_v8 = vpop.f32.mrb[63].mxu1 }
 0x178   :  { %v1235_v4 = vmul.f32 %v1615_v2, %v1164_v44  ;;  %v1133_v9 = vld [vmem:[#allocation2 + $0xe8] sm:$0xff] }
 0x179   :  { %v1165_v10 = vld [vmem:[#allocation2 + $0x1e8] sm:$0xff]  ;;  %v1274_v12 = vadd.f32 %v1616_v11, %v1203_v3  ;;  %v1204_v14 = vmul.f32 %v1615_v2, %v1133_v9  ;;  %1068 = vst.msk [vmem:[#allocation2 + $0xf8] sm:$0xff] %vm22_vm3, %v1003_v5  ;;  %1100 = vst.msk [vmem:[#allocation2 + $0x1f8] sm:$0xff] %vm22_vm3, %v1035_v6 }
 0x17a   :  { %v1306_v13 = vadd.f32 %v1616_v11, %v1235_v4  ;;  %v1236_v15 = vmul.f32 %v1615_v2, %v1165_v10 }
 0x17b   :  { %1338 = vst.msk [vmem:[%s2483_s4 + $0xe0] sm:$0xff] %vm22_vm3, %v1274_v12  ;;  %v1275_v16 = vadd.f32 %v1616_v11, %v1204_v14 }
 0x17c   :  { %1370 = vst.msk [vmem:[%s2483_s4 + $0x1e0] sm:$0xff] %vm22_vm3, %v1306_v13  ;;  %v1307_v17 = vadd.f32 %v1616_v11, %v1236_v15 }
 0x17d   :  { %1339 = vst.msk [vmem:[%s2483_s4 + $0xe8] sm:$0xff] %vm22_vm3, %v1275_v16 }
 0x17e   :  { %1371 = vst.msk [vmem:[%s2483_s4 + $0x1e8] sm:$0xff] %vm22_vm3, %v1307_v17  ;;  %v1134_v18 = vld [vmem:[#allocation2 + $0xf0] sm:$0xff] }
 0x17f   :  { %v1166_v19 = vld [vmem:[#allocation2 + $0x1f0] sm:$0xff]  ;;  %v1205_v20 = vmul.f32 %v1615_v2, %v1134_v18 }
 0x180   :  { %v1237_v21 = vmul.f32 %v1615_v2, %v1166_v19  ;;  %v1135_v22 = vld [vmem:[#allocation2 + $0xf8] sm:$0xff] }
 0x181   :  { %v1167_v23 = vld [vmem:[#allocation2 + $0x1f8] sm:$0xff]  ;;  %v1276_v24 = vadd.f32 %v1616_v11, %v1205_v20  ;;  %v1206_v26 = vmul.f32 %v1615_v2, %v1135_v22 }
 0x182   :  { %v1308_v25 = vadd.f32 %v1616_v11, %v1237_v21  ;;  %v1238_v27 = vmul.f32 %v1615_v2, %v1167_v23 }
 0x183   :  { %1340 = vst.msk [vmem:[%s2483_s4 + $0xf0] sm:$0xff] %vm22_vm3, %v1276_v24  ;;  %v1277_v28 = vadd.f32 %v1616_v11, %v1206_v26 }
 0x184   :  { %1372 = vst.msk [vmem:[%s2483_s4 + $0x1f0] sm:$0xff] %vm22_vm3, %v1308_v25  ;;  %v1309_v29 = vadd.f32 %v1616_v11, %v1238_v27 }
 0x185   :  { %1341 = vst.msk [vmem:[%s2483_s4 + $0xf8] sm:$0xff] %vm22_vm3, %v1277_v28 }
 0x186   :  { %1373 = vst.msk [vmem:[%s2483_s4 + $0x1f8] sm:$0xff] %vm22_vm3, %v1309_v29 }

// kernel: resnet18_forward.23
= control target key start
LH: loop header
LB: loop body
LE: loop exit
PB: predicated region body
PF: predicated region fallthrough
CT: control target
= control target key end

     0   :  { %vm22_vm0 = vcmask 523264   ;;  %s1827_s1 = inlined_call_operand.vmem [shape: bf16[576,64], index: 1, kind: input, shape index: {}]   ;;  %s1828_s0 = inlined_call_operand.vmem [shape: bf16[128,576], index: 0, kind: input, shape index: {}]   ;;  %s1829_s2 = inlined_call_operand.vmem [shape: f32[1,64], index: 2, kind: input, shape index: {}]   ;;  %s1830_s3 = inlined_call_operand.vmem [shape: f32[1,64], index: 3, kind: input, shape index: {}]   ;;  %s1831_s4 = inlined_call_operand.vmem [shape: f32[128,64], index: 4, kind: output, shape index: {}]  }
   0x1   :  { %v1299_v0 = vld [vmem:[%s1827_s1 + $0x40] sm:$0xff]   ;;  %v1303_v4 = vld [vmem:[%s1827_s1 + $0x48] sm:$0xff]   ;;  %v1307_v8 = vld [vmem:[%s1827_s1 + $0x50] sm:$0xff]  }
   0x2   :  { %v1300_v1 = vld [vmem:[%s1827_s1 + $0xc0] sm:$0xff]   ;;  %1126 = vmatprep.subr.bf16.mxu0 %v1299_v0  ;;  %v1304_v5 = vld [vmem:[%s1827_s1 + $0xc8] sm:$0xff]   ;;  %v1308_v9 = vld [vmem:[%s1827_s1 + $0xd0] sm:$0xff]  }
   0x3   :  { %v1301_v2 = vld [vmem:[%s1827_s1] sm:$0xff]   ;;  %1190 = vmatprep.subr.bf16.mxu1 %v1300_v1  ;;  %v1305_v6 = vld [vmem:[%s1827_s1 + $0x8] sm:$0xff]   ;;  %v1309_v10 = vld [vmem:[%s1827_s1 + $0x10] sm:$0xff]  }
   0x4   :  { %v1302_v3 = vld [vmem:[%s1827_s1 + $0x80] sm:$0xff]   ;;  %1127 = vmatpush3.bf16.msra.mxu0 %v1301_v2  ;;  %v1306_v7 = vld [vmem:[%s1827_s1 + $0x88] sm:$0xff]   ;;  %v1310_v11 = vld [vmem:[%s1827_s1 + $0x90] sm:$0xff]  }
   0x5   :  { %1191 = vmatpush3.bf16.msra.mxu1 %v1302_v3  ;;  %1128 = vmatprep.subr.bf16.mxu0 %v1303_v4  ;;  %v1311_v12 = vld [vmem:[%s1827_s1 + $0x58] sm:$0xff]   ;;  %v1315_v16 = vld [vmem:[%s1827_s1 + $0x60] sm:$0xff]   ;;  %v1319_v20 = vld [vmem:[%s1827_s1 + $0x68] sm:$0xff]  }
   0x6   :  { %1192 = vmatprep.subr.bf16.mxu1 %v1304_v5  ;;  %v1312_v13 = vld [vmem:[%s1827_s1 + $0xd8] sm:$0xff]   ;;  %v1316_v17 = vld [vmem:[%s1827_s1 + $0xe0] sm:$0xff]   ;;  %v1320_v21 = vld [vmem:[%s1827_s1 + $0xe8] sm:$0xff]  }
   0x7   :  { %v1313_v14 = vld [vmem:[%s1827_s1 + $0x18] sm:$0xff]   ;;  %v1317_v18 = vld [vmem:[%s1827_s1 + $0x20] sm:$0xff]   ;;  %v1321_v22 = vld [vmem:[%s1827_s1 + $0x28] sm:$0xff]  }
   0x8   :  { %1129 = vmatpush3.bf16.msra.mxu0 %v1305_v6  ;;  %v1314_v15 = vld [vmem:[%s1827_s1 + $0x98] sm:$0xff]   ;;  %v1318_v19 = vld [vmem:[%s1827_s1 + $0xa0] sm:$0xff]   ;;  %v1322_v23 = vld [vmem:[%s1827_s1 + $0xa8] sm:$0xff]  }
   0x9   :  { %1193 = vmatpush3.bf16.msra.mxu1 %v1306_v7  ;;  %1130 = vmatprep.subr.bf16.mxu0 %v1307_v8  ;;  %v1323_v24 = vld [vmem:[%s1827_s1 + $0x70] sm:$0xff]   ;;  %v1327_v28 = vld [vmem:[%s1827_s1 + $0x78] sm:$0xff]   ;;  %v1336_v35 = vld [vmem:[%s1828_s0 + $0xc] ss:$20 sps:$4 sm:$0xff]  }
   0xa   :  { %1194 = vmatprep.subr.bf16.mxu1 %v1308_v9  ;;  %v1324_v25 = vld [vmem:[%s1827_s1 + $0xf0] sm:$0xff]   ;;  %v1328_v29 = vld [vmem:[%s1827_s1 + $0xf8] sm:$0xff]   ;;  %v1337_v36 = vld [vmem:[%s1827_s1 + $0x100] sm:$0xff]   ;;  %745 = vmatprep.mubr.bf16.mxu1 %v1336_v35 }
   0xb   :  { %v1325_v26 = vld [vmem:[%s1827_s1 + $0x30] sm:$0xff]   ;;  %v1329_v30 = vld [vmem:[%s1827_s1 + $0x38] sm:$0xff]   ;;  %v1338_v37 = vld [vmem:[%s1828_s0 + $0x2c] ss:$20 sps:$4 sm:$0xff]  }
   0xc   :  { %1131 = vmatpush3.bf16.msra.mxu0 %v1309_v10  ;;  %v1326_v27 = vld [vmem:[%s1827_s1 + $0xb0] sm:$0xff]   ;;  %v1330_v31 = vld [vmem:[%s1827_s1 + $0xb8] sm:$0xff]   ;;  %v1350_v42 = vld [vmem:[%s1827_s1 + $0x108] sm:$0xff]  }
   0xd   :  { %1195 = vmatpush3.bf16.msra.mxu1 %v1310_v11  ;;  %1132 = vmatprep.subr.bf16.mxu0 %v1311_v12  ;;  %v1331_v32 = vld [vmem:[%s1828_s0] ss:$20 sps:$4 sm:$0xff]   ;;  %v1333_v33 = vld [vmem:[%s1828_s0 + $0x4] ss:$20 sps:$4 sm:$0xff]   ;;  %v1334_v34 = vld [vmem:[%s1828_s0 + $0x8] ss:$20 sps:$4 sm:$0xff]  }
   0xe   :  { %1196 = vmatprep.subr.bf16.mxu1 %v1312_v13  ;;  %648 = vmatprep.mubr.bf16.mxu0 %v1333_v33  ;;  %v1340_v38 = vld [vmem:[%s1828_s0 + $0x34] ss:$20 sps:$4 sm:$0xff]   ;;  %v1343_v40 = vld [vmem:[%s1828_s0 + $0x30] ss:$20 sps:$4 sm:$0xff]   ;;  %v1349_v45 = vld [vmem:[%s1828_s0 + $0x58] ss:$20 sps:$4 sm:$0xff]  }
   0xf   :  { %v1342_v39 = vld [vmem:[%s1828_s0 + $0x28] ss:$20 sps:$4 sm:$0xff]   ;;  %v1348_v44 = vld [vmem:[%s1828_s0 + $0x50] ss:$20 sps:$4 sm:$0xff]   ;;  %v1355_v50 = vld [vmem:[%s1828_s0 + $0x78] ss:$20 sps:$4 sm:$0xff]  }
  0x10   :  { %1133 = vmatpush3.bf16.msra.mxu0 %v1313_v14  ;;  %v1344_v41 = vld [vmem:[%s1828_s0 + $0x54] ss:$20 sps:$4 sm:$0xff]   ;;  %v1346_v43 = vld [vmem:[%s1828_s0 + $0x5c] ss:$20 sps:$4 sm:$0xff]   ;;  %v1353_v48 = vld [vmem:[%s1828_s0 + $0x84] ss:$20 sps:$4 sm:$0xff]  }
  0x11   :  { %1197 = vmatpush3.bf16.msra.mxu1 %v1314_v15  ;;  %1134 = vmatprep.subr.bf16.mxu0 %v1315_v16  ;;  %v1363_v46 = vld [vmem:[%s1827_s1 + $0x110] sm:$0xff]   ;;  %v1376_v49 = vld [vmem:[%s1827_s1 + $0x118] sm:$0xff]   ;;  %v1359_v53 = vld [vmem:[%s1828_s0 + $0xac] ss:$20 sps:$4 sm:$0xff]   ;;  %v1391_v12 = vmov 0.0  }
  0x12   :  { %1198 = vmatprep.subr.bf16.mxu1 %v1316_v17  ;;  %v1351_v47 = vld [vmem:[%s1828_s0 + $0x7c] ss:$20 sps:$4 sm:$0xff]   ;;  %v1356_v51 = vld [vmem:[%s1828_s0 + $0x80] ss:$20 sps:$4 sm:$0xff]   ;;  %v1357_v52 = vld [vmem:[%s1828_s0 + $0xa4] ss:$20 sps:$4 sm:$0xff]  }
  0x13   :  { %v1361_v54 = vld [vmem:[%s1828_s0 + $0xa0] ss:$20 sps:$4 sm:$0xff]   ;;  %v1362_v55 = vld [vmem:[%s1828_s0 + $0xa8] ss:$20 sps:$4 sm:$0xff]   ;;  %v1369_v59 = vld [vmem:[%s1828_s0 + $0xd0] ss:$20 sps:$4 sm:$0xff]  }
  0x14   :  { %1135 = vmatpush3.bf16.msra.mxu0 %v1317_v18  ;;  %v1364_v56 = vld [vmem:[%s1828_s0 + $0xcc] ss:$20 sps:$4 sm:$0xff]   ;;  %v1366_v57 = vld [vmem:[%s1828_s0 + $0xd4] ss:$20 sps:$4 sm:$0xff]   ;;  %v1372_v61 = vld [vmem:[%s1828_s0 + $0xfc] ss:$20 sps:$4 sm:$0xff]  }
  0x15   :  { %1199 = vmatpush3.bf16.msra.mxu1 %v1318_v19  ;;  %1136 = vmatprep.subr.bf16.mxu0 %v1319_v20  ;;  %v1368_v58 = vld [vmem:[%s1828_s0 + $0xc8] ss:$20 sps:$4 sm:$0xff]   ;;  %v1374_v62 = vld [vmem:[%s1828_s0 + $0xf0] ss:$20 sps:$4 sm:$0xff]   ;;  %v1375_v63 = vld [vmem:[%s1828_s0 + $0xf8] ss:$20 sps:$4 sm:$0xff]  }
  0x16   :  { %1200 = vmatprep.subr.bf16.mxu1 %v1320_v21  ;;  %v1370_v60 = vld [vmem:[%s1828_s0 + $0xf4] ss:$20 sps:$4 sm:$0xff]   ;;  %v1377_v0 = vld [vmem:[%s1828_s0 + $0x11c] ss:$20 sps:$4 sm:$0xff]   ;;  %v1379_v1 = vld [vmem:[%s1828_s0 + $0x124] ss:$20 sps:$4 sm:$0xff]  }
  0x17   :  { %v1381_v2 = vld [vmem:[%s1828_s0 + $0x118] ss:$20 sps:$4 sm:$0xff]   ;;  %v1382_v3 = vld [vmem:[%s1828_s0 + $0x120] ss:$20 sps:$4 sm:$0xff]   ;;  %v1383_v4 = vld [vmem:[%s1828_s0 + $0x10] ss:$20 sps:$4 sm:$0xff]  }
  0x18   :  { %1137 = vmatpush3.bf16.msra.mxu0 %v1321_v22  ;;  %v1384_v5 = vld [vmem:[%s1828_s0 + $0xb0] ss:$20 sps:$4 sm:$0xff]   ;;  %v1385_v6 = vld [vmem:[%s1828_s0 + $0x38] ss:$20 sps:$4 sm:$0xff]   ;;  %v1387_v8 = vld [vmem:[%s1828_s0 + $0x60] ss:$20 sps:$4 sm:$0xff]  }
  0x19   :  { %1201 = vmatpush3.bf16.msra.mxu1 %v1322_v23  ;;  %1138 = vmatprep.subr.bf16.mxu0 %v1323_v24  ;;  %v1386_v7 = vld [vmem:[%s1828_s0 + $0xd8] ss:$20 sps:$4 sm:$0xff]   ;;  %v1388_v9 = vld [vmem:[%s1828_s0 + $0x100] ss:$20 sps:$4 sm:$0xff]   ;;  %v1389_v10 = vld [vmem:[%s1828_s0 + $0x88] ss:$20 sps:$4 sm:$0xff]  }
  0x1a   :  { %1202 = vmatprep.subr.bf16.mxu1 %v1324_v25  ;;  %v1390_v11 = vld [vmem:[%s1828_s0 + $0x128] ss:$20 sps:$4 sm:$0xff]   ;;  %25 = vst.msk [vmem:[#allocation2 + $0x10] sm:$0xff] %vm22_vm0, %v1391_v12  ;;  %23 = vst.msk [vmem:[#allocation2] sm:$0xff] %vm22_vm0, %v1391_v12 }
  0x1b   :  { %24 = vst.msk [vmem:[#allocation2 + $0x8] sm:$0xff] %vm22_vm0, %v1391_v12  ;;  %26 = vst.msk [vmem:[#allocation2 + $0x18] sm:$0xff] %vm22_vm0, %v1391_v12 }
  0x1c   :  { %1139 = vmatpush3.bf16.msra.mxu0 %v1325_v26  ;;  %27 = vst.msk [vmem:[#allocation2 + $0x20] sm:$0xff] %vm22_vm0, %v1391_v12  ;;  %28 = vst.msk [vmem:[#allocation2 + $0x28] sm:$0xff] %vm22_vm0, %v1391_v12 }
  0x1d   :  { %1203 = vmatpush3.bf16.msra.mxu1 %v1326_v27  ;;  %1140 = vmatprep.subr.bf16.mxu0 %v1327_v28  ;;  %29 = vst.msk [vmem:[#allocation2 + $0x30] sm:$0xff] %vm22_vm0, %v1391_v12  ;;  %30 = vst.msk [vmem:[#allocation2 + $0x38] sm:$0xff] %vm22_vm0, %v1391_v12 }
  0x1e   :  { %1204 = vmatprep.subr.bf16.mxu1 %v1328_v29  ;;  %31 = vst.msk [vmem:[#allocation2 + $0x40] sm:$0xff] %vm22_vm0, %v1391_v12  ;;  %32 = vst.msk [vmem:[#allocation2 + $0x48] sm:$0xff] %vm22_vm0, %v1391_v12 }
  0x1f   :  { %33 = vst.msk [vmem:[#allocation2 + $0x50] sm:$0xff] %vm22_vm0, %v1391_v12  ;;  %34 = vst.msk [vmem:[#allocation2 + $0x58] sm:$0xff] %vm22_vm0, %v1391_v12 }
  0x20   :  { %1141 = vmatpush3.bf16.msra.mxu0 %v1329_v30  ;;  %35 = vst.msk [vmem:[#allocation2 + $0x60] sm:$0xff] %vm22_vm0, %v1391_v12  ;;  %36 = vst.msk [vmem:[#allocation2 + $0x68] sm:$0xff] %vm22_vm0, %v1391_v12 }
  0x21   :  { %1205 = vmatpush3.bf16.msra.mxu1 %v1330_v31  ;;  %1266 = vmatprep.subr.bf16.mxu0 %v1337_v36  ;;  %37 = vst.msk [vmem:[#allocation2 + $0x70] sm:$0xff] %vm22_vm0, %v1391_v12  ;;  %38 = vst.msk [vmem:[#allocation2 + $0x78] sm:$0xff] %vm22_vm0, %v1391_v12 }
  0x22   :  { %1290 = vmatprep.subr.bf16.mxu1 %v1337_v36 }
  0x23   :  { %649 = vmatmul.mubr.bf16.vlgmr.msra.gmra.mrb[0].mxu0 %v1331_v32 }
  0x24   :  { %746 = vmatmul.mubr.bf16.vlgmr.msra.gmra.mrb[0].mxu1 %v1334_v34  ;;  %1267 = vmatpush3.bf16.msra.mxu0 %v1337_v36 }
  0x25   :  { %1294 = vmatpush3.bf16.msra.mxu1 %v1337_v36  ;;  %656 = vmatprep.mubr.bf16.mxu0 %v1338_v37 }
  0x26   :  { %753 = vmatprep.mubr.bf16.mxu1 %v1340_v38  ;;  %1268 = vmatprep.subr.bf16.mxu0 %v1350_v42 }
  0x27   :  { %1291 = vmatprep.subr.bf16.mxu1 %v1350_v42 }
  0x28   :  { %1269 = vmatpush3.bf16.msra.mxu0 %v1350_v42 }
  0x29   :  { %1295 = vmatpush3.bf16.msra.mxu1 %v1350_v42  ;;  %1270 = vmatprep.subr.bf16.mxu0 %v1363_v46 }
  0x2a   :  { %1292 = vmatprep.subr.bf16.mxu1 %v1363_v46 }
  0x2b   :  { %657 = vmatmul.mubr.bf16.gmra.mrb[4].mxu0 %v1342_v39 }
  0x2c   :  { %754 = vmatmul.mubr.bf16.gmra.mrb[4].mxu1 %v1343_v40  ;;  %664 = vmatprep.mubr.bf16.mxu0 %v1344_v41 }
  0x2d   :  { %761 = vmatprep.mubr.bf16.mxu1 %v1346_v43  ;;  %1271 = vmatpush3.bf16.msra.mxu0 %v1363_v46 }
  0x2e   :  { %1296 = vmatpush3.bf16.msra.mxu1 %v1363_v46  ;;  %1272 = vmatprep.subr.bf16.mxu0 %v1376_v49 }
  0x2f   :  { %1293 = vmatprep.subr.bf16.mxu1 %v1376_v49 }
  0x31   :  { %1273 = vmatpush3.bf16.msra.mxu0 %v1376_v49 }
  0x32   :  { %1297 = vmatpush3.bf16.msra.mxu1 %v1376_v49 }
  0x33   :  { %665 = vmatmul.mubr.bf16.gmra.mrb[8].mxu0 %v1348_v44 }
  0x34   :  { %762 = vmatmul.mubr.bf16.gmra.mrb[8].mxu1 %v1349_v45  ;;  %672 = vmatprep.mubr.bf16.mxu0 %v1351_v47 }
  0x35   :  { %769 = vmatprep.mubr.bf16.mxu1 %v1353_v48 }
  0x3b   :  { %673 = vmatmul.mubr.bf16.gmra.mrb[12].mxu0 %v1355_v50 }
  0x3c   :  { %770 = vmatmul.mubr.bf16.gmra.mrb[12].mxu1 %v1356_v51  ;;  %680 = vmatprep.mubr.bf16.mxu0 %v1357_v52 }
  0x3d   :  { %777 = vmatprep.mubr.bf16.mxu1 %v1359_v53 }
  0x43   :  { %681 = vmatmul.mubr.bf16.gmra.mrb[16].mxu0 %v1361_v54 }
  0x44   :  { %778 = vmatmul.mubr.bf16.gmra.mrb[16].mxu1 %v1362_v55  ;;  %688 = vmatprep.mubr.bf16.mxu0 %v1364_v56 }
  0x45   :  { %785 = vmatprep.mubr.bf16.mxu1 %v1366_v57 }
  0x4b   :  { %689 = vmatmul.mubr.bf16.gmra.mrb[20].mxu0 %v1368_v58 }
  0x4c   :  { %786 = vmatmul.mubr.bf16.gmra.mrb[20].mxu1 %v1369_v59  ;;  %696 = vmatprep.mubr.bf16.mxu0 %v1370_v60 }
  0x4d   :  { %793 = vmatprep.mubr.bf16.mxu1 %v1372_v61 }
  0x53   :  { %697 = vmatmul.mubr.bf16.gmra.mrb[24].mxu0 %v1374_v62 }
  0x54   :  { %794 = vmatmul.mubr.bf16.gmra.mrb[24].mxu1 %v1375_v63  ;;  %704 = vmatprep.mubr.bf16.mxu0 %v1377_v0 }
  0x55   :  { %801 = vmatprep.mubr.bf16.mxu1 %v1379_v1 }
  0x5b   :  { %705 = vmatmul.mubr.bf16.gmra.mrb[28].mxu0 %v1381_v2 }
  0x5c   :  { %802 = vmatmul.mubr.bf16.gmra.mrb[28].mxu1 %v1382_v3  ;;  %1274 = vmatprep.mubr.msk.bf16.mxu0 %vm22_vm0, %v1383_v4 }
  0x5d   :  { %1282 = vmatprep.mubr.msk.bf16.mxu1 %vm22_vm0, %v1384_v5 }
  0x63   :  { %1275 = vmatmul.mubr.msk.bf16.vlgmr.msra.gmra.mrb[32].mxu0 %vm22_vm0, %v1385_v6 }
  0x64   :  { %1283 = vmatmul.mubr.msk.bf16.vlgmr.msra.gmra.mrb[32].mxu1 %vm22_vm0, %v1386_v7  ;;  %1278 = vmatprep.mubr.msk.bf16.mxu0 %vm22_vm0, %v1387_v8 }
  0x65   :  { %1286 = vmatprep.mubr.msk.bf16.mxu1 %vm22_vm0, %v1388_v9 }
  0x6b   :  { %1279 = vmatmul.mubr.msk.bf16.gmra.mrb[36].mxu0 %vm22_vm0, %v1389_v10 }
  0x6c   :  { %1287 = vmatmul.mubr.msk.bf16.gmra.mrb[36].mxu1 %vm22_vm0, %v1390_v11 }
  0xf6   :  { %v1142_v13 = vpop.f32.mrb[0].mxu0 }
  0xf7   :  { %v1206_v14 = vpop.f32.mrb[0].mxu1  ;;  %v1143_v15 = vpop.f32.mrb[1].mxu0 }
  0xf8   :  { %v1144_v16 = vadd.f32 %v1143_v15, %v1142_v13  ;;  %v1207_v17 = vpop.f32.mrb[1].mxu1  ;;  %v1145_v18 = vpop.f32.mrb[2].mxu0 }
  0xf9   :  { %v1208_v19 = vadd.f32 %v1207_v17, %v1206_v14  ;;  %v1209_v20 = vpop.f32.mrb[2].mxu1  ;;  %v1146_v21 = vpop.f32.mrb[3].mxu0 }
  0xfa   :  { %v1147_v22 = vadd.f32 %v1146_v21, %v1145_v18  ;;  %v1210_v23 = vpop.f32.mrb[3].mxu1 }
  0xfb   :  { %v1211_v24 = vadd.f32 %v1210_v23, %v1209_v20  ;;  %v1669_v25 = vadd.f32 %v1208_v19, %v1144_v16 }
  0xfd   :  { %v1671_v26 = vadd.f32 %v1211_v24, %v1147_v22 }
  0xfe   :  { %v1148_v27 = vpop.f32.mrb[4].mxu0 }
  0xff   :  { %v1212_v28 = vpop.f32.mrb[4].mxu1  ;;  %v1149_v29 = vpop.f32.mrb[5].mxu0 }
 0x100   :  { %v1150_v30 = vadd.f32 %v1149_v29, %v1148_v27  ;;  %v1213_v31 = vpop.f32.mrb[5].mxu1  ;;  %v1151_v32 = vpop.f32.mrb[6].mxu0 }
 0x101   :  { %v1214_v33 = vadd.f32 %v1213_v31, %v1212_v28  ;;  %v1215_v34 = vpop.f32.mrb[6].mxu1  ;;  %v1152_v35 = vpop.f32.mrb[7].mxu0 }
 0x102   :  { %v1153_v36 = vadd.f32 %v1152_v35, %v1151_v32  ;;  %v1216_v37 = vpop.f32.mrb[7].mxu1 }
 0x103   :  { %v1217_v38 = vadd.f32 %v1216_v37, %v1215_v34  ;;  %v1673_v39 = vadd.f32 %v1214_v33, %v1150_v30 }
 0x105   :  { %v1675_v40 = vadd.f32 %v1217_v38, %v1153_v36 }
 0x106   :  { %v1154_v41 = vpop.f32.mrb[8].mxu0 }
 0x107   :  { %v1218_v42 = vpop.f32.mrb[8].mxu1  ;;  %v1155_v43 = vpop.f32.mrb[9].mxu0 }
 0x108   :  { %v1156_v44 = vadd.f32 %v1155_v43, %v1154_v41  ;;  %v1219_v45 = vpop.f32.mrb[9].mxu1  ;;  %v1157_v46 = vpop.f32.mrb[10].mxu0 }
 0x109   :  { %v1220_v47 = vadd.f32 %v1219_v45, %v1218_v42  ;;  %v1221_v48 = vpop.f32.mrb[10].mxu1  ;;  %v1158_v49 = vpop.f32.mrb[11].mxu0 }
 0x10a   :  { %v1159_v50 = vadd.f32 %v1158_v49, %v1157_v46  ;;  %v1222_v51 = vpop.f32.mrb[11].mxu1 }
 0x10b   :  { %v1223_v52 = vadd.f32 %v1222_v51, %v1221_v48  ;;  %v1677_v53 = vadd.f32 %v1220_v47, %v1156_v44 }
 0x10d   :  { %v1679_v54 = vadd.f32 %v1223_v52, %v1159_v50 }
 0x10e   :  { %v1160_v55 = vpop.f32.mrb[12].mxu0 }
 0x10f   :  { %v1224_v56 = vpop.f32.mrb[12].mxu1  ;;  %v1161_v57 = vpop.f32.mrb[13].mxu0 }
 0x110   :  { %v1162_v58 = vadd.f32 %v1161_v57, %v1160_v55  ;;  %v1225_v59 = vpop.f32.mrb[13].mxu1  ;;  %v1163_v60 = vpop.f32.mrb[14].mxu0 }
 0x111   :  { %v1226_v61 = vadd.f32 %v1225_v59, %v1224_v56  ;;  %v1227_v62 = vpop.f32.mrb[14].mxu1  ;;  %v1164_v63 = vpop.f32.mrb[15].mxu0 }
 0x112   :  { %v1165_v0 = vadd.f32 %v1164_v63, %v1163_v60  ;;  %v1228_v1 = vpop.f32.mrb[15].mxu1 }
 0x113   :  { %v1229_v2 = vadd.f32 %v1228_v1, %v1227_v62  ;;  %v1681_v3 = vadd.f32 %v1226_v61, %v1162_v58 }
 0x115   :  { %v1683_v4 = vadd.f32 %v1229_v2, %v1165_v0 }
 0x116   :  { %v1166_v5 = vpop.f32.mrb[16].mxu0 }
 0x117   :  { %v1230_v6 = vpop.f32.mrb[16].mxu1  ;;  %v1167_v7 = vpop.f32.mrb[17].mxu0 }
 0x118   :  { %v1168_v8 = vadd.f32 %v1167_v7, %v1166_v5  ;;  %v1231_v9 = vpop.f32.mrb[17].mxu1  ;;  %v1169_v10 = vpop.f32.mrb[18].mxu0  ;;  %v41_v5 = vld [vmem:[#allocation2 + $0x10] sm:$0xff] }
 0x119   :  { %v1232_v11 = vadd.f32 %v1231_v9, %v1230_v6  ;;  %v1233_v12 = vpop.f32.mrb[18].mxu1  ;;  %v1170_v13 = vpop.f32.mrb[19].mxu0 }
 0x11a   :  { %v1171_v14 = vadd.f32 %v1170_v13, %v1169_v10  ;;  %v1234_v15 = vpop.f32.mrb[19].mxu1  ;;  %v39_v10 = vld [vmem:[#allocation2] sm:$0xff] }
 0x11b   :  { %v1235_v16 = vadd.f32 %v1234_v15, %v1233_v12  ;;  %v780_v17 = vadd.f32 %v1232_v11, %v1168_v8  ;;  %v49_v8 = vld [vmem:[#allocation2 + $0x50] sm:$0xff] }
 0x11d   :  { %v1685_v18 = vadd.f32 %v1235_v16, %v1171_v14  ;;  %v47_v14 = vld [vmem:[#allocation2 + $0x40] sm:$0xff]  ;;  %v42_v16 = vld [vmem:[#allocation2 + $0x18] sm:$0xff] }
 0x11e   :  { %v1172_v19 = vpop.f32.mrb[20].mxu0 }
 0x11f   :  { %v1236_v20 = vpop.f32.mrb[20].mxu1  ;;  %v1173_v21 = vpop.f32.mrb[21].mxu0 }
 0x120   :  { %v1174_v22 = vadd.f32 %v1173_v21, %v1172_v19  ;;  %v1237_v23 = vpop.f32.mrb[21].mxu1  ;;  %v1175_v24 = vpop.f32.mrb[22].mxu0 }
 0x121   :  { %v1238_v27 = vadd.f32 %v1237_v23, %v1236_v20  ;;  %v1239_v28 = vpop.f32.mrb[22].mxu1  ;;  %v1176_v29 = vpop.f32.mrb[23].mxu0  ;;  %v50_v23 = vld [vmem:[#allocation2 + $0x58] sm:$0xff] }
 0x122   :  { %v1177_v30 = vadd.f32 %v1176_v29, %v1175_v24  ;;  %v1240_v31 = vpop.f32.mrb[23].mxu1 }
 0x123   :  { %v1241_v32 = vadd.f32 %v1240_v31, %v1239_v28  ;;  %v788_v33 = vadd.f32 %v1238_v27, %v1174_v22  ;;  %v40_v27 = vld [vmem:[#allocation2 + $0x8] sm:$0xff] }
 0x125   :  { %v791_v34 = vadd.f32 %v1241_v32, %v1177_v30  ;;  %v48_v32 = vld [vmem:[#allocation2 + $0x48] sm:$0xff] }
 0x126   :  { %v1178_v35 = vpop.f32.mrb[24].mxu0 }
 0x127   :  { %v1242_v36 = vpop.f32.mrb[24].mxu1  ;;  %v1179_v37 = vpop.f32.mrb[25].mxu0 }
 0x128   :  { %v1180_v38 = vadd.f32 %v1179_v37, %v1178_v35  ;;  %v1243_v41 = vpop.f32.mrb[25].mxu1  ;;  %v1181_v42 = vpop.f32.mrb[26].mxu0 }
 0x129   :  { %v1244_v43 = vadd.f32 %v1243_v41, %v1242_v36  ;;  %v1245_v44 = vpop.f32.mrb[26].mxu1  ;;  %v1182_v45 = vpop.f32.mrb[27].mxu0 }
 0x12a   :  { %v1183_v46 = vadd.f32 %v1182_v45, %v1181_v42  ;;  %v1246_v47 = vpop.f32.mrb[27].mxu1  ;;  %v43_v42 = vld [vmem:[#allocation2 + $0x20] sm:$0xff] }
 0x12b   :  { %v1247_v48 = vadd.f32 %v1246_v47, %v1245_v44  ;;  %v1687_v49 = vadd.f32 %v1244_v43, %v1180_v38  ;;  %v53_v38 = vld [vmem:[#allocation2 + $0x70] sm:$0xff]  ;;  %v1710_v44 = vld [vmem:[%s1829_s2] ss:$0 sm:$0xff] }
 0x12c   :  { %v51_v47 = vld [vmem:[#allocation2 + $0x60] sm:$0xff] }
 0x12d   :  { %v1689_v50 = vadd.f32 %v1247_v48, %v1183_v46 }
 0x12e   :  { %v1184_v51 = vpop.f32.mrb[28].mxu0 }
 0x12f   :  { %v1248_v52 = vpop.f32.mrb[28].mxu1  ;;  %v1185_v55 = vpop.f32.mrb[29].mxu0 }
 0x130   :  { %v1186_v56 = vadd.f32 %v1185_v55, %v1184_v51  ;;  %v1249_v57 = vpop.f32.mrb[29].mxu1  ;;  %v1187_v58 = vpop.f32.mrb[30].mxu0  ;;  %v46_v51 = vld [vmem:[#allocation2 + $0x38] sm:$0xff] }
 0x131   :  { %v1250_v59 = vadd.f32 %v1249_v57, %v1248_v52  ;;  %v1251_v60 = vpop.f32.mrb[30].mxu1  ;;  %v1188_v61 = vpop.f32.mrb[31].mxu0  ;;  %v54_v57 = vld [vmem:[#allocation2 + $0x78] sm:$0xff] }
 0x132   :  { %v1189_v62 = vadd.f32 %v1188_v61, %v1187_v58  ;;  %v1252_v63 = vpop.f32.mrb[31].mxu1 }
 0x133   :  { %v1253_v0 = vadd.f32 %v1252_v63, %v1251_v60  ;;  %v804_v1 = vadd.f32 %v1250_v59, %v1186_v56  ;;  %v44_v59 = vld [vmem:[#allocation2 + $0x28] sm:$0xff] }
 0x135   :  { %v1691_v2 = vadd.f32 %v1253_v0, %v1189_v62  ;;  %v1718_v62 = vld [vmem:[%s1830_s3] ss:$0 sm:$0xff] }
 0x136   :  { %v1276_v6 = vpop.f32.mrb[32].mxu0 }
 0x137   :  { %v853_v7 = vadd.f32 %v1276_v6, %v1673_v39  ;;  %v1284_v9 = vpop.f32.mrb[32].mxu1  ;;  %v844_v11 = vpop.f32.mrb[33].mxu0 }
 0x138   :  { %v885_v12 = vadd.f32 %v1284_v9, %v788_v33  ;;  %v845_v13 = vadd.f32 %v844_v11, %v1669_v25  ;;  %v876_v15 = vpop.f32.mrb[33].mxu1  ;;  %v1277_v19 = vpop.f32.mrb[34].mxu0 }
 0x139   :  { %v909_v20 = vadd.f32 %v853_v7, %v41_v5  ;;  %v877_v21 = vadd.f32 %v876_v15, %v780_v17  ;;  %v856_v22 = vadd.f32 %v1277_v19, %v1675_v40  ;;  %v1285_v24 = vpop.f32.mrb[34].mxu1  ;;  %v847_v28 = vpop.f32.mrb[35].mxu0  ;;  %v52_v5 = vld [vmem:[#allocation2 + $0x68] sm:$0xff] }
 0x13a   :  { %v917_v39 = vadd.f32 %v885_v12, %v49_v8  ;;  %v907_v29 = vadd.f32 %v845_v13, %v39_v10  ;;  %v888_v30 = vadd.f32 %v1285_v24, %v791_v34  ;;  %v848_v31 = vadd.f32 %v847_v28, %v1671_v26  ;;  %v879_v33 = vpop.f32.mrb[35].mxu1  ;;  %v45_v26 = vld [vmem:[#allocation2 + $0x30] sm:$0xff] }
 0x13b   :  { %925 = vst.msk [vmem:[#allocation2 + $0x10] sm:$0xff] %vm22_vm0, %v909_v20  ;;  %v915_v25 = vadd.f32 %v877_v21, %v47_v14  ;;  %v910_v35 = vadd.f32 %v856_v22, %v42_v16  ;;  %v880_v36 = vadd.f32 %v879_v33, %v1685_v18 }
 0x13c   :  { %933 = vst.msk [vmem:[#allocation2 + $0x50] sm:$0xff] %vm22_vm0, %v917_v39  ;;  %923 = vst.msk [vmem:[#allocation2] sm:$0xff] %vm22_vm0, %v907_v29  ;;  %v918_v40 = vadd.f32 %v888_v30, %v50_v23  ;;  %v908_v17 = vadd.f32 %v848_v31, %v40_v27 }
 0x13d   :  { %931 = vst.msk [vmem:[#allocation2 + $0x40] sm:$0xff] %vm22_vm0, %v915_v25  ;;  %926 = vst.msk [vmem:[#allocation2 + $0x18] sm:$0xff] %vm22_vm0, %v910_v35  ;;  %v916_v34 = vadd.f32 %v880_v36, %v48_v32 }
 0x13e   :  { %934 = vst.msk [vmem:[#allocation2 + $0x58] sm:$0xff] %vm22_vm0, %v918_v40  ;;  %924 = vst.msk [vmem:[#allocation2 + $0x8] sm:$0xff] %vm22_vm0, %v908_v17  ;;  %v1280_v37 = vpop.f32.mrb[36].mxu0 }
 0x13f   :  { %932 = vst.msk [vmem:[#allocation2 + $0x48] sm:$0xff] %vm22_vm0, %v916_v34  ;;  %v869_v18 = vadd.f32 %v1280_v37, %v1681_v3  ;;  %v1288_v41 = vpop.f32.mrb[36].mxu1  ;;  %v860_v43 = vpop.f32.mrb[37].mxu0 }
 0x140   :  { %v901_v45 = vadd.f32 %v1288_v41, %v804_v1  ;;  %v861_v46 = vadd.f32 %v860_v43, %v1677_v53  ;;  %v892_v48 = vpop.f32.mrb[37].mxu1  ;;  %v1281_v52 = vpop.f32.mrb[38].mxu0 }
 0x141   :  { %v913_v55 = vadd.f32 %v869_v18, %v45_v26  ;;  %v893_v56 = vadd.f32 %v892_v48, %v1687_v49  ;;  %v872_v3 = vadd.f32 %v1281_v52, %v1683_v4  ;;  %v1289_v58 = vpop.f32.mrb[38].mxu1  ;;  %v863_v60 = vpop.f32.mrb[39].mxu0 }
 0x142   :  { %v944_v61 = vld [vmem:[#allocation2 + $0x10] sm:$0xff]  ;;  %v921_v53 = vadd.f32 %v901_v45, %v53_v38  ;;  %v911_v63 = vadd.f32 %v861_v46, %v43_v42  ;;  %v904_v0 = vadd.f32 %v1289_v58, %v1691_v2  ;;  %v864_v1 = vadd.f32 %v863_v60, %v1679_v54  ;;  %v895_v49 = vpop.f32.mrb[39].mxu1 }
 0x143   :  { %v967_v4 = vmul.f32 %v1710_v44, %v944_v61  ;;  %v952_v6 = vld [vmem:[#allocation2 + $0x50] sm:$0xff]  ;;  %v942_v7 = vld [vmem:[#allocation2] sm:$0xff]  ;;  %929 = vst.msk [vmem:[#allocation2 + $0x30] sm:$0xff] %vm22_vm0, %v913_v55  ;;  %v919_v8 = vadd.f32 %v893_v56, %v51_v47  ;;  %v914_v9 = vadd.f32 %v872_v3, %v46_v51  ;;  %v896_v10 = vadd.f32 %v895_v49, %v1689_v50 }
 0x144   :  { %v975_v11 = vmul.f32 %v1710_v44, %v952_v6  ;;  %v965_v12 = vmul.f32 %v1710_v44, %v942_v7  ;;  %v950_v13 = vld [vmem:[#allocation2 + $0x40] sm:$0xff]  ;;  %v945_v2 = vld [vmem:[#allocation2 + $0x18] sm:$0xff]  ;;  %937 = vst.msk [vmem:[#allocation2 + $0x70] sm:$0xff] %vm22_vm0, %v921_v53  ;;  %927 = vst.msk [vmem:[#allocation2 + $0x20] sm:$0xff] %vm22_vm0, %v911_v63  ;;  %v922_v54 = vadd.f32 %v904_v0, %v54_v57 }
 0x145   :  { %v912_v14 = vadd.f32 %v864_v1, %v44_v59  ;;  %v990_v15 = vadd.f32 %v1718_v62, %v967_v4  ;;  %v973_v16 = vmul.f32 %v1710_v44, %v950_v13  ;;  %v968_v19 = vmul.f32 %v1710_v44, %v945_v2  ;;  %v953_v20 = vld [vmem:[#allocation2 + $0x58] sm:$0xff]  ;;  %v943_v50 = vld [vmem:[#allocation2 + $0x8] sm:$0xff]  ;;  %935 = vst.msk [vmem:[#allocation2 + $0x60] sm:$0xff] %vm22_vm0, %v919_v8 }
 0x146   :  { %930 = vst.msk [vmem:[#allocation2 + $0x38] sm:$0xff] %vm22_vm0, %v914_v9  ;;  %v920_v21 = vadd.f32 %v896_v10, %v52_v5  ;;  %v998_v22 = vadd.f32 %v1718_v62, %v975_v11  ;;  %v988_v23 = vadd.f32 %v1718_v62, %v965_v12  ;;  %v976_v24 = vmul.f32 %v1710_v44, %v953_v20  ;;  %v951_v28 = vld [vmem:[#allocation2 + $0x48] sm:$0xff] }
 0x147   :  { %v966_v27 = vmul.f32 %v1710_v44, %v943_v50  ;;  %938 = vst.msk [vmem:[#allocation2 + $0x78] sm:$0xff] %vm22_vm0, %v922_v54  ;;  %928 = vst.msk [vmem:[#allocation2 + $0x28] sm:$0xff] %vm22_vm0, %v912_v14  ;;  %v1006_v39 = vmax.f32 %v990_v15, 0.0  ;;  %v996_v29 = vadd.f32 %v1718_v62, %v973_v16  ;;  %v991_v30 = vadd.f32 %v1718_v62, %v968_v19 }
 0x148   :  { %v974_v31 = vmul.f32 %v1710_v44, %v951_v28  ;;  %936 = vst.msk [vmem:[#allocation2 + $0x68] sm:$0xff] %vm22_vm0, %v920_v21  ;;  %v1014_v32 = vmax.f32 %v998_v22, 0.0  ;;  %v1004_v33 = vmax.f32 %v988_v23, 0.0  ;;  %v999_v25 = vadd.f32 %v1718_v62, %v976_v24 }
 0x149   :  { %v989_v35 = vadd.f32 %v1718_v62, %v966_v27  ;;  %1022 = vst.msk [vmem:[%s1831_s4 + $0x10] sm:$0xff] %vm22_vm0, %v1006_v39  ;;  %v1012_v36 = vmax.f32 %v996_v29, 0.0  ;;  %v1007_v40 = vmax.f32 %v991_v30, 0.0 }
 0x14a   :  { %v997_v17 = vadd.f32 %v1718_v62, %v974_v31  ;;  %1030 = vst.msk [vmem:[%s1831_s4 + $0x50] sm:$0xff] %vm22_vm0, %v1014_v32  ;;  %1020 = vst.msk [vmem:[%s1831_s4] sm:$0xff] %vm22_vm0, %v1004_v33  ;;  %v1015_v34 = vmax.f32 %v999_v25, 0.0  ;;  %v948_v37 = vld [vmem:[#allocation2 + $0x30] sm:$0xff] }
 0x14b   :  { %v1005_v26 = vmax.f32 %v989_v35, 0.0  ;;  %1028 = vst.msk [vmem:[%s1831_s4 + $0x40] sm:$0xff] %vm22_vm0, %v1012_v36  ;;  %1023 = vst.msk [vmem:[%s1831_s4 + $0x18] sm:$0xff] %vm22_vm0, %v1007_v40  ;;  %v971_v38 = vmul.f32 %v1710_v44, %v948_v37  ;;  %v956_v41 = vld [vmem:[#allocation2 + $0x70] sm:$0xff]  ;;  %v946_v42 = vld [vmem:[#allocation2 + $0x20] sm:$0xff] }
 0x14c   :  { %v1013_v18 = vmax.f32 %v997_v17, 0.0  ;;  %1031 = vst.msk [vmem:[%s1831_s4 + $0x58] sm:$0xff] %vm22_vm0, %v1015_v34  ;;  %v979_v43 = vmul.f32 %v1710_v44, %v956_v41  ;;  %v969_v45 = vmul.f32 %v1710_v44, %v946_v42  ;;  %v954_v46 = vld [vmem:[#allocation2 + $0x60] sm:$0xff] }
 0x14d   :  { %1021 = vst.msk [vmem:[%s1831_s4 + $0x8] sm:$0xff] %vm22_vm0, %v1005_v26  ;;  %v949_v47 = vld [vmem:[#allocation2 + $0x38] sm:$0xff]  ;;  %v994_v48 = vadd.f32 %v1718_v62, %v971_v38  ;;  %v977_v51 = vmul.f32 %v1710_v44, %v954_v46 }
 0x14e   :  { %1029 = vst.msk [vmem:[%s1831_s4 + $0x48] sm:$0xff] %vm22_vm0, %v1013_v18  ;;  %v972_v52 = vmul.f32 %v1710_v44, %v949_v47  ;;  %v957_v55 = vld [vmem:[#allocation2 + $0x78] sm:$0xff]  ;;  %v947_v56 = vld [vmem:[#allocation2 + $0x28] sm:$0xff]  ;;  %v1002_v3 = vadd.f32 %v1718_v62, %v979_v43  ;;  %v992_v57 = vadd.f32 %v1718_v62, %v969_v45 }
 0x14f   :  { %v980_v58 = vmul.f32 %v1710_v44, %v957_v55  ;;  %v970_v59 = vmul.f32 %v1710_v44, %v947_v56  ;;  %v955_v60 = vld [vmem:[#allocation2 + $0x68] sm:$0xff]  ;;  %v1010_v61 = vmax.f32 %v994_v48, 0.0  ;;  %v1000_v53 = vadd.f32 %v1718_v62, %v977_v51 }
 0x150   :  { %v995_v63 = vadd.f32 %v1718_v62, %v972_v52  ;;  %v978_v0 = vmul.f32 %v1710_v44, %v955_v60  ;;  %v1018_v1 = vmax.f32 %v1002_v3, 0.0  ;;  %v1008_v5 = vmax.f32 %v992_v57, 0.0 }
 0x151   :  { %v1003_v49 = vadd.f32 %v1718_v62, %v980_v58  ;;  %v993_v4 = vadd.f32 %v1718_v62, %v970_v59  ;;  %1026 = vst.msk [vmem:[%s1831_s4 + $0x30] sm:$0xff] %vm22_vm0, %v1010_v61  ;;  %v1016_v6 = vmax.f32 %v1000_v53, 0.0 }
 0x152   :  { %v1011_v7 = vmax.f32 %v995_v63, 0.0  ;;  %v1001_v8 = vadd.f32 %v1718_v62, %v978_v0  ;;  %1034 = vst.msk [vmem:[%s1831_s4 + $0x70] sm:$0xff] %vm22_vm0, %v1018_v1  ;;  %1024 = vst.msk [vmem:[%s1831_s4 + $0x20] sm:$0xff] %vm22_vm0, %v1008_v5 }
 0x153   :  { %v1019_v44 = vmax.f32 %v1003_v49, 0.0  ;;  %v1009_v9 = vmax.f32 %v993_v4, 0.0  ;;  %1032 = vst.msk [vmem:[%s1831_s4 + $0x60] sm:$0xff] %vm22_vm0, %v1016_v6 }
 0x154   :  { %1027 = vst.msk [vmem:[%s1831_s4 + $0x38] sm:$0xff] %vm22_vm0, %v1011_v7  ;;  %v1017_v62 = vmax.f32 %v1001_v8, 0.0 }
 0x155   :  { %1035 = vst.msk [vmem:[%s1831_s4 + $0x78] sm:$0xff] %vm22_vm0, %v1019_v44  ;;  %1025 = vst.msk [vmem:[%s1831_s4 + $0x28] sm:$0xff] %vm22_vm0, %v1009_v9 }
 0x156   :  { %1033 = vst.msk [vmem:[%s1831_s4 + $0x68] sm:$0xff] %vm22_vm0, %v1017_v62 }

// kernel: resnet18_forward.24
= control target key start
LH: loop header
LB: loop body
LE: loop exit
PB: predicated region body
PF: predicated region fallthrough
CT: control target
= control target key end

     0   :  { %vm25_vm0 = vcmask 523264   ;;  %s1915_s1 = inlined_call_operand.vmem [shape: bf16[576,64], index: 1, kind: input, shape index: {}]   ;;  %s1916_s0 = inlined_call_operand.vmem [shape: bf16[128,576], index: 0, kind: input, shape index: {}]   ;;  %s1917_s2 = inlined_call_operand.vmem [shape: f32[1,64], index: 2, kind: input, shape index: {}]   ;;  %s1918_s3 = inlined_call_operand.vmem [shape: f32[1,64], index: 3, kind: input, shape index: {}]   ;;  %s1919_s4 = inlined_call_operand.vmem [shape: f32[128,64], index: 4, kind: input, shape index: {}]   ;;  %s1920_s5 = inlined_call_operand.vmem [shape: f32[128,64], index: 5, kind: output, shape index: {}]  }
   0x1   :  { %v1334_v0 = vld [vmem:[%s1915_s1 + $0x40] sm:$0xff]   ;;  %v1338_v4 = vld [vmem:[%s1915_s1 + $0x48] sm:$0xff]   ;;  %v1342_v8 = vld [vmem:[%s1915_s1 + $0x50] sm:$0xff]  }
   0x2   :  { %v1335_v1 = vld [vmem:[%s1915_s1 + $0xc0] sm:$0xff]   ;;  %1161 = vmatprep.subr.bf16.mxu0 %v1334_v0  ;;  %v1339_v5 = vld [vmem:[%s1915_s1 + $0xc8] sm:$0xff]   ;;  %v1343_v9 = vld [vmem:[%s1915_s1 + $0xd0] sm:$0xff]  }
   0x3   :  { %v1336_v2 = vld [vmem:[%s1915_s1] sm:$0xff]   ;;  %1225 = vmatprep.subr.bf16.mxu1 %v1335_v1  ;;  %v1340_v6 = vld [vmem:[%s1915_s1 + $0x8] sm:$0xff]   ;;  %v1344_v10 = vld [vmem:[%s1915_s1 + $0x10] sm:$0xff]  }
   0x4   :  { %v1337_v3 = vld [vmem:[%s1915_s1 + $0x80] sm:$0xff]   ;;  %1162 = vmatpush3.bf16.msra.mxu0 %v1336_v2  ;;  %v1341_v7 = vld [vmem:[%s1915_s1 + $0x88] sm:$0xff]   ;;  %v1345_v11 = vld [vmem:[%s1915_s1 + $0x90] sm:$0xff]  }
   0x5   :  { %1226 = vmatpush3.bf16.msra.mxu1 %v1337_v3  ;;  %1163 = vmatprep.subr.bf16.mxu0 %v1338_v4  ;;  %v1346_v12 = vld [vmem:[%s1915_s1 + $0x58] sm:$0xff]   ;;  %v1350_v16 = vld [vmem:[%s1915_s1 + $0x60] sm:$0xff]   ;;  %v1354_v20 = vld [vmem:[%s1915_s1 + $0x68] sm:$0xff]  }
   0x6   :  { %1227 = vmatprep.subr.bf16.mxu1 %v1339_v5  ;;  %v1347_v13 = vld [vmem:[%s1915_s1 + $0xd8] sm:$0xff]   ;;  %v1351_v17 = vld [vmem:[%s1915_s1 + $0xe0] sm:$0xff]   ;;  %v1355_v21 = vld [vmem:[%s1915_s1 + $0xe8] sm:$0xff]  }
   0x7   :  { %v1348_v14 = vld [vmem:[%s1915_s1 + $0x18] sm:$0xff]   ;;  %v1352_v18 = vld [vmem:[%s1915_s1 + $0x20] sm:$0xff]   ;;  %v1356_v22 = vld [vmem:[%s1915_s1 + $0x28] sm:$0xff]  }
   0x8   :  { %1164 = vmatpush3.bf16.msra.mxu0 %v1340_v6  ;;  %v1349_v15 = vld [vmem:[%s1915_s1 + $0x98] sm:$0xff]   ;;  %v1353_v19 = vld [vmem:[%s1915_s1 + $0xa0] sm:$0xff]   ;;  %v1357_v23 = vld [vmem:[%s1915_s1 + $0xa8] sm:$0xff]  }
   0x9   :  { %1228 = vmatpush3.bf16.msra.mxu1 %v1341_v7  ;;  %1165 = vmatprep.subr.bf16.mxu0 %v1342_v8  ;;  %v1358_v24 = vld [vmem:[%s1915_s1 + $0x70] sm:$0xff]   ;;  %v1362_v28 = vld [vmem:[%s1915_s1 + $0x78] sm:$0xff]   ;;  %v1371_v35 = vld [vmem:[%s1916_s0 + $0xc] ss:$20 sps:$4 sm:$0xff]  }
   0xa   :  { %1229 = vmatprep.subr.bf16.mxu1 %v1343_v9  ;;  %v1359_v25 = vld [vmem:[%s1915_s1 + $0xf0] sm:$0xff]   ;;  %v1363_v29 = vld [vmem:[%s1915_s1 + $0xf8] sm:$0xff]   ;;  %v1372_v36 = vld [vmem:[%s1915_s1 + $0x100] sm:$0xff]   ;;  %748 = vmatprep.mubr.bf16.mxu1 %v1371_v35 }
   0xb   :  { %v1360_v26 = vld [vmem:[%s1915_s1 + $0x30] sm:$0xff]   ;;  %v1364_v30 = vld [vmem:[%s1915_s1 + $0x38] sm:$0xff]   ;;  %v1373_v37 = vld [vmem:[%s1916_s0 + $0x2c] ss:$20 sps:$4 sm:$0xff]  }
   0xc   :  { %1166 = vmatpush3.bf16.msra.mxu0 %v1344_v10  ;;  %v1361_v27 = vld [vmem:[%s1915_s1 + $0xb0] sm:$0xff]   ;;  %v1365_v31 = vld [vmem:[%s1915_s1 + $0xb8] sm:$0xff]   ;;  %v1385_v42 = vld [vmem:[%s1915_s1 + $0x108] sm:$0xff]  }
   0xd   :  { %1230 = vmatpush3.bf16.msra.mxu1 %v1345_v11  ;;  %1167 = vmatprep.subr.bf16.mxu0 %v1346_v12  ;;  %v1366_v32 = vld [vmem:[%s1916_s0] ss:$20 sps:$4 sm:$0xff]   ;;  %v1368_v33 = vld [vmem:[%s1916_s0 + $0x4] ss:$20 sps:$4 sm:$0xff]   ;;  %v1369_v34 = vld [vmem:[%s1916_s0 + $0x8] ss:$20 sps:$4 sm:$0xff]  }
   0xe   :  { %1231 = vmatprep.subr.bf16.mxu1 %v1347_v13  ;;  %651 = vmatprep.mubr.bf16.mxu0 %v1368_v33  ;;  %v1375_v38 = vld [vmem:[%s1916_s0 + $0x34] ss:$20 sps:$4 sm:$0xff]   ;;  %v1378_v40 = vld [vmem:[%s1916_s0 + $0x30] ss:$20 sps:$4 sm:$0xff]   ;;  %v1384_v45 = vld [vmem:[%s1916_s0 + $0x58] ss:$20 sps:$4 sm:$0xff]  }
   0xf   :  { %v1377_v39 = vld [vmem:[%s1916_s0 + $0x28] ss:$20 sps:$4 sm:$0xff]   ;;  %v1383_v44 = vld [vmem:[%s1916_s0 + $0x50] ss:$20 sps:$4 sm:$0xff]   ;;  %v1390_v50 = vld [vmem:[%s1916_s0 + $0x78] ss:$20 sps:$4 sm:$0xff]  }
  0x10   :  { %1168 = vmatpush3.bf16.msra.mxu0 %v1348_v14  ;;  %v1379_v41 = vld [vmem:[%s1916_s0 + $0x54] ss:$20 sps:$4 sm:$0xff]   ;;  %v1381_v43 = vld [vmem:[%s1916_s0 + $0x5c] ss:$20 sps:$4 sm:$0xff]   ;;  %v1388_v48 = vld [vmem:[%s1916_s0 + $0x84] ss:$20 sps:$4 sm:$0xff]  }
  0x11   :  { %1232 = vmatpush3.bf16.msra.mxu1 %v1349_v15  ;;  %1169 = vmatprep.subr.bf16.mxu0 %v1350_v16  ;;  %v1398_v46 = vld [vmem:[%s1915_s1 + $0x110] sm:$0xff]   ;;  %v1411_v49 = vld [vmem:[%s1915_s1 + $0x118] sm:$0xff]   ;;  %v1394_v53 = vld [vmem:[%s1916_s0 + $0xac] ss:$20 sps:$4 sm:$0xff]   ;;  %v1426_v12 = vmov 0.0  }
  0x12   :  { %1233 = vmatprep.subr.bf16.mxu1 %v1351_v17  ;;  %v1386_v47 = vld [vmem:[%s1916_s0 + $0x7c] ss:$20 sps:$4 sm:$0xff]   ;;  %v1391_v51 = vld [vmem:[%s1916_s0 + $0x80] ss:$20 sps:$4 sm:$0xff]   ;;  %v1392_v52 = vld [vmem:[%s1916_s0 + $0xa4] ss:$20 sps:$4 sm:$0xff]  }
  0x13   :  { %v1396_v54 = vld [vmem:[%s1916_s0 + $0xa0] ss:$20 sps:$4 sm:$0xff]   ;;  %v1397_v55 = vld [vmem:[%s1916_s0 + $0xa8] ss:$20 sps:$4 sm:$0xff]   ;;  %v1404_v59 = vld [vmem:[%s1916_s0 + $0xd0] ss:$20 sps:$4 sm:$0xff]  }
  0x14   :  { %1170 = vmatpush3.bf16.msra.mxu0 %v1352_v18  ;;  %v1399_v56 = vld [vmem:[%s1916_s0 + $0xcc] ss:$20 sps:$4 sm:$0xff]   ;;  %v1401_v57 = vld [vmem:[%s1916_s0 + $0xd4] ss:$20 sps:$4 sm:$0xff]   ;;  %v1407_v61 = vld [vmem:[%s1916_s0 + $0xfc] ss:$20 sps:$4 sm:$0xff]  }
  0x15   :  { %1234 = vmatpush3.bf16.msra.mxu1 %v1353_v19  ;;  %1171 = vmatprep.subr.bf16.mxu0 %v1354_v20  ;;  %v1403_v58 = vld [vmem:[%s1916_s0 + $0xc8] ss:$20 sps:$4 sm:$0xff]   ;;  %v1409_v62 = vld [vmem:[%s1916_s0 + $0xf0] ss:$20 sps:$4 sm:$0xff]   ;;  %v1410_v63 = vld [vmem:[%s1916_s0 + $0xf8] ss:$20 sps:$4 sm:$0xff]  }
  0x16   :  { %1235 = vmatprep.subr.bf16.mxu1 %v1355_v21  ;;  %v1405_v60 = vld [vmem:[%s1916_s0 + $0xf4] ss:$20 sps:$4 sm:$0xff]   ;;  %v1412_v0 = vld [vmem:[%s1916_s0 + $0x11c] ss:$20 sps:$4 sm:$0xff]   ;;  %v1414_v1 = vld [vmem:[%s1916_s0 + $0x124] ss:$20 sps:$4 sm:$0xff]  }
  0x17   :  { %v1416_v2 = vld [vmem:[%s1916_s0 + $0x118] ss:$20 sps:$4 sm:$0xff]   ;;  %v1417_v3 = vld [vmem:[%s1916_s0 + $0x120] ss:$20 sps:$4 sm:$0xff]   ;;  %v1418_v4 = vld [vmem:[%s1916_s0 + $0x10] ss:$20 sps:$4 sm:$0xff]  }
  0x18   :  { %1172 = vmatpush3.bf16.msra.mxu0 %v1356_v22  ;;  %v1419_v5 = vld [vmem:[%s1916_s0 + $0xb0] ss:$20 sps:$4 sm:$0xff]   ;;  %v1420_v6 = vld [vmem:[%s1916_s0 + $0x38] ss:$20 sps:$4 sm:$0xff]   ;;  %v1422_v8 = vld [vmem:[%s1916_s0 + $0x60] ss:$20 sps:$4 sm:$0xff]  }
  0x19   :  { %1236 = vmatpush3.bf16.msra.mxu1 %v1357_v23  ;;  %1173 = vmatprep.subr.bf16.mxu0 %v1358_v24  ;;  %v1421_v7 = vld [vmem:[%s1916_s0 + $0xd8] ss:$20 sps:$4 sm:$0xff]   ;;  %v1423_v9 = vld [vmem:[%s1916_s0 + $0x100] ss:$20 sps:$4 sm:$0xff]   ;;  %v1424_v10 = vld [vmem:[%s1916_s0 + $0x88] ss:$20 sps:$4 sm:$0xff]  }
  0x1a   :  { %1237 = vmatprep.subr.bf16.mxu1 %v1359_v25  ;;  %v1425_v11 = vld [vmem:[%s1916_s0 + $0x128] ss:$20 sps:$4 sm:$0xff]   ;;  %28 = vst.msk [vmem:[#allocation2 + $0x10] sm:$0xff] %vm25_vm0, %v1426_v12  ;;  %26 = vst.msk [vmem:[#allocation2] sm:$0xff] %vm25_vm0, %v1426_v12 }
  0x1b   :  { %27 = vst.msk [vmem:[#allocation2 + $0x8] sm:$0xff] %vm25_vm0, %v1426_v12  ;;  %29 = vst.msk [vmem:[#allocation2 + $0x18] sm:$0xff] %vm25_vm0, %v1426_v12 }
  0x1c   :  { %1174 = vmatpush3.bf16.msra.mxu0 %v1360_v26  ;;  %30 = vst.msk [vmem:[#allocation2 + $0x20] sm:$0xff] %vm25_vm0, %v1426_v12  ;;  %31 = vst.msk [vmem:[#allocation2 + $0x28] sm:$0xff] %vm25_vm0, %v1426_v12 }
  0x1d   :  { %1238 = vmatpush3.bf16.msra.mxu1 %v1361_v27  ;;  %1175 = vmatprep.subr.bf16.mxu0 %v1362_v28  ;;  %32 = vst.msk [vmem:[#allocation2 + $0x30] sm:$0xff] %vm25_vm0, %v1426_v12  ;;  %33 = vst.msk [vmem:[#allocation2 + $0x38] sm:$0xff] %vm25_vm0, %v1426_v12 }
  0x1e   :  { %1239 = vmatprep.subr.bf16.mxu1 %v1363_v29  ;;  %34 = vst.msk [vmem:[#allocation2 + $0x40] sm:$0xff] %vm25_vm0, %v1426_v12  ;;  %35 = vst.msk [vmem:[#allocation2 + $0x48] sm:$0xff] %vm25_vm0, %v1426_v12 }
  0x1f   :  { %36 = vst.msk [vmem:[#allocation2 + $0x50] sm:$0xff] %vm25_vm0, %v1426_v12  ;;  %37 = vst.msk [vmem:[#allocation2 + $0x58] sm:$0xff] %vm25_vm0, %v1426_v12 }
  0x20   :  { %1176 = vmatpush3.bf16.msra.mxu0 %v1364_v30  ;;  %38 = vst.msk [vmem:[#allocation2 + $0x60] sm:$0xff] %vm25_vm0, %v1426_v12  ;;  %39 = vst.msk [vmem:[#allocation2 + $0x68] sm:$0xff] %vm25_vm0, %v1426_v12 }
  0x21   :  { %1240 = vmatpush3.bf16.msra.mxu1 %v1365_v31  ;;  %1301 = vmatprep.subr.bf16.mxu0 %v1372_v36  ;;  %40 = vst.msk [vmem:[#allocation2 + $0x70] sm:$0xff] %vm25_vm0, %v1426_v12  ;;  %41 = vst.msk [vmem:[#allocation2 + $0x78] sm:$0xff] %vm25_vm0, %v1426_v12 }
  0x22   :  { %1325 = vmatprep.subr.bf16.mxu1 %v1372_v36 }
  0x23   :  { %652 = vmatmul.mubr.bf16.vlgmr.msra.gmra.mrb[0].mxu0 %v1366_v32 }
  0x24   :  { %749 = vmatmul.mubr.bf16.vlgmr.msra.gmra.mrb[0].mxu1 %v1369_v34  ;;  %1302 = vmatpush3.bf16.msra.mxu0 %v1372_v36 }
  0x25   :  { %1329 = vmatpush3.bf16.msra.mxu1 %v1372_v36  ;;  %659 = vmatprep.mubr.bf16.mxu0 %v1373_v37 }
  0x26   :  { %756 = vmatprep.mubr.bf16.mxu1 %v1375_v38  ;;  %1303 = vmatprep.subr.bf16.mxu0 %v1385_v42 }
  0x27   :  { %1326 = vmatprep.subr.bf16.mxu1 %v1385_v42 }
  0x28   :  { %1304 = vmatpush3.bf16.msra.mxu0 %v1385_v42 }
  0x29   :  { %1330 = vmatpush3.bf16.msra.mxu1 %v1385_v42  ;;  %1305 = vmatprep.subr.bf16.mxu0 %v1398_v46 }
  0x2a   :  { %1327 = vmatprep.subr.bf16.mxu1 %v1398_v46 }
  0x2b   :  { %660 = vmatmul.mubr.bf16.gmra.mrb[4].mxu0 %v1377_v39 }
  0x2c   :  { %757 = vmatmul.mubr.bf16.gmra.mrb[4].mxu1 %v1378_v40  ;;  %667 = vmatprep.mubr.bf16.mxu0 %v1379_v41 }
  0x2d   :  { %764 = vmatprep.mubr.bf16.mxu1 %v1381_v43  ;;  %1306 = vmatpush3.bf16.msra.mxu0 %v1398_v46 }
  0x2e   :  { %1331 = vmatpush3.bf16.msra.mxu1 %v1398_v46  ;;  %1307 = vmatprep.subr.bf16.mxu0 %v1411_v49 }
  0x2f   :  { %1328 = vmatprep.subr.bf16.mxu1 %v1411_v49 }
  0x31   :  { %1308 = vmatpush3.bf16.msra.mxu0 %v1411_v49 }
  0x32   :  { %1332 = vmatpush3.bf16.msra.mxu1 %v1411_v49 }
  0x33   :  { %668 = vmatmul.mubr.bf16.gmra.mrb[8].mxu0 %v1383_v44 }
  0x34   :  { %765 = vmatmul.mubr.bf16.gmra.mrb[8].mxu1 %v1384_v45  ;;  %675 = vmatprep.mubr.bf16.mxu0 %v1386_v47 }
  0x35   :  { %772 = vmatprep.mubr.bf16.mxu1 %v1388_v48 }
  0x3b   :  { %676 = vmatmul.mubr.bf16.gmra.mrb[12].mxu0 %v1390_v50 }
  0x3c   :  { %773 = vmatmul.mubr.bf16.gmra.mrb[12].mxu1 %v1391_v51  ;;  %683 = vmatprep.mubr.bf16.mxu0 %v1392_v52 }
  0x3d   :  { %780 = vmatprep.mubr.bf16.mxu1 %v1394_v53 }
  0x43   :  { %684 = vmatmul.mubr.bf16.gmra.mrb[16].mxu0 %v1396_v54 }
  0x44   :  { %781 = vmatmul.mubr.bf16.gmra.mrb[16].mxu1 %v1397_v55  ;;  %691 = vmatprep.mubr.bf16.mxu0 %v1399_v56 }
  0x45   :  { %788 = vmatprep.mubr.bf16.mxu1 %v1401_v57 }
  0x4b   :  { %692 = vmatmul.mubr.bf16.gmra.mrb[20].mxu0 %v1403_v58 }
  0x4c   :  { %789 = vmatmul.mubr.bf16.gmra.mrb[20].mxu1 %v1404_v59  ;;  %699 = vmatprep.mubr.bf16.mxu0 %v1405_v60 }
  0x4d   :  { %796 = vmatprep.mubr.bf16.mxu1 %v1407_v61 }
  0x53   :  { %700 = vmatmul.mubr.bf16.gmra.mrb[24].mxu0 %v1409_v62 }
  0x54   :  { %797 = vmatmul.mubr.bf16.gmra.mrb[24].mxu1 %v1410_v63  ;;  %707 = vmatprep.mubr.bf16.mxu0 %v1412_v0 }
  0x55   :  { %804 = vmatprep.mubr.bf16.mxu1 %v1414_v1 }
  0x5b   :  { %708 = vmatmul.mubr.bf16.gmra.mrb[28].mxu0 %v1416_v2 }
  0x5c   :  { %805 = vmatmul.mubr.bf16.gmra.mrb[28].mxu1 %v1417_v3  ;;  %1309 = vmatprep.mubr.msk.bf16.mxu0 %vm25_vm0, %v1418_v4 }
  0x5d   :  { %1317 = vmatprep.mubr.msk.bf16.mxu1 %vm25_vm0, %v1419_v5 }
  0x63   :  { %1310 = vmatmul.mubr.msk.bf16.vlgmr.msra.gmra.mrb[32].mxu0 %vm25_vm0, %v1420_v6 }
  0x64   :  { %1318 = vmatmul.mubr.msk.bf16.vlgmr.msra.gmra.mrb[32].mxu1 %vm25_vm0, %v1421_v7  ;;  %1313 = vmatprep.mubr.msk.bf16.mxu0 %vm25_vm0, %v1422_v8 }
  0x65   :  { %1321 = vmatprep.mubr.msk.bf16.mxu1 %vm25_vm0, %v1423_v9 }
  0x6b   :  { %1314 = vmatmul.mubr.msk.bf16.gmra.mrb[36].mxu0 %vm25_vm0, %v1424_v10 }
  0x6c   :  { %1322 = vmatmul.mubr.msk.bf16.gmra.mrb[36].mxu1 %vm25_vm0, %v1425_v11 }
  0xf6   :  { %v1177_v13 = vpop.f32.mrb[0].mxu0 }
  0xf7   :  { %v1241_v14 = vpop.f32.mrb[0].mxu1  ;;  %v1178_v15 = vpop.f32.mrb[1].mxu0 }
  0xf8   :  { %v1179_v16 = vadd.f32 %v1178_v15, %v1177_v13  ;;  %v1242_v17 = vpop.f32.mrb[1].mxu1  ;;  %v1180_v18 = vpop.f32.mrb[2].mxu0 }
  0xf9   :  { %v1243_v19 = vadd.f32 %v1242_v17, %v1241_v14  ;;  %v1244_v20 = vpop.f32.mrb[2].mxu1  ;;  %v1181_v21 = vpop.f32.mrb[3].mxu0 }
  0xfa   :  { %v1182_v22 = vadd.f32 %v1181_v21, %v1180_v18  ;;  %v1245_v23 = vpop.f32.mrb[3].mxu1 }
  0xfb   :  { %v1246_v24 = vadd.f32 %v1245_v23, %v1244_v20  ;;  %v1709_v25 = vadd.f32 %v1243_v19, %v1179_v16 }
  0xfd   :  { %v1711_v26 = vadd.f32 %v1246_v24, %v1182_v22 }
  0xfe   :  { %v1183_v27 = vpop.f32.mrb[4].mxu0 }
  0xff   :  { %v1247_v28 = vpop.f32.mrb[4].mxu1  ;;  %v1184_v29 = vpop.f32.mrb[5].mxu0 }
 0x100   :  { %v1185_v30 = vadd.f32 %v1184_v29, %v1183_v27  ;;  %v1248_v31 = vpop.f32.mrb[5].mxu1  ;;  %v1186_v32 = vpop.f32.mrb[6].mxu0 }
 0x101   :  { %v1249_v33 = vadd.f32 %v1248_v31, %v1247_v28  ;;  %v1250_v34 = vpop.f32.mrb[6].mxu1  ;;  %v1187_v35 = vpop.f32.mrb[7].mxu0 }
 0x102   :  { %v1188_v36 = vadd.f32 %v1187_v35, %v1186_v32  ;;  %v1251_v37 = vpop.f32.mrb[7].mxu1 }
 0x103   :  { %v1252_v38 = vadd.f32 %v1251_v37, %v1250_v34  ;;  %v1713_v39 = vadd.f32 %v1249_v33, %v1185_v30 }
 0x105   :  { %v1715_v40 = vadd.f32 %v1252_v38, %v1188_v36 }
 0x106   :  { %v1189_v41 = vpop.f32.mrb[8].mxu0 }
 0x107   :  { %v1253_v42 = vpop.f32.mrb[8].mxu1  ;;  %v1190_v43 = vpop.f32.mrb[9].mxu0 }
 0x108   :  { %v1191_v44 = vadd.f32 %v1190_v43, %v1189_v41  ;;  %v1254_v45 = vpop.f32.mrb[9].mxu1  ;;  %v1192_v46 = vpop.f32.mrb[10].mxu0 }
 0x109   :  { %v1255_v47 = vadd.f32 %v1254_v45, %v1253_v42  ;;  %v1256_v48 = vpop.f32.mrb[10].mxu1  ;;  %v1193_v49 = vpop.f32.mrb[11].mxu0 }
 0x10a   :  { %v1194_v50 = vadd.f32 %v1193_v49, %v1192_v46  ;;  %v1257_v51 = vpop.f32.mrb[11].mxu1 }
 0x10b   :  { %v1258_v52 = vadd.f32 %v1257_v51, %v1256_v48  ;;  %v1717_v53 = vadd.f32 %v1255_v47, %v1191_v44 }
 0x10d   :  { %v1719_v54 = vadd.f32 %v1258_v52, %v1194_v50 }
 0x10e   :  { %v1195_v55 = vpop.f32.mrb[12].mxu0 }
 0x10f   :  { %v1259_v56 = vpop.f32.mrb[12].mxu1  ;;  %v1196_v57 = vpop.f32.mrb[13].mxu0 }
 0x110   :  { %v1197_v58 = vadd.f32 %v1196_v57, %v1195_v55  ;;  %v1260_v59 = vpop.f32.mrb[13].mxu1  ;;  %v1198_v60 = vpop.f32.mrb[14].mxu0 }
 0x111   :  { %v1261_v61 = vadd.f32 %v1260_v59, %v1259_v56  ;;  %v1262_v62 = vpop.f32.mrb[14].mxu1  ;;  %v1199_v63 = vpop.f32.mrb[15].mxu0 }
 0x112   :  { %v1200_v0 = vadd.f32 %v1199_v63, %v1198_v60  ;;  %v1263_v1 = vpop.f32.mrb[15].mxu1 }
 0x113   :  { %v1264_v2 = vadd.f32 %v1263_v1, %v1262_v62  ;;  %v1721_v3 = vadd.f32 %v1261_v61, %v1197_v58 }
 0x115   :  { %v1723_v4 = vadd.f32 %v1264_v2, %v1200_v0 }
 0x116   :  { %v1201_v5 = vpop.f32.mrb[16].mxu0 }
 0x117   :  { %v1265_v6 = vpop.f32.mrb[16].mxu1  ;;  %v1202_v7 = vpop.f32.mrb[17].mxu0 }
 0x118   :  { %v1203_v8 = vadd.f32 %v1202_v7, %v1201_v5  ;;  %v1266_v9 = vpop.f32.mrb[17].mxu1  ;;  %v1204_v10 = vpop.f32.mrb[18].mxu0  ;;  %v44_v5 = vld [vmem:[#allocation2 + $0x10] sm:$0xff] }
 0x119   :  { %v1267_v11 = vadd.f32 %v1266_v9, %v1265_v6  ;;  %v1268_v12 = vpop.f32.mrb[18].mxu1  ;;  %v1205_v13 = vpop.f32.mrb[19].mxu0 }
 0x11a   :  { %v1206_v14 = vadd.f32 %v1205_v13, %v1204_v10  ;;  %v1269_v15 = vpop.f32.mrb[19].mxu1  ;;  %v42_v10 = vld [vmem:[#allocation2] sm:$0xff] }
 0x11b   :  { %v1270_v16 = vadd.f32 %v1269_v15, %v1268_v12  ;;  %v783_v17 = vadd.f32 %v1267_v11, %v1203_v8  ;;  %v52_v8 = vld [vmem:[#allocation2 + $0x50] sm:$0xff] }
 0x11d   :  { %v1725_v18 = vadd.f32 %v1270_v16, %v1206_v14  ;;  %v50_v14 = vld [vmem:[#allocation2 + $0x40] sm:$0xff]  ;;  %v45_v16 = vld [vmem:[#allocation2 + $0x18] sm:$0xff] }
 0x11e   :  { %v1207_v19 = vpop.f32.mrb[20].mxu0 }
 0x11f   :  { %v1271_v20 = vpop.f32.mrb[20].mxu1  ;;  %v1208_v21 = vpop.f32.mrb[21].mxu0 }
 0x120   :  { %v1209_v22 = vadd.f32 %v1208_v21, %v1207_v19  ;;  %v1272_v23 = vpop.f32.mrb[21].mxu1  ;;  %v1210_v24 = vpop.f32.mrb[22].mxu0 }
 0x121   :  { %v1273_v27 = vadd.f32 %v1272_v23, %v1271_v20  ;;  %v1274_v28 = vpop.f32.mrb[22].mxu1  ;;  %v1211_v29 = vpop.f32.mrb[23].mxu0  ;;  %v53_v23 = vld [vmem:[#allocation2 + $0x58] sm:$0xff] }
 0x122   :  { %v1212_v30 = vadd.f32 %v1211_v29, %v1210_v24  ;;  %v1275_v31 = vpop.f32.mrb[23].mxu1 }
 0x123   :  { %v1276_v32 = vadd.f32 %v1275_v31, %v1274_v28  ;;  %v791_v33 = vadd.f32 %v1273_v27, %v1209_v22  ;;  %v43_v27 = vld [vmem:[#allocation2 + $0x8] sm:$0xff] }
 0x125   :  { %v794_v34 = vadd.f32 %v1276_v32, %v1212_v30  ;;  %v51_v32 = vld [vmem:[#allocation2 + $0x48] sm:$0xff] }
 0x126   :  { %v1213_v35 = vpop.f32.mrb[24].mxu0 }
 0x127   :  { %v1277_v36 = vpop.f32.mrb[24].mxu1  ;;  %v1214_v37 = vpop.f32.mrb[25].mxu0 }
 0x128   :  { %v1215_v38 = vadd.f32 %v1214_v37, %v1213_v35  ;;  %v1278_v41 = vpop.f32.mrb[25].mxu1  ;;  %v1216_v42 = vpop.f32.mrb[26].mxu0 }
 0x129   :  { %v1279_v43 = vadd.f32 %v1278_v41, %v1277_v36  ;;  %v1280_v44 = vpop.f32.mrb[26].mxu1  ;;  %v1217_v45 = vpop.f32.mrb[27].mxu0 }
 0x12a   :  { %v1218_v46 = vadd.f32 %v1217_v45, %v1216_v42  ;;  %v1281_v47 = vpop.f32.mrb[27].mxu1  ;;  %v46_v42 = vld [vmem:[#allocation2 + $0x20] sm:$0xff] }
 0x12b   :  { %v1282_v48 = vadd.f32 %v1281_v47, %v1280_v44  ;;  %v1727_v49 = vadd.f32 %v1279_v43, %v1215_v38  ;;  %v56_v38 = vld [vmem:[#allocation2 + $0x70] sm:$0xff]  ;;  %v1750_v44 = vld [vmem:[%s1917_s2] ss:$0 sm:$0xff] }
 0x12c   :  { %v54_v47 = vld [vmem:[#allocation2 + $0x60] sm:$0xff] }
 0x12d   :  { %v1729_v50 = vadd.f32 %v1282_v48, %v1218_v46 }
 0x12e   :  { %v1219_v51 = vpop.f32.mrb[28].mxu0 }
 0x12f   :  { %v1283_v52 = vpop.f32.mrb[28].mxu1  ;;  %v1220_v55 = vpop.f32.mrb[29].mxu0 }
 0x130   :  { %v1221_v56 = vadd.f32 %v1220_v55, %v1219_v51  ;;  %v1284_v57 = vpop.f32.mrb[29].mxu1  ;;  %v1222_v58 = vpop.f32.mrb[30].mxu0  ;;  %v49_v51 = vld [vmem:[#allocation2 + $0x38] sm:$0xff] }
 0x131   :  { %v1285_v59 = vadd.f32 %v1284_v57, %v1283_v52  ;;  %v1286_v60 = vpop.f32.mrb[30].mxu1  ;;  %v1223_v61 = vpop.f32.mrb[31].mxu0  ;;  %v57_v57 = vld [vmem:[#allocation2 + $0x78] sm:$0xff] }
 0x132   :  { %v1224_v62 = vadd.f32 %v1223_v61, %v1222_v58  ;;  %v1287_v63 = vpop.f32.mrb[31].mxu1 }
 0x133   :  { %v1288_v0 = vadd.f32 %v1287_v63, %v1286_v60  ;;  %v807_v1 = vadd.f32 %v1285_v59, %v1221_v56  ;;  %v47_v59 = vld [vmem:[#allocation2 + $0x28] sm:$0xff] }
 0x135   :  { %v1731_v2 = vadd.f32 %v1288_v0, %v1224_v62  ;;  %v1758_v62 = vld [vmem:[%s1918_s3] ss:$0 sm:$0xff] }
 0x136   :  { %v1311_v6 = vpop.f32.mrb[32].mxu0 }
 0x137   :  { %v856_v7 = vadd.f32 %v1311_v6, %v1713_v39  ;;  %v1319_v9 = vpop.f32.mrb[32].mxu1  ;;  %v847_v11 = vpop.f32.mrb[33].mxu0  ;;  %v1009_v6 = vld [vmem:[%s1919_s4 + $0x10] sm:$0xff] }
 0x138   :  { %v888_v12 = vadd.f32 %v1319_v9, %v791_v33  ;;  %v848_v13 = vadd.f32 %v847_v11, %v1709_v25  ;;  %v879_v15 = vpop.f32.mrb[33].mxu1  ;;  %v1312_v19 = vpop.f32.mrb[34].mxu0 }
 0x139   :  { %v912_v20 = vadd.f32 %v856_v7, %v44_v5  ;;  %v880_v21 = vadd.f32 %v879_v15, %v783_v17  ;;  %v859_v22 = vadd.f32 %v1312_v19, %v1715_v40  ;;  %v1320_v24 = vpop.f32.mrb[34].mxu1  ;;  %v850_v28 = vpop.f32.mrb[35].mxu0  ;;  %v55_v5 = vld [vmem:[#allocation2 + $0x68] sm:$0xff] }
 0x13a   :  { %v920_v39 = vadd.f32 %v888_v12, %v52_v8  ;;  %v910_v29 = vadd.f32 %v848_v13, %v42_v10  ;;  %v891_v30 = vadd.f32 %v1320_v24, %v794_v34  ;;  %v851_v31 = vadd.f32 %v850_v28, %v1711_v26  ;;  %v882_v33 = vpop.f32.mrb[35].mxu1  ;;  %v48_v26 = vld [vmem:[#allocation2 + $0x30] sm:$0xff] }
 0x13b   :  { %928 = vst.msk [vmem:[#allocation2 + $0x10] sm:$0xff] %vm25_vm0, %v912_v20  ;;  %v918_v25 = vadd.f32 %v880_v21, %v50_v14  ;;  %v913_v35 = vadd.f32 %v859_v22, %v45_v16  ;;  %v883_v36 = vadd.f32 %v882_v33, %v1725_v18 }
 0x13c   :  { %936 = vst.msk [vmem:[#allocation2 + $0x50] sm:$0xff] %vm25_vm0, %v920_v39  ;;  %926 = vst.msk [vmem:[#allocation2] sm:$0xff] %vm25_vm0, %v910_v29  ;;  %v921_v40 = vadd.f32 %v891_v30, %v53_v23  ;;  %v911_v17 = vadd.f32 %v851_v31, %v43_v27  ;;  %v1015_v39 = vld [vmem:[%s1919_s4 + $0x40] sm:$0xff]  ;;  %v1010_v29 = vld [vmem:[%s1919_s4 + $0x18] sm:$0xff] }
 0x13d   :  { %934 = vst.msk [vmem:[#allocation2 + $0x40] sm:$0xff] %vm25_vm0, %v918_v25  ;;  %929 = vst.msk [vmem:[#allocation2 + $0x18] sm:$0xff] %vm25_vm0, %v913_v35  ;;  %v919_v34 = vadd.f32 %v883_v36, %v51_v32  ;;  %v1018_v36 = vld [vmem:[%s1919_s4 + $0x58] sm:$0xff] }
 0x13e   :  { %937 = vst.msk [vmem:[#allocation2 + $0x58] sm:$0xff] %vm25_vm0, %v921_v40  ;;  %927 = vst.msk [vmem:[#allocation2 + $0x8] sm:$0xff] %vm25_vm0, %v911_v17  ;;  %v1315_v37 = vpop.f32.mrb[36].mxu0  ;;  %v1008_v40 = vld [vmem:[%s1919_s4 + $0x8] sm:$0xff] }
 0x13f   :  { %935 = vst.msk [vmem:[#allocation2 + $0x48] sm:$0xff] %vm25_vm0, %v919_v34  ;;  %v872_v18 = vadd.f32 %v1315_v37, %v1721_v3  ;;  %v1323_v41 = vpop.f32.mrb[36].mxu1  ;;  %v863_v43 = vpop.f32.mrb[37].mxu0 }
 0x140   :  { %v904_v45 = vadd.f32 %v1323_v41, %v807_v1  ;;  %v864_v46 = vadd.f32 %v863_v43, %v1717_v53  ;;  %v895_v48 = vpop.f32.mrb[37].mxu1  ;;  %v1316_v52 = vpop.f32.mrb[38].mxu0 }
 0x141   :  { %v916_v55 = vadd.f32 %v872_v18, %v48_v26  ;;  %v896_v56 = vadd.f32 %v895_v48, %v1727_v49  ;;  %v875_v3 = vadd.f32 %v1316_v52, %v1723_v4  ;;  %v1324_v58 = vpop.f32.mrb[38].mxu1  ;;  %v866_v60 = vpop.f32.mrb[39].mxu0 }
 0x142   :  { %v947_v61 = vld [vmem:[#allocation2 + $0x10] sm:$0xff]  ;;  %v924_v53 = vadd.f32 %v904_v45, %v56_v38  ;;  %v914_v63 = vadd.f32 %v864_v46, %v46_v42  ;;  %v907_v0 = vadd.f32 %v1324_v58, %v1731_v2  ;;  %v867_v1 = vadd.f32 %v866_v60, %v1719_v54  ;;  %v898_v49 = vpop.f32.mrb[39].mxu1  ;;  %v1016_v38 = vld [vmem:[%s1919_s4 + $0x48] sm:$0xff] }
 0x143   :  { %v970_v4 = vmul.f32 %v1750_v44, %v947_v61  ;;  %v955_v7 = vld [vmem:[#allocation2 + $0x50] sm:$0xff]  ;;  %v945_v8 = vld [vmem:[#allocation2] sm:$0xff]  ;;  %932 = vst.msk [vmem:[#allocation2 + $0x30] sm:$0xff] %vm25_vm0, %v916_v55  ;;  %v922_v9 = vadd.f32 %v896_v56, %v54_v47  ;;  %v917_v10 = vadd.f32 %v875_v3, %v49_v51  ;;  %v899_v11 = vadd.f32 %v898_v49, %v1729_v50 }
 0x144   :  { %v978_v2 = vmul.f32 %v1750_v44, %v955_v7  ;;  %v1017_v54 = vld [vmem:[%s1919_s4 + $0x50] sm:$0xff]  ;;  %v968_v12 = vmul.f32 %v1750_v44, %v945_v8  ;;  %v953_v13 = vld [vmem:[#allocation2 + $0x40] sm:$0xff]  ;;  %v948_v14 = vld [vmem:[#allocation2 + $0x18] sm:$0xff]  ;;  %940 = vst.msk [vmem:[#allocation2 + $0x70] sm:$0xff] %vm25_vm0, %v924_v53  ;;  %v925_v15 = vadd.f32 %v907_v0, %v57_v57  ;;  %v915_v16 = vadd.f32 %v867_v1, %v47_v59 }
 0x145   :  { %930 = vst.msk [vmem:[#allocation2 + $0x20] sm:$0xff] %vm25_vm0, %v914_v63  ;;  %v993_v19 = vadd.f32 %v1758_v62, %v970_v4  ;;  %v1007_v50 = vld [vmem:[%s1919_s4] sm:$0xff]  ;;  %v976_v20 = vmul.f32 %v1750_v44, %v953_v13  ;;  %v971_v21 = vmul.f32 %v1750_v44, %v948_v14  ;;  %v956_v22 = vld [vmem:[#allocation2 + $0x58] sm:$0xff]  ;;  %v946_v23 = vld [vmem:[#allocation2 + $0x8] sm:$0xff]  ;;  %v923_v24 = vadd.f32 %v899_v11, %v55_v5 }
 0x146   :  { %938 = vst.msk [vmem:[#allocation2 + $0x60] sm:$0xff] %vm25_vm0, %v922_v9  ;;  %933 = vst.msk [vmem:[#allocation2 + $0x38] sm:$0xff] %vm25_vm0, %v917_v10  ;;  %v1001_v27 = vadd.f32 %v1758_v62, %v978_v2  ;;  %v991_v28 = vadd.f32 %v1758_v62, %v968_v12  ;;  %v979_v30 = vmul.f32 %v1750_v44, %v956_v22  ;;  %v954_v32 = vld [vmem:[#allocation2 + $0x48] sm:$0xff]  ;;  %v1013_v58 = vld [vmem:[%s1919_s4 + $0x30] sm:$0xff] }
 0x147   :  { %v969_v31 = vmul.f32 %v1750_v44, %v946_v23  ;;  %941 = vst.msk [vmem:[#allocation2 + $0x78] sm:$0xff] %vm25_vm0, %v925_v15  ;;  %931 = vst.msk [vmem:[#allocation2 + $0x28] sm:$0xff] %vm25_vm0, %v915_v16  ;;  %v1025_v33 = vadd.f32 %v1009_v6, %v993_v19  ;;  %v999_v25 = vadd.f32 %v1758_v62, %v976_v20  ;;  %v1021_v0 = vld [vmem:[%s1919_s4 + $0x70] sm:$0xff]  ;;  %v1011_v7 = vld [vmem:[%s1919_s4 + $0x20] sm:$0xff] }
 0x148   :  { %v994_v35 = vadd.f32 %v1758_v62, %v971_v21  ;;  %v977_v17 = vmul.f32 %v1750_v44, %v954_v32  ;;  %939 = vst.msk [vmem:[#allocation2 + $0x68] sm:$0xff] %vm25_vm0, %v923_v24  ;;  %v1033_v34 = vadd.f32 %v1017_v54, %v1001_v27  ;;  %v1023_v26 = vadd.f32 %v1007_v50, %v991_v28  ;;  %v1019_v12 = vld [vmem:[%s1919_s4 + $0x60] sm:$0xff]  ;;  %v1014_v13 = vld [vmem:[%s1919_s4 + $0x38] sm:$0xff]  ;;  %v1012_v22 = vld [vmem:[%s1919_s4 + $0x28] sm:$0xff] }
 0x149   :  { %v1002_v37 = vadd.f32 %v1758_v62, %v979_v30  ;;  %v992_v18 = vadd.f32 %v1758_v62, %v969_v31  ;;  %v1041_v41 = vmax.f32 %v1025_v33, 0.0  ;;  %v1031_v42 = vadd.f32 %v1015_v39, %v999_v25  ;;  %v1022_v21 = vld [vmem:[%s1919_s4 + $0x78] sm:$0xff] }
 0x14a   :  { %v1026_v43 = vadd.f32 %v1010_v29, %v994_v35  ;;  %v1000_v45 = vadd.f32 %v1758_v62, %v977_v17  ;;  %v1049_v46 = vmax.f32 %v1033_v34, 0.0  ;;  %v1039_v47 = vmax.f32 %v1023_v26, 0.0  ;;  %v951_v52 = vld [vmem:[#allocation2 + $0x30] sm:$0xff]  ;;  %v1020_v29 = vld [vmem:[%s1919_s4 + $0x68] sm:$0xff] }
 0x14b   :  { %v1034_v48 = vadd.f32 %v1018_v36, %v1002_v37  ;;  %v1024_v51 = vadd.f32 %v1008_v40, %v992_v18  ;;  %1057 = vst.msk [vmem:[%s1920_s5 + $0x10] sm:$0xff] %vm25_vm0, %v1041_v41  ;;  %v1047_v55 = vmax.f32 %v1031_v42, 0.0  ;;  %v974_v57 = vmul.f32 %v1750_v44, %v951_v52  ;;  %v959_v59 = vld [vmem:[#allocation2 + $0x70] sm:$0xff] }
 0x14c   :  { %v1042_v56 = vmax.f32 %v1026_v43, 0.0  ;;  %v1032_v3 = vadd.f32 %v1016_v38, %v1000_v45  ;;  %v949_v60 = vld [vmem:[#allocation2 + $0x20] sm:$0xff]  ;;  %1065 = vst.msk [vmem:[%s1920_s5 + $0x50] sm:$0xff] %vm25_vm0, %v1049_v46  ;;  %1055 = vst.msk [vmem:[%s1920_s5] sm:$0xff] %vm25_vm0, %v1039_v47  ;;  %v982_v63 = vmul.f32 %v1750_v44, %v959_v59 }
 0x14d   :  { %v1050_v61 = vmax.f32 %v1034_v48, 0.0  ;;  %v1040_v53 = vmax.f32 %v1024_v51, 0.0  ;;  %v972_v1 = vmul.f32 %v1750_v44, %v949_v60  ;;  %v957_v5 = vld [vmem:[#allocation2 + $0x60] sm:$0xff]  ;;  %v952_v49 = vld [vmem:[#allocation2 + $0x38] sm:$0xff]  ;;  %1063 = vst.msk [vmem:[%s1920_s5 + $0x40] sm:$0xff] %vm25_vm0, %v1047_v55  ;;  %v997_v6 = vadd.f32 %v1758_v62, %v974_v57 }
 0x14e   :  { %1058 = vst.msk [vmem:[%s1920_s5 + $0x18] sm:$0xff] %vm25_vm0, %v1042_v56  ;;  %v1048_v4 = vmax.f32 %v1032_v3, 0.0  ;;  %v980_v8 = vmul.f32 %v1750_v44, %v957_v5  ;;  %v975_v9 = vmul.f32 %v1750_v44, %v952_v49  ;;  %v960_v10 = vld [vmem:[#allocation2 + $0x78] sm:$0xff]  ;;  %v950_v11 = vld [vmem:[#allocation2 + $0x28] sm:$0xff]  ;;  %v1005_v2 = vadd.f32 %v1758_v62, %v982_v63 }
 0x14f   :  { %1066 = vst.msk [vmem:[%s1920_s5 + $0x58] sm:$0xff] %vm25_vm0, %v1050_v61  ;;  %1056 = vst.msk [vmem:[%s1920_s5 + $0x8] sm:$0xff] %vm25_vm0, %v1040_v53  ;;  %v995_v54 = vadd.f32 %v1758_v62, %v972_v1  ;;  %v983_v14 = vmul.f32 %v1750_v44, %v960_v10  ;;  %v973_v15 = vmul.f32 %v1750_v44, %v950_v11  ;;  %v958_v16 = vld [vmem:[#allocation2 + $0x68] sm:$0xff] }
 0x150   :  { %1064 = vst.msk [vmem:[%s1920_s5 + $0x48] sm:$0xff] %vm25_vm0, %v1048_v4  ;;  %v1029_v19 = vadd.f32 %v1013_v58, %v997_v6  ;;  %v1003_v50 = vadd.f32 %v1758_v62, %v980_v8  ;;  %v998_v20 = vadd.f32 %v1758_v62, %v975_v9  ;;  %v981_v23 = vmul.f32 %v1750_v44, %v958_v16 }
 0x151   :  { %v1037_v24 = vadd.f32 %v1021_v0, %v1005_v2  ;;  %v1027_v27 = vadd.f32 %v1011_v7, %v995_v54  ;;  %v1006_v28 = vadd.f32 %v1758_v62, %v983_v14  ;;  %v996_v39 = vadd.f32 %v1758_v62, %v973_v15 }
 0x152   :  { %v1045_v30 = vmax.f32 %v1029_v19, 0.0  ;;  %v1035_v31 = vadd.f32 %v1019_v12, %v1003_v50  ;;  %v1030_v32 = vadd.f32 %v1014_v13, %v998_v20  ;;  %v1004_v33 = vadd.f32 %v1758_v62, %v981_v23 }
 0x153   :  { %v1053_v25 = vmax.f32 %v1037_v24, 0.0  ;;  %v1043_v35 = vmax.f32 %v1027_v27, 0.0  ;;  %v1038_v36 = vadd.f32 %v1022_v21, %v1006_v28  ;;  %v1028_v40 = vadd.f32 %v1012_v22, %v996_v39 }
 0x154   :  { %1061 = vst.msk [vmem:[%s1920_s5 + $0x30] sm:$0xff] %vm25_vm0, %v1045_v30  ;;  %v1051_v44 = vmax.f32 %v1035_v31, 0.0  ;;  %v1046_v17 = vmax.f32 %v1030_v32, 0.0  ;;  %v1036_v34 = vadd.f32 %v1020_v29, %v1004_v33 }
 0x155   :  { %1069 = vst.msk [vmem:[%s1920_s5 + $0x70] sm:$0xff] %vm25_vm0, %v1053_v25  ;;  %1059 = vst.msk [vmem:[%s1920_s5 + $0x20] sm:$0xff] %vm25_vm0, %v1043_v35  ;;  %v1054_v62 = vmax.f32 %v1038_v36, 0.0  ;;  %v1044_v26 = vmax.f32 %v1028_v40, 0.0 }
 0x156   :  { %1067 = vst.msk [vmem:[%s1920_s5 + $0x60] sm:$0xff] %vm25_vm0, %v1051_v44  ;;  %1062 = vst.msk [vmem:[%s1920_s5 + $0x38] sm:$0xff] %vm25_vm0, %v1046_v17  ;;  %v1052_v37 = vmax.f32 %v1036_v34, 0.0 }
 0x157   :  { %1070 = vst.msk [vmem:[%s1920_s5 + $0x78] sm:$0xff] %vm25_vm0, %v1054_v62  ;;  %1060 = vst.msk [vmem:[%s1920_s5 + $0x28] sm:$0xff] %vm25_vm0, %v1044_v26 }
 0x158   :  { %1068 = vst.msk [vmem:[%s1920_s5 + $0x68] sm:$0xff] %vm25_vm0, %v1052_v37 }

// kernel: resnet18_forward.28
= control target key start
LH: loop header
LB: loop body
LE: loop exit
PB: predicated region body
PF: predicated region fallthrough
CT: control target
= control target key end

     0   :  { %vm76_vm0 = vcmask 523264   ;;  %s272_s1 = inlined_call_operand.vmem [shape: bf16[64,128], index: 1, kind: input, shape index: {}]   ;;  %s273_s0 = inlined_call_operand.vmem [shape: bf16[32,64], index: 0, kind: input, shape index: {}]   ;;  %s274_s2 = inlined_call_operand.vmem [shape: f32[1,128], index: 2, kind: input, shape index: {}]   ;;  %s275_s3 = inlined_call_operand.vmem [shape: f32[1,128], index: 3, kind: input, shape index: {}]   ;;  %s276_s4 = inlined_call_operand.vmem [shape: f32[32,128], index: 4, kind: output, shape index: {}]  }
   0x1   :  { %v205_v0 = vld [vmem:[%s272_s1] sm:$0xff]   ;;  %v206_v1 = vld [vmem:[%s272_s1 + $0x8] sm:$0xff]   ;;  %v207_v2 = vld [vmem:[%s272_s1 + $0x10] sm:$0xff]  }
   0x2   :  { %193 = vmatprep.subr.bf16.mxu0 %v205_v0  ;;  %v209_v3 = vld [vmem:[%s273_s0] sm:$0xff]   ;;  %v208_v4 = vld [vmem:[%s272_s1 + $0x18] sm:$0xff]   ;;  %v210_v5 = vld [vmem:[%s273_s0 + $0x8] sm:$0xff]  }
   0x3   :  { %194 = vmatpush3.bf16.msra.mxu0 %v205_v0  ;;  %201 = vmatprep.mubr.msk.bf16.mxu0 %vm76_vm0, %v209_v3  ;;  %v185_v6 = vld [vmem:[%s274_s2] ss:$0 sm:$0xff] }
   0x4   :  { %195 = vmatprep.subr.bf16.mxu0 %v206_v1  ;;  %v186_v8 = vld [vmem:[%s275_s3] ss:$0 sm:$0xff] }
   0x7   :  { %196 = vmatpush3.bf16.msra.mxu0 %v206_v1 }
   0x8   :  { %197 = vmatprep.subr.bf16.mxu0 %v207_v2 }
   0xb   :  { %198 = vmatpush3.bf16.msra.mxu0 %v207_v2 }
   0xc   :  { %199 = vmatprep.subr.bf16.mxu0 %v208_v4 }
   0xf   :  { %200 = vmatpush3.bf16.msra.mxu0 %v208_v4 }
  0x12   :  { %202 = vmatmul.mubr.msk.bf16.vlgmr.msra.gmra.mrb[0].mxu0 %vm76_vm0, %v210_v5 }
  0xe5   :  { %v203_v7 = vpop.f32.mrb[0].mxu0 }
  0xe6   :  { %v156_v9 = vmul.f32 %v203_v7, %v185_v6  ;;  %v117_v10 = vpop.f32.mrb[1].mxu0 }
  0xe7   :  { %v154_v11 = vmul.f32 %v185_v6, %v117_v10  ;;  %v204_v12 = vpop.f32.mrb[2].mxu0 }
  0xe8   :  { %v167_v13 = vadd.f32 %v186_v8, %v156_v9  ;;  %v157_v14 = vmul.f32 %v204_v12, %v185_v6  ;;  %v120_v15 = vpop.f32.mrb[3].mxu0 }
  0xe9   :  { %v165_v16 = vadd.f32 %v186_v8, %v154_v11  ;;  %v155_v17 = vmul.f32 %v185_v6, %v120_v15 }
  0xea   :  { %171 = vst [vmem:[%s276_s4 + $0x10] sm:$0xff] %v167_v13  ;;  %v168_v18 = vadd.f32 %v186_v8, %v157_v14 }
  0xeb   :  { %169 = vst [vmem:[%s276_s4] sm:$0xff] %v165_v16  ;;  %v166_v19 = vadd.f32 %v186_v8, %v155_v17 }
  0xec   :  { %172 = vst [vmem:[%s276_s4 + $0x18] sm:$0xff] %v168_v18 }
  0xed   :  { %170 = vst [vmem:[%s276_s4 + $0x8] sm:$0xff] %v166_v19 }

// kernel: resnet18_forward.27
= control target key start
LH: loop header
LB: loop body
LE: loop exit
PB: predicated region body
PF: predicated region fallthrough
CT: control target
= control target key end

     0   :  { %vm380_vm0 = vcmask 523264   ;;  %s938_s1 = inlined_call_operand.vmem [shape: bf16[576,128], index: 1, kind: input, shape index: {}]   ;;  %s939_s0 = inlined_call_operand.vmem [shape: bf16[32,576], index: 0, kind: input, shape index: {}]   ;;  %s940_s2 = inlined_call_operand.vmem [shape: f32[1,128], index: 2, kind: input, shape index: {}]   ;;  %s941_s3 = inlined_call_operand.vmem [shape: f32[1,128], index: 3, kind: input, shape index: {}]   ;;  %s942_s4 = inlined_call_operand.vmem [shape: f32[32,128], index: 4, kind: output, shape index: {}]  }
   0x1   :  { %v707_v0 = vld [vmem:[%s938_s1 + $0x40] sm:$0xff]   ;;  %v711_v4 = vld [vmem:[%s938_s1 + $0x48] sm:$0xff]   ;;  %v715_v8 = vld [vmem:[%s938_s1 + $0x50] sm:$0xff]  }
   0x2   :  { %v708_v1 = vld [vmem:[%s938_s1 + $0xc0] sm:$0xff]   ;;  %633 = vmatprep.subr.bf16.mxu0 %v707_v0  ;;  %v712_v5 = vld [vmem:[%s938_s1 + $0xc8] sm:$0xff]   ;;  %v716_v9 = vld [vmem:[%s938_s1 + $0xd0] sm:$0xff]  }
   0x3   :  { %v709_v2 = vld [vmem:[%s938_s1] sm:$0xff]   ;;  %661 = vmatprep.subr.bf16.mxu1 %v708_v1  ;;  %v713_v6 = vld [vmem:[%s938_s1 + $0x8] sm:$0xff]   ;;  %v717_v10 = vld [vmem:[%s938_s1 + $0x10] sm:$0xff]  }
   0x4   :  { %v710_v3 = vld [vmem:[%s938_s1 + $0x80] sm:$0xff]   ;;  %634 = vmatpush3.bf16.msra.mxu0 %v709_v2  ;;  %v714_v7 = vld [vmem:[%s938_s1 + $0x88] sm:$0xff]   ;;  %v718_v11 = vld [vmem:[%s938_s1 + $0x90] sm:$0xff]  }
   0x5   :  { %662 = vmatpush3.bf16.msra.mxu1 %v710_v3  ;;  %635 = vmatprep.subr.bf16.mxu0 %v711_v4  ;;  %v719_v12 = vld [vmem:[%s938_s1 + $0x58] sm:$0xff]   ;;  %v723_v16 = vld [vmem:[%s938_s1 + $0x60] sm:$0xff]   ;;  %v727_v20 = vld [vmem:[%s938_s1 + $0x68] sm:$0xff]  }
   0x6   :  { %663 = vmatprep.subr.bf16.mxu1 %v712_v5  ;;  %v720_v13 = vld [vmem:[%s938_s1 + $0xd8] sm:$0xff]   ;;  %v724_v17 = vld [vmem:[%s938_s1 + $0xe0] sm:$0xff]   ;;  %v728_v21 = vld [vmem:[%s938_s1 + $0xe8] sm:$0xff]  }
   0x7   :  { %v721_v14 = vld [vmem:[%s938_s1 + $0x18] sm:$0xff]   ;;  %v725_v18 = vld [vmem:[%s938_s1 + $0x20] sm:$0xff]   ;;  %v729_v22 = vld [vmem:[%s938_s1 + $0x28] sm:$0xff]  }
   0x8   :  { %636 = vmatpush3.bf16.msra.mxu0 %v713_v6  ;;  %v722_v15 = vld [vmem:[%s938_s1 + $0x98] sm:$0xff]   ;;  %v726_v19 = vld [vmem:[%s938_s1 + $0xa0] sm:$0xff]   ;;  %v730_v23 = vld [vmem:[%s938_s1 + $0xa8] sm:$0xff]  }
   0x9   :  { %664 = vmatpush3.bf16.msra.mxu1 %v714_v7  ;;  %637 = vmatprep.subr.bf16.mxu0 %v715_v8  ;;  %v731_v24 = vld [vmem:[%s938_s1 + $0x70] sm:$0xff]   ;;  %v735_v28 = vld [vmem:[%s938_s1 + $0x78] sm:$0xff]   ;;  %v744_v35 = vld [vmem:[%s939_s0 + $0xc] ss:$20 sps:$4 sm:$0xff]  }
   0xa   :  { %665 = vmatprep.subr.bf16.mxu1 %v716_v9  ;;  %v732_v25 = vld [vmem:[%s938_s1 + $0xf0] sm:$0xff]   ;;  %v736_v29 = vld [vmem:[%s938_s1 + $0xf8] sm:$0xff]   ;;  %v745_v36 = vld [vmem:[%s938_s1 + $0x100] sm:$0xff]   ;;  %468 = vmatprep.mubr.bf16.mxu1 %v744_v35 }
   0xb   :  { %v733_v26 = vld [vmem:[%s938_s1 + $0x30] sm:$0xff]   ;;  %v737_v30 = vld [vmem:[%s938_s1 + $0x38] sm:$0xff]   ;;  %v746_v37 = vld [vmem:[%s938_s1 + $0x108] sm:$0xff]  }
   0xc   :  { %638 = vmatpush3.bf16.msra.mxu0 %v717_v10  ;;  %v734_v27 = vld [vmem:[%s938_s1 + $0xb0] sm:$0xff]   ;;  %v738_v31 = vld [vmem:[%s938_s1 + $0xb8] sm:$0xff]   ;;  %v747_v38 = vld [vmem:[%s939_s0 + $0x2c] ss:$20 sps:$4 sm:$0xff]  }
   0xd   :  { %666 = vmatpush3.bf16.msra.mxu1 %v718_v11  ;;  %639 = vmatprep.subr.bf16.mxu0 %v719_v12  ;;  %v739_v32 = vld [vmem:[%s939_s0] ss:$20 sps:$4 sm:$0xff]   ;;  %v741_v33 = vld [vmem:[%s939_s0 + $0x4] ss:$20 sps:$4 sm:$0xff]   ;;  %v742_v34 = vld [vmem:[%s939_s0 + $0x8] ss:$20 sps:$4 sm:$0xff]  }
   0xe   :  { %667 = vmatprep.subr.bf16.mxu1 %v720_v13  ;;  %419 = vmatprep.mubr.bf16.mxu0 %v741_v33  ;;  %v749_v39 = vld [vmem:[%s939_s0 + $0x34] ss:$20 sps:$4 sm:$0xff]   ;;  %v752_v42 = vld [vmem:[%s939_s0 + $0x30] ss:$20 sps:$4 sm:$0xff]   ;;  %v754_v44 = vld [vmem:[%s938_s1 + $0x118] sm:$0xff]  }
   0xf   :  { %v751_v40 = vld [vmem:[%s939_s0 + $0x28] ss:$20 sps:$4 sm:$0xff]   ;;  %v753_v41 = vld [vmem:[%s938_s1 + $0x110] sm:$0xff]   ;;  %v756_v45 = vld [vmem:[%s939_s0 + $0x38] ss:$20 sps:$4 sm:$0xff]  }
  0x10   :  { %640 = vmatpush3.bf16.msra.mxu0 %v721_v14  ;;  %v755_v43 = vld [vmem:[%s939_s0 + $0x10] ss:$20 sps:$4 sm:$0xff]   ;;  %v631_v11 = vld [vmem:[%s940_s2] ss:$0 sm:$0xff] }
  0x11   :  { %668 = vmatpush3.bf16.msra.mxu1 %v722_v15  ;;  %641 = vmatprep.subr.bf16.mxu0 %v723_v16  ;;  %v632_v14 = vld [vmem:[%s941_s3] ss:$0 sm:$0xff] }
  0x12   :  { %669 = vmatprep.subr.bf16.mxu1 %v724_v17 }
  0x14   :  { %642 = vmatpush3.bf16.msra.mxu0 %v725_v18 }
  0x15   :  { %670 = vmatpush3.bf16.msra.mxu1 %v726_v19  ;;  %643 = vmatprep.subr.bf16.mxu0 %v727_v20 }
  0x16   :  { %671 = vmatprep.subr.bf16.mxu1 %v728_v21 }
  0x18   :  { %644 = vmatpush3.bf16.msra.mxu0 %v729_v22 }
  0x19   :  { %672 = vmatpush3.bf16.msra.mxu1 %v730_v23  ;;  %645 = vmatprep.subr.bf16.mxu0 %v731_v24 }
  0x1a   :  { %673 = vmatprep.subr.bf16.mxu1 %v732_v25 }
  0x1c   :  { %646 = vmatpush3.bf16.msra.mxu0 %v733_v26 }
  0x1d   :  { %674 = vmatpush3.bf16.msra.mxu1 %v734_v27  ;;  %647 = vmatprep.subr.bf16.mxu0 %v735_v28 }
  0x1e   :  { %675 = vmatprep.subr.bf16.mxu1 %v736_v29 }
  0x20   :  { %648 = vmatpush3.bf16.msra.mxu0 %v737_v30 }
  0x21   :  { %676 = vmatpush3.bf16.msra.mxu1 %v738_v31  ;;  %695 = vmatprep.subr.bf16.mxu0 %v745_v36 }
  0x23   :  { %420 = vmatmul.mubr.bf16.vlgmr.msra.gmra.mrb[0].mxu0 %v739_v32 }
  0x24   :  { %469 = vmatmul.mubr.bf16.vlgmr.msra.gmra.mrb[0].mxu1 %v742_v34  ;;  %696 = vmatpush3.bf16.msra.mxu0 %v745_v36 }
  0x25   :  { %697 = vmatprep.subr.bf16.mxu0 %v746_v37  ;;  %427 = vmatprep.mubr.bf16.mxu0 %v747_v38 }
  0x26   :  { %476 = vmatprep.mubr.bf16.mxu1 %v749_v39 }
  0x28   :  { %698 = vmatpush3.bf16.msra.mxu0 %v746_v37 }
  0x29   :  { %699 = vmatprep.subr.bf16.mxu0 %v753_v41 }
  0x2b   :  { %428 = vmatmul.mubr.bf16.gmra.mrb[4].mxu0 %v751_v40 }
  0x2c   :  { %477 = vmatmul.mubr.bf16.gmra.mrb[4].mxu1 %v752_v42  ;;  %703 = vmatprep.mubr.msk.bf16.mxu0 %vm380_vm0, %v755_v43 }
  0x2d   :  { %700 = vmatpush3.bf16.msra.mxu0 %v753_v41 }
  0x2e   :  { %701 = vmatprep.subr.bf16.mxu0 %v754_v44 }
  0x31   :  { %702 = vmatpush3.bf16.msra.mxu0 %v754_v44 }
  0x34   :  { %704 = vmatmul.mubr.msk.bf16.vlgmr.msra.gmra.mrb[8].mxu0 %vm380_vm0, %v756_v45 }
  0xf6   :  { %v649_v46 = vpop.f32.mrb[0].mxu0 }
  0xf7   :  { %v677_v47 = vpop.f32.mrb[0].mxu1  ;;  %v650_v48 = vpop.f32.mrb[1].mxu0 }
  0xf8   :  { %v651_v49 = vadd.f32 %v650_v48, %v649_v46  ;;  %v678_v50 = vpop.f32.mrb[1].mxu1  ;;  %v652_v51 = vpop.f32.mrb[2].mxu0 }
  0xf9   :  { %v679_v52 = vadd.f32 %v678_v50, %v677_v47  ;;  %v680_v53 = vpop.f32.mrb[2].mxu1  ;;  %v653_v54 = vpop.f32.mrb[3].mxu0 }
  0xfa   :  { %v654_v55 = vadd.f32 %v653_v54, %v652_v51  ;;  %v681_v56 = vpop.f32.mrb[3].mxu1 }
  0xfb   :  { %v682_v57 = vadd.f32 %v681_v56, %v680_v53  ;;  %v471_v58 = vadd.f32 %v679_v52, %v651_v49 }
  0xfd   :  { %v474_v59 = vadd.f32 %v682_v57, %v654_v55 }
  0xfe   :  { %v655_v60 = vpop.f32.mrb[4].mxu0 }
  0xff   :  { %v683_v61 = vpop.f32.mrb[4].mxu1  ;;  %v656_v62 = vpop.f32.mrb[5].mxu0 }
 0x100   :  { %v657_v63 = vadd.f32 %v656_v62, %v655_v60  ;;  %v684_v0 = vpop.f32.mrb[5].mxu1  ;;  %v658_v1 = vpop.f32.mrb[6].mxu0 }
 0x101   :  { %v685_v2 = vadd.f32 %v684_v0, %v683_v61  ;;  %v686_v3 = vpop.f32.mrb[6].mxu1  ;;  %v659_v4 = vpop.f32.mrb[7].mxu0 }
 0x102   :  { %v660_v5 = vadd.f32 %v659_v4, %v658_v1  ;;  %v687_v6 = vpop.f32.mrb[7].mxu1 }
 0x103   :  { %v688_v7 = vadd.f32 %v687_v6, %v686_v3  ;;  %v479_v8 = vadd.f32 %v685_v2, %v657_v63 }
 0x105   :  { %v482_v9 = vadd.f32 %v688_v7, %v660_v5 }
 0x107   :  { %v705_v10 = vpop.f32.mrb[8].mxu0 }
 0x108   :  { %v528_v12 = vadd.f32 %v705_v10, %v479_v8  ;;  %v519_v13 = vpop.f32.mrb[9].mxu0 }
 0x109   :  { %v520_v15 = vadd.f32 %v519_v13, %v471_v58  ;;  %v706_v16 = vpop.f32.mrb[10].mxu0 }
 0x10a   :  { %v558_v17 = vmul.f32 %v631_v11, %v528_v12  ;;  %v531_v18 = vadd.f32 %v706_v16, %v482_v9  ;;  %v522_v19 = vpop.f32.mrb[11].mxu0 }
 0x10b   :  { %v556_v20 = vmul.f32 %v631_v11, %v520_v15  ;;  %v523_v21 = vadd.f32 %v522_v19, %v474_v59 }
 0x10c   :  { %v569_v22 = vadd.f32 %v632_v14, %v558_v17  ;;  %v559_v23 = vmul.f32 %v631_v11, %v531_v18 }
 0x10d   :  { %v567_v24 = vadd.f32 %v632_v14, %v556_v20  ;;  %v557_v25 = vmul.f32 %v631_v11, %v523_v21 }
 0x10e   :  { %v573_v26 = vmax.f32 %v569_v22, 0.0  ;;  %v570_v27 = vadd.f32 %v632_v14, %v559_v23 }
 0x10f   :  { %v571_v28 = vmax.f32 %v567_v24, 0.0  ;;  %v568_v29 = vadd.f32 %v632_v14, %v557_v25 }
 0x110   :  { %577 = vst [vmem:[%s942_s4 + $0x10] sm:$0xff] %v573_v26  ;;  %v574_v30 = vmax.f32 %v570_v27, 0.0 }
 0x111   :  { %575 = vst [vmem:[%s942_s4] sm:$0xff] %v571_v28  ;;  %v572_v31 = vmax.f32 %v568_v29, 0.0 }
 0x112   :  { %578 = vst [vmem:[%s942_s4 + $0x18] sm:$0xff] %v574_v30 }
 0x113   :  { %576 = vst [vmem:[%s942_s4 + $0x8] sm:$0xff] %v572_v31 }

// kernel: resnet18_forward.29
= control target key start
LH: loop header
LB: loop body
LE: loop exit
PB: predicated region body
PF: predicated region fallthrough
CT: control target
= control target key end

     0   :  { %s1199_s18 = smov 0   ;;  %s1201_s19 = smov 0   ;;  %s1330_s0 = inlined_call_operand.vmem [shape: bf16[32,1152], index: 0, kind: input, shape index: {}]   ;;  %s1331_s1 = inlined_call_operand.vmem [shape: bf16[1152,128], index: 1, kind: input, shape index: {}]   ;;  %s1332_s2 = inlined_call_operand.vmem [shape: f32[1,128], index: 2, kind: input, shape index: {}]   ;;  %s1333_s3 = inlined_call_operand.vmem [shape: f32[1,128], index: 3, kind: input, shape index: {}]   ;;  %s1334_s4 = inlined_call_operand.vmem [shape: f32[32,128], index: 4, kind: input, shape index: {}]   ;;  %s1335_s5 = inlined_call_operand.vmem [shape: f32[32,128], index: 5, kind: output, shape index: {}]  }
   0x1   :  { %s1203_s20 = smov 0   ;;  %s1205_s21 = smov 0  }
   0x2   :  { %s1207_s22 = smov 0  }
   0x3 LB: > { %s27_s23 = sadd.s32 1, %s1162_s21  ;;  %p50_p1 = scmp.ne.s32.totalorder %s1154_s19, %s1150_s18  ;;  %s1166_s22 = sphi %s1207_s22, %s15_s22   ;;  %s1162_s21 = sphi %s1205_s21, %s1339_s21   ;;  %s1158_s20 = sphi %s1203_s20, %s1338_s20   ;;  %s1154_s19 = sphi %s1201_s19, %s1337_s19   ;;  %s1150_s18 = sphi %s1199_s18, %s1336_s18  }
   0x4   : > { %p28_p0 = scmp.ge.s32.totalorder %s27_s23, 3  ;;  %p51_p2 = scmp.eq.s32.totalorder %s1166_s22, 0 }
   0x5   : > { %s43_s25 = sadd.s32 1, %s1154_s19  ;;  %p944_p5 = scmp.ge.s32.totalorder %s1166_s22, 3 }
   0x6   : > { %s1341_s23 = smov (%p28_p0, %s27_s23), 0  ;;  %p52_p3 = por %p51_p2, %p50_p1 }
   0x7   : > { %s39_s24 = ssub.s32 %s1162_s21, %s1341_s23  ;;  %236 = sbr.rel (%p944_p5) target bundleno = 23 (0x17), region = 28 }
   0x8   : > { %p41_p4 = scmp.eq.s32.totalorder %s39_s24, 0 }
   0xa   : > { %s1234_s26 = scalar_select %p41_p4, %s1154_s19, %s43_s25  }
   0xe   : > { %239 = sbr.rel (!%p52_p3) target bundleno = 23 (0x17), region = 32  ;;  %s241_s27 = sand.u32 (%p52_p3), 1, %s1154_s19  }
   0xf   : > { %s994_s28 = smul.u32 (%p52_p3), 12, %s1162_s21 }
  0x10   : > { %s1053_s29 = smul.u32 (%p52_p3), 48, %s241_s27 }
  0x11   : > { %s249_s7 = scalar_lea.vmem (%p52_p3), %s1330_s0, %s994_s28 }
  0x12   : > { %v264_v0 = vld [vmem:[%s249_s7] sm:$0xff] (%p52_p3)  ;;  %v268_v2 = vld [vmem:[%s249_s7 + $0x48] sm:$0xff] (%p52_p3)  ;;  %s243_s8 = scalar_lea.vmem (%p52_p3), [#allocation3], %s1053_s29  ;;  %v950_v6 = vld [vmem:[%s249_s7 + $0x50] sm:$0xf] (%p52_p3) }
  0x13   : > { %v266_v1 = vld [vmem:[%s249_s7 + $0x24] sm:$0xff] (%p52_p3)  ;;  %265 = vst [vmem:[%s243_s8] sm:$0xff] (%p52_p3), %v264_v0  ;;  %269 = vst [vmem:[%s243_s8 + $0x18] sm:$0xff] (%p52_p3), %v268_v2  ;;  %v270_v3 = vld [vmem:[%s249_s7 + $0x6c] sm:$0xff] (%p52_p3) }
  0x14   : > { %267 = vst [vmem:[%s243_s8 + $0xc] sm:$0xff] (%p52_p3), %v266_v1  ;;  %v946_v4 = vld [vmem:[%s249_s7 + $0x8] sm:$0xf] (%p52_p3)  ;;  %v948_v5 = vld [vmem:[%s249_s7 + $0x2c] sm:$0xf] (%p52_p3)  ;;  %271 = vst [vmem:[%s243_s8 + $0x24] sm:$0xff] (%p52_p3), %v270_v3 }
  0x15   : > { %947 = vst [vmem:[%s243_s8 + $0x8] sm:$0xf] %v946_v4  ;;  %949 = vst [vmem:[%s243_s8 + $0x14] sm:$0xf] %v948_v5  ;;  %v952_v7 = vld [vmem:[%s249_s7 + $0x74] sm:$0xf] }
  0x16   : > { %951 = vst [vmem:[%s243_s8 + $0x20] sm:$0xf] %v950_v6  ;;  %953 = vst [vmem:[%s243_s8 + $0x2c] sm:$0xf] %v952_v7 }
  0x17 PF: > { %p954_p6 = scmp.ge.s32.totalorder %s1166_s22, 1  ;;  %p303_p7 = scmp.lt.s32.totalorder %s1166_s22, 4 }
  0x19   : > { %p304_p8 = pnand %p954_p6, %p303_p7 }
  0x1a   : > { %s310_s9 = sand.u32 (!%p304_p8), 1, %s1150_s18   ;;  %s364_s10 = smul.u32 (!%p304_p8), 48, %s1158_s20 }
  0x1b   : > { %307 = sbr.rel (%p304_p8) target bundleno = 320 (0x140), region = 62  ;;  %p956_p10 = scmp.ne.s32.totalorder (!%p304_p8), %s1158_s20, 0 }
  0x1c   : > { %s1054_s11 = smul.u32 (!%p304_p8), 48, %s310_s9  ;;  %p365_p9 = scmp.lt.s32.totalorder (!%p304_p8), %s364_s10, 143 }
  0x1e   : > { %s1251_s16 = scalar_lea.vmem (!%p304_p8), [#allocation3], %s1054_s11 }
  0x22   : > { %s1343_s10 = smov (!%p365_p9, %s364_s10), 143  ;;  %401 = sbr.rel (%p956_p10) target bundleno = 41 (0x29), region = 70 }
  0x23   : > { %s955_s12 = sshll.u32 %s1343_s10, 2  ;;  %v1168_v8 = vmov (!%p956_p10), 0.0  }
  0x24   : > { %s1249_s15 = scalar_lea.vmem %s1331_s1, %s955_s12  ;;  %402 = vst [vmem:[#allocation2] sm:$0xff] (!%p956_p10), %v1168_v8  ;;  %403 = vst [vmem:[#allocation2 + $0x8] sm:$0xff] (!%p956_p10), %v1168_v8 }
  0x25   : > { %404 = vst [vmem:[#allocation2 + $0x10] sm:$0xff] (!%p956_p10), %v1168_v8  ;;  %405 = vst [vmem:[#allocation2 + $0x18] sm:$0xff] (!%p956_p10), %v1168_v8 }
  0x29 PF: > { %v1096_v9 = vld [vmem:[%s1249_s15 + $0x40] sm:$0xff]   ;;  %v1099_v12 = vld [vmem:[%s1249_s15 + $0x48] sm:$0xff]   ;;  %v1102_v15 = vld [vmem:[%s1249_s15 + $0x50] sm:$0xff]   ;;  %p987_p11 = scmp.ne.s32.totalorder %s1158_s20, 2 }
  0x2a   : > { %v1097_v10 = vld [vmem:[%s1249_s15] sm:$0xff]   ;;  %995 = vmatprep.subr.bf16.mxu0 %v1096_v9  ;;  %v1100_v13 = vld [vmem:[%s1249_s15 + $0x8] sm:$0xff]   ;;  %v1103_v16 = vld [vmem:[%s1249_s15 + $0x10] sm:$0xff]  }
  0x2b   : > { %v1098_v11 = vld [vmem:[%s1249_s15 + $0x80] sm:$0xff]   ;;  %996 = vmatpush3.bf16.msra.mxu0 %v1097_v10  ;;  %v1101_v14 = vld [vmem:[%s1249_s15 + $0x88] sm:$0xff]   ;;  %v1104_v17 = vld [vmem:[%s1249_s15 + $0x90] sm:$0xff]  }
  0x2c   : > { %1033 = vmatprep.subr.bf16.mxu1 %v1098_v11  ;;  %997 = vmatprep.subr.bf16.mxu0 %v1099_v12  ;;  %v1105_v18 = vld [vmem:[%s1249_s15 + $0x58] sm:$0xff]   ;;  %v1108_v21 = vld [vmem:[%s1249_s15 + $0x60] sm:$0xff]   ;;  %v1111_v24 = vld [vmem:[%s1249_s15 + $0x68] sm:$0xff]  }
  0x2d   : > { %1034 = vmatpush3.bf16.msra.mxu1 %v1098_v11  ;;  %v1106_v19 = vld [vmem:[%s1249_s15 + $0x18] sm:$0xff]   ;;  %v1110_v22 = vld [vmem:[%s1249_s15 + $0xa0] sm:$0xff]   ;;  %v1113_v25 = vld [vmem:[%s1249_s15 + $0xa8] sm:$0xff]  }
  0x2e   : > { %1035 = vmatprep.subr.bf16.mxu1 %v1101_v14  ;;  %v1107_v20 = vld [vmem:[%s1249_s15 + $0x98] sm:$0xff]   ;;  %v1109_v23 = vld [vmem:[%s1249_s15 + $0x20] sm:$0xff]   ;;  %v1112_v26 = vld [vmem:[%s1249_s15 + $0x28] sm:$0xff]  }
  0x2f   : > { %998 = vmatpush3.bf16.msra.mxu0 %v1100_v13  ;;  %v1114_v27 = vld [vmem:[%s1249_s15 + $0x70] sm:$0xff]   ;;  %v1117_v30 = vld [vmem:[%s1249_s15 + $0x78] sm:$0xff]   ;;  %v406_v45 = vld [vmem:[#allocation2] sm:$0xff] }
  0x30   : > { %999 = vmatprep.subr.bf16.mxu0 %v1102_v15  ;;  %v1115_v28 = vld [vmem:[%s1249_s15 + $0x30] sm:$0xff]   ;;  %v1119_v31 = vld [vmem:[%s1249_s15 + $0xb8] sm:$0xff]   ;;  %v407_v50 = vld [vmem:[#allocation2 + $0x8] sm:$0xff] }
  0x31   : > { %1036 = vmatpush3.bf16.msra.mxu1 %v1101_v14  ;;  %v1116_v29 = vld [vmem:[%s1249_s15 + $0xb0] sm:$0xff]   ;;  %v1118_v34 = vld [vmem:[%s1249_s15 + $0x38] sm:$0xff]   ;;  %v988_v4 = vld [vmem:[%s1332_s2] ss:$0 sm:$0xff] (!%p987_p11) }
  0x32   : > { %1037 = vmatprep.subr.bf16.mxu1 %v1104_v17  ;;  %v1122_v32 = vld [vmem:[%s1251_s16 + $0x4] ss:$12 sps:$4 sm:$0xff]   ;;  %v1123_v33 = vld [vmem:[%s1251_s16 + $0x8] ss:$12 sps:$4 sm:$0xff]   ;;  %v1120_v35 = vld [vmem:[%s1251_s16] ss:$12 sps:$4 sm:$0xff]  }
  0x33   : > { %1000 = vmatpush3.bf16.msra.mxu0 %v1103_v16  ;;  %674 = vmatprep.mubr.bf16.mxu0 %v1122_v32  ;;  %v1125_v36 = vld [vmem:[%s1251_s16 + $0x1c] ss:$12 sps:$4 sm:$0xff]   ;;  %v1124_v37 = vld [vmem:[%s1251_s16 + $0x20] ss:$12 sps:$4 sm:$0xff]   ;;  %v1127_v38 = vld [vmem:[%s1251_s16 + $0x18] ss:$12 sps:$4 sm:$0xff]  }
  0x34   : > { %1001 = vmatprep.subr.bf16.mxu0 %v1105_v18  ;;  %1049 = vmatprep.mubr.bf16.mxu1 %v1123_v33  ;;  %v408_v59 = vld [vmem:[#allocation2 + $0x10] sm:$0xff]  ;;  %v409_v63 = vld [vmem:[#allocation2 + $0x18] sm:$0xff]  ;;  %v989_v5 = vld [vmem:[%s1333_s3] ss:$0 sm:$0xff] (!%p987_p11) }
  0x35   : > { %1038 = vmatpush3.bf16.msra.mxu1 %v1104_v17  ;;  %v778_v8 = vld [vmem:[%s1334_s4] sm:$0xff] (!%p987_p11)  ;;  %v779_v13 = vld [vmem:[%s1334_s4 + $0x8] sm:$0xff] (!%p987_p11)  ;;  %v780_v17 = vld [vmem:[%s1334_s4 + $0x10] sm:$0xff] (!%p987_p11) }
  0x36   : > { %1039 = vmatprep.subr.bf16.mxu1 %v1107_v20  ;;  %v781_v18 = vld [vmem:[%s1334_s4 + $0x18] sm:$0xff] (!%p987_p11) }
  0x37   : > { %1002 = vmatpush3.bf16.msra.mxu0 %v1106_v19 }
  0x38   : > { %1003 = vmatprep.subr.bf16.mxu0 %v1108_v21 }
  0x39   : > { %1040 = vmatpush3.bf16.msra.mxu1 %v1107_v20 }
  0x3a   : > { %1041 = vmatprep.subr.bf16.mxu1 %v1110_v22 }
  0x3b   : > { %1004 = vmatpush3.bf16.msra.mxu0 %v1109_v23 }
  0x3c   : > { %1005 = vmatprep.subr.bf16.mxu0 %v1111_v24 }
  0x3d   : > { %1042 = vmatpush3.bf16.msra.mxu1 %v1110_v22 }
  0x3e   : > { %1043 = vmatprep.subr.bf16.mxu1 %v1113_v25 }
  0x3f   : > { %1006 = vmatpush3.bf16.msra.mxu0 %v1112_v26 }
  0x40   : > { %1007 = vmatprep.subr.bf16.mxu0 %v1114_v27 }
  0x41   : > { %1044 = vmatpush3.bf16.msra.mxu1 %v1113_v25 }
  0x42   : > { %1045 = vmatprep.subr.bf16.mxu1 %v1116_v29 }
  0x43   : > { %1008 = vmatpush3.bf16.msra.mxu0 %v1115_v28 }
  0x44   : > { %1009 = vmatprep.subr.bf16.mxu0 %v1117_v30 }
  0x45   : > { %1046 = vmatpush3.bf16.msra.mxu1 %v1116_v29 }
  0x46   : > { %1047 = vmatprep.subr.bf16.mxu1 %v1119_v31 }
  0x47   : > { %1010 = vmatpush3.bf16.msra.mxu0 %v1118_v34 }
  0x49   : > { %1048 = vmatpush3.bf16.msra.mxu1 %v1119_v31 }
  0x4a   : > { %675 = vmatmul.mubr.bf16.vlgmr.msra.gmra.mrb[0].mxu0 %v1120_v35 }
  0x4b   : > { %682 = vmatprep.mubr.bf16.mxu0 %v1125_v36 }
  0x4c   : > { %1050 = vmatmul.mubr.bf16.vlgmr.msra.gmra.mrb[0].mxu1 %v1124_v37 }
  0x52   : > { %683 = vmatmul.mubr.bf16.gmra.mrb[4].mxu0 %v1127_v38 }
 0x11d   : > { %v1011_v39 = vpop.f32.mrb[0].mxu0 }
 0x11e   : > { %v1012_v40 = vpop.f32.mrb[1].mxu0 }
 0x11f   : > { %v1013_v41 = vadd.f32 %v1012_v40, %v1011_v39  ;;  %v1014_v42 = vpop.f32.mrb[2].mxu0  ;;  %v1051_v43 = vpop.f32.mrb[0].mxu1 }
 0x120   : > { %v1015_v44 = vpop.f32.mrb[3].mxu0  ;;  %v725_v46 = vpop.f32.mrb[1].mxu1 }
 0x121   : > { %v1016_v47 = vadd.f32 %v1015_v44, %v1014_v42  ;;  %v726_v48 = vadd.f32 %v1013_v41, %v725_v46  ;;  %v1052_v49 = vpop.f32.mrb[2].mxu1 }
 0x122   : > { %v728_v51 = vpop.f32.mrb[3].mxu1 }
 0x123   : > { %v740_v52 = vadd.f32 %v726_v48, %v406_v45  ;;  %v729_v53 = vadd.f32 %v1016_v47, %v728_v51 }
 0x125   : > { %744 = vst [vmem:[#allocation2] sm:$0xff] %v740_v52  ;;  %v741_v54 = vadd.f32 %v729_v53, %v407_v50  ;;  %v1017_v55 = vpop.f32.mrb[4].mxu0 }
 0x126   : > { %v1018_v56 = vpop.f32.mrb[5].mxu0 }
 0x127   : > { %745 = vst [vmem:[#allocation2 + $0x8] sm:$0xff] %v741_v54  ;;  %v1019_v57 = vadd.f32 %v1018_v56, %v1017_v55  ;;  %v1020_v58 = vpop.f32.mrb[6].mxu0 }
 0x128   : > { %v1021_v60 = vpop.f32.mrb[7].mxu0 }
 0x129   : > { %v734_v61 = vadd.f32 %v1051_v43, %v1019_v57  ;;  %v1022_v62 = vadd.f32 %v1021_v60, %v1020_v58  ;;  %751 = sbr.rel (%p987_p11) target bundleno = 320 (0x140), region = 74 }
 0x12b   : > { %v742_v0 = vadd.f32 %v734_v61, %v408_v59  ;;  %v737_v1 = vadd.f32 %v1052_v49, %v1022_v62 }
 0x12c   : > { %v752_v3 = vld [vmem:[#allocation2] sm:$0xff] (!%p987_p11) }
 0x12d   : > { %746 = vst [vmem:[#allocation2 + $0x10] sm:$0xff] %v742_v0  ;;  %v743_v2 = vadd.f32 %v737_v1, %v409_v63  ;;  %v763_v6 = vmul.f32 (!%p987_p11), %v988_v4, %v752_v3 }
 0x12e   : > { %v753_v7 = vld [vmem:[#allocation2 + $0x8] sm:$0xff] (!%p987_p11) }
 0x12f   : > { %747 = vst [vmem:[#allocation2 + $0x18] sm:$0xff] %v743_v2  ;;  %v764_v9 = vmul.f32 (!%p987_p11), %v988_v4, %v753_v7  ;;  %v774_v12 = vadd.f32 (!%p987_p11), %v989_v5, %v763_v6 }
 0x131   : > { %v775_v16 = vadd.f32 %v989_v5, %v764_v9  ;;  %v782_v19 = vadd.f32 %v778_v8, %v774_v12 }
 0x133   : > { %v783_v22 = vadd.f32 %v779_v13, %v775_v16  ;;  %v786_v23 = vmax.f32 %v782_v19, 0.0 }
 0x134   : > { %v754_v10 = vld [vmem:[#allocation2 + $0x10] sm:$0xff] }
 0x135   : > { %v765_v14 = vmul.f32 %v988_v4, %v754_v10  ;;  %v787_v26 = vmax.f32 %v783_v22, 0.0  ;;  %790 = vst [vmem:[%s1335_s5] sm:$0xff] %v786_v23 }
 0x136   : > { %v755_v11 = vld [vmem:[#allocation2 + $0x18] sm:$0xff] }
 0x137   : > { %v766_v15 = vmul.f32 %v988_v4, %v755_v11  ;;  %v776_v20 = vadd.f32 %v989_v5, %v765_v14  ;;  %791 = vst [vmem:[%s1335_s5 + $0x8] sm:$0xff] %v787_v26 }
 0x139   : > { %v777_v21 = vadd.f32 %v989_v5, %v766_v15  ;;  %v784_v24 = vadd.f32 %v780_v17, %v776_v20 }
 0x13b   : > { %v785_v25 = vadd.f32 %v781_v18, %v777_v21  ;;  %v788_v27 = vmax.f32 %v784_v24, 0.0 }
 0x13d   : > { %v789_v28 = vmax.f32 %v785_v25, 0.0  ;;  %792 = vst [vmem:[%s1335_s5 + $0x10] sm:$0xff] %v788_v27 }
 0x13f   : > { %793 = vst [vmem:[%s1335_s5 + $0x18] sm:$0xff] %v789_v28 }
 0x140 PF: > { %s15_s22 = sadd.s32 1, %s1166_s22   ;;  %s1336_s18 = smov %s1154_s19 }
 0x141   : > { %p12_p12 = scmp.ge.s32.totalorder %s15_s22, 5   ;;  %s1337_s19 = smov %s1234_s26 }
 0x142   : > { %s1338_s20 = smov %s1162_s21  ;;  %s1339_s21 = smov %s1341_s23 }
 0x143   :  { %14 = sbr.rel (!%p12_p12) target bundleno = 3 (0x3), region = 127 }

// kernel: resnet18_forward.30
= control target key start
LH: loop header
LB: loop body
LE: loop exit
PB: predicated region body
PF: predicated region fallthrough
CT: control target
= control target key end

     0   :  { %s1107_s15 = smov 0   ;;  %s1109_s16 = smov 0   ;;  %s1226_s0 = inlined_call_operand.vmem [shape: bf16[32,1152], index: 0, kind: input, shape index: {}]   ;;  %s1227_s1 = inlined_call_operand.vmem [shape: bf16[1152,128], index: 1, kind: input, shape index: {}]   ;;  %s1228_s2 = inlined_call_operand.vmem [shape: f32[1,128], index: 2, kind: input, shape index: {}]   ;;  %s1229_s3 = inlined_call_operand.vmem [shape: f32[1,128], index: 3, kind: input, shape index: {}]   ;;  %s1230_s4 = inlined_call_operand.vmem [shape: f32[32,128], index: 4, kind: output, shape index: {}]  }
   0x1   :  { %s1111_s17 = smov 0   ;;  %s1113_s18 = smov 0  }
   0x2   :  { %s1115_s19 = smov 0  }
   0x3 LB: > { %s26_s20 = sadd.s32 1, %s1075_s18  ;;  %p49_p1 = scmp.ne.s32.totalorder %s1067_s16, %s1063_s15  ;;  %s1079_s19 = sphi %s1115_s19, %s14_s19   ;;  %s1075_s18 = sphi %s1113_s18, %s1234_s18   ;;  %s1071_s17 = sphi %s1111_s17, %s1233_s17   ;;  %s1067_s16 = sphi %s1109_s16, %s1232_s16   ;;  %s1063_s15 = sphi %s1107_s15, %s1231_s15  }
   0x4   : > { %p27_p0 = scmp.ge.s32.totalorder %s26_s20, 3  ;;  %p50_p2 = scmp.eq.s32.totalorder %s1079_s19, 0 }
   0x5   : > { %s42_s22 = sadd.s32 1, %s1067_s16  ;;  %p857_p5 = scmp.ge.s32.totalorder %s1079_s19, 3 }
   0x6   : > { %s1236_s20 = smov (%p27_p0, %s26_s20), 0  ;;  %p51_p3 = por %p50_p2, %p49_p1 }
   0x7   : > { %s38_s21 = ssub.s32 %s1075_s18, %s1236_s20  ;;  %195 = sbr.rel (%p857_p5) target bundleno = 23 (0x17), region = 24 }
   0x8   : > { %p40_p4 = scmp.eq.s32.totalorder %s38_s21, 0 }
   0xa   : > { %s1142_s23 = scalar_select %p40_p4, %s1067_s16, %s42_s22  }
   0xe   : > { %198 = sbr.rel (!%p51_p3) target bundleno = 23 (0x17), region = 28  ;;  %s200_s24 = sand.u32 (%p51_p3), 1, %s1067_s16  }
   0xf   : > { %s907_s25 = smul.u32 (%p51_p3), 12, %s1075_s18 }
  0x10   : > { %s966_s26 = smul.u32 (%p51_p3), 48, %s200_s24 }
  0x11   : > { %s208_s29 = scalar_lea.vmem (%p51_p3), %s1226_s0, %s907_s25 }
  0x12   : > { %v223_v0 = vld [vmem:[%s208_s29] sm:$0xff] (%p51_p3)  ;;  %v227_v2 = vld [vmem:[%s208_s29 + $0x48] sm:$0xff] (%p51_p3)  ;;  %s202_s30 = scalar_lea.vmem (%p51_p3), [#allocation3], %s966_s26  ;;  %v863_v6 = vld [vmem:[%s208_s29 + $0x50] sm:$0xf] (%p51_p3) }
  0x13   : > { %v225_v1 = vld [vmem:[%s208_s29 + $0x24] sm:$0xff] (%p51_p3)  ;;  %224 = vst [vmem:[%s202_s30] sm:$0xff] (%p51_p3), %v223_v0  ;;  %228 = vst [vmem:[%s202_s30 + $0x18] sm:$0xff] (%p51_p3), %v227_v2  ;;  %v229_v3 = vld [vmem:[%s208_s29 + $0x6c] sm:$0xff] (%p51_p3) }
  0x14   : > { %226 = vst [vmem:[%s202_s30 + $0xc] sm:$0xff] (%p51_p3), %v225_v1  ;;  %v859_v4 = vld [vmem:[%s208_s29 + $0x8] sm:$0xf] (%p51_p3)  ;;  %v861_v5 = vld [vmem:[%s208_s29 + $0x2c] sm:$0xf] (%p51_p3)  ;;  %230 = vst [vmem:[%s202_s30 + $0x24] sm:$0xff] (%p51_p3), %v229_v3 }
  0x15   : > { %860 = vst [vmem:[%s202_s30 + $0x8] sm:$0xf] %v859_v4  ;;  %862 = vst [vmem:[%s202_s30 + $0x14] sm:$0xf] %v861_v5  ;;  %v865_v7 = vld [vmem:[%s208_s29 + $0x74] sm:$0xf] }
  0x16   : > { %864 = vst [vmem:[%s202_s30 + $0x20] sm:$0xf] %v863_v6  ;;  %866 = vst [vmem:[%s202_s30 + $0x2c] sm:$0xf] %v865_v7 }
  0x17 PF: > { %p867_p6 = scmp.ge.s32.totalorder %s1079_s19, 1  ;;  %p262_p7 = scmp.lt.s32.totalorder %s1079_s19, 4 }
  0x19   : > { %p263_p8 = pnand %p867_p6, %p262_p7 }
  0x1a   : > { %s269_s5 = sand.u32 (!%p263_p8), 1, %s1063_s15   ;;  %s313_s6 = smul.u32 (!%p263_p8), 48, %s1071_s17 }
  0x1b   : > { %266 = sbr.rel (%p263_p8) target bundleno = 318 (0x13e), region = 58  ;;  %p869_p10 = scmp.ne.s32.totalorder (!%p263_p8), %s1071_s17, 0 }
  0x1c   : > { %s967_s7 = smul.u32 (!%p263_p8), 48, %s269_s5  ;;  %p314_p9 = scmp.lt.s32.totalorder (!%p263_p8), %s313_s6, 143 }
  0x1e   : > { %s1159_s12 = scalar_lea.vmem (!%p263_p8), [#allocation3], %s967_s7 }
  0x22   : > { %s1238_s6 = smov (!%p314_p9, %s313_s6), 143  ;;  %341 = sbr.rel (%p869_p10) target bundleno = 41 (0x29), region = 66 }
  0x23   : > { %s868_s8 = sshll.u32 %s1238_s6, 2  ;;  %v1081_v8 = vmov (!%p869_p10), 0.0  }
  0x24   : > { %s1157_s11 = scalar_lea.vmem %s1227_s1, %s868_s8  ;;  %342 = vst [vmem:[#allocation2] sm:$0xff] (!%p869_p10), %v1081_v8  ;;  %343 = vst [vmem:[#allocation2 + $0x8] sm:$0xff] (!%p869_p10), %v1081_v8 }
  0x25   : > { %344 = vst [vmem:[#allocation2 + $0x10] sm:$0xff] (!%p869_p10), %v1081_v8  ;;  %345 = vst [vmem:[#allocation2 + $0x18] sm:$0xff] (!%p869_p10), %v1081_v8 }
  0x29 PF: > { %v1009_v9 = vld [vmem:[%s1157_s11 + $0x40] sm:$0xff]   ;;  %v1012_v12 = vld [vmem:[%s1157_s11 + $0x48] sm:$0xff]   ;;  %v1015_v15 = vld [vmem:[%s1157_s11 + $0x50] sm:$0xff]   ;;  %p900_p11 = scmp.ne.s32.totalorder %s1071_s17, 2 }
  0x2a   : > { %v1010_v10 = vld [vmem:[%s1157_s11] sm:$0xff]   ;;  %908 = vmatprep.subr.bf16.mxu0 %v1009_v9  ;;  %v1013_v13 = vld [vmem:[%s1157_s11 + $0x8] sm:$0xff]   ;;  %v1016_v16 = vld [vmem:[%s1157_s11 + $0x10] sm:$0xff]  }
  0x2b   : > { %v1011_v11 = vld [vmem:[%s1157_s11 + $0x80] sm:$0xff]   ;;  %909 = vmatpush3.bf16.msra.mxu0 %v1010_v10  ;;  %v1014_v14 = vld [vmem:[%s1157_s11 + $0x88] sm:$0xff]   ;;  %v1017_v17 = vld [vmem:[%s1157_s11 + $0x90] sm:$0xff]  }
  0x2c   : > { %946 = vmatprep.subr.bf16.mxu1 %v1011_v11  ;;  %910 = vmatprep.subr.bf16.mxu0 %v1012_v12  ;;  %v1018_v18 = vld [vmem:[%s1157_s11 + $0x58] sm:$0xff]   ;;  %v1021_v21 = vld [vmem:[%s1157_s11 + $0x60] sm:$0xff]   ;;  %v1024_v24 = vld [vmem:[%s1157_s11 + $0x68] sm:$0xff]  }
  0x2d   : > { %947 = vmatpush3.bf16.msra.mxu1 %v1011_v11  ;;  %v1019_v19 = vld [vmem:[%s1157_s11 + $0x18] sm:$0xff]   ;;  %v1023_v22 = vld [vmem:[%s1157_s11 + $0xa0] sm:$0xff]   ;;  %v1026_v25 = vld [vmem:[%s1157_s11 + $0xa8] sm:$0xff]  }
  0x2e   : > { %948 = vmatprep.subr.bf16.mxu1 %v1014_v14  ;;  %v1020_v20 = vld [vmem:[%s1157_s11 + $0x98] sm:$0xff]   ;;  %v1022_v23 = vld [vmem:[%s1157_s11 + $0x20] sm:$0xff]   ;;  %v1025_v26 = vld [vmem:[%s1157_s11 + $0x28] sm:$0xff]  }
  0x2f   : > { %911 = vmatpush3.bf16.msra.mxu0 %v1013_v13  ;;  %v1027_v27 = vld [vmem:[%s1157_s11 + $0x70] sm:$0xff]   ;;  %v1030_v30 = vld [vmem:[%s1157_s11 + $0x78] sm:$0xff]   ;;  %v346_v45 = vld [vmem:[#allocation2] sm:$0xff] }
  0x30   : > { %912 = vmatprep.subr.bf16.mxu0 %v1015_v15  ;;  %v1028_v28 = vld [vmem:[%s1157_s11 + $0x30] sm:$0xff]   ;;  %v1032_v31 = vld [vmem:[%s1157_s11 + $0xb8] sm:$0xff]   ;;  %v347_v50 = vld [vmem:[#allocation2 + $0x8] sm:$0xff] }
  0x31   : > { %949 = vmatpush3.bf16.msra.mxu1 %v1014_v14  ;;  %v1029_v29 = vld [vmem:[%s1157_s11 + $0xb0] sm:$0xff]   ;;  %v1031_v34 = vld [vmem:[%s1157_s11 + $0x38] sm:$0xff]   ;;  %v901_v4 = vld [vmem:[%s1228_s2] ss:$0 sm:$0xff] (!%p900_p11) }
  0x32   : > { %950 = vmatprep.subr.bf16.mxu1 %v1017_v17  ;;  %v1035_v32 = vld [vmem:[%s1159_s12 + $0x4] ss:$12 sps:$4 sm:$0xff]   ;;  %v1036_v33 = vld [vmem:[%s1159_s12 + $0x8] ss:$12 sps:$4 sm:$0xff]   ;;  %v1033_v35 = vld [vmem:[%s1159_s12] ss:$12 sps:$4 sm:$0xff]  }
  0x33   : > { %913 = vmatpush3.bf16.msra.mxu0 %v1016_v16  ;;  %614 = vmatprep.mubr.bf16.mxu0 %v1035_v32  ;;  %v1038_v36 = vld [vmem:[%s1159_s12 + $0x1c] ss:$12 sps:$4 sm:$0xff]   ;;  %v1037_v37 = vld [vmem:[%s1159_s12 + $0x20] ss:$12 sps:$4 sm:$0xff]   ;;  %v1040_v38 = vld [vmem:[%s1159_s12 + $0x18] ss:$12 sps:$4 sm:$0xff]  }
  0x34   : > { %914 = vmatprep.subr.bf16.mxu0 %v1018_v18  ;;  %962 = vmatprep.mubr.bf16.mxu1 %v1036_v33  ;;  %v348_v59 = vld [vmem:[#allocation2 + $0x10] sm:$0xff]  ;;  %v349_v63 = vld [vmem:[#allocation2 + $0x18] sm:$0xff]  ;;  %v902_v5 = vld [vmem:[%s1229_s3] ss:$0 sm:$0xff] (!%p900_p11) }
  0x35   : > { %951 = vmatpush3.bf16.msra.mxu1 %v1017_v17 }
  0x36   : > { %952 = vmatprep.subr.bf16.mxu1 %v1020_v20 }
  0x37   : > { %915 = vmatpush3.bf16.msra.mxu0 %v1019_v19 }
  0x38   : > { %916 = vmatprep.subr.bf16.mxu0 %v1021_v21 }
  0x39   : > { %953 = vmatpush3.bf16.msra.mxu1 %v1020_v20 }
  0x3a   : > { %954 = vmatprep.subr.bf16.mxu1 %v1023_v22 }
  0x3b   : > { %917 = vmatpush3.bf16.msra.mxu0 %v1022_v23 }
  0x3c   : > { %918 = vmatprep.subr.bf16.mxu0 %v1024_v24 }
  0x3d   : > { %955 = vmatpush3.bf16.msra.mxu1 %v1023_v22 }
  0x3e   : > { %956 = vmatprep.subr.bf16.mxu1 %v1026_v25 }
  0x3f   : > { %919 = vmatpush3.bf16.msra.mxu0 %v1025_v26 }
  0x40   : > { %920 = vmatprep.subr.bf16.mxu0 %v1027_v27 }
  0x41   : > { %957 = vmatpush3.bf16.msra.mxu1 %v1026_v25 }
  0x42   : > { %958 = vmatprep.subr.bf16.mxu1 %v1029_v29 }
  0x43   : > { %921 = vmatpush3.bf16.msra.mxu0 %v1028_v28 }
  0x44   : > { %922 = vmatprep.subr.bf16.mxu0 %v1030_v30 }
  0x45   : > { %959 = vmatpush3.bf16.msra.mxu1 %v1029_v29 }
  0x46   : > { %960 = vmatprep.subr.bf16.mxu1 %v1032_v31 }
  0x47   : > { %923 = vmatpush3.bf16.msra.mxu0 %v1031_v34 }
  0x49   : > { %961 = vmatpush3.bf16.msra.mxu1 %v1032_v31 }
  0x4a   : > { %615 = vmatmul.mubr.bf16.vlgmr.msra.gmra.mrb[0].mxu0 %v1033_v35 }
  0x4b   : > { %622 = vmatprep.mubr.bf16.mxu0 %v1038_v36 }
  0x4c   : > { %963 = vmatmul.mubr.bf16.vlgmr.msra.gmra.mrb[0].mxu1 %v1037_v37 }
  0x52   : > { %623 = vmatmul.mubr.bf16.gmra.mrb[4].mxu0 %v1040_v38 }
 0x11d   : > { %v924_v39 = vpop.f32.mrb[0].mxu0 }
 0x11e   : > { %v925_v40 = vpop.f32.mrb[1].mxu0 }
 0x11f   : > { %v926_v41 = vadd.f32 %v925_v40, %v924_v39  ;;  %v927_v42 = vpop.f32.mrb[2].mxu0  ;;  %v964_v43 = vpop.f32.mrb[0].mxu1 }
 0x120   : > { %v928_v44 = vpop.f32.mrb[3].mxu0  ;;  %v665_v46 = vpop.f32.mrb[1].mxu1 }
 0x121   : > { %v929_v47 = vadd.f32 %v928_v44, %v927_v42  ;;  %v666_v48 = vadd.f32 %v926_v41, %v665_v46  ;;  %v965_v49 = vpop.f32.mrb[2].mxu1 }
 0x122   : > { %v668_v51 = vpop.f32.mrb[3].mxu1 }
 0x123   : > { %v680_v52 = vadd.f32 %v666_v48, %v346_v45  ;;  %v669_v53 = vadd.f32 %v929_v47, %v668_v51 }
 0x125   : > { %684 = vst [vmem:[#allocation2] sm:$0xff] %v680_v52  ;;  %v681_v54 = vadd.f32 %v669_v53, %v347_v50  ;;  %v930_v55 = vpop.f32.mrb[4].mxu0 }
 0x126   : > { %v931_v56 = vpop.f32.mrb[5].mxu0 }
 0x127   : > { %685 = vst [vmem:[#allocation2 + $0x8] sm:$0xff] %v681_v54  ;;  %v932_v57 = vadd.f32 %v931_v56, %v930_v55  ;;  %v933_v58 = vpop.f32.mrb[6].mxu0 }
 0x128   : > { %v934_v60 = vpop.f32.mrb[7].mxu0 }
 0x129   : > { %v674_v61 = vadd.f32 %v964_v43, %v932_v57  ;;  %v935_v62 = vadd.f32 %v934_v60, %v933_v58  ;;  %691 = sbr.rel (%p900_p11) target bundleno = 318 (0x13e), region = 70 }
 0x12b   : > { %v682_v0 = vadd.f32 %v674_v61, %v348_v59  ;;  %v677_v1 = vadd.f32 %v965_v49, %v935_v62 }
 0x12c   : > { %v692_v3 = vld [vmem:[#allocation2] sm:$0xff] (!%p900_p11) }
 0x12d   : > { %686 = vst [vmem:[#allocation2 + $0x10] sm:$0xff] %v682_v0  ;;  %v683_v2 = vadd.f32 %v677_v1, %v349_v63  ;;  %v703_v6 = vmul.f32 (!%p900_p11), %v901_v4, %v692_v3 }
 0x12e   : > { %v693_v7 = vld [vmem:[#allocation2 + $0x8] sm:$0xff] (!%p900_p11) }
 0x12f   : > { %687 = vst [vmem:[#allocation2 + $0x18] sm:$0xff] %v683_v2  ;;  %v704_v10 = vmul.f32 (!%p900_p11), %v901_v4, %v693_v7  ;;  %v714_v13 = vadd.f32 (!%p900_p11), %v902_v5, %v703_v6 }
 0x131   : > { %v715_v14 = vadd.f32 %v902_v5, %v704_v10  ;;  %v718_v17 = vmax.f32 %v714_v13, 0.0 }
 0x133   : > { %v719_v18 = vmax.f32 %v715_v14, 0.0  ;;  %722 = vst [vmem:[%s1230_s4] sm:$0xff] %v718_v17 }
 0x134   : > { %v694_v8 = vld [vmem:[#allocation2 + $0x10] sm:$0xff] }
 0x135   : > { %v705_v11 = vmul.f32 %v901_v4, %v694_v8  ;;  %723 = vst [vmem:[%s1230_s4 + $0x8] sm:$0xff] %v719_v18 }
 0x136   : > { %v695_v9 = vld [vmem:[#allocation2 + $0x18] sm:$0xff] }
 0x137   : > { %v706_v12 = vmul.f32 %v901_v4, %v695_v9  ;;  %v716_v15 = vadd.f32 %v902_v5, %v705_v11 }
 0x139   : > { %v717_v16 = vadd.f32 %v902_v5, %v706_v12  ;;  %v720_v19 = vmax.f32 %v716_v15, 0.0 }
 0x13b   : > { %v721_v20 = vmax.f32 %v717_v16, 0.0  ;;  %724 = vst [vmem:[%s1230_s4 + $0x10] sm:$0xff] %v720_v19 }
 0x13d   : > { %725 = vst [vmem:[%s1230_s4 + $0x18] sm:$0xff] %v721_v20 }
 0x13e PF: > { %s14_s19 = sadd.s32 1, %s1079_s19   ;;  %s1231_s15 = smov %s1067_s16 }
 0x13f   : > { %p11_p12 = scmp.ge.s32.totalorder %s14_s19, 5   ;;  %s1232_s16 = smov %s1142_s23 }
 0x140   : > { %s1233_s17 = smov %s1075_s18  ;;  %s1234_s18 = smov %s1236_s20 }
 0x141   :  { %13 = sbr.rel (!%p11_p12) target bundleno = 3 (0x3), region = 120 }

// kernel: resnet18_forward.32
= control target key start
LH: loop header
LB: loop body
LE: loop exit
PB: predicated region body
PF: predicated region fallthrough
CT: control target
= control target key end

     0   :  { %s1105_s15 = smov 0   ;;  %s1107_s16 = smov 0   ;;  %s1210_s0 = inlined_call_operand.vmem [shape: bf16[8,1152], index: 0, kind: input, shape index: {}]   ;;  %s1211_s1 = inlined_call_operand.vmem [shape: bf16[1152,256], index: 1, kind: input, shape index: {}]   ;;  %s1212_s2 = inlined_call_operand.vmem [shape: f32[1,256], index: 2, kind: input, shape index: {}]   ;;  %s1213_s3 = inlined_call_operand.vmem [shape: f32[1,256], index: 3, kind: input, shape index: {}]   ;;  %s1214_s4 = inlined_call_operand.vmem [shape: f32[8,256], index: 4, kind: output, shape index: {}]  }
   0x1   :  { %s1109_s17 = smov 0  }
   0x2 LB: > { %s26_s18 = sadd.s32 1, %s1072_s16  ;;  %p891_p0 = scmp.ge.s32.totalorder %s1076_s17, 1  ;;  %s1076_s17 = sphi %s1109_s17, %s14_s17   ;;  %s1072_s16 = sphi %s1107_s16, %s1216_s16   ;;  %s1068_s15 = sphi %s1105_s15, %s1215_s15  }
   0x3   : > { %p27_p1 = scmp.ge.s32.totalorder %s26_s18, 3  ;;  %p229_p2 = scmp.lt.s32.totalorder %s1076_s17, 4 }
   0x5   : > { %s1218_s18 = smov (%p27_p1, %s26_s18), 0  ;;  %p230_p3 = pnand %p891_p0, %p229_p2 }
   0x6   : > { %s281_s19 = smul.u32 (!%p230_p3), 3, %s1068_s15  ;;  %p895_p6 = scmp.ne.s32.totalorder (!%p230_p3), %s1068_s15, 0 }
   0x7   : > { %233 = sbr.rel (%p230_p3) target bundleno = 321 (0x141), region = 36 }
   0x8   : > { %s291_s20 = smul.u32 (!%p230_p3), 48, %s1068_s15  ;;  %p284_p4 = scmp.lt.s32.totalorder (!%p230_p3), %s281_s19, 8 }
   0xa   : > { %p293_p5 = scmp.lt.s32.totalorder (!%p230_p3), %s291_s20, 143 }
   0xe   : > { %s1220_s19 = smov (!%p284_p4, %s281_s19), 8  ;;  %s1222_s20 = smov (!%p293_p5, %s291_s20), 143 }
   0xf   : > { %s892_s21 = sshll.u32 %s1220_s19, 2  ;;  %s952_s25 = sshll.u32 %s1222_s20, 3  ;;  %v1078_v0 = vmov (!%p895_p6), 0.0  }
  0x10   : > { %s1130_s24 = scalar_lea.vmem %s1210_s0, %s892_s21  ;;  %s1135_s28 = scalar_lea.vmem %s1211_s1, %s952_s25  ;;  %328 = vst [vmem:[#allocation2] sm:$0xff] (!%p895_p6), %v1078_v0  ;;  %329 = vst [vmem:[#allocation2 + $0x8] sm:$0xff] (!%p895_p6), %v1078_v0 }
  0x11   : > { %327 = sbr.rel (%p895_p6) target bundleno = 24 (0x18), region = 40 }
  0x18 PF: > { %v979_v1 = vld [vmem:[%s1135_s28 + $0x4] ss:$8 sps:$4 sm:$0xff]   ;;  %v981_v2 = vld [vmem:[%s1135_s28] ss:$8 sps:$4 sm:$0xff]   ;;  %v1079_v3 = vmov 0   ;;  %p947_p7 = scmp.ne.s32.totalorder %s1068_s15, 2 }
  0x19   : > { %706 = vmatprep.mubr.bf16.mxu1 %v1079_v3  ;;  %633 = vmatprep.subr.bf16.mxu0 %v979_v1  ;;  %v982_v4 = vld [vmem:[%s1135_s28 + $0x14] ss:$8 sps:$4 sm:$0xff]   ;;  %v984_v5 = vld [vmem:[%s1135_s28 + $0x10] ss:$8 sps:$4 sm:$0xff]   ;;  %v985_v6 = vld [vmem:[%s1135_s28 + $0x24] ss:$8 sps:$4 sm:$0xff]  }
  0x1a   : > { %634 = vmatpush1.bf16.msra.mxu0 %v981_v2  ;;  %v987_v7 = vld [vmem:[%s1135_s28 + $0x20] ss:$8 sps:$4 sm:$0xff]   ;;  %v988_v8 = vld [vmem:[%s1135_s28 + $0x34] ss:$8 sps:$4 sm:$0xff]   ;;  %v990_v9 = vld [vmem:[%s1135_s28 + $0x30] ss:$8 sps:$4 sm:$0xff]  }
  0x1b   : > { %635 = vmatprep.subr.bf16.mxu0 %v982_v4  ;;  %v1003_v10 = vld [vmem:[%s1135_s28 + $0x104] ss:$8 sps:$4 sm:$0xff]   ;;  %v1005_v11 = vld [vmem:[%s1135_s28 + $0x100] ss:$8 sps:$4 sm:$0xff]   ;;  %v1009_v13 = vld [vmem:[%s1135_s28 + $0x114] ss:$8 sps:$4 sm:$0xff]   ;;  %v727_v4 = vlaneseq (!%p947_p7) }
  0x1c   : > { %v991_v12 = vld [vmem:[%s1135_s28 + $0x44] ss:$8 sps:$4 sm:$0xff]   ;;  %674 = vmatprep.subr.bf16.mxu1 %v1003_v10  ;;  %v1011_v14 = vld [vmem:[%s1135_s28 + $0x110] ss:$8 sps:$4 sm:$0xff]   ;;  %v993_v15 = vld [vmem:[%s1135_s28 + $0x40] ss:$8 sps:$4 sm:$0xff]  }
  0x1d   : > { %675 = vmatpush1.bf16.msra.mxu1 %v1005_v11  ;;  %v994_v16 = vld [vmem:[%s1135_s28 + $0x54] ss:$8 sps:$4 sm:$0xff]   ;;  %v1015_v17 = vld [vmem:[%s1135_s28 + $0x124] ss:$8 sps:$4 sm:$0xff]   ;;  %v1017_v18 = vld [vmem:[%s1135_s28 + $0x120] ss:$8 sps:$4 sm:$0xff]  }
  0x1e   : > { %636 = vmatpush1.bf16.msra.mxu0 %v984_v5  ;;  %676 = vmatprep.subr.bf16.mxu1 %v1009_v13  ;;  %v996_v19 = vld [vmem:[%s1135_s28 + $0x50] ss:$8 sps:$4 sm:$0xff]   ;;  %v1021_v20 = vld [vmem:[%s1135_s28 + $0x134] ss:$8 sps:$4 sm:$0xff]   ;;  %v997_v21 = vld [vmem:[%s1135_s28 + $0x64] ss:$8 sps:$4 sm:$0xff]  }
  0x1f   : > { %637 = vmatprep.subr.bf16.mxu0 %v985_v6  ;;  %v1023_v22 = vld [vmem:[%s1135_s28 + $0x130] ss:$8 sps:$4 sm:$0xff]   ;;  %v999_v23 = vld [vmem:[%s1135_s28 + $0x60] ss:$8 sps:$4 sm:$0xff]   ;;  %v1027_v24 = vld [vmem:[%s1135_s28 + $0x144] ss:$8 sps:$4 sm:$0xff]  }
  0x20   : > { %v1000_v25 = vld [vmem:[%s1135_s28 + $0x74] ss:$8 sps:$4 sm:$0xff]   ;;  %v1029_v26 = vld [vmem:[%s1135_s28 + $0x140] ss:$8 sps:$4 sm:$0xff]   ;;  %v1002_v27 = vld [vmem:[%s1135_s28 + $0x70] ss:$8 sps:$4 sm:$0xff]  }
  0x21   : > { %677 = vmatpush1.bf16.msra.mxu1 %v1011_v14  ;;  %v1033_v28 = vld [vmem:[%s1135_s28 + $0x154] ss:$8 sps:$4 sm:$0xff]   ;;  %v1006_v29 = vld [vmem:[%s1135_s28 + $0x84] ss:$8 sps:$4 sm:$0xff]   ;;  %v1035_v30 = vld [vmem:[%s1135_s28 + $0x150] ss:$8 sps:$4 sm:$0xff]  }
  0x22   : > { %638 = vmatpush1.bf16.msra.mxu0 %v987_v7  ;;  %678 = vmatprep.subr.bf16.mxu1 %v1015_v17  ;;  %v1008_v31 = vld [vmem:[%s1135_s28 + $0x80] ss:$8 sps:$4 sm:$0xff]   ;;  %v1039_v32 = vld [vmem:[%s1135_s28 + $0x164] ss:$8 sps:$4 sm:$0xff]   ;;  %v1012_v33 = vld [vmem:[%s1135_s28 + $0x94] ss:$8 sps:$4 sm:$0xff]  }
  0x23   : > { %639 = vmatprep.subr.bf16.mxu0 %v988_v8  ;;  %v332_v34 = vld [vmem:[%s1130_s24] sm:$0xff]  ;;  %v1014_v37 = vld [vmem:[%s1135_s28 + $0x90] ss:$8 sps:$4 sm:$0xff]   ;;  %v1045_v38 = vld [vmem:[%s1135_s28 + $0x174] ss:$8 sps:$4 sm:$0xff]   ;;  %v728_v5 = vshrl.u32 (!%p947_p7), %v727_v4, 7 }
  0x24   : > { %v897_v35 = vcombine.high %v332_v34, %v332_v34  ;;  %v1041_v36 = vld [vmem:[%s1135_s28 + $0x160] ss:$8 sps:$4 sm:$0xff]   ;;  %v1018_v39 = vld [vmem:[%s1135_s28 + $0xa4] ss:$8 sps:$4 sm:$0xff]   ;;  %v1047_v40 = vld [vmem:[%s1135_s28 + $0x170] ss:$8 sps:$4 sm:$0xff]   ;;  %v896_v53 = vcombine.low %v332_v34, %v332_v34 }
  0x25   : > { %679 = vmatpush1.bf16.msra.mxu1 %v1017_v18  ;;  %v1020_v41 = vld [vmem:[%s1135_s28 + $0xa0] ss:$8 sps:$4 sm:$0xff]   ;;  %v1024_v42 = vld [vmem:[%s1135_s28 + $0xb4] ss:$8 sps:$4 sm:$0xff]   ;;  %v1026_v44 = vld [vmem:[%s1135_s28 + $0xb0] ss:$8 sps:$4 sm:$0xff]  }
  0x26   : > { %640 = vmatpush1.bf16.msra.mxu0 %v990_v9  ;;  %680 = vmatprep.subr.bf16.mxu1 %v1021_v20  ;;  %v1051_v43 = vld [vmem:[%s1130_s24 + $0x8] ss:$0 sps:$4 sm:$0xff]   ;;  %v1030_v45 = vld [vmem:[%s1135_s28 + $0xc4] ss:$8 sps:$4 sm:$0xff]   ;;  %v1036_v47 = vld [vmem:[%s1135_s28 + $0xd4] ss:$8 sps:$4 sm:$0xff]  }
  0x27   : > { %641 = vmatprep.subr.bf16.mxu0 %v991_v12  ;;  %665 = vmatprep.mubr.bf16.mxu0 %v897_v35  ;;  %v1032_v46 = vld [vmem:[%s1135_s28 + $0xc0] ss:$8 sps:$4 sm:$0xff]   ;;  %v1038_v48 = vld [vmem:[%s1135_s28 + $0xd0] ss:$8 sps:$4 sm:$0xff]   ;;  %v1042_v49 = vld [vmem:[%s1135_s28 + $0xe4] ss:$8 sps:$4 sm:$0xff]  }
  0x28   : > { %v1044_v50 = vld [vmem:[%s1135_s28 + $0xe0] ss:$8 sps:$4 sm:$0xff]   ;;  %v1048_v51 = vld [vmem:[%s1135_s28 + $0xf4] ss:$8 sps:$4 sm:$0xff]   ;;  %v1050_v52 = vld [vmem:[%s1135_s28 + $0xf0] ss:$8 sps:$4 sm:$0xff]  }
  0x29   : > { %681 = vmatpush1.bf16.msra.mxu1 %v1023_v22  ;;  %v330_v58 = vld [vmem:[#allocation2] sm:$0xff]  ;;  %v331_v61 = vld [vmem:[#allocation2 + $0x8] sm:$0xff]  ;;  %v729_v8 = vsub.s32 (!%p947_p7), 0, %v728_v5  ;;  %v733_v9 = vsub.s32 (!%p947_p7), 1, %v728_v5 }
  0x2a   : > { %642 = vmatpush1.bf16.msra.mxu0 %v993_v15  ;;  %682 = vmatprep.subr.bf16.mxu1 %v1027_v24  ;;  %v725_v6 = vld [vmem:[%s1212_s2] sm:$0x3] (!%p947_p7) }
  0x2b   : > { %643 = vmatprep.subr.bf16.mxu0 %v994_v16  ;;  %v739_v7 = vld [vmem:[%s1213_s3] sm:$0x3] (!%p947_p7)  ;;  %v730_v12 = vrot.slane (!%p947_p7), %v725_v6, %v729_v8  ;;  %v734_v14 = vrot.slane (!%p947_p7), %v725_v6, %v733_v9 }
  0x2c   : > { %v744_v13 = vrot.slane (!%p947_p7), %v739_v7, %v729_v8  ;;  %v748_v15 = vrot.slane (!%p947_p7), %v739_v7, %v733_v9 }
  0x2d   : > { %683 = vmatpush1.bf16.msra.mxu1 %v1029_v26 }
  0x2e   : > { %644 = vmatpush1.bf16.msra.mxu0 %v996_v19  ;;  %684 = vmatprep.subr.bf16.mxu1 %v1033_v28 }
  0x2f   : > { %645 = vmatprep.subr.bf16.mxu0 %v997_v21 }
  0x31   : > { %685 = vmatpush1.bf16.msra.mxu1 %v1035_v30 }
  0x32   : > { %646 = vmatpush1.bf16.msra.mxu0 %v999_v23  ;;  %686 = vmatprep.subr.bf16.mxu1 %v1039_v32 }
  0x33   : > { %647 = vmatprep.subr.bf16.mxu0 %v1000_v25 }
  0x35   : > { %687 = vmatpush1.bf16.msra.mxu1 %v1041_v36 }
  0x36   : > { %648 = vmatpush1.bf16.msra.mxu0 %v1002_v27  ;;  %688 = vmatprep.subr.bf16.mxu1 %v1045_v38 }
  0x37   : > { %649 = vmatprep.subr.bf16.mxu0 %v1006_v29 }
  0x39   : > { %689 = vmatpush1.bf16.msra.mxu1 %v1047_v40 }
  0x3a   : > { %650 = vmatpush1.bf16.msra.mxu0 %v1008_v31 }
  0x3b   : > { %651 = vmatprep.subr.bf16.mxu0 %v1012_v33 }
  0x3c   : > { %707 = vmatmul.mubr.bf16.vlgmr.msra.gmra.mrb[0].mxu1 %v1051_v43 }
  0x3e   : > { %652 = vmatpush1.bf16.msra.mxu0 %v1014_v37 }
  0x3f   : > { %653 = vmatprep.subr.bf16.mxu0 %v1018_v39 }
  0x42   : > { %654 = vmatpush1.bf16.msra.mxu0 %v1020_v41 }
  0x43   : > { %655 = vmatprep.subr.bf16.mxu0 %v1024_v42 }
  0x46   : > { %656 = vmatpush1.bf16.msra.mxu0 %v1026_v44 }
  0x47   : > { %657 = vmatprep.subr.bf16.mxu0 %v1030_v45 }
  0x4a   : > { %658 = vmatpush1.bf16.msra.mxu0 %v1032_v46 }
  0x4b   : > { %659 = vmatprep.subr.bf16.mxu0 %v1036_v47 }
  0x4e   : > { %660 = vmatpush1.bf16.msra.mxu0 %v1038_v48 }
  0x4f   : > { %661 = vmatprep.subr.bf16.mxu0 %v1042_v49 }
  0x52   : > { %662 = vmatpush1.bf16.msra.mxu0 %v1044_v50 }
  0x53   : > { %663 = vmatprep.subr.bf16.mxu0 %v1048_v51 }
  0x56   : > { %664 = vmatpush1.bf16.msra.mxu0 %v1050_v52 }
  0x59   : > { %666 = vmatmul.mubr.bf16.vlgmr.msra.gmra.mrb[0].mxu0 %v896_v53 }
 0x10f   : > { %v708_v54 = vpop.f32.mrb[0].mxu1 }
 0x110   : > { %v710_v55 = vpop.f32.mrb[1].mxu1 }
 0x111   : > { %v712_v56 = vpop.f32.mrb[2].mxu1 }
 0x112   : > { %v713_v57 = vpop.f32.mrb[3].mxu1 }
 0x12c   : > { %v667_v59 = vpop.f32.mrb[0].mxu0  ;;  %722 = sbr.rel (%p947_p7) target bundleno = 321 (0x141), region = 44 }
 0x12d   : > { %v709_v60 = vadd.f32 %v708_v54, %v667_v59  ;;  %v669_v62 = vpop.f32.mrb[1].mxu0 }
 0x12e   : > { %v711_v63 = vadd.f32 %v710_v55, %v669_v62  ;;  %v671_v0 = vpop.f32.mrb[2].mxu0 }
 0x12f   : > { %v715_v1 = vadd.f32 %v709_v60, %v330_v58  ;;  %v672_v2 = vpop.f32.mrb[3].mxu0 }
 0x130   : > { %v716_v3 = vadd.f32 %v711_v63, %v331_v61 }
 0x131   : > { %717 = vst [vmem:[#allocation2] sm:$0xff] %v715_v1 }
 0x132   : > { %718 = vst [vmem:[#allocation2 + $0x8] sm:$0xff] %v716_v3 }
 0x138   : > { %v723_v10 = vld [vmem:[#allocation2] sm:$0xff] }
 0x139   : > { %v724_v11 = vld [vmem:[#allocation2 + $0x8] sm:$0xff]  ;;  %v737_v16 = vmul.f32 %v730_v12, %v723_v10 }
 0x13a   : > { %v738_v17 = vmul.f32 %v734_v14, %v724_v11 }
 0x13b   : > { %v751_v18 = vadd.f32 %v744_v13, %v737_v16 }
 0x13c   : > { %v752_v19 = vadd.f32 %v748_v15, %v738_v17 }
 0x13d   : > { %v753_v20 = vmax.f32 %v751_v18, 0.0 }
 0x13e   : > { %v754_v21 = vmax.f32 %v752_v19, 0.0 }
 0x13f   : > { %755 = vst [vmem:[%s1214_s4] sm:$0xff] %v753_v20 }
 0x140   : > { %756 = vst [vmem:[%s1214_s4 + $0x8] sm:$0xff] %v754_v21 }
 0x141 PF: > { %s14_s17 = sadd.s32 1, %s1076_s17   ;;  %s1215_s15 = smov %s1072_s16 }
 0x142   : > { %p11_p8 = scmp.ge.s32.totalorder %s14_s17, 5   ;;  %s1216_s16 = smov %s1218_s18 }
 0x144   :  { %13 = sbr.rel (!%p11_p8) target bundleno = 2 (0x2), region = 83 }

// kernel: resnet18_forward.33
= control target key start
LH: loop header
LB: loop body
LE: loop exit
PB: predicated region body
PF: predicated region fallthrough
CT: control target
= control target key end

     0   :  { %v248_v1 = vmov 0   ;;  %v175_v18 = vlaneseq  ;;  %s337_s1 = inlined_call_operand.vmem [shape: bf16[128,256], index: 1, kind: input, shape index: {}]   ;;  %s338_s0 = inlined_call_operand.vmem [shape: bf16[8,128], index: 0, kind: input, shape index: {}]   ;;  %s339_s2 = inlined_call_operand.vmem [shape: f32[1,256], index: 2, kind: input, shape index: {}]   ;;  %s340_s3 = inlined_call_operand.vmem [shape: f32[1,256], index: 3, kind: input, shape index: {}]   ;;  %s341_s4 = inlined_call_operand.vmem [shape: f32[8,256], index: 4, kind: output, shape index: {}]  }
   0x1   :  { %v224_v0 = vld [vmem:[%s337_s1 + $0x4] ss:$8 sps:$4 sm:$0xff]   ;;  %155 = vmatprep.mubr.bf16.mxu0 %v248_v1  ;;  %v226_v2 = vld [vmem:[%s337_s1] ss:$8 sps:$4 sm:$0xff]   ;;  %v227_v3 = vld [vmem:[%s337_s1 + $0x14] ss:$8 sps:$4 sm:$0xff]  }
   0x2   :  { %123 = vmatprep.subr.bf16.mxu0 %v224_v0  ;;  %v229_v4 = vld [vmem:[%s337_s1 + $0x10] ss:$8 sps:$4 sm:$0xff]   ;;  %v230_v5 = vld [vmem:[%s337_s1 + $0x24] ss:$8 sps:$4 sm:$0xff]   ;;  %v232_v6 = vld [vmem:[%s337_s1 + $0x20] ss:$8 sps:$4 sm:$0xff]  }
   0x3   :  { %124 = vmatpush1.bf16.msra.mxu0 %v226_v2  ;;  %v233_v7 = vld [vmem:[%s337_s1 + $0x34] ss:$8 sps:$4 sm:$0xff]   ;;  %v235_v8 = vld [vmem:[%s337_s1 + $0x30] ss:$8 sps:$4 sm:$0xff]   ;;  %v236_v9 = vld [vmem:[%s337_s1 + $0x44] ss:$8 sps:$4 sm:$0xff]  }
   0x4   :  { %125 = vmatprep.subr.bf16.mxu0 %v227_v3  ;;  %v238_v10 = vld [vmem:[%s337_s1 + $0x40] ss:$8 sps:$4 sm:$0xff]   ;;  %v239_v11 = vld [vmem:[%s337_s1 + $0x54] ss:$8 sps:$4 sm:$0xff]   ;;  %v241_v12 = vld [vmem:[%s337_s1 + $0x50] ss:$8 sps:$4 sm:$0xff]  }
   0x5   :  { %v242_v13 = vld [vmem:[%s337_s1 + $0x64] ss:$8 sps:$4 sm:$0xff]   ;;  %v244_v14 = vld [vmem:[%s337_s1 + $0x60] ss:$8 sps:$4 sm:$0xff]   ;;  %v245_v15 = vld [vmem:[%s337_s1 + $0x74] ss:$8 sps:$4 sm:$0xff]  }
   0x6   :  { %v247_v16 = vld [vmem:[%s337_s1 + $0x70] ss:$8 sps:$4 sm:$0xff]   ;;  %v26_v17 = vld [vmem:[%s338_s0] sm:$0xf]  ;;  %v176_v19 = vshrl.u32 %v175_v18, 7 }
   0x7   :  { %126 = vmatpush1.bf16.msra.mxu0 %v229_v4  ;;  %v173_v21 = vld [vmem:[%s339_s2] sm:$0x3] }
   0x8   :  { %127 = vmatprep.subr.bf16.mxu0 %v230_v5  ;;  %v177_v20 = vsub.s32 0, %v176_v19  ;;  %v181_v22 = vsub.s32 1, %v176_v19  ;;  %v187_v23 = vld [vmem:[%s340_s3] sm:$0x3] }
   0xa   :  { %v178_v24 = vrot.slane %v173_v21, %v177_v20  ;;  %v182_v25 = vrot.slane %v173_v21, %v181_v22  ;;  %v192_v26 = vrot.slane %v187_v23, %v177_v20  ;;  %v196_v28 = vrot.slane %v187_v23, %v181_v22 }
   0xb   :  { %128 = vmatpush1.bf16.msra.mxu0 %v232_v6 }
   0xc   :  { %129 = vmatprep.subr.bf16.mxu0 %v233_v7 }
   0xf   :  { %130 = vmatpush1.bf16.msra.mxu0 %v235_v8 }
  0x10   :  { %131 = vmatprep.subr.bf16.mxu0 %v236_v9 }
  0x13   :  { %132 = vmatpush1.bf16.msra.mxu0 %v238_v10 }
  0x14   :  { %133 = vmatprep.subr.bf16.mxu0 %v239_v11 }
  0x17   :  { %134 = vmatpush1.bf16.msra.mxu0 %v241_v12 }
  0x18   :  { %135 = vmatprep.subr.bf16.mxu0 %v242_v13 }
  0x1b   :  { %136 = vmatpush1.bf16.msra.mxu0 %v244_v14 }
  0x1c   :  { %137 = vmatprep.subr.bf16.mxu0 %v245_v15 }
  0x1f   :  { %138 = vmatpush1.bf16.msra.mxu0 %v247_v16 }
  0x22   :  { %156 = vmatmul.mubr.bf16.vlgmr.msra.gmra.mrb[0].mxu0 %v26_v17 }
  0xf5   :  { %v157_v27 = vpop.f32.mrb[0].mxu0 }
  0xf6   :  { %v185_v29 = vmul.f32 %v178_v24, %v157_v27  ;;  %v159_v30 = vpop.f32.mrb[1].mxu0 }
  0xf7   :  { %v186_v31 = vmul.f32 %v182_v25, %v159_v30  ;;  %v161_v32 = vpop.f32.mrb[2].mxu0 }
  0xf8   :  { %v199_v33 = vadd.f32 %v192_v26, %v185_v29  ;;  %v162_v34 = vpop.f32.mrb[3].mxu0 }
  0xf9   :  { %v200_v35 = vadd.f32 %v196_v28, %v186_v31 }
  0xfa   :  { %201 = vst [vmem:[%s341_s4] sm:$0xff] %v199_v33 }
  0xfb   :  { %202 = vst [vmem:[%s341_s4 + $0x8] sm:$0xff] %v200_v35 }

// kernel: resnet18_forward.34
= control target key start
LH: loop header
LB: loop body
LE: loop exit
PB: predicated region body
PF: predicated region fallthrough
CT: control target
= control target key end

     0   :  { %s1199_s18 = smov 0   ;;  %s1201_s19 = smov 0   ;;  %s1310_s0 = inlined_call_operand.vmem [shape: bf16[8,2304], index: 0, kind: input, shape index: {}]   ;;  %s1311_s1 = inlined_call_operand.vmem [shape: bf16[2304,256], index: 1, kind: input, shape index: {}]   ;;  %s1312_s2 = inlined_call_operand.vmem [shape: f32[1,256], index: 2, kind: input, shape index: {}]   ;;  %s1313_s3 = inlined_call_operand.vmem [shape: f32[1,256], index: 3, kind: input, shape index: {}]   ;;  %s1314_s4 = inlined_call_operand.vmem [shape: f32[8,256], index: 4, kind: input, shape index: {}]   ;;  %s1315_s5 = inlined_call_operand.vmem [shape: f32[8,256], index: 5, kind: output, shape index: {}]  }
   0x1   :  { %s1203_s20 = smov 0  }
   0x2 LB: > { %s27_s21 = sadd.s32 1, %s1161_s19  ;;  %p980_p0 = scmp.ge.s32.totalorder %s1165_s20, 1  ;;  %s1165_s20 = sphi %s1203_s20, %s15_s20   ;;  %s1161_s19 = sphi %s1201_s19, %s1317_s19   ;;  %s1157_s18 = sphi %s1199_s18, %s1316_s18  }
   0x3   : > { %p28_p1 = scmp.ge.s32.totalorder %s27_s21, 6  ;;  %p271_p2 = scmp.lt.s32.totalorder %s1165_s20, 7 }
   0x5   : > { %s1319_s21 = smov (%p28_p1, %s27_s21), 0  ;;  %p272_p3 = pnand %p980_p0, %p271_p2 }
   0x6   : > { %s334_s22 = smul.u32 (!%p272_p3), 3, %s1157_s18  ;;  %p984_p6 = scmp.ne.s32.totalorder (!%p272_p3), %s1157_s18, 0 }
   0x7   : > { %275 = sbr.rel (%p272_p3) target bundleno = 323 (0x143), region = 40 }
   0x8   : > { %s344_s23 = smul.u32 (!%p272_p3), 48, %s1157_s18  ;;  %p337_p4 = scmp.lt.s32.totalorder (!%p272_p3), %s334_s22, 17 }
   0xa   : > { %p346_p5 = scmp.lt.s32.totalorder (!%p272_p3), %s344_s23, 287 }
   0xe   : > { %s1321_s22 = smov (!%p337_p4, %s334_s22), 17  ;;  %s1323_s23 = smov (!%p346_p5, %s344_s23), 287 }
   0xf   : > { %s981_s24 = sshll.u32 %s1321_s22, 2  ;;  %s1041_s28 = sshll.u32 %s1323_s23, 3  ;;  %v1167_v0 = vmov (!%p984_p6), 0.0  }
  0x10   : > { %s1224_s27 = scalar_lea.vmem %s1310_s0, %s981_s24  ;;  %s1229_s6 = scalar_lea.vmem %s1311_s1, %s1041_s28  ;;  %391 = vst [vmem:[#allocation2] sm:$0xff] (!%p984_p6), %v1167_v0  ;;  %392 = vst [vmem:[#allocation2 + $0x8] sm:$0xff] (!%p984_p6), %v1167_v0 }
  0x11   : > { %390 = sbr.rel (%p984_p6) target bundleno = 24 (0x18), region = 44 }
  0x18 PF: > { %v1068_v1 = vld [vmem:[%s1229_s6 + $0x4] ss:$8 sps:$4 sm:$0xff]   ;;  %v1070_v2 = vld [vmem:[%s1229_s6] ss:$8 sps:$4 sm:$0xff]   ;;  %v1168_v3 = vmov 0   ;;  %p1036_p7 = scmp.ne.s32.totalorder %s1157_s18, 5 }
  0x19   : > { %769 = vmatprep.mubr.bf16.mxu1 %v1168_v3  ;;  %696 = vmatprep.subr.bf16.mxu0 %v1068_v1  ;;  %v1071_v4 = vld [vmem:[%s1229_s6 + $0x14] ss:$8 sps:$4 sm:$0xff]   ;;  %v1073_v5 = vld [vmem:[%s1229_s6 + $0x10] ss:$8 sps:$4 sm:$0xff]   ;;  %v1074_v6 = vld [vmem:[%s1229_s6 + $0x24] ss:$8 sps:$4 sm:$0xff]  }
  0x1a   : > { %697 = vmatpush1.bf16.msra.mxu0 %v1070_v2  ;;  %v1076_v7 = vld [vmem:[%s1229_s6 + $0x20] ss:$8 sps:$4 sm:$0xff]   ;;  %v1077_v8 = vld [vmem:[%s1229_s6 + $0x34] ss:$8 sps:$4 sm:$0xff]   ;;  %v1079_v9 = vld [vmem:[%s1229_s6 + $0x30] ss:$8 sps:$4 sm:$0xff]  }
  0x1b   : > { %698 = vmatprep.subr.bf16.mxu0 %v1071_v4  ;;  %v1092_v10 = vld [vmem:[%s1229_s6 + $0x104] ss:$8 sps:$4 sm:$0xff]   ;;  %v1094_v11 = vld [vmem:[%s1229_s6 + $0x100] ss:$8 sps:$4 sm:$0xff]   ;;  %v1098_v13 = vld [vmem:[%s1229_s6 + $0x114] ss:$8 sps:$4 sm:$0xff]   ;;  %v790_v4 = vlaneseq (!%p1036_p7) }
  0x1c   : > { %v1080_v12 = vld [vmem:[%s1229_s6 + $0x44] ss:$8 sps:$4 sm:$0xff]   ;;  %737 = vmatprep.subr.bf16.mxu1 %v1092_v10  ;;  %v1100_v14 = vld [vmem:[%s1229_s6 + $0x110] ss:$8 sps:$4 sm:$0xff]   ;;  %v1082_v15 = vld [vmem:[%s1229_s6 + $0x40] ss:$8 sps:$4 sm:$0xff]  }
  0x1d   : > { %738 = vmatpush1.bf16.msra.mxu1 %v1094_v11  ;;  %v1083_v16 = vld [vmem:[%s1229_s6 + $0x54] ss:$8 sps:$4 sm:$0xff]   ;;  %v1104_v17 = vld [vmem:[%s1229_s6 + $0x124] ss:$8 sps:$4 sm:$0xff]   ;;  %v1106_v18 = vld [vmem:[%s1229_s6 + $0x120] ss:$8 sps:$4 sm:$0xff]  }
  0x1e   : > { %699 = vmatpush1.bf16.msra.mxu0 %v1073_v5  ;;  %739 = vmatprep.subr.bf16.mxu1 %v1098_v13  ;;  %v1085_v19 = vld [vmem:[%s1229_s6 + $0x50] ss:$8 sps:$4 sm:$0xff]   ;;  %v1110_v20 = vld [vmem:[%s1229_s6 + $0x134] ss:$8 sps:$4 sm:$0xff]   ;;  %v1086_v21 = vld [vmem:[%s1229_s6 + $0x64] ss:$8 sps:$4 sm:$0xff]  }
  0x1f   : > { %700 = vmatprep.subr.bf16.mxu0 %v1074_v6  ;;  %v1112_v22 = vld [vmem:[%s1229_s6 + $0x130] ss:$8 sps:$4 sm:$0xff]   ;;  %v1088_v23 = vld [vmem:[%s1229_s6 + $0x60] ss:$8 sps:$4 sm:$0xff]   ;;  %v1116_v24 = vld [vmem:[%s1229_s6 + $0x144] ss:$8 sps:$4 sm:$0xff]  }
  0x20   : > { %v1089_v25 = vld [vmem:[%s1229_s6 + $0x74] ss:$8 sps:$4 sm:$0xff]   ;;  %v1118_v26 = vld [vmem:[%s1229_s6 + $0x140] ss:$8 sps:$4 sm:$0xff]   ;;  %v1091_v27 = vld [vmem:[%s1229_s6 + $0x70] ss:$8 sps:$4 sm:$0xff]  }
  0x21   : > { %740 = vmatpush1.bf16.msra.mxu1 %v1100_v14  ;;  %v1122_v28 = vld [vmem:[%s1229_s6 + $0x154] ss:$8 sps:$4 sm:$0xff]   ;;  %v1095_v29 = vld [vmem:[%s1229_s6 + $0x84] ss:$8 sps:$4 sm:$0xff]   ;;  %v1124_v30 = vld [vmem:[%s1229_s6 + $0x150] ss:$8 sps:$4 sm:$0xff]  }
  0x22   : > { %701 = vmatpush1.bf16.msra.mxu0 %v1076_v7  ;;  %741 = vmatprep.subr.bf16.mxu1 %v1104_v17  ;;  %v1097_v31 = vld [vmem:[%s1229_s6 + $0x80] ss:$8 sps:$4 sm:$0xff]   ;;  %v1128_v32 = vld [vmem:[%s1229_s6 + $0x164] ss:$8 sps:$4 sm:$0xff]   ;;  %v1101_v33 = vld [vmem:[%s1229_s6 + $0x94] ss:$8 sps:$4 sm:$0xff]  }
  0x23   : > { %702 = vmatprep.subr.bf16.mxu0 %v1077_v8  ;;  %v395_v34 = vld [vmem:[%s1224_s27] sm:$0xff]  ;;  %v1103_v37 = vld [vmem:[%s1229_s6 + $0x90] ss:$8 sps:$4 sm:$0xff]   ;;  %v1134_v38 = vld [vmem:[%s1229_s6 + $0x174] ss:$8 sps:$4 sm:$0xff]   ;;  %v791_v5 = vshrl.u32 (!%p1036_p7), %v790_v4, 7 }
  0x24   : > { %v986_v35 = vcombine.high %v395_v34, %v395_v34  ;;  %v1130_v36 = vld [vmem:[%s1229_s6 + $0x160] ss:$8 sps:$4 sm:$0xff]   ;;  %v1107_v39 = vld [vmem:[%s1229_s6 + $0xa4] ss:$8 sps:$4 sm:$0xff]   ;;  %v1136_v40 = vld [vmem:[%s1229_s6 + $0x170] ss:$8 sps:$4 sm:$0xff]   ;;  %v985_v53 = vcombine.low %v395_v34, %v395_v34 }
  0x25   : > { %742 = vmatpush1.bf16.msra.mxu1 %v1106_v18  ;;  %v1109_v41 = vld [vmem:[%s1229_s6 + $0xa0] ss:$8 sps:$4 sm:$0xff]   ;;  %v1113_v42 = vld [vmem:[%s1229_s6 + $0xb4] ss:$8 sps:$4 sm:$0xff]   ;;  %v1115_v44 = vld [vmem:[%s1229_s6 + $0xb0] ss:$8 sps:$4 sm:$0xff]  }
  0x26   : > { %703 = vmatpush1.bf16.msra.mxu0 %v1079_v9  ;;  %743 = vmatprep.subr.bf16.mxu1 %v1110_v20  ;;  %v1140_v43 = vld [vmem:[%s1224_s27 + $0x8] ss:$0 sps:$4 sm:$0xff]   ;;  %v1119_v45 = vld [vmem:[%s1229_s6 + $0xc4] ss:$8 sps:$4 sm:$0xff]   ;;  %v1125_v47 = vld [vmem:[%s1229_s6 + $0xd4] ss:$8 sps:$4 sm:$0xff]  }
  0x27   : > { %704 = vmatprep.subr.bf16.mxu0 %v1080_v12  ;;  %728 = vmatprep.mubr.bf16.mxu0 %v986_v35  ;;  %v1121_v46 = vld [vmem:[%s1229_s6 + $0xc0] ss:$8 sps:$4 sm:$0xff]   ;;  %v1127_v48 = vld [vmem:[%s1229_s6 + $0xd0] ss:$8 sps:$4 sm:$0xff]   ;;  %v1131_v49 = vld [vmem:[%s1229_s6 + $0xe4] ss:$8 sps:$4 sm:$0xff]  }
  0x28   : > { %v1133_v50 = vld [vmem:[%s1229_s6 + $0xe0] ss:$8 sps:$4 sm:$0xff]   ;;  %v1137_v51 = vld [vmem:[%s1229_s6 + $0xf4] ss:$8 sps:$4 sm:$0xff]   ;;  %v1139_v52 = vld [vmem:[%s1229_s6 + $0xf0] ss:$8 sps:$4 sm:$0xff]  }
  0x29   : > { %744 = vmatpush1.bf16.msra.mxu1 %v1112_v22  ;;  %v393_v58 = vld [vmem:[#allocation2] sm:$0xff]  ;;  %v394_v61 = vld [vmem:[#allocation2 + $0x8] sm:$0xff]  ;;  %v792_v8 = vsub.s32 (!%p1036_p7), 0, %v791_v5  ;;  %v796_v9 = vsub.s32 (!%p1036_p7), 1, %v791_v5 }
  0x2a   : > { %705 = vmatpush1.bf16.msra.mxu0 %v1082_v15  ;;  %745 = vmatprep.subr.bf16.mxu1 %v1116_v24  ;;  %v788_v6 = vld [vmem:[%s1312_s2] sm:$0x3] (!%p1036_p7) }
  0x2b   : > { %706 = vmatprep.subr.bf16.mxu0 %v1083_v16  ;;  %v802_v7 = vld [vmem:[%s1313_s3] sm:$0x3] (!%p1036_p7)  ;;  %v793_v12 = vrot.slane (!%p1036_p7), %v788_v6, %v792_v8  ;;  %v797_v14 = vrot.slane (!%p1036_p7), %v788_v6, %v796_v9 }
  0x2c   : > { %v807_v13 = vrot.slane (!%p1036_p7), %v802_v7, %v792_v8  ;;  %v811_v15 = vrot.slane (!%p1036_p7), %v802_v7, %v796_v9  ;;  %v816_v18 = vld [vmem:[%s1314_s4] sm:$0xff] (!%p1036_p7) }
  0x2d   : > { %746 = vmatpush1.bf16.msra.mxu1 %v1118_v26 }
  0x2e   : > { %707 = vmatpush1.bf16.msra.mxu0 %v1085_v19  ;;  %747 = vmatprep.subr.bf16.mxu1 %v1122_v28  ;;  %v817_v19 = vld [vmem:[%s1314_s4 + $0x8] sm:$0xff] (!%p1036_p7) }
  0x2f   : > { %708 = vmatprep.subr.bf16.mxu0 %v1086_v21 }
  0x31   : > { %748 = vmatpush1.bf16.msra.mxu1 %v1124_v30 }
  0x32   : > { %709 = vmatpush1.bf16.msra.mxu0 %v1088_v23  ;;  %749 = vmatprep.subr.bf16.mxu1 %v1128_v32 }
  0x33   : > { %710 = vmatprep.subr.bf16.mxu0 %v1089_v25 }
  0x35   : > { %750 = vmatpush1.bf16.msra.mxu1 %v1130_v36 }
  0x36   : > { %711 = vmatpush1.bf16.msra.mxu0 %v1091_v27  ;;  %751 = vmatprep.subr.bf16.mxu1 %v1134_v38 }
  0x37   : > { %712 = vmatprep.subr.bf16.mxu0 %v1095_v29 }
  0x39   : > { %752 = vmatpush1.bf16.msra.mxu1 %v1136_v40 }
  0x3a   : > { %713 = vmatpush1.bf16.msra.mxu0 %v1097_v31 }
  0x3b   : > { %714 = vmatprep.subr.bf16.mxu0 %v1101_v33 }
  0x3c   : > { %770 = vmatmul.mubr.bf16.vlgmr.msra.gmra.mrb[0].mxu1 %v1140_v43 }
  0x3e   : > { %715 = vmatpush1.bf16.msra.mxu0 %v1103_v37 }
  0x3f   : > { %716 = vmatprep.subr.bf16.mxu0 %v1107_v39 }
  0x42   : > { %717 = vmatpush1.bf16.msra.mxu0 %v1109_v41 }
  0x43   : > { %718 = vmatprep.subr.bf16.mxu0 %v1113_v42 }
  0x46   : > { %719 = vmatpush1.bf16.msra.mxu0 %v1115_v44 }
  0x47   : > { %720 = vmatprep.subr.bf16.mxu0 %v1119_v45 }
  0x4a   : > { %721 = vmatpush1.bf16.msra.mxu0 %v1121_v46 }
  0x4b   : > { %722 = vmatprep.subr.bf16.mxu0 %v1125_v47 }
  0x4e   : > { %723 = vmatpush1.bf16.msra.mxu0 %v1127_v48 }
  0x4f   : > { %724 = vmatprep.subr.bf16.mxu0 %v1131_v49 }
  0x52   : > { %725 = vmatpush1.bf16.msra.mxu0 %v1133_v50 }
  0x53   : > { %726 = vmatprep.subr.bf16.mxu0 %v1137_v51 }
  0x56   : > { %727 = vmatpush1.bf16.msra.mxu0 %v1139_v52 }
  0x59   : > { %729 = vmatmul.mubr.bf16.vlgmr.msra.gmra.mrb[0].mxu0 %v985_v53 }
 0x10f   : > { %v771_v54 = vpop.f32.mrb[0].mxu1 }
 0x110   : > { %v773_v55 = vpop.f32.mrb[1].mxu1 }
 0x111   : > { %v775_v56 = vpop.f32.mrb[2].mxu1 }
 0x112   : > { %v776_v57 = vpop.f32.mrb[3].mxu1 }
 0x12c   : > { %v730_v59 = vpop.f32.mrb[0].mxu0  ;;  %785 = sbr.rel (%p1036_p7) target bundleno = 323 (0x143), region = 48 }
 0x12d   : > { %v772_v60 = vadd.f32 %v771_v54, %v730_v59  ;;  %v732_v62 = vpop.f32.mrb[1].mxu0 }
 0x12e   : > { %v774_v63 = vadd.f32 %v773_v55, %v732_v62  ;;  %v734_v0 = vpop.f32.mrb[2].mxu0 }
 0x12f   : > { %v778_v1 = vadd.f32 %v772_v60, %v393_v58  ;;  %v735_v2 = vpop.f32.mrb[3].mxu0 }
 0x130   : > { %v779_v3 = vadd.f32 %v774_v63, %v394_v61 }
 0x131   : > { %780 = vst [vmem:[#allocation2] sm:$0xff] %v778_v1 }
 0x132   : > { %781 = vst [vmem:[#allocation2 + $0x8] sm:$0xff] %v779_v3 }
 0x138   : > { %v786_v10 = vld [vmem:[#allocation2] sm:$0xff] }
 0x139   : > { %v787_v11 = vld [vmem:[#allocation2 + $0x8] sm:$0xff]  ;;  %v800_v16 = vmul.f32 %v793_v12, %v786_v10 }
 0x13a   : > { %v801_v17 = vmul.f32 %v797_v14, %v787_v11 }
 0x13b   : > { %v814_v20 = vadd.f32 %v807_v13, %v800_v16 }
 0x13c   : > { %v815_v21 = vadd.f32 %v811_v15, %v801_v17 }
 0x13d   : > { %v818_v22 = vadd.f32 %v816_v18, %v814_v20 }
 0x13e   : > { %v819_v23 = vadd.f32 %v817_v19, %v815_v21 }
 0x13f   : > { %v820_v24 = vmax.f32 %v818_v22, 0.0 }
 0x140   : > { %v821_v25 = vmax.f32 %v819_v23, 0.0 }
 0x141   : > { %822 = vst [vmem:[%s1315_s5] sm:$0xff] %v820_v24 }
 0x142   : > { %823 = vst [vmem:[%s1315_s5 + $0x8] sm:$0xff] %v821_v25 }
 0x143 PF: > { %s15_s20 = sadd.s32 1, %s1165_s20   ;;  %s1316_s18 = smov %s1161_s19 }
 0x144   : > { %p12_p8 = scmp.ge.s32.totalorder %s15_s20, 8   ;;  %s1317_s19 = smov %s1319_s21 }
 0x146   :  { %14 = sbr.rel (!%p12_p8) target bundleno = 2 (0x2), region = 90 }

// kernel: resnet18_forward.35
= control target key start
LH: loop header
LB: loop body
LE: loop exit
PB: predicated region body
PF: predicated region fallthrough
CT: control target
= control target key end

     0   :  { %s1105_s15 = smov 0   ;;  %s1107_s16 = smov 0   ;;  %s1210_s0 = inlined_call_operand.vmem [shape: bf16[8,2304], index: 0, kind: input, shape index: {}]   ;;  %s1211_s1 = inlined_call_operand.vmem [shape: bf16[2304,256], index: 1, kind: input, shape index: {}]   ;;  %s1212_s2 = inlined_call_operand.vmem [shape: f32[1,256], index: 2, kind: input, shape index: {}]   ;;  %s1213_s3 = inlined_call_operand.vmem [shape: f32[1,256], index: 3, kind: input, shape index: {}]   ;;  %s1214_s4 = inlined_call_operand.vmem [shape: f32[8,256], index: 4, kind: output, shape index: {}]  }
   0x1   :  { %s1109_s17 = smov 0  }
   0x2 LB: > { %s26_s18 = sadd.s32 1, %s1072_s16  ;;  %p891_p0 = scmp.ge.s32.totalorder %s1076_s17, 1  ;;  %s1076_s17 = sphi %s1109_s17, %s14_s17   ;;  %s1072_s16 = sphi %s1107_s16, %s1216_s16   ;;  %s1068_s15 = sphi %s1105_s15, %s1215_s15  }
   0x3   : > { %p27_p1 = scmp.ge.s32.totalorder %s26_s18, 6  ;;  %p229_p2 = scmp.lt.s32.totalorder %s1076_s17, 7 }
   0x5   : > { %s1218_s18 = smov (%p27_p1, %s26_s18), 0  ;;  %p230_p3 = pnand %p891_p0, %p229_p2 }
   0x6   : > { %s281_s19 = smul.u32 (!%p230_p3), 3, %s1068_s15  ;;  %p895_p6 = scmp.ne.s32.totalorder (!%p230_p3), %s1068_s15, 0 }
   0x7   : > { %233 = sbr.rel (%p230_p3) target bundleno = 321 (0x141), region = 36 }
   0x8   : > { %s291_s20 = smul.u32 (!%p230_p3), 48, %s1068_s15  ;;  %p284_p4 = scmp.lt.s32.totalorder (!%p230_p3), %s281_s19, 17 }
   0xa   : > { %p293_p5 = scmp.lt.s32.totalorder (!%p230_p3), %s291_s20, 287 }
   0xe   : > { %s1220_s19 = smov (!%p284_p4, %s281_s19), 17  ;;  %s1222_s20 = smov (!%p293_p5, %s291_s20), 287 }
   0xf   : > { %s892_s21 = sshll.u32 %s1220_s19, 2  ;;  %s952_s25 = sshll.u32 %s1222_s20, 3  ;;  %v1078_v0 = vmov (!%p895_p6), 0.0  }
  0x10   : > { %s1130_s24 = scalar_lea.vmem %s1210_s0, %s892_s21  ;;  %s1135_s28 = scalar_lea.vmem %s1211_s1, %s952_s25  ;;  %328 = vst [vmem:[#allocation2] sm:$0xff] (!%p895_p6), %v1078_v0  ;;  %329 = vst [vmem:[#allocation2 + $0x8] sm:$0xff] (!%p895_p6), %v1078_v0 }
  0x11   : > { %327 = sbr.rel (%p895_p6) target bundleno = 24 (0x18), region = 40 }
  0x18 PF: > { %v979_v1 = vld [vmem:[%s1135_s28 + $0x4] ss:$8 sps:$4 sm:$0xff]   ;;  %v981_v2 = vld [vmem:[%s1135_s28] ss:$8 sps:$4 sm:$0xff]   ;;  %v1079_v3 = vmov 0   ;;  %p947_p7 = scmp.ne.s32.totalorder %s1068_s15, 5 }
  0x19   : > { %706 = vmatprep.mubr.bf16.mxu1 %v1079_v3  ;;  %633 = vmatprep.subr.bf16.mxu0 %v979_v1  ;;  %v982_v4 = vld [vmem:[%s1135_s28 + $0x14] ss:$8 sps:$4 sm:$0xff]   ;;  %v984_v5 = vld [vmem:[%s1135_s28 + $0x10] ss:$8 sps:$4 sm:$0xff]   ;;  %v985_v6 = vld [vmem:[%s1135_s28 + $0x24] ss:$8 sps:$4 sm:$0xff]  }
  0x1a   : > { %634 = vmatpush1.bf16.msra.mxu0 %v981_v2  ;;  %v987_v7 = vld [vmem:[%s1135_s28 + $0x20] ss:$8 sps:$4 sm:$0xff]   ;;  %v988_v8 = vld [vmem:[%s1135_s28 + $0x34] ss:$8 sps:$4 sm:$0xff]   ;;  %v990_v9 = vld [vmem:[%s1135_s28 + $0x30] ss:$8 sps:$4 sm:$0xff]  }
  0x1b   : > { %635 = vmatprep.subr.bf16.mxu0 %v982_v4  ;;  %v1003_v10 = vld [vmem:[%s1135_s28 + $0x104] ss:$8 sps:$4 sm:$0xff]   ;;  %v1005_v11 = vld [vmem:[%s1135_s28 + $0x100] ss:$8 sps:$4 sm:$0xff]   ;;  %v1009_v13 = vld [vmem:[%s1135_s28 + $0x114] ss:$8 sps:$4 sm:$0xff]   ;;  %v727_v4 = vlaneseq (!%p947_p7) }
  0x1c   : > { %v991_v12 = vld [vmem:[%s1135_s28 + $0x44] ss:$8 sps:$4 sm:$0xff]   ;;  %674 = vmatprep.subr.bf16.mxu1 %v1003_v10  ;;  %v1011_v14 = vld [vmem:[%s1135_s28 + $0x110] ss:$8 sps:$4 sm:$0xff]   ;;  %v993_v15 = vld [vmem:[%s1135_s28 + $0x40] ss:$8 sps:$4 sm:$0xff]  }
  0x1d   : > { %675 = vmatpush1.bf16.msra.mxu1 %v1005_v11  ;;  %v994_v16 = vld [vmem:[%s1135_s28 + $0x54] ss:$8 sps:$4 sm:$0xff]   ;;  %v1015_v17 = vld [vmem:[%s1135_s28 + $0x124] ss:$8 sps:$4 sm:$0xff]   ;;  %v1017_v18 = vld [vmem:[%s1135_s28 + $0x120] ss:$8 sps:$4 sm:$0xff]  }
  0x1e   : > { %636 = vmatpush1.bf16.msra.mxu0 %v984_v5  ;;  %676 = vmatprep.subr.bf16.mxu1 %v1009_v13  ;;  %v996_v19 = vld [vmem:[%s1135_s28 + $0x50] ss:$8 sps:$4 sm:$0xff]   ;;  %v1021_v20 = vld [vmem:[%s1135_s28 + $0x134] ss:$8 sps:$4 sm:$0xff]   ;;  %v997_v21 = vld [vmem:[%s1135_s28 + $0x64] ss:$8 sps:$4 sm:$0xff]  }
  0x1f   : > { %637 = vmatprep.subr.bf16.mxu0 %v985_v6  ;;  %v1023_v22 = vld [vmem:[%s1135_s28 + $0x130] ss:$8 sps:$4 sm:$0xff]   ;;  %v999_v23 = vld [vmem:[%s1135_s28 + $0x60] ss:$8 sps:$4 sm:$0xff]   ;;  %v1027_v24 = vld [vmem:[%s1135_s28 + $0x144] ss:$8 sps:$4 sm:$0xff]  }
  0x20   : > { %v1000_v25 = vld [vmem:[%s1135_s28 + $0x74] ss:$8 sps:$4 sm:$0xff]   ;;  %v1029_v26 = vld [vmem:[%s1135_s28 + $0x140] ss:$8 sps:$4 sm:$0xff]   ;;  %v1002_v27 = vld [vmem:[%s1135_s28 + $0x70] ss:$8 sps:$4 sm:$0xff]  }
  0x21   : > { %677 = vmatpush1.bf16.msra.mxu1 %v1011_v14  ;;  %v1033_v28 = vld [vmem:[%s1135_s28 + $0x154] ss:$8 sps:$4 sm:$0xff]   ;;  %v1006_v29 = vld [vmem:[%s1135_s28 + $0x84] ss:$8 sps:$4 sm:$0xff]   ;;  %v1035_v30 = vld [vmem:[%s1135_s28 + $0x150] ss:$8 sps:$4 sm:$0xff]  }
  0x22   : > { %638 = vmatpush1.bf16.msra.mxu0 %v987_v7  ;;  %678 = vmatprep.subr.bf16.mxu1 %v1015_v17  ;;  %v1008_v31 = vld [vmem:[%s1135_s28 + $0x80] ss:$8 sps:$4 sm:$0xff]   ;;  %v1039_v32 = vld [vmem:[%s1135_s28 + $0x164] ss:$8 sps:$4 sm:$0xff]   ;;  %v1012_v33 = vld [vmem:[%s1135_s28 + $0x94] ss:$8 sps:$4 sm:$0xff]  }
  0x23   : > { %639 = vmatprep.subr.bf16.mxu0 %v988_v8  ;;  %v332_v34 = vld [vmem:[%s1130_s24] sm:$0xff]  ;;  %v1014_v37 = vld [vmem:[%s1135_s28 + $0x90] ss:$8 sps:$4 sm:$0xff]   ;;  %v1045_v38 = vld [vmem:[%s1135_s28 + $0x174] ss:$8 sps:$4 sm:$0xff]   ;;  %v728_v5 = vshrl.u32 (!%p947_p7), %v727_v4, 7 }
  0x24   : > { %v897_v35 = vcombine.high %v332_v34, %v332_v34  ;;  %v1041_v36 = vld [vmem:[%s1135_s28 + $0x160] ss:$8 sps:$4 sm:$0xff]   ;;  %v1018_v39 = vld [vmem:[%s1135_s28 + $0xa4] ss:$8 sps:$4 sm:$0xff]   ;;  %v1047_v40 = vld [vmem:[%s1135_s28 + $0x170] ss:$8 sps:$4 sm:$0xff]   ;;  %v896_v53 = vcombine.low %v332_v34, %v332_v34 }
  0x25   : > { %679 = vmatpush1.bf16.msra.mxu1 %v1017_v18  ;;  %v1020_v41 = vld [vmem:[%s1135_s28 + $0xa0] ss:$8 sps:$4 sm:$0xff]   ;;  %v1024_v42 = vld [vmem:[%s1135_s28 + $0xb4] ss:$8 sps:$4 sm:$0xff]   ;;  %v1026_v44 = vld [vmem:[%s1135_s28 + $0xb0] ss:$8 sps:$4 sm:$0xff]  }
  0x26   : > { %640 = vmatpush1.bf16.msra.mxu0 %v990_v9  ;;  %680 = vmatprep.subr.bf16.mxu1 %v1021_v20  ;;  %v1051_v43 = vld [vmem:[%s1130_s24 + $0x8] ss:$0 sps:$4 sm:$0xff]   ;;  %v1030_v45 = vld [vmem:[%s1135_s28 + $0xc4] ss:$8 sps:$4 sm:$0xff]   ;;  %v1036_v47 = vld [vmem:[%s1135_s28 + $0xd4] ss:$8 sps:$4 sm:$0xff]  }
  0x27   : > { %641 = vmatprep.subr.bf16.mxu0 %v991_v12  ;;  %665 = vmatprep.mubr.bf16.mxu0 %v897_v35  ;;  %v1032_v46 = vld [vmem:[%s1135_s28 + $0xc0] ss:$8 sps:$4 sm:$0xff]   ;;  %v1038_v48 = vld [vmem:[%s1135_s28 + $0xd0] ss:$8 sps:$4 sm:$0xff]   ;;  %v1042_v49 = vld [vmem:[%s1135_s28 + $0xe4] ss:$8 sps:$4 sm:$0xff]  }
  0x28   : > { %v1044_v50 = vld [vmem:[%s1135_s28 + $0xe0] ss:$8 sps:$4 sm:$0xff]   ;;  %v1048_v51 = vld [vmem:[%s1135_s28 + $0xf4] ss:$8 sps:$4 sm:$0xff]   ;;  %v1050_v52 = vld [vmem:[%s1135_s28 + $0xf0] ss:$8 sps:$4 sm:$0xff]  }
  0x29   : > { %681 = vmatpush1.bf16.msra.mxu1 %v1023_v22  ;;  %v330_v58 = vld [vmem:[#allocation2] sm:$0xff]  ;;  %v331_v61 = vld [vmem:[#allocation2 + $0x8] sm:$0xff]  ;;  %v729_v8 = vsub.s32 (!%p947_p7), 0, %v728_v5  ;;  %v733_v9 = vsub.s32 (!%p947_p7), 1, %v728_v5 }
  0x2a   : > { %642 = vmatpush1.bf16.msra.mxu0 %v993_v15  ;;  %682 = vmatprep.subr.bf16.mxu1 %v1027_v24  ;;  %v725_v6 = vld [vmem:[%s1212_s2] sm:$0x3] (!%p947_p7) }
  0x2b   : > { %643 = vmatprep.subr.bf16.mxu0 %v994_v16  ;;  %v739_v7 = vld [vmem:[%s1213_s3] sm:$0x3] (!%p947_p7)  ;;  %v730_v12 = vrot.slane (!%p947_p7), %v725_v6, %v729_v8  ;;  %v734_v14 = vrot.slane (!%p947_p7), %v725_v6, %v733_v9 }
  0x2c   : > { %v744_v13 = vrot.slane (!%p947_p7), %v739_v7, %v729_v8  ;;  %v748_v15 = vrot.slane (!%p947_p7), %v739_v7, %v733_v9 }
  0x2d   : > { %683 = vmatpush1.bf16.msra.mxu1 %v1029_v26 }
  0x2e   : > { %644 = vmatpush1.bf16.msra.mxu0 %v996_v19  ;;  %684 = vmatprep.subr.bf16.mxu1 %v1033_v28 }
  0x2f   : > { %645 = vmatprep.subr.bf16.mxu0 %v997_v21 }
  0x31   : > { %685 = vmatpush1.bf16.msra.mxu1 %v1035_v30 }
  0x32   : > { %646 = vmatpush1.bf16.msra.mxu0 %v999_v23  ;;  %686 = vmatprep.subr.bf16.mxu1 %v1039_v32 }
  0x33   : > { %647 = vmatprep.subr.bf16.mxu0 %v1000_v25 }
  0x35   : > { %687 = vmatpush1.bf16.msra.mxu1 %v1041_v36 }
  0x36   : > { %648 = vmatpush1.bf16.msra.mxu0 %v1002_v27  ;;  %688 = vmatprep.subr.bf16.mxu1 %v1045_v38 }
  0x37   : > { %649 = vmatprep.subr.bf16.mxu0 %v1006_v29 }
  0x39   : > { %689 = vmatpush1.bf16.msra.mxu1 %v1047_v40 }
  0x3a   : > { %650 = vmatpush1.bf16.msra.mxu0 %v1008_v31 }
  0x3b   : > { %651 = vmatprep.subr.bf16.mxu0 %v1012_v33 }
  0x3c   : > { %707 = vmatmul.mubr.bf16.vlgmr.msra.gmra.mrb[0].mxu1 %v1051_v43 }
  0x3e   : > { %652 = vmatpush1.bf16.msra.mxu0 %v1014_v37 }
  0x3f   : > { %653 = vmatprep.subr.bf16.mxu0 %v1018_v39 }
  0x42   : > { %654 = vmatpush1.bf16.msra.mxu0 %v1020_v41 }
  0x43   : > { %655 = vmatprep.subr.bf16.mxu0 %v1024_v42 }
  0x46   : > { %656 = vmatpush1.bf16.msra.mxu0 %v1026_v44 }
  0x47   : > { %657 = vmatprep.subr.bf16.mxu0 %v1030_v45 }
  0x4a   : > { %658 = vmatpush1.bf16.msra.mxu0 %v1032_v46 }
  0x4b   : > { %659 = vmatprep.subr.bf16.mxu0 %v1036_v47 }
  0x4e   : > { %660 = vmatpush1.bf16.msra.mxu0 %v1038_v48 }
  0x4f   : > { %661 = vmatprep.subr.bf16.mxu0 %v1042_v49 }
  0x52   : > { %662 = vmatpush1.bf16.msra.mxu0 %v1044_v50 }
  0x53   : > { %663 = vmatprep.subr.bf16.mxu0 %v1048_v51 }
  0x56   : > { %664 = vmatpush1.bf16.msra.mxu0 %v1050_v52 }
  0x59   : > { %666 = vmatmul.mubr.bf16.vlgmr.msra.gmra.mrb[0].mxu0 %v896_v53 }
 0x10f   : > { %v708_v54 = vpop.f32.mrb[0].mxu1 }
 0x110   : > { %v710_v55 = vpop.f32.mrb[1].mxu1 }
 0x111   : > { %v712_v56 = vpop.f32.mrb[2].mxu1 }
 0x112   : > { %v713_v57 = vpop.f32.mrb[3].mxu1 }
 0x12c   : > { %v667_v59 = vpop.f32.mrb[0].mxu0  ;;  %722 = sbr.rel (%p947_p7) target bundleno = 321 (0x141), region = 44 }
 0x12d   : > { %v709_v60 = vadd.f32 %v708_v54, %v667_v59  ;;  %v669_v62 = vpop.f32.mrb[1].mxu0 }
 0x12e   : > { %v711_v63 = vadd.f32 %v710_v55, %v669_v62  ;;  %v671_v0 = vpop.f32.mrb[2].mxu0 }
 0x12f   : > { %v715_v1 = vadd.f32 %v709_v60, %v330_v58  ;;  %v672_v2 = vpop.f32.mrb[3].mxu0 }
 0x130   : > { %v716_v3 = vadd.f32 %v711_v63, %v331_v61 }
 0x131   : > { %717 = vst [vmem:[#allocation2] sm:$0xff] %v715_v1 }
 0x132   : > { %718 = vst [vmem:[#allocation2 + $0x8] sm:$0xff] %v716_v3 }
 0x138   : > { %v723_v10 = vld [vmem:[#allocation2] sm:$0xff] }
 0x139   : > { %v724_v11 = vld [vmem:[#allocation2 + $0x8] sm:$0xff]  ;;  %v737_v16 = vmul.f32 %v730_v12, %v723_v10 }
 0x13a   : > { %v738_v17 = vmul.f32 %v734_v14, %v724_v11 }
 0x13b   : > { %v751_v18 = vadd.f32 %v744_v13, %v737_v16 }
 0x13c   : > { %v752_v19 = vadd.f32 %v748_v15, %v738_v17 }
 0x13d   : > { %v753_v20 = vmax.f32 %v751_v18, 0.0 }
 0x13e   : > { %v754_v21 = vmax.f32 %v752_v19, 0.0 }
 0x13f   : > { %755 = vst [vmem:[%s1214_s4] sm:$0xff] %v753_v20 }
 0x140   : > { %756 = vst [vmem:[%s1214_s4 + $0x8] sm:$0xff] %v754_v21 }
 0x141 PF: > { %s14_s17 = sadd.s32 1, %s1076_s17   ;;  %s1215_s15 = smov %s1072_s16 }
 0x142   : > { %p11_p8 = scmp.ge.s32.totalorder %s14_s17, 8   ;;  %s1216_s16 = smov %s1218_s18 }
 0x144   :  { %13 = sbr.rel (!%p11_p8) target bundleno = 2 (0x2), region = 83 }

// kernel: resnet18_forward.37
= control target key start
LH: loop header
LB: loop body
LE: loop exit
PB: predicated region body
PF: predicated region fallthrough
CT: control target
= control target key end

     0   :  { %s1410_s15 = smov 0   ;;  %s1412_s16 = smov 0   ;;  %s1692_s0 = inlined_call_operand.vmem [shape: bf16[2,2304], index: 0, kind: input, shape index: {}]   ;;  %s1693_s1 = inlined_call_operand.vmem [shape: bf16[2304,512], index: 1, kind: input, shape index: {}]   ;;  %s1694_s2 = inlined_call_operand.vmem [shape: f32[1,512], index: 2, kind: input, shape index: {}]   ;;  %s1695_s3 = inlined_call_operand.vmem [shape: f32[1,512], index: 3, kind: input, shape index: {}]   ;;  %s1696_s4 = inlined_call_operand.vmem [shape: f32[2,512], index: 4, kind: output, shape index: {}]  }
   0x1   :  { %s1414_s17 = smov 0   ;;  %s1416_s18 = smov 0  }
   0x2   :  { %s1418_s19 = smov 0   ;;  %s1420_s20 = smov 0  }
   0x3   :  { %s1422_s21 = smov 0  }
   0x4 LB: > { %s26_s22 = sadd.s32 1, %s1371_s19  ;;  %s29_s23 = sadd.s32 1, %s1375_s20  ;;  %s1379_s21 = sphi %s1422_s21, %s14_s21   ;;  %s1375_s20 = sphi %s1420_s20, %s1702_s20   ;;  %s1371_s19 = sphi %s1418_s19, %s1701_s19   ;;  %s1367_s18 = sphi %s1416_s18, %s1700_s18   ;;  %s1363_s17 = sphi %s1414_s17, %s1699_s17   ;;  %s1359_s16 = sphi %s1412_s16, %s1698_s16   ;;  %s1355_s15 = sphi %s1410_s15, %s1697_s15  }
   0x5   : > { %p27_p0 = scmp.ge.s32.totalorder %s26_s22, 6  ;;  %p77_p1 = scmp.ne.s32.totalorder %s1359_s16, %s1355_s15 }
   0x6   : > { %p78_p2 = scmp.eq.s32.totalorder %s1379_s21, 0  ;;  %s70_s27 = sadd.s32 1, %s1359_s16 }
   0x7   : > { %s1704_s22 = smov (%p27_p0, %s26_s22), 0  ;;  %s1706_s23 = smov (!%p27_p0, %s29_s23), %s1375_s20 }
   0x8   : > { %p79_p3 = por %p78_p2, %p77_p1  ;;  %p31_p4 = scmp.ge.s32.totalorder %s1706_s23, 2 }
   0x9   : > { %s65_s24 = ssub.s32 %s1371_s19, %s1704_s22  ;;  %p1126_p6 = scmp.ge.s32.totalorder %s1379_s21, 12 }
   0xa   : > { %s1708_s23 = smov (%p31_p4, %s1706_s23), 0 }
   0xb   : > { %s66_s25 = ssub.s32 %s1375_s20, %s1708_s23  ;;  %183 = sbr.rel (%p1126_p6) target bundleno = 50 (0x32), region = 16 }
   0xc   : > { %s67_s26 = sor.u32 %s66_s25, %s65_s24 }
   0xd   : > { %p68_p5 = scmp.eq.s32.totalorder %s67_s26, 0 }
   0xf   : > { %s1461_s28 = scalar_select %p68_p5, %s1359_s16, %s70_s27  }
  0x12   : > { %198 = sbr.rel (!%p79_p3) target bundleno = 50 (0x32), region = 24  ;;  %s200_s29 = sand.u32 (%p79_p3), 1, %s1359_s16  }
  0x13   : > { %s1191_s30 = smul.u32 (%p79_p3), 384, %s200_s29  ;;  %s1127_s5 = sshll.u32 (%p79_p3), %s1375_s20, 1 }
  0x14   : > { %s1188_s6 = smul.u32 (%p79_p3), 192, %s1371_s19 }
  0x15   : > { %s1475_s12 = scalar_lea.vmem (%p79_p3), [#allocation3], %s1191_s30 }
  0x16   : > { %s206_s7 = sadd.s32 (%p79_p3), %s1188_s6, %s1127_s5 }
  0x17   : > { %s1129_s8 = sshll.u32 (%p79_p3), %s206_s7, 2 }
  0x18   : > { %s1470_s11 = scalar_lea.vmem (%p79_p3), %s1693_s1, %s1129_s8 }
  0x19   : > { %v330_v0 = vld [vmem:[%s1470_s11] sm:$0xff]  ;;  %v332_v1 = vld [vmem:[%s1470_s11 + $0x10] sm:$0xff] }
  0x1a   : > { %v334_v2 = vld [vmem:[%s1470_s11 + $0x20] sm:$0xff]  ;;  %331 = vst [vmem:[%s1475_s12] sm:$0xff] %v330_v0  ;;  %333 = vst [vmem:[%s1475_s12 + $0x8] sm:$0xff] %v332_v1  ;;  %v336_v3 = vld [vmem:[%s1470_s11 + $0x30] sm:$0xff] }
  0x1b   : > { %335 = vst [vmem:[%s1475_s12 + $0x10] sm:$0xff] %v334_v2  ;;  %v338_v4 = vld [vmem:[%s1470_s11 + $0x40] sm:$0xff]  ;;  %v340_v5 = vld [vmem:[%s1470_s11 + $0x50] sm:$0xff]  ;;  %337 = vst [vmem:[%s1475_s12 + $0x18] sm:$0xff] %v336_v3 }
  0x1c   : > { %339 = vst [vmem:[%s1475_s12 + $0x20] sm:$0xff] %v338_v4  ;;  %341 = vst [vmem:[%s1475_s12 + $0x28] sm:$0xff] %v340_v5  ;;  %v342_v6 = vld [vmem:[%s1470_s11 + $0x60] sm:$0xff]  ;;  %v344_v7 = vld [vmem:[%s1470_s11 + $0x70] sm:$0xff] }
  0x1d   : > { %v346_v8 = vld [vmem:[%s1470_s11 + $0x80] sm:$0xff]  ;;  %343 = vst [vmem:[%s1475_s12 + $0x30] sm:$0xff] %v342_v6  ;;  %345 = vst [vmem:[%s1475_s12 + $0x38] sm:$0xff] %v344_v7  ;;  %v348_v9 = vld [vmem:[%s1470_s11 + $0x90] sm:$0xff] }
  0x1e   : > { %347 = vst [vmem:[%s1475_s12 + $0x40] sm:$0xff] %v346_v8  ;;  %v350_v10 = vld [vmem:[%s1470_s11 + $0xa0] sm:$0xff]  ;;  %v352_v11 = vld [vmem:[%s1470_s11 + $0xb0] sm:$0xff]  ;;  %349 = vst [vmem:[%s1475_s12 + $0x48] sm:$0xff] %v348_v9 }
  0x1f   : > { %351 = vst [vmem:[%s1475_s12 + $0x50] sm:$0xff] %v350_v10  ;;  %353 = vst [vmem:[%s1475_s12 + $0x58] sm:$0xff] %v352_v11  ;;  %v354_v12 = vld [vmem:[%s1470_s11 + $0xc0] sm:$0xff]  ;;  %v356_v13 = vld [vmem:[%s1470_s11 + $0xd0] sm:$0xff] }
  0x20   : > { %v358_v14 = vld [vmem:[%s1470_s11 + $0xe0] sm:$0xff]  ;;  %355 = vst [vmem:[%s1475_s12 + $0x60] sm:$0xff] %v354_v12  ;;  %357 = vst [vmem:[%s1475_s12 + $0x68] sm:$0xff] %v356_v13  ;;  %v360_v15 = vld [vmem:[%s1470_s11 + $0xf0] sm:$0xff] }
  0x21   : > { %359 = vst [vmem:[%s1475_s12 + $0x70] sm:$0xff] %v358_v14  ;;  %v362_v16 = vld [vmem:[%s1470_s11 + $0x100] sm:$0xff]  ;;  %v364_v17 = vld [vmem:[%s1470_s11 + $0x110] sm:$0xff]  ;;  %361 = vst [vmem:[%s1475_s12 + $0x78] sm:$0xff] %v360_v15 }
  0x22   : > { %363 = vst [vmem:[%s1475_s12 + $0x80] sm:$0xff] %v362_v16  ;;  %365 = vst [vmem:[%s1475_s12 + $0x88] sm:$0xff] %v364_v17  ;;  %v366_v18 = vld [vmem:[%s1470_s11 + $0x120] sm:$0xff]  ;;  %v368_v19 = vld [vmem:[%s1470_s11 + $0x130] sm:$0xff] }
  0x23   : > { %v370_v20 = vld [vmem:[%s1470_s11 + $0x140] sm:$0xff]  ;;  %367 = vst [vmem:[%s1475_s12 + $0x90] sm:$0xff] %v366_v18  ;;  %369 = vst [vmem:[%s1475_s12 + $0x98] sm:$0xff] %v368_v19  ;;  %v372_v21 = vld [vmem:[%s1470_s11 + $0x150] sm:$0xff] }
  0x24   : > { %371 = vst [vmem:[%s1475_s12 + $0xa0] sm:$0xff] %v370_v20  ;;  %v374_v22 = vld [vmem:[%s1470_s11 + $0x160] sm:$0xff]  ;;  %v376_v23 = vld [vmem:[%s1470_s11 + $0x170] sm:$0xff]  ;;  %373 = vst [vmem:[%s1475_s12 + $0xa8] sm:$0xff] %v372_v21 }
  0x25   : > { %375 = vst [vmem:[%s1475_s12 + $0xb0] sm:$0xff] %v374_v22  ;;  %377 = vst [vmem:[%s1475_s12 + $0xb8] sm:$0xff] %v376_v23  ;;  %v378_v24 = vld [vmem:[%s1470_s11 + $0x180] sm:$0xff]  ;;  %v380_v25 = vld [vmem:[%s1470_s11 + $0x190] sm:$0xff] }
  0x26   : > { %v382_v26 = vld [vmem:[%s1470_s11 + $0x1a0] sm:$0xff]  ;;  %379 = vst [vmem:[%s1475_s12 + $0xc0] sm:$0xff] %v378_v24  ;;  %381 = vst [vmem:[%s1475_s12 + $0xc8] sm:$0xff] %v380_v25  ;;  %v384_v27 = vld [vmem:[%s1470_s11 + $0x1b0] sm:$0xff] }
  0x27   : > { %383 = vst [vmem:[%s1475_s12 + $0xd0] sm:$0xff] %v382_v26  ;;  %v386_v28 = vld [vmem:[%s1470_s11 + $0x1c0] sm:$0xff]  ;;  %v388_v29 = vld [vmem:[%s1470_s11 + $0x1d0] sm:$0xff]  ;;  %385 = vst [vmem:[%s1475_s12 + $0xd8] sm:$0xff] %v384_v27 }
  0x28   : > { %387 = vst [vmem:[%s1475_s12 + $0xe0] sm:$0xff] %v386_v28  ;;  %389 = vst [vmem:[%s1475_s12 + $0xe8] sm:$0xff] %v388_v29  ;;  %v390_v30 = vld [vmem:[%s1470_s11 + $0x1e0] sm:$0xff]  ;;  %v392_v31 = vld [vmem:[%s1470_s11 + $0x1f0] sm:$0xff] }
  0x29   : > { %v394_v32 = vld [vmem:[%s1470_s11 + $0x200] sm:$0xff]  ;;  %391 = vst [vmem:[%s1475_s12 + $0xf0] sm:$0xff] %v390_v30  ;;  %393 = vst [vmem:[%s1475_s12 + $0xf8] sm:$0xff] %v392_v31  ;;  %v396_v33 = vld [vmem:[%s1470_s11 + $0x210] sm:$0xff] }
  0x2a   : > { %395 = vst [vmem:[%s1475_s12 + $0x100] sm:$0xff] %v394_v32  ;;  %v398_v34 = vld [vmem:[%s1470_s11 + $0x220] sm:$0xff]  ;;  %v400_v35 = vld [vmem:[%s1470_s11 + $0x230] sm:$0xff]  ;;  %397 = vst [vmem:[%s1475_s12 + $0x108] sm:$0xff] %v396_v33 }
  0x2b   : > { %399 = vst [vmem:[%s1475_s12 + $0x110] sm:$0xff] %v398_v34  ;;  %401 = vst [vmem:[%s1475_s12 + $0x118] sm:$0xff] %v400_v35  ;;  %v402_v36 = vld [vmem:[%s1470_s11 + $0x240] sm:$0xff]  ;;  %v404_v37 = vld [vmem:[%s1470_s11 + $0x250] sm:$0xff] }
  0x2c   : > { %v406_v38 = vld [vmem:[%s1470_s11 + $0x260] sm:$0xff]  ;;  %403 = vst [vmem:[%s1475_s12 + $0x120] sm:$0xff] %v402_v36  ;;  %405 = vst [vmem:[%s1475_s12 + $0x128] sm:$0xff] %v404_v37  ;;  %v408_v39 = vld [vmem:[%s1470_s11 + $0x270] sm:$0xff] }
  0x2d   : > { %407 = vst [vmem:[%s1475_s12 + $0x130] sm:$0xff] %v406_v38  ;;  %v410_v40 = vld [vmem:[%s1470_s11 + $0x280] sm:$0xff]  ;;  %v412_v41 = vld [vmem:[%s1470_s11 + $0x290] sm:$0xff]  ;;  %409 = vst [vmem:[%s1475_s12 + $0x138] sm:$0xff] %v408_v39 }
  0x2e   : > { %411 = vst [vmem:[%s1475_s12 + $0x140] sm:$0xff] %v410_v40  ;;  %413 = vst [vmem:[%s1475_s12 + $0x148] sm:$0xff] %v412_v41  ;;  %v414_v42 = vld [vmem:[%s1470_s11 + $0x2a0] sm:$0xff]  ;;  %v416_v43 = vld [vmem:[%s1470_s11 + $0x2b0] sm:$0xff] }
  0x2f   : > { %v418_v44 = vld [vmem:[%s1470_s11 + $0x2c0] sm:$0xff]  ;;  %415 = vst [vmem:[%s1475_s12 + $0x150] sm:$0xff] %v414_v42  ;;  %417 = vst [vmem:[%s1475_s12 + $0x158] sm:$0xff] %v416_v43  ;;  %v420_v45 = vld [vmem:[%s1470_s11 + $0x2d0] sm:$0xff] }
  0x30   : > { %419 = vst [vmem:[%s1475_s12 + $0x160] sm:$0xff] %v418_v44  ;;  %v422_v46 = vld [vmem:[%s1470_s11 + $0x2e0] sm:$0xff]  ;;  %v424_v47 = vld [vmem:[%s1470_s11 + $0x2f0] sm:$0xff]  ;;  %421 = vst [vmem:[%s1475_s12 + $0x168] sm:$0xff] %v420_v45 }
  0x31   : > { %423 = vst [vmem:[%s1475_s12 + $0x170] sm:$0xff] %v422_v46  ;;  %425 = vst [vmem:[%s1475_s12 + $0x178] sm:$0xff] %v424_v47 }
  0x32 PF: > { %p1130_p7 = scmp.ge.s32.totalorder %s1379_s21, 1  ;;  %p446_p8 = scmp.lt.s32.totalorder %s1379_s21, 13 }
  0x34   : > { %p447_p9 = pnand %p1130_p7, %p446_p8 }
  0x35   : > { %s453_s13 = sand.u32 (!%p447_p9), 1, %s1355_s15   ;;  %s498_s14 = smul.u32 (!%p447_p9), 3, %s1363_s17 }
  0x36   : > { %450 = sbr.rel (%p447_p9) target bundleno = 372 (0x174), region = 70  ;;  %s1131_s25 = sshll.u32 (!%p447_p9), %s1367_s18, 1 }
  0x37   : > { %s1192_s24 = smul.u32 (!%p447_p9), 384, %s453_s13  ;;  %p501_p10 = scmp.lt.s32.totalorder (!%p447_p9), %s498_s14, 17 }
  0x38   : > { %p510_p11 = scmp.lt.s32.totalorder (!%p447_p9), %s1131_s25, 3  ;;  %p1135_p12 = scmp.ne.s32.totalorder (!%p447_p9), %s1363_s17, 0 }
  0x39   : > { %s1597_s12 = scalar_lea.vmem (!%p447_p9), [#allocation3], %s1192_s24 }
  0x3d   : > { %s1710_s14 = smov (!%p501_p10, %s498_s14), 17  ;;  %s1712_s25 = smov (!%p510_p11, %s1131_s25), 3 }
  0x3e   : > { %s505_s29 = scalar_lea.vmem %s1692_s0, %s1710_s14  ;;  %s512_s15 = scalar_lea.vmem %s1694_s2, %s1712_s25  ;;  %v1381_v48 = vmov (!%p1135_p12), 0.0  }
  0x3f   : > { %s517_s7 = scalar_lea.vmem %s1695_s3, %s1712_s25  ;;  %s1134_s8 = sshll.u32 %s1712_s25, 1  ;;  %534 = vst [vmem:[#allocation2] sm:$0xf] (!%p1135_p12), %v1381_v48 }
  0x40   : > { %s1595_s11 = scalar_lea.vmem %s1696_s4, %s1134_s8  ;;  %533 = sbr.rel (%p1135_p12) target bundleno = 71 (0x47), region = 78 }
  0x47 PF: > { %v1253_v49 = vld [vmem:[%s1597_s12 + $0x4] ss:$8 sps:$4 sm:$0xff]   ;;  %v1255_v50 = vld [vmem:[%s1597_s12] ss:$8 sps:$4 sm:$0xff]   ;;  %v1382_v51 = vmov 0   ;;  %v597_v12 = vlaneseq  ;;  %p1185_p13 = scmp.ne.s32.totalorder %s1363_s17, 5 }
  0x48   : > { %925 = vmatprep.mubr.bf16.mxu0 %v1382_v51  ;;  %852 = vmatprep.subr.bf16.mxu1 %v1253_v49  ;;  %v1256_v52 = vld [vmem:[%s1597_s12 + $0x14] ss:$8 sps:$4 sm:$0xff]   ;;  %v1258_v53 = vld [vmem:[%s1597_s12 + $0x10] ss:$8 sps:$4 sm:$0xff]   ;;  %v1259_v54 = vld [vmem:[%s1597_s12 + $0x24] ss:$8 sps:$4 sm:$0xff]  }
  0x49   : > { %853 = vmatpush1.bf16.msra.mxu1 %v1255_v50  ;;  %v1261_v55 = vld [vmem:[%s1597_s12 + $0x20] ss:$8 sps:$4 sm:$0xff]   ;;  %v1262_v56 = vld [vmem:[%s1597_s12 + $0x34] ss:$8 sps:$4 sm:$0xff]   ;;  %v1264_v57 = vld [vmem:[%s1597_s12 + $0x30] ss:$8 sps:$4 sm:$0xff]  }
  0x4a   : > { %854 = vmatprep.subr.bf16.mxu1 %v1256_v52  ;;  %v1277_v58 = vld [vmem:[%s1597_s12 + $0x104] ss:$8 sps:$4 sm:$0xff]   ;;  %v1279_v59 = vld [vmem:[%s1597_s12 + $0x100] ss:$8 sps:$4 sm:$0xff]   ;;  %v1283_v61 = vld [vmem:[%s1597_s12 + $0x114] ss:$8 sps:$4 sm:$0xff]  }
  0x4b   : > { %v1265_v60 = vld [vmem:[%s1597_s12 + $0x44] ss:$8 sps:$4 sm:$0xff]   ;;  %893 = vmatprep.subr.bf16.mxu0 %v1277_v58  ;;  %v1285_v62 = vld [vmem:[%s1597_s12 + $0x110] ss:$8 sps:$4 sm:$0xff]   ;;  %v1267_v63 = vld [vmem:[%s1597_s12 + $0x40] ss:$8 sps:$4 sm:$0xff]  }
  0x4c   : > { %894 = vmatpush1.bf16.msra.mxu0 %v1279_v59  ;;  %v1268_v0 = vld [vmem:[%s1597_s12 + $0x54] ss:$8 sps:$4 sm:$0xff]   ;;  %v1289_v1 = vld [vmem:[%s1597_s12 + $0x124] ss:$8 sps:$4 sm:$0xff]   ;;  %v1291_v2 = vld [vmem:[%s1597_s12 + $0x120] ss:$8 sps:$4 sm:$0xff]  }
  0x4d   : > { %855 = vmatpush1.bf16.msra.mxu1 %v1258_v53  ;;  %895 = vmatprep.subr.bf16.mxu0 %v1283_v61  ;;  %v1270_v3 = vld [vmem:[%s1597_s12 + $0x50] ss:$8 sps:$4 sm:$0xff]   ;;  %v1295_v4 = vld [vmem:[%s1597_s12 + $0x134] ss:$8 sps:$4 sm:$0xff]   ;;  %v1271_v5 = vld [vmem:[%s1597_s12 + $0x64] ss:$8 sps:$4 sm:$0xff]  }
  0x4e   : > { %856 = vmatprep.subr.bf16.mxu1 %v1259_v54  ;;  %v1297_v6 = vld [vmem:[%s1597_s12 + $0x130] ss:$8 sps:$4 sm:$0xff]   ;;  %v1273_v7 = vld [vmem:[%s1597_s12 + $0x60] ss:$8 sps:$4 sm:$0xff]   ;;  %v1301_v8 = vld [vmem:[%s1597_s12 + $0x144] ss:$8 sps:$4 sm:$0xff]  }
  0x4f   : > { %v1274_v9 = vld [vmem:[%s1597_s12 + $0x74] ss:$8 sps:$4 sm:$0xff]   ;;  %v1383_v10 = vmov 1966171168   ;;  %v1303_v13 = vld [vmem:[%s1597_s12 + $0x140] ss:$8 sps:$4 sm:$0xff]  }
  0x50   : > { %896 = vmatpush1.bf16.msra.mxu0 %v1285_v62  ;;  %v595_v11 = vunpack.c.l.s4 %v1383_v10  ;;  %v1276_v14 = vld [vmem:[%s1597_s12 + $0x70] ss:$8 sps:$4 sm:$0xff]   ;;  %v1307_v15 = vld [vmem:[%s1597_s12 + $0x154] ss:$8 sps:$4 sm:$0xff]   ;;  %v1280_v16 = vld [vmem:[%s1597_s12 + $0x84] ss:$8 sps:$4 sm:$0xff]  }
  0x51   : > { %857 = vmatpush1.bf16.msra.mxu1 %v1261_v55  ;;  %897 = vmatprep.subr.bf16.mxu0 %v1289_v1  ;;  %v1628_v18 = vshrl.u32 %v597_v12, 7  ;;  %v1309_v19 = vld [vmem:[%s1597_s12 + $0x150] ss:$8 sps:$4 sm:$0xff]   ;;  %v1282_v20 = vld [vmem:[%s1597_s12 + $0x80] ss:$8 sps:$4 sm:$0xff]  }
  0x52   : > { %858 = vmatprep.subr.bf16.mxu1 %v1262_v56  ;;  %v596_v17 = vunpack.c.0.s8 %v595_v11  ;;  %v1313_v21 = vld [vmem:[%s1597_s12 + $0x164] ss:$8 sps:$4 sm:$0xff]   ;;  %v1286_v22 = vld [vmem:[%s1597_s12 + $0x94] ss:$8 sps:$4 sm:$0xff]   ;;  %v1315_v26 = vld [vmem:[%s1597_s12 + $0x160] ss:$8 sps:$4 sm:$0xff]  }
  0x53   : > { %v1136_v23 = vld.sshfl [vmem:[%s505_s29] sm:$0x13 pattern:$0x75316420]  ;;  %v1288_v27 = vld [vmem:[%s1597_s12 + $0x90] ss:$8 sps:$4 sm:$0xff]  }
  0x54   : > { %898 = vmatpush1.bf16.msra.mxu0 %v1291_v2  ;;  %v599_v24 = vsub.s32 %v596_v17, %v1628_v18  ;;  %v593_v25 = vcombine.high %v1136_v23, %v1136_v23  ;;  %v1319_v28 = vld [vmem:[%s1597_s12 + $0x174] ss:$8 sps:$4 sm:$0xff]   ;;  %v1292_v30 = vld [vmem:[%s1597_s12 + $0xa4] ss:$8 sps:$4 sm:$0xff]   ;;  %v1321_v32 = vld [vmem:[%s1597_s12 + $0x170] ss:$8 sps:$4 sm:$0xff]  }
  0x55   : > { %859 = vmatpush1.bf16.msra.mxu1 %v1264_v57  ;;  %899 = vmatprep.subr.bf16.mxu0 %v1295_v4  ;;  %v1294_v33 = vld [vmem:[%s1597_s12 + $0xa0] ss:$8 sps:$4 sm:$0xff]   ;;  %v1298_v34 = vld [vmem:[%s1597_s12 + $0xb4] ss:$8 sps:$4 sm:$0xff]   ;;  %v1300_v36 = vld [vmem:[%s1597_s12 + $0xb0] ss:$8 sps:$4 sm:$0xff]  }
  0x56   : > { %860 = vmatprep.subr.bf16.mxu1 %v1265_v60  ;;  %v607_v29 = vrot.slane %v593_v25, %v599_v24  ;;  %v600_v31 = vrot.slane %v1136_v23, %v599_v24  ;;  %v1304_v37 = vld [vmem:[%s1597_s12 + $0xc4] ss:$8 sps:$4 sm:$0xff]   ;;  %v1306_v38 = vld [vmem:[%s1597_s12 + $0xc0] ss:$8 sps:$4 sm:$0xff]   ;;  %v1310_v39 = vld [vmem:[%s1597_s12 + $0xd4] ss:$8 sps:$4 sm:$0xff]  }
  0x57   : > { %v1312_v40 = vld [vmem:[%s1597_s12 + $0xd0] ss:$8 sps:$4 sm:$0xff]   ;;  %v1316_v41 = vld [vmem:[%s1597_s12 + $0xe4] ss:$8 sps:$4 sm:$0xff]   ;;  %v1318_v42 = vld [vmem:[%s1597_s12 + $0xe0] ss:$8 sps:$4 sm:$0xff]  }
  0x58   : > { %900 = vmatpush1.bf16.msra.mxu0 %v1297_v6  ;;  %884 = vmatprep.mubr.bf16.mxu1 %v607_v29  ;;  %v608_v35 = vcombine.high %v600_v31, %v600_v31  ;;  %v1322_v43 = vld [vmem:[%s1597_s12 + $0xf4] ss:$8 sps:$4 sm:$0xff]   ;;  %v1324_v44 = vld [vmem:[%s1597_s12 + $0xf0] ss:$8 sps:$4 sm:$0xff]   ;;  %v1384_v49 = vmov 1983009808  }
  0x59   : > { %861 = vmatpush1.bf16.msra.mxu1 %v1267_v63  ;;  %901 = vmatprep.subr.bf16.mxu0 %v1301_v8  ;;  %v938_v50 = vunpack.c.l.s4 %v1384_v49  ;;  %v535_v60 = vld [vmem:[#allocation2] sm:$0xf]  ;;  %v960_v1 = vsub.s32 (!%p1185_p13), 1, %v1628_v18 }
  0x5a   : > { %862 = vmatprep.subr.bf16.mxu1 %v1268_v0  ;;  %v952_v63 = vld [vmem:[%s512_s15] sm:$0x3] (!%p1185_p13)  ;;  %v956_v0 = vsub.s32 (!%p1185_p13), 0, %v1628_v18 }
  0x5b   : > { %v939_v51 = vunpack.c.0.s8 %v938_v50  ;;  %v972_v2 = vld [vmem:[%s517_s7] sm:$0x3] (!%p1185_p13)  ;;  %v961_v4 = vrot.slane (!%p1185_p13), %v952_v63, %v960_v1 }
  0x5c   : > { %902 = vmatpush1.bf16.msra.mxu0 %v1303_v13  ;;  %v981_v6 = vrot.slane (!%p1185_p13), %v972_v2, %v960_v1 }
  0x5d   : > { %863 = vmatpush1.bf16.msra.mxu1 %v1270_v3  ;;  %903 = vmatprep.subr.bf16.mxu0 %v1307_v15  ;;  %v942_v56 = vsub.s32 %v939_v51, %v1628_v18  ;;  %v957_v3 = vrot.slane (!%p1185_p13), %v952_v63, %v956_v0 }
  0x5e   : > { %864 = vmatprep.subr.bf16.mxu1 %v1271_v5  ;;  %v977_v5 = vrot.slane (!%p1185_p13), %v972_v2, %v956_v0 }
  0x60   : > { %904 = vmatpush1.bf16.msra.mxu0 %v1309_v19  ;;  %v982_v8 = vcombine.low (!%p1185_p13), %v977_v5, %v981_v6 }
  0x61   : > { %865 = vmatpush1.bf16.msra.mxu1 %v1273_v7  ;;  %905 = vmatprep.subr.bf16.mxu0 %v1313_v21  ;;  %v962_v7 = vcombine.low (!%p1185_p13), %v957_v3, %v961_v4 }
  0x62   : > { %866 = vmatprep.subr.bf16.mxu1 %v1274_v9  ;;  %v989_v11 = vrot.slane (!%p1185_p13), %v982_v8, %v942_v56 }
  0x63   : > { %v969_v10 = vrot.slane (!%p1185_p13), %v962_v7, %v942_v56 }
  0x64   : > { %906 = vmatpush1.bf16.msra.mxu0 %v1315_v26 }
  0x65   : > { %867 = vmatpush1.bf16.msra.mxu1 %v1276_v14  ;;  %907 = vmatprep.subr.bf16.mxu0 %v1319_v28 }
  0x66   : > { %868 = vmatprep.subr.bf16.mxu1 %v1280_v16 }
  0x68   : > { %908 = vmatpush1.bf16.msra.mxu0 %v1321_v32 }
  0x69   : > { %869 = vmatpush1.bf16.msra.mxu1 %v1282_v20 }
  0x6a   : > { %870 = vmatprep.subr.bf16.mxu1 %v1286_v22 }
  0x6b   : > { %926 = vmatmul.mubr.bf16.vlgmr.msra.gmra.mrb[0].mxu0 %v608_v35 }
  0x6d   : > { %871 = vmatpush1.bf16.msra.mxu1 %v1288_v27 }
  0x6e   : > { %872 = vmatprep.subr.bf16.mxu1 %v1292_v30 }
  0x71   : > { %873 = vmatpush1.bf16.msra.mxu1 %v1294_v33 }
  0x72   : > { %874 = vmatprep.subr.bf16.mxu1 %v1298_v34 }
  0x75   : > { %875 = vmatpush1.bf16.msra.mxu1 %v1300_v36 }
  0x76   : > { %876 = vmatprep.subr.bf16.mxu1 %v1304_v37 }
  0x79   : > { %877 = vmatpush1.bf16.msra.mxu1 %v1306_v38 }
  0x7a   : > { %878 = vmatprep.subr.bf16.mxu1 %v1310_v39 }
  0x7d   : > { %879 = vmatpush1.bf16.msra.mxu1 %v1312_v40 }
  0x7e   : > { %880 = vmatprep.subr.bf16.mxu1 %v1316_v41 }
  0x81   : > { %881 = vmatpush1.bf16.msra.mxu1 %v1318_v42 }
  0x82   : > { %882 = vmatprep.subr.bf16.mxu1 %v1322_v43 }
  0x85   : > { %883 = vmatpush1.bf16.msra.mxu1 %v1324_v44 }
  0x88   : > { %885 = vmatmul.mubr.bf16.vlgmr.msra.gmra.mrb[0].mxu1 %v600_v31 }
 0x13e   : > { %v927_v45 = vpop.f32.mrb[0].mxu0 }
 0x13f   : > { %v929_v46 = vpop.f32.mrb[1].mxu0 }
 0x140   : > { %v931_v47 = vpop.f32.mrb[2].mxu0 }
 0x141   : > { %v932_v48 = vpop.f32.mrb[3].mxu0 }
 0x15b   : > { %v886_v52 = vpop.f32.mrb[0].mxu1 }
 0x15c   : > { %v928_v53 = vadd.f32 %v927_v45, %v886_v52  ;;  %v888_v54 = vpop.f32.mrb[1].mxu1 }
 0x15d   : > { %v930_v55 = vadd.f32 %v929_v46, %v888_v54  ;;  %v890_v57 = vpop.f32.mrb[2].mxu1 }
 0x15e   : > { %v891_v58 = vpop.f32.mrb[3].mxu1 }
 0x15f   : > { %v936_v59 = vcombine.low %v928_v53, %v930_v55  ;;  %950 = sbr.rel (%p1185_p13) target bundleno = 372 (0x174), region = 82 }
 0x161   : > { %v943_v61 = vrot.slane %v936_v59, %v942_v56 }
 0x163   : > { %v945_v62 = vadd.f32 %v943_v61, %v535_v60 }
 0x165   : > { %946 = vst [vmem:[#allocation2] sm:$0xf] %v945_v62 }
 0x16c   : > { %v951_v9 = vld [vmem:[#allocation2] sm:$0xf] }
 0x16d   : > { %v971_v12 = vmul.f32 %v969_v10, %v951_v9 }
 0x16f   : > { %v991_v13 = vadd.f32 %v989_v11, %v971_v12 }
 0x171   : > { %v992_v14 = vmax.f32 %v991_v13, 0.0 }
 0x173   : > { %993 = vst [vmem:[%s1595_s11] sm:$0xf] %v992_v14 }
 0x174 PF: > { %s14_s21 = sadd.s32 1, %s1379_s21   ;;  %s1697_s15 = smov %s1359_s16 }
 0x175   : > { %p11_p0 = scmp.ge.s32.totalorder %s14_s21, 14   ;;  %s1698_s16 = smov %s1461_s28 }
 0x176   : > { %s1699_s17 = smov %s1371_s19  ;;  %s1700_s18 = smov %s1375_s20 }
 0x177   : > { %s1701_s19 = smov %s1704_s22  ;;  %s1702_s20 = smov %s1708_s23 }
 0x178   :  { %13 = sbr.rel (!%p11_p0) target bundleno = 4 (0x4), region = 126 }

// kernel: resnet18_forward.38
= control target key start
LH: loop header
LB: loop body
LE: loop exit
PB: predicated region body
PF: predicated region fallthrough
CT: control target
= control target key end

     0   :  { %s1126_s15 = smov 0   ;;  %s1128_s16 = smov 0   ;;  %s1318_s0 = inlined_call_operand.vmem [shape: bf16[2,256], index: 0, kind: input, shape index: {}]   ;;  %s1319_s1 = inlined_call_operand.vmem [shape: bf16[256,512], index: 1, kind: input, shape index: {}]   ;;  %s1320_s2 = inlined_call_operand.vmem [shape: f32[1,512], index: 2, kind: input, shape index: {}]   ;;  %s1321_s3 = inlined_call_operand.vmem [shape: f32[1,512], index: 3, kind: input, shape index: {}]   ;;  %s1322_s4 = inlined_call_operand.vmem [shape: f32[2,512], index: 4, kind: output, shape index: {}]  }
   0x1   :  { %s1130_s17 = smov 0   ;;  %s1132_s18 = smov 0  }
   0x2   :  { %s1134_s19 = smov 0  }
   0x3 LB: > { %s29_s20 = sadd.s32 1, %s1092_s18  ;;  %p77_p1 = scmp.ne.s32.totalorder %s1084_s16, %s1080_s15  ;;  %s1096_s19 = sphi %s1134_s19, %s14_s19   ;;  %s1092_s18 = sphi %s1132_s18, %s1326_s18   ;;  %s1088_s17 = sphi %s1130_s17, %s1325_s17   ;;  %s1084_s16 = sphi %s1128_s16, %s1324_s16   ;;  %s1080_s15 = sphi %s1126_s15, %s1323_s15  }
   0x4   : > { %p31_p0 = scmp.ge.s32.totalorder %s29_s20, 2  ;;  %p78_p2 = scmp.eq.s32.totalorder %s1096_s19, 0 }
   0x5   : > { %s70_s22 = sadd.s32 1, %s1084_s16  ;;  %p921_p5 = scmp.ge.s32.totalorder %s1096_s19, 2 }
   0x6   : > { %s1328_s20 = smov (%p31_p0, %s29_s20), 0  ;;  %p79_p3 = por %p78_p2, %p77_p1 }
   0x7   : > { %s66_s21 = ssub.s32 %s1092_s18, %s1328_s20  ;;  %195 = sbr.rel (%p921_p5) target bundleno = 34 (0x22), region = 20 }
   0x8   : > { %p68_p4 = scmp.eq.s32.totalorder %s66_s21, 0 }
   0xa   : > { %s1161_s23 = scalar_select %p68_p4, %s1084_s16, %s70_s22  }
   0xe   : > { %198 = sbr.rel (!%p79_p3) target bundleno = 34 (0x22), region = 24  ;;  %s200_s24 = sand.u32 (%p79_p3), 1, %s1084_s16  }
   0xf   : > { %s966_s25 = sshll.u32 (%p79_p3), %s1092_s18, 3  ;;  %s922_s26 = sshll.u32 (%p79_p3), %s200_s24, 8 }
  0x10   : > { %s1169_s29 = scalar_lea.vmem (%p79_p3), %s1319_s1, %s966_s25  ;;  %s1174_s30 = scalar_lea.vmem (%p79_p3), [#allocation3], %s922_s26 }
  0x11   : > { %v298_v0 = vld [vmem:[%s1169_s29] sm:$0xff] (%p79_p3)  ;;  %v300_v1 = vld [vmem:[%s1169_s29 + $0x10] sm:$0xff] (%p79_p3) }
  0x12   : > { %v302_v2 = vld [vmem:[%s1169_s29 + $0x20] sm:$0xff] (%p79_p3)  ;;  %299 = vst [vmem:[%s1174_s30] sm:$0xff] (%p79_p3), %v298_v0  ;;  %301 = vst [vmem:[%s1174_s30 + $0x8] sm:$0xff] (%p79_p3), %v300_v1  ;;  %v304_v3 = vld [vmem:[%s1169_s29 + $0x30] sm:$0xff] (%p79_p3) }
  0x13   : > { %303 = vst [vmem:[%s1174_s30 + $0x10] sm:$0xff] (%p79_p3), %v302_v2  ;;  %v306_v4 = vld [vmem:[%s1169_s29 + $0x40] sm:$0xff] (%p79_p3)  ;;  %v308_v5 = vld [vmem:[%s1169_s29 + $0x50] sm:$0xff] (%p79_p3)  ;;  %305 = vst [vmem:[%s1174_s30 + $0x18] sm:$0xff] (%p79_p3), %v304_v3 }
  0x14   : > { %307 = vst [vmem:[%s1174_s30 + $0x20] sm:$0xff] (%p79_p3), %v306_v4  ;;  %309 = vst [vmem:[%s1174_s30 + $0x28] sm:$0xff] (%p79_p3), %v308_v5  ;;  %v310_v6 = vld [vmem:[%s1169_s29 + $0x60] sm:$0xff] (%p79_p3)  ;;  %v312_v7 = vld [vmem:[%s1169_s29 + $0x70] sm:$0xff] (%p79_p3) }
  0x15   : > { %v314_v8 = vld [vmem:[%s1169_s29 + $0x80] sm:$0xff]  ;;  %311 = vst [vmem:[%s1174_s30 + $0x30] sm:$0xff] %v310_v6  ;;  %313 = vst [vmem:[%s1174_s30 + $0x38] sm:$0xff] %v312_v7  ;;  %v316_v9 = vld [vmem:[%s1169_s29 + $0x90] sm:$0xff] }
  0x16   : > { %315 = vst [vmem:[%s1174_s30 + $0x40] sm:$0xff] %v314_v8  ;;  %v318_v10 = vld [vmem:[%s1169_s29 + $0xa0] sm:$0xff]  ;;  %v320_v11 = vld [vmem:[%s1169_s29 + $0xb0] sm:$0xff]  ;;  %317 = vst [vmem:[%s1174_s30 + $0x48] sm:$0xff] %v316_v9 }
  0x17   : > { %319 = vst [vmem:[%s1174_s30 + $0x50] sm:$0xff] %v318_v10  ;;  %321 = vst [vmem:[%s1174_s30 + $0x58] sm:$0xff] %v320_v11  ;;  %v322_v12 = vld [vmem:[%s1169_s29 + $0xc0] sm:$0xff]  ;;  %v324_v13 = vld [vmem:[%s1169_s29 + $0xd0] sm:$0xff] }
  0x18   : > { %v326_v14 = vld [vmem:[%s1169_s29 + $0xe0] sm:$0xff]  ;;  %323 = vst [vmem:[%s1174_s30 + $0x60] sm:$0xff] %v322_v12  ;;  %325 = vst [vmem:[%s1174_s30 + $0x68] sm:$0xff] %v324_v13  ;;  %v328_v15 = vld [vmem:[%s1169_s29 + $0xf0] sm:$0xff] }
  0x19   : > { %327 = vst [vmem:[%s1174_s30 + $0x70] sm:$0xff] %v326_v14  ;;  %v330_v16 = vld [vmem:[%s1169_s29 + $0x100] sm:$0xff]  ;;  %v332_v17 = vld [vmem:[%s1169_s29 + $0x110] sm:$0xff]  ;;  %329 = vst [vmem:[%s1174_s30 + $0x78] sm:$0xff] %v328_v15 }
  0x1a   : > { %331 = vst [vmem:[%s1174_s30 + $0x80] sm:$0xff] %v330_v16  ;;  %333 = vst [vmem:[%s1174_s30 + $0x88] sm:$0xff] %v332_v17  ;;  %v334_v18 = vld [vmem:[%s1169_s29 + $0x120] sm:$0xff]  ;;  %v336_v19 = vld [vmem:[%s1169_s29 + $0x130] sm:$0xff] }
  0x1b   : > { %v338_v20 = vld [vmem:[%s1169_s29 + $0x140] sm:$0xff]  ;;  %335 = vst [vmem:[%s1174_s30 + $0x90] sm:$0xff] %v334_v18  ;;  %337 = vst [vmem:[%s1174_s30 + $0x98] sm:$0xff] %v336_v19  ;;  %v340_v21 = vld [vmem:[%s1169_s29 + $0x150] sm:$0xff] }
  0x1c   : > { %339 = vst [vmem:[%s1174_s30 + $0xa0] sm:$0xff] %v338_v20  ;;  %v342_v22 = vld [vmem:[%s1169_s29 + $0x160] sm:$0xff]  ;;  %v344_v23 = vld [vmem:[%s1169_s29 + $0x170] sm:$0xff]  ;;  %341 = vst [vmem:[%s1174_s30 + $0xa8] sm:$0xff] %v340_v21 }
  0x1d   : > { %343 = vst [vmem:[%s1174_s30 + $0xb0] sm:$0xff] %v342_v22  ;;  %345 = vst [vmem:[%s1174_s30 + $0xb8] sm:$0xff] %v344_v23  ;;  %v346_v24 = vld [vmem:[%s1169_s29 + $0x180] sm:$0xff]  ;;  %v348_v25 = vld [vmem:[%s1169_s29 + $0x190] sm:$0xff] }
  0x1e   : > { %v350_v26 = vld [vmem:[%s1169_s29 + $0x1a0] sm:$0xff]  ;;  %347 = vst [vmem:[%s1174_s30 + $0xc0] sm:$0xff] %v346_v24  ;;  %349 = vst [vmem:[%s1174_s30 + $0xc8] sm:$0xff] %v348_v25  ;;  %v352_v27 = vld [vmem:[%s1169_s29 + $0x1b0] sm:$0xff] }
  0x1f   : > { %351 = vst [vmem:[%s1174_s30 + $0xd0] sm:$0xff] %v350_v26  ;;  %v354_v28 = vld [vmem:[%s1169_s29 + $0x1c0] sm:$0xff]  ;;  %v356_v29 = vld [vmem:[%s1169_s29 + $0x1d0] sm:$0xff]  ;;  %353 = vst [vmem:[%s1174_s30 + $0xd8] sm:$0xff] %v352_v27 }
  0x20   : > { %355 = vst [vmem:[%s1174_s30 + $0xe0] sm:$0xff] %v354_v28  ;;  %357 = vst [vmem:[%s1174_s30 + $0xe8] sm:$0xff] %v356_v29  ;;  %v358_v30 = vld [vmem:[%s1169_s29 + $0x1e0] sm:$0xff]  ;;  %v360_v31 = vld [vmem:[%s1169_s29 + $0x1f0] sm:$0xff] }
  0x21   : > { %359 = vst [vmem:[%s1174_s30 + $0xf0] sm:$0xff] %v358_v30  ;;  %361 = vst [vmem:[%s1174_s30 + $0xf8] sm:$0xff] %v360_v31 }
  0x22 PF: > { %p925_p6 = scmp.ge.s32.totalorder %s1096_s19, 1  ;;  %p382_p7 = scmp.lt.s32.totalorder %s1096_s19, 3 }
  0x24   : > { %p383_p8 = pnand %p925_p6, %p382_p7 }
  0x25   : > { %s389_s5 = sand.u32 (!%p383_p8), 1, %s1080_s15   ;;  %v1243_v32 = vld.sshfl [vmem:[%s1318_s0] sm:$0x11 pattern:$0x75316420] (!%p383_p8)  ;;  %v516_v33 = vlaneseq (!%p383_p8)  ;;  %v1099_v10 = vmov (!%p383_p8), 0.0  }
  0x26   : > { %386 = sbr.rel (%p383_p8) target bundleno = 337 (0x151), region = 70  ;;  %s926_s8 = sshll.u32 (!%p383_p8), %s389_s5, 8  ;;  %v1098_v34 = vmov (!%p383_p8), 1966171168   ;;  %v512_v39 = vcombine.high (!%p383_p8), %v1243_v32, %v1243_v32  ;;  %469 = vst [vmem:[#allocation2] sm:$0xf] (!%p383_p8), %v1099_v10 }
  0x27   : > { %v514_v35 = vunpack.c.l.s4 (!%p383_p8), %v1098_v34  ;;  %v1245_v36 = vshrl.u32 (!%p383_p8), %v516_v33, 7  ;;  %s1247_s9 = scalar_lea.vmem (!%p383_p8), [#allocation3], %s926_s8  ;;  %s927_s10 = sshll.u32 (!%p383_p8), %s1088_s17, 1  ;;  %v1100_v11 = vmov (!%p383_p8), 1983009808  }
  0x28   : > { %v1010_v37 = vld [vmem:[%s1247_s9 + $0x4] ss:$8 sps:$4 sm:$0xff] (!%p383_p8)   ;;  %v1012_v38 = vld [vmem:[%s1247_s9] ss:$8 sps:$4 sm:$0xff] (!%p383_p8)   ;;  %v1013_v41 = vld [vmem:[%s1247_s9 + $0x14] ss:$8 sps:$4 sm:$0xff] (!%p383_p8)   ;;  %v734_v12 = vunpack.c.l.s4 (!%p383_p8), %v1100_v11 }
  0x29   : > { %v515_v40 = vunpack.c.0.s8 (!%p383_p8), %v514_v35  ;;  %689 = vmatprep.subr.bf16.mxu0 (!%p383_p8), %v1010_v37  ;;  %v1015_v42 = vld [vmem:[%s1247_s9 + $0x10] ss:$8 sps:$4 sm:$0xff] (!%p383_p8)   ;;  %v1016_v44 = vld [vmem:[%s1247_s9 + $0x24] ss:$8 sps:$4 sm:$0xff] (!%p383_p8)   ;;  %v1018_v46 = vld [vmem:[%s1247_s9 + $0x20] ss:$8 sps:$4 sm:$0xff] (!%p383_p8)  }
  0x2a   : > { %690 = vmatpush1.bf16.msra.mxu0 (!%p383_p8), %v1012_v38  ;;  %v1019_v47 = vld [vmem:[%s1247_s9 + $0x34] ss:$8 sps:$4 sm:$0xff] (!%p383_p8)   ;;  %v1021_v48 = vld [vmem:[%s1247_s9 + $0x30] ss:$8 sps:$4 sm:$0xff] (!%p383_p8)   ;;  %v1022_v49 = vld [vmem:[%s1247_s9 + $0x44] ss:$8 sps:$4 sm:$0xff] (!%p383_p8)   ;;  %v735_v13 = vunpack.c.0.s8 (!%p383_p8), %v734_v12 }
  0x2b   : > { %v518_v43 = vsub.s32 (!%p383_p8), %v515_v40, %v1245_v36  ;;  %691 = vmatprep.subr.bf16.mxu0 (!%p383_p8), %v1013_v41  ;;  %v1024_v50 = vld [vmem:[%s1247_s9 + $0x40] ss:$8 sps:$4 sm:$0xff] (!%p383_p8)   ;;  %v1025_v51 = vld [vmem:[%s1247_s9 + $0x54] ss:$8 sps:$4 sm:$0xff] (!%p383_p8)   ;;  %v1027_v52 = vld [vmem:[%s1247_s9 + $0x50] ss:$8 sps:$4 sm:$0xff] (!%p383_p8)  }
  0x2c   : > { %v1028_v53 = vld [vmem:[%s1247_s9 + $0x64] ss:$8 sps:$4 sm:$0xff] (!%p383_p8)   ;;  %v1030_v54 = vld [vmem:[%s1247_s9 + $0x60] ss:$8 sps:$4 sm:$0xff] (!%p383_p8)   ;;  %v1031_v55 = vld [vmem:[%s1247_s9 + $0x74] ss:$8 sps:$4 sm:$0xff] (!%p383_p8)   ;;  %v738_v15 = vsub.s32 (!%p383_p8), %v735_v13, %v1245_v36 }
  0x2d   : > { %v526_v45 = vrot.slane %v512_v39, %v518_v43  ;;  %v1033_v56 = vld [vmem:[%s1247_s9 + $0x70] ss:$8 sps:$4 sm:$0xff]   ;;  %v1034_v57 = vld [vmem:[%s1247_s9 + $0x84] ss:$8 sps:$4 sm:$0xff]   ;;  %v1036_v58 = vld [vmem:[%s1247_s9 + $0x80] ss:$8 sps:$4 sm:$0xff]   ;;  %v519_v9 = vrot.slane %v1243_v32, %v518_v43 }
  0x2e   : > { %692 = vmatpush1.bf16.msra.mxu0 %v1015_v42  ;;  %v1037_v59 = vld [vmem:[%s1247_s9 + $0x94] ss:$8 sps:$4 sm:$0xff]   ;;  %v1039_v60 = vld [vmem:[%s1247_s9 + $0x90] ss:$8 sps:$4 sm:$0xff]   ;;  %v1040_v61 = vld [vmem:[%s1247_s9 + $0xa4] ss:$8 sps:$4 sm:$0xff]  }
  0x2f   : > { %721 = vmatprep.mubr.bf16.mxu0 %v526_v45  ;;  %693 = vmatprep.subr.bf16.mxu0 %v1016_v44  ;;  %v1042_v62 = vld [vmem:[%s1247_s9 + $0xa0] ss:$8 sps:$4 sm:$0xff]   ;;  %v1043_v63 = vld [vmem:[%s1247_s9 + $0xb4] ss:$8 sps:$4 sm:$0xff]   ;;  %v1045_v0 = vld [vmem:[%s1247_s9 + $0xb0] ss:$8 sps:$4 sm:$0xff]  }
  0x30   : > { %v1046_v1 = vld [vmem:[%s1247_s9 + $0xc4] ss:$8 sps:$4 sm:$0xff]   ;;  %v1048_v2 = vld [vmem:[%s1247_s9 + $0xc0] ss:$8 sps:$4 sm:$0xff]   ;;  %v1049_v3 = vld [vmem:[%s1247_s9 + $0xd4] ss:$8 sps:$4 sm:$0xff]  }
  0x31   : > { %v1051_v4 = vld [vmem:[%s1247_s9 + $0xd0] ss:$8 sps:$4 sm:$0xff]   ;;  %v1052_v5 = vld [vmem:[%s1247_s9 + $0xe4] ss:$8 sps:$4 sm:$0xff]   ;;  %v1054_v6 = vld [vmem:[%s1247_s9 + $0xe0] ss:$8 sps:$4 sm:$0xff]  }
  0x32   : > { %694 = vmatpush1.bf16.msra.mxu0 %v1018_v46  ;;  %v1055_v7 = vld [vmem:[%s1247_s9 + $0xf4] ss:$8 sps:$4 sm:$0xff]   ;;  %v1057_v8 = vld [vmem:[%s1247_s9 + $0xf0] ss:$8 sps:$4 sm:$0xff]   ;;  %p446_p9 = scmp.lt.s32.totalorder %s927_s10, 3  ;;  %v751_v16 = vsub.s32 0, %v1245_v36 }
  0x33   : > { %695 = vmatprep.subr.bf16.mxu0 %v1019_v47  ;;  %v755_v17 = vsub.s32 1, %v1245_v36  ;;  %v470_v22 = vld [vmem:[#allocation2] sm:$0xf] }
  0x34   : > { %s1330_s10 = smov (!%p446_p9, %s927_s10), 3 }
  0x35   : > { %s448_s13 = scalar_lea.vmem %s1320_s2, %s1330_s10  ;;  %s453_s21 = scalar_lea.vmem %s1321_s3, %s1330_s10 }
  0x36   : > { %696 = vmatpush1.bf16.msra.mxu0 %v1021_v48  ;;  %v747_v19 = vld [vmem:[%s448_s13] sm:$0x3]  ;;  %s930_s17 = sshll.u32 %s1330_s10, 1 }
  0x37   : > { %697 = vmatprep.subr.bf16.mxu0 %v1022_v49  ;;  %v767_v23 = vld [vmem:[%s453_s21] sm:$0x3]  ;;  %v752_v26 = vrot.slane %v747_v19, %v751_v16  ;;  %v756_v27 = vrot.slane %v747_v19, %v755_v17  ;;  %s463_s25 = scalar_lea.vmem %s1322_s4, %s930_s17 }
  0x38   : > { %v772_v29 = vrot.slane %v767_v23, %v751_v16  ;;  %v776_v30 = vrot.slane %v767_v23, %v755_v17 }
  0x39   : > { %v757_v31 = vcombine.low %v752_v26, %v756_v27 }
  0x3a   : > { %698 = vmatpush1.bf16.msra.mxu0 %v1024_v50  ;;  %v777_v32 = vcombine.low %v772_v29, %v776_v30 }
  0x3b   : > { %699 = vmatprep.subr.bf16.mxu0 %v1025_v51  ;;  %v764_v33 = vrot.slane %v757_v31, %v738_v15 }
  0x3c   : > { %v784_v34 = vrot.slane %v777_v32, %v738_v15 }
  0x3e   : > { %700 = vmatpush1.bf16.msra.mxu0 %v1027_v52 }
  0x3f   : > { %701 = vmatprep.subr.bf16.mxu0 %v1028_v53 }
  0x42   : > { %702 = vmatpush1.bf16.msra.mxu0 %v1030_v54 }
  0x43   : > { %703 = vmatprep.subr.bf16.mxu0 %v1031_v55 }
  0x46   : > { %704 = vmatpush1.bf16.msra.mxu0 %v1033_v56 }
  0x47   : > { %705 = vmatprep.subr.bf16.mxu0 %v1034_v57 }
  0x4a   : > { %706 = vmatpush1.bf16.msra.mxu0 %v1036_v58 }
  0x4b   : > { %707 = vmatprep.subr.bf16.mxu0 %v1037_v59 }
  0x4e   : > { %708 = vmatpush1.bf16.msra.mxu0 %v1039_v60 }
  0x4f   : > { %709 = vmatprep.subr.bf16.mxu0 %v1040_v61 }
  0x52   : > { %710 = vmatpush1.bf16.msra.mxu0 %v1042_v62 }
  0x53   : > { %711 = vmatprep.subr.bf16.mxu0 %v1043_v63 }
  0x56   : > { %712 = vmatpush1.bf16.msra.mxu0 %v1045_v0 }
  0x57   : > { %713 = vmatprep.subr.bf16.mxu0 %v1046_v1 }
  0x5a   : > { %714 = vmatpush1.bf16.msra.mxu0 %v1048_v2 }
  0x5b   : > { %715 = vmatprep.subr.bf16.mxu0 %v1049_v3 }
  0x5e   : > { %716 = vmatpush1.bf16.msra.mxu0 %v1051_v4 }
  0x5f   : > { %717 = vmatprep.subr.bf16.mxu0 %v1052_v5 }
  0x62   : > { %718 = vmatpush1.bf16.msra.mxu0 %v1054_v6 }
  0x63   : > { %719 = vmatprep.subr.bf16.mxu0 %v1055_v7 }
  0x66   : > { %720 = vmatpush1.bf16.msra.mxu0 %v1057_v8 }
  0x69   : > { %722 = vmatmul.mubr.bf16.vlgmr.msra.gmra.mrb[0].mxu0 %v519_v9 }
 0x13c   : > { %v723_v14 = vpop.f32.mrb[0].mxu0 }
 0x13d   : > { %v725_v18 = vpop.f32.mrb[1].mxu0 }
 0x13e   : > { %v732_v20 = vcombine.low %v723_v14, %v725_v18  ;;  %v727_v21 = vpop.f32.mrb[2].mxu0 }
 0x13f   : > { %v728_v24 = vpop.f32.mrb[3].mxu0 }
 0x140   : > { %v739_v25 = vrot.slane %v732_v20, %v738_v15 }
 0x142   : > { %v741_v28 = vadd.f32 %v739_v25, %v470_v22 }
 0x144   : > { %742 = vst [vmem:[#allocation2] sm:$0xf] %v741_v28 }
 0x14b   : > { %v746_v35 = vld [vmem:[#allocation2] sm:$0xf] }
 0x14c   : > { %v766_v36 = vmul.f32 %v764_v33, %v746_v35 }
 0x14e   : > { %v786_v37 = vadd.f32 %v784_v34, %v766_v36 }
 0x150   : > { %787 = vst [vmem:[%s463_s25] sm:$0xf] %v786_v37 }
 0x151 PF: > { %s14_s19 = sadd.s32 1, %s1096_s19   ;;  %s1323_s15 = smov %s1084_s16 }
 0x152   : > { %p11_p10 = scmp.ge.s32.totalorder %s14_s19, 4   ;;  %s1324_s16 = smov %s1161_s23 }
 0x153   : > { %s1325_s17 = smov %s1092_s18  ;;  %s1326_s18 = smov %s1328_s20 }
 0x154   :  { %13 = sbr.rel (!%p11_p10) target bundleno = 3 (0x3), region = 126 }

// kernel: resnet18_forward.39
= control target key start
LH: loop header
LB: loop body
LE: loop exit
PB: predicated region body
PF: predicated region fallthrough
CT: control target
= control target key end

     0   :  { %s1701_s18 = smov 0   ;;  %s1703_s19 = smov 0   ;;  %s2037_s0 = inlined_call_operand.vmem [shape: bf16[2,4608], index: 0, kind: input, shape index: {}]   ;;  %s2038_s1 = inlined_call_operand.vmem [shape: bf16[4608,512], index: 1, kind: input, shape index: {}]   ;;  %s2039_s2 = inlined_call_operand.vmem [shape: f32[1,512], index: 2, kind: input, shape index: {}]   ;;  %s2040_s3 = inlined_call_operand.vmem [shape: f32[1,512], index: 3, kind: input, shape index: {}]   ;;  %s2041_s4 = inlined_call_operand.vmem [shape: f32[2,512], index: 4, kind: input, shape index: {}]   ;;  %s2042_s5 = inlined_call_operand.vmem [shape: f32[2,512], index: 5, kind: output, shape index: {}]  }
   0x1   :  { %s1705_s20 = smov 0   ;;  %s1707_s21 = smov 0  }
   0x2   :  { %s1709_s22 = smov 0   ;;  %s1711_s23 = smov 0  }
   0x3   :  { %s1713_s24 = smov 0  }
   0x4 LB: > { %s27_s25 = sadd.s32 1, %s1658_s22  ;;  %s30_s26 = sadd.s32 1, %s1662_s23  ;;  %s1666_s24 = sphi %s1713_s24, %s15_s24   ;;  %s1662_s23 = sphi %s1711_s23, %s2049_s23   ;;  %s1658_s22 = sphi %s1709_s22, %s2048_s22   ;;  %s1654_s21 = sphi %s1707_s21, %s2047_s21   ;;  %s1650_s20 = sphi %s1705_s20, %s2046_s20   ;;  %s1646_s19 = sphi %s1703_s19, %s2045_s19   ;;  %s1642_s18 = sphi %s1701_s18, %s2044_s18  }
   0x5   : > { %p28_p0 = scmp.ge.s32.totalorder %s27_s25, 9  ;;  %p78_p1 = scmp.ne.s32.totalorder %s1646_s19, %s1642_s18 }
   0x6   : > { %p79_p2 = scmp.eq.s32.totalorder %s1666_s24, 0  ;;  %s71_s30 = sadd.s32 1, %s1646_s19 }
   0x7   : > { %s2051_s25 = smov (%p28_p0, %s27_s25), 0  ;;  %s2053_s26 = smov (!%p28_p0, %s30_s26), %s1662_s23 }
   0x8   : > { %p80_p3 = por %p79_p2, %p78_p1  ;;  %p32_p4 = scmp.ge.s32.totalorder %s2053_s26, 2 }
   0x9   : > { %s66_s27 = ssub.s32 %s1658_s22, %s2051_s25  ;;  %p1370_p6 = scmp.ge.s32.totalorder %s1666_s24, 18 }
   0xa   : > { %s2055_s26 = smov (%p32_p4, %s2053_s26), 0 }
   0xb   : > { %s67_s28 = ssub.s32 %s1662_s23, %s2055_s26  ;;  %212 = sbr.rel (%p1370_p6) target bundleno = 57 (0x39), region = 16 }
   0xc   : > { %s68_s29 = sor.u32 %s67_s28, %s66_s27 }
   0xd   : > { %p69_p5 = scmp.eq.s32.totalorder %s68_s29, 0 }
   0xf   : > { %s1752_s6 = scalar_select %p69_p5, %s1646_s19, %s71_s30  }
  0x12   : > { %227 = sbr.rel (!%p80_p3) target bundleno = 57 (0x39), region = 24  ;;  %s229_s7 = sand.u32 (%p80_p3), 1, %s1646_s19  }
  0x13   : > { %s1373_s8 = sshll.u32 (%p80_p3), %s1662_s23, 1  ;;  %s1371_s9 = sshll.u32 (%p80_p3), %s229_s7, 9 }
  0x14   : > { %s1454_s10 = sshll.u32 (%p80_p3), %s1658_s22, 8  ;;  %s1766_s16 = scalar_lea.vmem (%p80_p3), [#allocation3], %s1371_s9 }
  0x15   : > { %s235_s11 = sadd.s32 (%p80_p3), %s1454_s10, %s1373_s8 }
  0x16   : > { %s1375_s12 = sshll.u32 (%p80_p3), %s235_s11, 2 }
  0x17   : > { %s1761_s15 = scalar_lea.vmem (%p80_p3), %s2038_s1, %s1375_s12 }
  0x18   : > { %v391_v0 = vld [vmem:[%s1761_s15] sm:$0xff] (%p80_p3)  ;;  %v393_v1 = vld [vmem:[%s1761_s15 + $0x10] sm:$0xff] (%p80_p3) }
  0x19   : > { %v395_v2 = vld [vmem:[%s1761_s15 + $0x20] sm:$0xff]  ;;  %392 = vst [vmem:[%s1766_s16] sm:$0xff] %v391_v0  ;;  %394 = vst [vmem:[%s1766_s16 + $0x8] sm:$0xff] %v393_v1  ;;  %v397_v3 = vld [vmem:[%s1761_s15 + $0x30] sm:$0xff] }
  0x1a   : > { %396 = vst [vmem:[%s1766_s16 + $0x10] sm:$0xff] %v395_v2  ;;  %v399_v4 = vld [vmem:[%s1761_s15 + $0x40] sm:$0xff]  ;;  %v401_v5 = vld [vmem:[%s1761_s15 + $0x50] sm:$0xff]  ;;  %398 = vst [vmem:[%s1766_s16 + $0x18] sm:$0xff] %v397_v3 }
  0x1b   : > { %400 = vst [vmem:[%s1766_s16 + $0x20] sm:$0xff] %v399_v4  ;;  %402 = vst [vmem:[%s1766_s16 + $0x28] sm:$0xff] %v401_v5  ;;  %v403_v6 = vld [vmem:[%s1761_s15 + $0x60] sm:$0xff]  ;;  %v405_v7 = vld [vmem:[%s1761_s15 + $0x70] sm:$0xff] }
  0x1c   : > { %v407_v8 = vld [vmem:[%s1761_s15 + $0x80] sm:$0xff]  ;;  %404 = vst [vmem:[%s1766_s16 + $0x30] sm:$0xff] %v403_v6  ;;  %406 = vst [vmem:[%s1766_s16 + $0x38] sm:$0xff] %v405_v7  ;;  %v409_v9 = vld [vmem:[%s1761_s15 + $0x90] sm:$0xff] }
  0x1d   : > { %408 = vst [vmem:[%s1766_s16 + $0x40] sm:$0xff] %v407_v8  ;;  %v411_v10 = vld [vmem:[%s1761_s15 + $0xa0] sm:$0xff]  ;;  %v413_v11 = vld [vmem:[%s1761_s15 + $0xb0] sm:$0xff]  ;;  %410 = vst [vmem:[%s1766_s16 + $0x48] sm:$0xff] %v409_v9 }
  0x1e   : > { %412 = vst [vmem:[%s1766_s16 + $0x50] sm:$0xff] %v411_v10  ;;  %414 = vst [vmem:[%s1766_s16 + $0x58] sm:$0xff] %v413_v11  ;;  %v415_v12 = vld [vmem:[%s1761_s15 + $0xc0] sm:$0xff]  ;;  %v417_v13 = vld [vmem:[%s1761_s15 + $0xd0] sm:$0xff] }
  0x1f   : > { %v419_v14 = vld [vmem:[%s1761_s15 + $0xe0] sm:$0xff]  ;;  %416 = vst [vmem:[%s1766_s16 + $0x60] sm:$0xff] %v415_v12  ;;  %418 = vst [vmem:[%s1766_s16 + $0x68] sm:$0xff] %v417_v13  ;;  %v421_v15 = vld [vmem:[%s1761_s15 + $0xf0] sm:$0xff] }
  0x20   : > { %420 = vst [vmem:[%s1766_s16 + $0x70] sm:$0xff] %v419_v14  ;;  %v423_v16 = vld [vmem:[%s1761_s15 + $0x100] sm:$0xff]  ;;  %v425_v17 = vld [vmem:[%s1761_s15 + $0x110] sm:$0xff]  ;;  %422 = vst [vmem:[%s1766_s16 + $0x78] sm:$0xff] %v421_v15 }
  0x21   : > { %424 = vst [vmem:[%s1766_s16 + $0x80] sm:$0xff] %v423_v16  ;;  %426 = vst [vmem:[%s1766_s16 + $0x88] sm:$0xff] %v425_v17  ;;  %v427_v18 = vld [vmem:[%s1761_s15 + $0x120] sm:$0xff]  ;;  %v429_v19 = vld [vmem:[%s1761_s15 + $0x130] sm:$0xff] }
  0x22   : > { %v431_v20 = vld [vmem:[%s1761_s15 + $0x140] sm:$0xff]  ;;  %428 = vst [vmem:[%s1766_s16 + $0x90] sm:$0xff] %v427_v18  ;;  %430 = vst [vmem:[%s1766_s16 + $0x98] sm:$0xff] %v429_v19  ;;  %v433_v21 = vld [vmem:[%s1761_s15 + $0x150] sm:$0xff] }
  0x23   : > { %432 = vst [vmem:[%s1766_s16 + $0xa0] sm:$0xff] %v431_v20  ;;  %v435_v22 = vld [vmem:[%s1761_s15 + $0x160] sm:$0xff]  ;;  %v437_v23 = vld [vmem:[%s1761_s15 + $0x170] sm:$0xff]  ;;  %434 = vst [vmem:[%s1766_s16 + $0xa8] sm:$0xff] %v433_v21 }
  0x24   : > { %436 = vst [vmem:[%s1766_s16 + $0xb0] sm:$0xff] %v435_v22  ;;  %438 = vst [vmem:[%s1766_s16 + $0xb8] sm:$0xff] %v437_v23  ;;  %v439_v24 = vld [vmem:[%s1761_s15 + $0x180] sm:$0xff]  ;;  %v441_v25 = vld [vmem:[%s1761_s15 + $0x190] sm:$0xff] }
  0x25   : > { %v443_v26 = vld [vmem:[%s1761_s15 + $0x1a0] sm:$0xff]  ;;  %440 = vst [vmem:[%s1766_s16 + $0xc0] sm:$0xff] %v439_v24  ;;  %442 = vst [vmem:[%s1766_s16 + $0xc8] sm:$0xff] %v441_v25  ;;  %v445_v27 = vld [vmem:[%s1761_s15 + $0x1b0] sm:$0xff] }
  0x26   : > { %444 = vst [vmem:[%s1766_s16 + $0xd0] sm:$0xff] %v443_v26  ;;  %v447_v28 = vld [vmem:[%s1761_s15 + $0x1c0] sm:$0xff]  ;;  %v449_v29 = vld [vmem:[%s1761_s15 + $0x1d0] sm:$0xff]  ;;  %446 = vst [vmem:[%s1766_s16 + $0xd8] sm:$0xff] %v445_v27 }
  0x27   : > { %448 = vst [vmem:[%s1766_s16 + $0xe0] sm:$0xff] %v447_v28  ;;  %450 = vst [vmem:[%s1766_s16 + $0xe8] sm:$0xff] %v449_v29  ;;  %v451_v30 = vld [vmem:[%s1761_s15 + $0x1e0] sm:$0xff]  ;;  %v453_v31 = vld [vmem:[%s1761_s15 + $0x1f0] sm:$0xff] }
  0x28   : > { %v455_v32 = vld [vmem:[%s1761_s15 + $0x200] sm:$0xff]  ;;  %452 = vst [vmem:[%s1766_s16 + $0xf0] sm:$0xff] %v451_v30  ;;  %454 = vst [vmem:[%s1766_s16 + $0xf8] sm:$0xff] %v453_v31  ;;  %v457_v33 = vld [vmem:[%s1761_s15 + $0x210] sm:$0xff] }
  0x29   : > { %456 = vst [vmem:[%s1766_s16 + $0x100] sm:$0xff] %v455_v32  ;;  %v459_v34 = vld [vmem:[%s1761_s15 + $0x220] sm:$0xff]  ;;  %v461_v35 = vld [vmem:[%s1761_s15 + $0x230] sm:$0xff]  ;;  %458 = vst [vmem:[%s1766_s16 + $0x108] sm:$0xff] %v457_v33 }
  0x2a   : > { %460 = vst [vmem:[%s1766_s16 + $0x110] sm:$0xff] %v459_v34  ;;  %462 = vst [vmem:[%s1766_s16 + $0x118] sm:$0xff] %v461_v35  ;;  %v463_v36 = vld [vmem:[%s1761_s15 + $0x240] sm:$0xff]  ;;  %v465_v37 = vld [vmem:[%s1761_s15 + $0x250] sm:$0xff] }
  0x2b   : > { %v467_v38 = vld [vmem:[%s1761_s15 + $0x260] sm:$0xff]  ;;  %464 = vst [vmem:[%s1766_s16 + $0x120] sm:$0xff] %v463_v36  ;;  %466 = vst [vmem:[%s1766_s16 + $0x128] sm:$0xff] %v465_v37  ;;  %v469_v39 = vld [vmem:[%s1761_s15 + $0x270] sm:$0xff] }
  0x2c   : > { %468 = vst [vmem:[%s1766_s16 + $0x130] sm:$0xff] %v467_v38  ;;  %v471_v40 = vld [vmem:[%s1761_s15 + $0x280] sm:$0xff]  ;;  %v473_v41 = vld [vmem:[%s1761_s15 + $0x290] sm:$0xff]  ;;  %470 = vst [vmem:[%s1766_s16 + $0x138] sm:$0xff] %v469_v39 }
  0x2d   : > { %472 = vst [vmem:[%s1766_s16 + $0x140] sm:$0xff] %v471_v40  ;;  %474 = vst [vmem:[%s1766_s16 + $0x148] sm:$0xff] %v473_v41  ;;  %v475_v42 = vld [vmem:[%s1761_s15 + $0x2a0] sm:$0xff]  ;;  %v477_v43 = vld [vmem:[%s1761_s15 + $0x2b0] sm:$0xff] }
  0x2e   : > { %v479_v44 = vld [vmem:[%s1761_s15 + $0x2c0] sm:$0xff]  ;;  %476 = vst [vmem:[%s1766_s16 + $0x150] sm:$0xff] %v475_v42  ;;  %478 = vst [vmem:[%s1766_s16 + $0x158] sm:$0xff] %v477_v43  ;;  %v481_v45 = vld [vmem:[%s1761_s15 + $0x2d0] sm:$0xff] }
  0x2f   : > { %480 = vst [vmem:[%s1766_s16 + $0x160] sm:$0xff] %v479_v44  ;;  %v483_v46 = vld [vmem:[%s1761_s15 + $0x2e0] sm:$0xff]  ;;  %v485_v47 = vld [vmem:[%s1761_s15 + $0x2f0] sm:$0xff]  ;;  %482 = vst [vmem:[%s1766_s16 + $0x168] sm:$0xff] %v481_v45 }
  0x30   : > { %484 = vst [vmem:[%s1766_s16 + $0x170] sm:$0xff] %v483_v46  ;;  %486 = vst [vmem:[%s1766_s16 + $0x178] sm:$0xff] %v485_v47  ;;  %v487_v48 = vld [vmem:[%s1761_s15 + $0x300] sm:$0xff]  ;;  %v489_v49 = vld [vmem:[%s1761_s15 + $0x310] sm:$0xff] }
  0x31   : > { %v491_v50 = vld [vmem:[%s1761_s15 + $0x320] sm:$0xff]  ;;  %488 = vst [vmem:[%s1766_s16 + $0x180] sm:$0xff] %v487_v48  ;;  %490 = vst [vmem:[%s1766_s16 + $0x188] sm:$0xff] %v489_v49  ;;  %v493_v51 = vld [vmem:[%s1761_s15 + $0x330] sm:$0xff] }
  0x32   : > { %492 = vst [vmem:[%s1766_s16 + $0x190] sm:$0xff] %v491_v50  ;;  %v495_v52 = vld [vmem:[%s1761_s15 + $0x340] sm:$0xff]  ;;  %v497_v53 = vld [vmem:[%s1761_s15 + $0x350] sm:$0xff]  ;;  %494 = vst [vmem:[%s1766_s16 + $0x198] sm:$0xff] %v493_v51 }
  0x33   : > { %496 = vst [vmem:[%s1766_s16 + $0x1a0] sm:$0xff] %v495_v52  ;;  %498 = vst [vmem:[%s1766_s16 + $0x1a8] sm:$0xff] %v497_v53  ;;  %v499_v54 = vld [vmem:[%s1761_s15 + $0x360] sm:$0xff]  ;;  %v501_v55 = vld [vmem:[%s1761_s15 + $0x370] sm:$0xff] }
  0x34   : > { %v503_v56 = vld [vmem:[%s1761_s15 + $0x380] sm:$0xff]  ;;  %500 = vst [vmem:[%s1766_s16 + $0x1b0] sm:$0xff] %v499_v54  ;;  %502 = vst [vmem:[%s1766_s16 + $0x1b8] sm:$0xff] %v501_v55  ;;  %v505_v57 = vld [vmem:[%s1761_s15 + $0x390] sm:$0xff] }
  0x35   : > { %504 = vst [vmem:[%s1766_s16 + $0x1c0] sm:$0xff] %v503_v56  ;;  %v507_v58 = vld [vmem:[%s1761_s15 + $0x3a0] sm:$0xff]  ;;  %v509_v59 = vld [vmem:[%s1761_s15 + $0x3b0] sm:$0xff]  ;;  %506 = vst [vmem:[%s1766_s16 + $0x1c8] sm:$0xff] %v505_v57 }
  0x36   : > { %508 = vst [vmem:[%s1766_s16 + $0x1d0] sm:$0xff] %v507_v58  ;;  %510 = vst [vmem:[%s1766_s16 + $0x1d8] sm:$0xff] %v509_v59  ;;  %v511_v60 = vld [vmem:[%s1761_s15 + $0x3c0] sm:$0xff]  ;;  %v513_v61 = vld [vmem:[%s1761_s15 + $0x3d0] sm:$0xff] }
  0x37   : > { %v515_v62 = vld [vmem:[%s1761_s15 + $0x3e0] sm:$0xff]  ;;  %512 = vst [vmem:[%s1766_s16 + $0x1e0] sm:$0xff] %v511_v60  ;;  %514 = vst [vmem:[%s1766_s16 + $0x1e8] sm:$0xff] %v513_v61  ;;  %v517_v63 = vld [vmem:[%s1761_s15 + $0x3f0] sm:$0xff] }
  0x38   : > { %516 = vst [vmem:[%s1766_s16 + $0x1f0] sm:$0xff] %v515_v62  ;;  %518 = vst [vmem:[%s1766_s16 + $0x1f8] sm:$0xff] %v517_v63 }
  0x39 PF: > { %p1376_p7 = scmp.ge.s32.totalorder %s1666_s24, 1  ;;  %p552_p8 = scmp.lt.s32.totalorder %s1666_s24, 19 }
  0x3b   : > { %p553_p9 = pnand %p1376_p7, %p552_p8 }
  0x3c   : > { %s559_s17 = sand.u32 (!%p553_p9), 1, %s1642_s18   ;;  %s1378_s27 = sshll.u32 (!%p553_p9), %s1650_s20, 2 }
  0x3d   : > { %556 = sbr.rel (%p553_p9) target bundleno = 381 (0x17d), region = 74  ;;  %s1377_s28 = sshll.u32 (!%p553_p9), %s559_s17, 9 }
  0x3e   : > { %p618_p10 = scmp.lt.s32.totalorder (!%p553_p9), %s1378_s27, 35  ;;  %s1379_s29 = sshll.u32 (!%p553_p9), %s1654_s21, 1 }
  0x3f   : > { %p627_p11 = scmp.lt.s32.totalorder (!%p553_p9), %s1379_s29, 3  ;;  %s1925_s8 = scalar_lea.vmem (!%p553_p9), [#allocation3], %s1377_s28 }
  0x40   : > { %p1385_p12 = scmp.ne.s32.totalorder (!%p553_p9), %s1650_s20, 0 }
  0x44   : > { %s2057_s27 = smov (!%p618_p10, %s1378_s27), 35  ;;  %s2059_s29 = smov (!%p627_p11, %s1379_s29), 3 }
  0x45   : > { %s629_s18 = scalar_lea.vmem %s2039_s2, %s2059_s29  ;;  %s634_s21 = scalar_lea.vmem %s2040_s3, %s2059_s29  ;;  %v1668_v0 = vmov (!%p1385_p12), 0.0  }
  0x46   : > { %s1382_s13 = sshll.u32 %s2059_s29, 1  ;;  %659 = sbr.rel (%p1385_p12) target bundleno = 77 (0x4d), region = 82  ;;  %660 = vst [vmem:[#allocation2] sm:$0xf] (!%p1385_p12), %v1668_v0 }
  0x47   : > { %s1918_s16 = scalar_lea.vmem %s2041_s4, %s1382_s13  ;;  %s1923_s7 = scalar_lea.vmem %s2042_s5, %s1382_s13 }
  0x4d PF: > { %v1516_v1 = vld [vmem:[%s1925_s8 + $0x4] ss:$8 sps:$4 sm:$0xff]   ;;  %v1520_v3 = vld [vmem:[%s1925_s8] ss:$8 sps:$4 sm:$0xff]   ;;  %v1522_v5 = vld [vmem:[%s1925_s8 + $0x14] ss:$8 sps:$4 sm:$0xff]   ;;  %v739_v41 = vlaneseq  ;;  %s2043_s10 = scalar_lea.vmem %s2037_s0, %s2057_s27 }
  0x4e   : > { %v1518_v2 = vld [vmem:[%s1925_s8 + $0x104] ss:$8 sps:$4 sm:$0xff]   ;;  %1076 = vmatprep.subr.bf16.mxu1 %v1516_v1  ;;  %v1521_v4 = vld [vmem:[%s1925_s8 + $0x100] ss:$8 sps:$4 sm:$0xff]   ;;  %v1524_v6 = vld [vmem:[%s1925_s8 + $0x114] ss:$8 sps:$4 sm:$0xff]  }
  0x4f   : > { %1117 = vmatprep.subr.bf16.mxu0 %v1518_v2  ;;  %1077 = vmatpush1.bf16.msra.mxu1 %v1520_v3  ;;  %v1526_v7 = vld [vmem:[%s1925_s8 + $0x10] ss:$8 sps:$4 sm:$0xff]   ;;  %v1528_v9 = vld [vmem:[%s1925_s8 + $0x24] ss:$8 sps:$4 sm:$0xff]   ;;  %v1532_v11 = vld [vmem:[%s1925_s8 + $0x20] ss:$8 sps:$4 sm:$0xff]  }
  0x50   : > { %1118 = vmatpush1.bf16.msra.mxu0 %v1521_v4  ;;  %1078 = vmatprep.subr.bf16.mxu1 %v1522_v5  ;;  %v1527_v8 = vld [vmem:[%s1925_s8 + $0x110] ss:$8 sps:$4 sm:$0xff]   ;;  %v1530_v10 = vld [vmem:[%s1925_s8 + $0x124] ss:$8 sps:$4 sm:$0xff]   ;;  %v1533_v12 = vld [vmem:[%s1925_s8 + $0x120] ss:$8 sps:$4 sm:$0xff]  }
  0x51   : > { %1119 = vmatprep.subr.bf16.mxu0 %v1524_v6  ;;  %v1534_v13 = vld [vmem:[%s1925_s8 + $0x34] ss:$8 sps:$4 sm:$0xff]   ;;  %v1538_v15 = vld [vmem:[%s1925_s8 + $0x30] ss:$8 sps:$4 sm:$0xff]   ;;  %v1540_v17 = vld [vmem:[%s1925_s8 + $0x44] ss:$8 sps:$4 sm:$0xff]  }
  0x52   : > { %v1536_v14 = vld [vmem:[%s1925_s8 + $0x134] ss:$8 sps:$4 sm:$0xff]   ;;  %v1539_v16 = vld [vmem:[%s1925_s8 + $0x130] ss:$8 sps:$4 sm:$0xff]   ;;  %v1542_v18 = vld [vmem:[%s1925_s8 + $0x144] ss:$8 sps:$4 sm:$0xff]  }
  0x53   : > { %1079 = vmatpush1.bf16.msra.mxu1 %v1526_v7  ;;  %v1544_v19 = vld [vmem:[%s1925_s8 + $0x40] ss:$8 sps:$4 sm:$0xff]   ;;  %v1546_v21 = vld [vmem:[%s1925_s8 + $0x54] ss:$8 sps:$4 sm:$0xff]   ;;  %v1550_v23 = vld [vmem:[%s1925_s8 + $0x50] ss:$8 sps:$4 sm:$0xff]  }
  0x54   : > { %1120 = vmatpush1.bf16.msra.mxu0 %v1527_v8  ;;  %1080 = vmatprep.subr.bf16.mxu1 %v1528_v9  ;;  %v1545_v20 = vld [vmem:[%s1925_s8 + $0x140] ss:$8 sps:$4 sm:$0xff]   ;;  %v1548_v22 = vld [vmem:[%s1925_s8 + $0x154] ss:$8 sps:$4 sm:$0xff]   ;;  %v1551_v24 = vld [vmem:[%s1925_s8 + $0x150] ss:$8 sps:$4 sm:$0xff]  }
  0x55   : > { %1121 = vmatprep.subr.bf16.mxu0 %v1530_v10  ;;  %v1552_v25 = vld [vmem:[%s1925_s8 + $0x64] ss:$8 sps:$4 sm:$0xff]   ;;  %v1556_v27 = vld [vmem:[%s1925_s8 + $0x60] ss:$8 sps:$4 sm:$0xff]   ;;  %v1558_v29 = vld [vmem:[%s1925_s8 + $0x74] ss:$8 sps:$4 sm:$0xff]  }
  0x56   : > { %v1554_v26 = vld [vmem:[%s1925_s8 + $0x164] ss:$8 sps:$4 sm:$0xff]   ;;  %v1557_v28 = vld [vmem:[%s1925_s8 + $0x160] ss:$8 sps:$4 sm:$0xff]   ;;  %v1560_v30 = vld [vmem:[%s1925_s8 + $0x174] ss:$8 sps:$4 sm:$0xff]  }
  0x57   : > { %1081 = vmatpush1.bf16.msra.mxu1 %v1532_v11  ;;  %v1562_v31 = vld [vmem:[%s1925_s8 + $0x70] ss:$8 sps:$4 sm:$0xff]   ;;  %v1564_v33 = vld [vmem:[%s1925_s8 + $0x84] ss:$8 sps:$4 sm:$0xff]   ;;  %v1568_v35 = vld [vmem:[%s1925_s8 + $0x80] ss:$8 sps:$4 sm:$0xff]  }
  0x58   : > { %1122 = vmatpush1.bf16.msra.mxu0 %v1533_v12  ;;  %1082 = vmatprep.subr.bf16.mxu1 %v1534_v13  ;;  %v1563_v32 = vld [vmem:[%s1925_s8 + $0x170] ss:$8 sps:$4 sm:$0xff]   ;;  %v1566_v34 = vld [vmem:[%s1925_s8 + $0x184] ss:$8 sps:$4 sm:$0xff]   ;;  %v1569_v36 = vld [vmem:[%s1925_s8 + $0x180] ss:$8 sps:$4 sm:$0xff]  }
  0x59   : > { %1123 = vmatprep.subr.bf16.mxu0 %v1536_v14  ;;  %v1570_v37 = vld [vmem:[%s1925_s8 + $0x94] ss:$8 sps:$4 sm:$0xff]   ;;  %v1669_v39 = vmov 1966171168   ;;  %v1574_v42 = vld [vmem:[%s1925_s8 + $0x90] ss:$8 sps:$4 sm:$0xff]  }
  0x5a   : > { %v1572_v38 = vld [vmem:[%s1925_s8 + $0x194] ss:$8 sps:$4 sm:$0xff]   ;;  %v737_v40 = vunpack.c.l.s4 %v1669_v39  ;;  %v1575_v43 = vld [vmem:[%s1925_s8 + $0x190] ss:$8 sps:$4 sm:$0xff]   ;;  %v1576_v44 = vld [vmem:[%s1925_s8 + $0xa4] ss:$8 sps:$4 sm:$0xff]  }
  0x5b   : > { %1083 = vmatpush1.bf16.msra.mxu1 %v1538_v15  ;;  %v1578_v45 = vld [vmem:[%s1925_s8 + $0x1a4] ss:$8 sps:$4 sm:$0xff]   ;;  %v1970_v47 = vshrl.u32 %v739_v41, 7  ;;  %v1580_v48 = vld [vmem:[%s1925_s8 + $0xa0] ss:$8 sps:$4 sm:$0xff]   ;;  %p1451_p13 = scmp.ne.s32.totalorder %s1650_s20, 8 }
  0x5c   : > { %1124 = vmatpush1.bf16.msra.mxu0 %v1539_v16  ;;  %1084 = vmatprep.subr.bf16.mxu1 %v1540_v17  ;;  %v738_v46 = vunpack.c.0.s8 %v737_v40  ;;  %v1581_v49 = vld [vmem:[%s1925_s8 + $0x1a0] ss:$8 sps:$4 sm:$0xff]   ;;  %v1582_v50 = vld [vmem:[%s1925_s8 + $0xb4] ss:$8 sps:$4 sm:$0xff]   ;;  %v1586_v54 = vld [vmem:[%s1925_s8 + $0xb0] ss:$8 sps:$4 sm:$0xff]  }
  0x5d   : > { %1125 = vmatprep.subr.bf16.mxu0 %v1542_v18  ;;  %v1584_v51 = vld [vmem:[%s1925_s8 + $0x1b4] ss:$8 sps:$4 sm:$0xff]   ;;  %v1587_v55 = vld [vmem:[%s1925_s8 + $0x1b0] ss:$8 sps:$4 sm:$0xff]   ;;  %v1588_v57 = vld [vmem:[%s1925_s8 + $0xc4] ss:$8 sps:$4 sm:$0xff]  }
  0x5e   : > { %v741_v52 = vsub.s32 %v738_v46, %v1970_v47  ;;  %v1386_v53 = vld.sshfl [vmem:[%s2043_s10] sm:$0x33 pattern:$0x75316420]  ;;  %v1590_v58 = vld [vmem:[%s1925_s8 + $0x1c4] ss:$8 sps:$4 sm:$0xff]  }
  0x5f   : > { %1085 = vmatpush1.bf16.msra.mxu1 %v1544_v19  ;;  %v735_v56 = vcombine.high %v1386_v53, %v1386_v53  ;;  %v1592_v60 = vld [vmem:[%s1925_s8 + $0xc0] ss:$8 sps:$4 sm:$0xff]   ;;  %v1594_v63 = vld [vmem:[%s1925_s8 + $0xd4] ss:$8 sps:$4 sm:$0xff]   ;;  %v1598_v1 = vld [vmem:[%s1925_s8 + $0xd0] ss:$8 sps:$4 sm:$0xff]  }
  0x60   : > { %1126 = vmatpush1.bf16.msra.mxu0 %v1545_v20  ;;  %1086 = vmatprep.subr.bf16.mxu1 %v1546_v21  ;;  %v1593_v61 = vld [vmem:[%s1925_s8 + $0x1c0] ss:$8 sps:$4 sm:$0xff]   ;;  %v1596_v0 = vld [vmem:[%s1925_s8 + $0x1d4] ss:$8 sps:$4 sm:$0xff]   ;;  %v1599_v2 = vld [vmem:[%s1925_s8 + $0x1d0] ss:$8 sps:$4 sm:$0xff]   ;;  %v742_v9 = vrot.slane %v1386_v53, %v741_v52 }
  0x61   : > { %1127 = vmatprep.subr.bf16.mxu0 %v1548_v22  ;;  %v749_v59 = vrot.slane %v735_v56, %v741_v52  ;;  %v1600_v3 = vld [vmem:[%s1925_s8 + $0xe4] ss:$8 sps:$4 sm:$0xff]   ;;  %v1604_v5 = vld [vmem:[%s1925_s8 + $0xe0] ss:$8 sps:$4 sm:$0xff]   ;;  %v1606_v7 = vld [vmem:[%s1925_s8 + $0xf4] ss:$8 sps:$4 sm:$0xff]  }
  0x62   : > { %v1602_v4 = vld [vmem:[%s1925_s8 + $0x1e4] ss:$8 sps:$4 sm:$0xff]   ;;  %v1605_v6 = vld [vmem:[%s1925_s8 + $0x1e0] ss:$8 sps:$4 sm:$0xff]   ;;  %v1608_v8 = vld [vmem:[%s1925_s8 + $0x1f4] ss:$8 sps:$4 sm:$0xff]   ;;  %v750_v12 = vcombine.high %v742_v9, %v742_v9 }
  0x63   : > { %1087 = vmatpush1.bf16.msra.mxu1 %v1550_v23  ;;  %v751_v62 = vcombine.high %v749_v59, %v749_v59  ;;  %1108 = vmatprep.mubr.bf16.mxu1 %v749_v59  ;;  %v1610_v10 = vld [vmem:[%s1925_s8 + $0xf0] ss:$8 sps:$4 sm:$0xff]   ;;  %v1670_v13 = vmov 1983009808  }
  0x64   : > { %1128 = vmatpush1.bf16.msra.mxu0 %v1551_v24  ;;  %1088 = vmatprep.subr.bf16.mxu1 %v1552_v25  ;;  %v1611_v11 = vld [vmem:[%s1925_s8 + $0x1f0] ss:$8 sps:$4 sm:$0xff]   ;;  %v1162_v14 = vunpack.c.l.s4 %v1670_v13 }
  0x65   : > { %1129 = vmatprep.subr.bf16.mxu0 %v1554_v26  ;;  %1149 = vmatprep.mubr.bf16.mxu0 %v751_v62 }
  0x66   : > { %v1163_v15 = vunpack.c.0.s8 %v1162_v14 }
  0x67   : > { %1089 = vmatpush1.bf16.msra.mxu1 %v1556_v27 }
  0x68   : > { %1130 = vmatpush1.bf16.msra.mxu0 %v1557_v28  ;;  %1090 = vmatprep.subr.bf16.mxu1 %v1558_v29  ;;  %v1166_v22 = vsub.s32 %v1163_v15, %v1970_v47  ;;  %v661_v28 = vld [vmem:[#allocation2] sm:$0xf] }
  0x69   : > { %1131 = vmatprep.subr.bf16.mxu0 %v1560_v30 }
  0x6b   : > { %1091 = vmatpush1.bf16.msra.mxu1 %v1562_v31  ;;  %v1176_v31 = vld [vmem:[%s629_s18] sm:$0x3] (!%p1451_p13) }
  0x6c   : > { %1132 = vmatpush1.bf16.msra.mxu0 %v1563_v32  ;;  %1092 = vmatprep.subr.bf16.mxu1 %v1564_v33  ;;  %v1180_v32 = vsub.s32 (!%p1451_p13), 0, %v1970_v47  ;;  %v1184_v33 = vsub.s32 (!%p1451_p13), 1, %v1970_v47 }
  0x6d   : > { %1133 = vmatprep.subr.bf16.mxu0 %v1566_v34  ;;  %v1196_v34 = vld [vmem:[%s634_s21] sm:$0x3] (!%p1451_p13) }
  0x6f   : > { %1093 = vmatpush1.bf16.msra.mxu1 %v1568_v35  ;;  %v1181_v35 = vrot.slane (!%p1451_p13), %v1176_v31, %v1180_v32 }
  0x70   : > { %1134 = vmatpush1.bf16.msra.mxu0 %v1569_v36  ;;  %1094 = vmatprep.subr.bf16.mxu1 %v1570_v37  ;;  %v1185_v36 = vrot.slane (!%p1451_p13), %v1176_v31, %v1184_v33  ;;  %v1201_v37 = vrot.slane (!%p1451_p13), %v1196_v34, %v1180_v32 }
  0x71   : > { %1135 = vmatprep.subr.bf16.mxu0 %v1572_v38  ;;  %v1205_v38 = vrot.slane (!%p1451_p13), %v1196_v34, %v1184_v33 }
  0x72   : > { %v1186_v39 = vcombine.low (!%p1451_p13), %v1181_v35, %v1185_v36 }
  0x73   : > { %1095 = vmatpush1.bf16.msra.mxu1 %v1574_v42  ;;  %v1206_v40 = vcombine.low (!%p1451_p13), %v1201_v37, %v1205_v38 }
  0x74   : > { %1136 = vmatpush1.bf16.msra.mxu0 %v1575_v43  ;;  %1096 = vmatprep.subr.bf16.mxu1 %v1576_v44  ;;  %v1193_v42 = vrot.slane (!%p1451_p13), %v1186_v39, %v1166_v22 }
  0x75   : > { %1137 = vmatprep.subr.bf16.mxu0 %v1578_v45  ;;  %v1213_v43 = vrot.slane (!%p1451_p13), %v1206_v40, %v1166_v22  ;;  %v1216_v45 = vld [vmem:[%s1918_s16] sm:$0xf] (!%p1451_p13) }
  0x77   : > { %1097 = vmatpush1.bf16.msra.mxu1 %v1580_v48 }
  0x78   : > { %1138 = vmatpush1.bf16.msra.mxu0 %v1581_v49  ;;  %1098 = vmatprep.subr.bf16.mxu1 %v1582_v50 }
  0x79   : > { %1139 = vmatprep.subr.bf16.mxu0 %v1584_v51 }
  0x7b   : > { %1099 = vmatpush1.bf16.msra.mxu1 %v1586_v54 }
  0x7c   : > { %1140 = vmatpush1.bf16.msra.mxu0 %v1587_v55  ;;  %1100 = vmatprep.subr.bf16.mxu1 %v1588_v57 }
  0x7d   : > { %1141 = vmatprep.subr.bf16.mxu0 %v1590_v58 }
  0x7f   : > { %1101 = vmatpush1.bf16.msra.mxu1 %v1592_v60 }
  0x80   : > { %1142 = vmatpush1.bf16.msra.mxu0 %v1593_v61  ;;  %1102 = vmatprep.subr.bf16.mxu1 %v1594_v63 }
  0x81   : > { %1143 = vmatprep.subr.bf16.mxu0 %v1596_v0 }
  0x83   : > { %1103 = vmatpush1.bf16.msra.mxu1 %v1598_v1 }
  0x84   : > { %1144 = vmatpush1.bf16.msra.mxu0 %v1599_v2  ;;  %1104 = vmatprep.subr.bf16.mxu1 %v1600_v3 }
  0x85   : > { %1145 = vmatprep.subr.bf16.mxu0 %v1602_v4 }
  0x87   : > { %1105 = vmatpush1.bf16.msra.mxu1 %v1604_v5 }
  0x88   : > { %1146 = vmatpush1.bf16.msra.mxu0 %v1605_v6  ;;  %1106 = vmatprep.subr.bf16.mxu1 %v1606_v7 }
  0x89   : > { %1147 = vmatprep.subr.bf16.mxu0 %v1608_v8 }
  0x8b   : > { %1107 = vmatpush1.bf16.msra.mxu1 %v1610_v10 }
  0x8c   : > { %1148 = vmatpush1.bf16.msra.mxu0 %v1611_v11 }
  0x8e   : > { %1109 = vmatmul.mubr.bf16.vlgmr.msra.gmra.mrb[0].mxu1 %v742_v9 }
  0x8f   : > { %1150 = vmatmul.mubr.bf16.vlgmr.msra.gmra.mrb[0].mxu0 %v750_v12 }
 0x161   : > { %v1110_v16 = vpop.f32.mrb[0].mxu1 }
 0x162   : > { %v1151_v17 = vpop.f32.mrb[0].mxu0  ;;  %v1112_v19 = vpop.f32.mrb[1].mxu1 }
 0x163   : > { %v1152_v18 = vadd.f32 %v1151_v17, %v1110_v16  ;;  %v1153_v20 = vpop.f32.mrb[1].mxu0  ;;  %v1114_v23 = vpop.f32.mrb[2].mxu1 }
 0x164   : > { %v1154_v21 = vadd.f32 %v1153_v20, %v1112_v19  ;;  %v1155_v24 = vpop.f32.mrb[2].mxu0  ;;  %v1115_v25 = vpop.f32.mrb[3].mxu1 }
 0x165   : > { %v1156_v26 = vpop.f32.mrb[3].mxu0 }
 0x166   : > { %v1160_v27 = vcombine.low %v1152_v18, %v1154_v21  ;;  %1174 = sbr.rel (%p1451_p13) target bundleno = 381 (0x17d), region = 86 }
 0x168   : > { %v1167_v29 = vrot.slane %v1160_v27, %v1166_v22 }
 0x16a   : > { %v1169_v30 = vadd.f32 %v1167_v29, %v661_v28 }
 0x16c   : > { %1170 = vst [vmem:[#allocation2] sm:$0xf] %v1169_v30 }
 0x173   : > { %v1175_v41 = vld [vmem:[#allocation2] sm:$0xf] }
 0x174   : > { %v1195_v44 = vmul.f32 %v1193_v42, %v1175_v41 }
 0x176   : > { %v1215_v46 = vadd.f32 %v1213_v43, %v1195_v44 }
 0x178   : > { %v1217_v48 = vadd.f32 %v1216_v45, %v1215_v46 }
 0x17a   : > { %v1218_v47 = vmax.f32 %v1217_v48, 0.0 }
 0x17c   : > { %1219 = vst [vmem:[%s1923_s7] sm:$0xf] %v1218_v47 }
 0x17d PF: > { %s15_s24 = sadd.s32 1, %s1666_s24   ;;  %s2044_s18 = smov %s1646_s19 }
 0x17e   : > { %p12_p0 = scmp.ge.s32.totalorder %s15_s24, 20   ;;  %s2045_s19 = smov %s1752_s6 }
 0x17f   : > { %s2046_s20 = smov %s1658_s22  ;;  %s2047_s21 = smov %s1662_s23 }
 0x180   : > { %s2048_s22 = smov %s2051_s25  ;;  %s2049_s23 = smov %s2055_s26 }
 0x181   :  { %14 = sbr.rel (!%p12_p0) target bundleno = 4 (0x4), region = 133 }

// kernel: resnet18_forward.40
= control target key start
LH: loop header
LB: loop body
LE: loop exit
PB: predicated region body
PF: predicated region fallthrough
CT: control target
= control target key end

     0   :  { %s1611_s15 = smov 0   ;;  %s1613_s16 = smov 0   ;;  %s1941_s0 = inlined_call_operand.vmem [shape: bf16[2,4608], index: 0, kind: input, shape index: {}]   ;;  %s1942_s1 = inlined_call_operand.vmem [shape: bf16[4608,512], index: 1, kind: input, shape index: {}]   ;;  %s1943_s2 = inlined_call_operand.vmem [shape: f32[1,512], index: 2, kind: input, shape index: {}]   ;;  %s1944_s3 = inlined_call_operand.vmem [shape: f32[1,512], index: 3, kind: input, shape index: {}]   ;;  %s1945_s4 = inlined_call_operand.vmem [shape: f32[2,512], index: 4, kind: output, shape index: {}]  }
   0x1   :  { %s1615_s17 = smov 0   ;;  %s1617_s18 = smov 0  }
   0x2   :  { %s1619_s19 = smov 0   ;;  %s1621_s20 = smov 0  }
   0x3   :  { %s1623_s21 = smov 0  }
   0x4 LB: > { %s26_s22 = sadd.s32 1, %s1573_s19  ;;  %s29_s23 = sadd.s32 1, %s1577_s20  ;;  %s1581_s21 = sphi %s1623_s21, %s14_s21   ;;  %s1577_s20 = sphi %s1621_s20, %s1951_s20   ;;  %s1573_s19 = sphi %s1619_s19, %s1950_s19   ;;  %s1569_s18 = sphi %s1617_s18, %s1949_s18   ;;  %s1565_s17 = sphi %s1615_s17, %s1948_s17   ;;  %s1561_s16 = sphi %s1613_s16, %s1947_s16   ;;  %s1557_s15 = sphi %s1611_s15, %s1946_s15  }
   0x5   : > { %p27_p0 = scmp.ge.s32.totalorder %s26_s22, 9  ;;  %p77_p1 = scmp.ne.s32.totalorder %s1561_s16, %s1557_s15 }
   0x6   : > { %p78_p2 = scmp.eq.s32.totalorder %s1581_s21, 0  ;;  %s70_s27 = sadd.s32 1, %s1561_s16 }
   0x7   : > { %s1953_s22 = smov (%p27_p0, %s26_s22), 0  ;;  %s1955_s23 = smov (!%p27_p0, %s29_s23), %s1577_s20 }
   0x8   : > { %p79_p3 = por %p78_p2, %p77_p1  ;;  %p31_p4 = scmp.ge.s32.totalorder %s1955_s23, 2 }
   0x9   : > { %s65_s24 = ssub.s32 %s1573_s19, %s1953_s22  ;;  %p1287_p6 = scmp.ge.s32.totalorder %s1581_s21, 18 }
   0xa   : > { %s1957_s23 = smov (%p31_p4, %s1955_s23), 0 }
   0xb   : > { %s66_s25 = ssub.s32 %s1577_s20, %s1957_s23  ;;  %183 = sbr.rel (%p1287_p6) target bundleno = 57 (0x39), region = 16 }
   0xc   : > { %s67_s26 = sor.u32 %s66_s25, %s65_s24 }
   0xd   : > { %p68_p5 = scmp.eq.s32.totalorder %s67_s26, 0 }
   0xf   : > { %s1662_s28 = scalar_select %p68_p5, %s1561_s16, %s70_s27  }
  0x12   : > { %198 = sbr.rel (!%p79_p3) target bundleno = 57 (0x39), region = 24  ;;  %s200_s29 = sand.u32 (%p79_p3), 1, %s1561_s16  }
  0x13   : > { %s1290_s30 = sshll.u32 (%p79_p3), %s1577_s20, 1  ;;  %s1288_s5 = sshll.u32 (%p79_p3), %s200_s29, 9 }
  0x14   : > { %s1369_s6 = sshll.u32 (%p79_p3), %s1573_s19, 8  ;;  %s1676_s12 = scalar_lea.vmem (%p79_p3), [#allocation3], %s1288_s5 }
  0x15   : > { %s206_s7 = sadd.s32 (%p79_p3), %s1369_s6, %s1290_s30 }
  0x16   : > { %s1292_s8 = sshll.u32 (%p79_p3), %s206_s7, 2 }
  0x17   : > { %s1671_s11 = scalar_lea.vmem (%p79_p3), %s1942_s1, %s1292_s8 }
  0x18   : > { %v362_v0 = vld [vmem:[%s1671_s11] sm:$0xff] (%p79_p3)  ;;  %v364_v1 = vld [vmem:[%s1671_s11 + $0x10] sm:$0xff] (%p79_p3) }
  0x19   : > { %v366_v2 = vld [vmem:[%s1671_s11 + $0x20] sm:$0xff]  ;;  %363 = vst [vmem:[%s1676_s12] sm:$0xff] %v362_v0  ;;  %365 = vst [vmem:[%s1676_s12 + $0x8] sm:$0xff] %v364_v1  ;;  %v368_v3 = vld [vmem:[%s1671_s11 + $0x30] sm:$0xff] }
  0x1a   : > { %367 = vst [vmem:[%s1676_s12 + $0x10] sm:$0xff] %v366_v2  ;;  %v370_v4 = vld [vmem:[%s1671_s11 + $0x40] sm:$0xff]  ;;  %v372_v5 = vld [vmem:[%s1671_s11 + $0x50] sm:$0xff]  ;;  %369 = vst [vmem:[%s1676_s12 + $0x18] sm:$0xff] %v368_v3 }
  0x1b   : > { %371 = vst [vmem:[%s1676_s12 + $0x20] sm:$0xff] %v370_v4  ;;  %373 = vst [vmem:[%s1676_s12 + $0x28] sm:$0xff] %v372_v5  ;;  %v374_v6 = vld [vmem:[%s1671_s11 + $0x60] sm:$0xff]  ;;  %v376_v7 = vld [vmem:[%s1671_s11 + $0x70] sm:$0xff] }
  0x1c   : > { %v378_v8 = vld [vmem:[%s1671_s11 + $0x80] sm:$0xff]  ;;  %375 = vst [vmem:[%s1676_s12 + $0x30] sm:$0xff] %v374_v6  ;;  %377 = vst [vmem:[%s1676_s12 + $0x38] sm:$0xff] %v376_v7  ;;  %v380_v9 = vld [vmem:[%s1671_s11 + $0x90] sm:$0xff] }
  0x1d   : > { %379 = vst [vmem:[%s1676_s12 + $0x40] sm:$0xff] %v378_v8  ;;  %v382_v10 = vld [vmem:[%s1671_s11 + $0xa0] sm:$0xff]  ;;  %v384_v11 = vld [vmem:[%s1671_s11 + $0xb0] sm:$0xff]  ;;  %381 = vst [vmem:[%s1676_s12 + $0x48] sm:$0xff] %v380_v9 }
  0x1e   : > { %383 = vst [vmem:[%s1676_s12 + $0x50] sm:$0xff] %v382_v10  ;;  %385 = vst [vmem:[%s1676_s12 + $0x58] sm:$0xff] %v384_v11  ;;  %v386_v12 = vld [vmem:[%s1671_s11 + $0xc0] sm:$0xff]  ;;  %v388_v13 = vld [vmem:[%s1671_s11 + $0xd0] sm:$0xff] }
  0x1f   : > { %v390_v14 = vld [vmem:[%s1671_s11 + $0xe0] sm:$0xff]  ;;  %387 = vst [vmem:[%s1676_s12 + $0x60] sm:$0xff] %v386_v12  ;;  %389 = vst [vmem:[%s1676_s12 + $0x68] sm:$0xff] %v388_v13  ;;  %v392_v15 = vld [vmem:[%s1671_s11 + $0xf0] sm:$0xff] }
  0x20   : > { %391 = vst [vmem:[%s1676_s12 + $0x70] sm:$0xff] %v390_v14  ;;  %v394_v16 = vld [vmem:[%s1671_s11 + $0x100] sm:$0xff]  ;;  %v396_v17 = vld [vmem:[%s1671_s11 + $0x110] sm:$0xff]  ;;  %393 = vst [vmem:[%s1676_s12 + $0x78] sm:$0xff] %v392_v15 }
  0x21   : > { %395 = vst [vmem:[%s1676_s12 + $0x80] sm:$0xff] %v394_v16  ;;  %397 = vst [vmem:[%s1676_s12 + $0x88] sm:$0xff] %v396_v17  ;;  %v398_v18 = vld [vmem:[%s1671_s11 + $0x120] sm:$0xff]  ;;  %v400_v19 = vld [vmem:[%s1671_s11 + $0x130] sm:$0xff] }
  0x22   : > { %v402_v20 = vld [vmem:[%s1671_s11 + $0x140] sm:$0xff]  ;;  %399 = vst [vmem:[%s1676_s12 + $0x90] sm:$0xff] %v398_v18  ;;  %401 = vst [vmem:[%s1676_s12 + $0x98] sm:$0xff] %v400_v19  ;;  %v404_v21 = vld [vmem:[%s1671_s11 + $0x150] sm:$0xff] }
  0x23   : > { %403 = vst [vmem:[%s1676_s12 + $0xa0] sm:$0xff] %v402_v20  ;;  %v406_v22 = vld [vmem:[%s1671_s11 + $0x160] sm:$0xff]  ;;  %v408_v23 = vld [vmem:[%s1671_s11 + $0x170] sm:$0xff]  ;;  %405 = vst [vmem:[%s1676_s12 + $0xa8] sm:$0xff] %v404_v21 }
  0x24   : > { %407 = vst [vmem:[%s1676_s12 + $0xb0] sm:$0xff] %v406_v22  ;;  %409 = vst [vmem:[%s1676_s12 + $0xb8] sm:$0xff] %v408_v23  ;;  %v410_v24 = vld [vmem:[%s1671_s11 + $0x180] sm:$0xff]  ;;  %v412_v25 = vld [vmem:[%s1671_s11 + $0x190] sm:$0xff] }
  0x25   : > { %v414_v26 = vld [vmem:[%s1671_s11 + $0x1a0] sm:$0xff]  ;;  %411 = vst [vmem:[%s1676_s12 + $0xc0] sm:$0xff] %v410_v24  ;;  %413 = vst [vmem:[%s1676_s12 + $0xc8] sm:$0xff] %v412_v25  ;;  %v416_v27 = vld [vmem:[%s1671_s11 + $0x1b0] sm:$0xff] }
  0x26   : > { %415 = vst [vmem:[%s1676_s12 + $0xd0] sm:$0xff] %v414_v26  ;;  %v418_v28 = vld [vmem:[%s1671_s11 + $0x1c0] sm:$0xff]  ;;  %v420_v29 = vld [vmem:[%s1671_s11 + $0x1d0] sm:$0xff]  ;;  %417 = vst [vmem:[%s1676_s12 + $0xd8] sm:$0xff] %v416_v27 }
  0x27   : > { %419 = vst [vmem:[%s1676_s12 + $0xe0] sm:$0xff] %v418_v28  ;;  %421 = vst [vmem:[%s1676_s12 + $0xe8] sm:$0xff] %v420_v29  ;;  %v422_v30 = vld [vmem:[%s1671_s11 + $0x1e0] sm:$0xff]  ;;  %v424_v31 = vld [vmem:[%s1671_s11 + $0x1f0] sm:$0xff] }
  0x28   : > { %v426_v32 = vld [vmem:[%s1671_s11 + $0x200] sm:$0xff]  ;;  %423 = vst [vmem:[%s1676_s12 + $0xf0] sm:$0xff] %v422_v30  ;;  %425 = vst [vmem:[%s1676_s12 + $0xf8] sm:$0xff] %v424_v31  ;;  %v428_v33 = vld [vmem:[%s1671_s11 + $0x210] sm:$0xff] }
  0x29   : > { %427 = vst [vmem:[%s1676_s12 + $0x100] sm:$0xff] %v426_v32  ;;  %v430_v34 = vld [vmem:[%s1671_s11 + $0x220] sm:$0xff]  ;;  %v432_v35 = vld [vmem:[%s1671_s11 + $0x230] sm:$0xff]  ;;  %429 = vst [vmem:[%s1676_s12 + $0x108] sm:$0xff] %v428_v33 }
  0x2a   : > { %431 = vst [vmem:[%s1676_s12 + $0x110] sm:$0xff] %v430_v34  ;;  %433 = vst [vmem:[%s1676_s12 + $0x118] sm:$0xff] %v432_v35  ;;  %v434_v36 = vld [vmem:[%s1671_s11 + $0x240] sm:$0xff]  ;;  %v436_v37 = vld [vmem:[%s1671_s11 + $0x250] sm:$0xff] }
  0x2b   : > { %v438_v38 = vld [vmem:[%s1671_s11 + $0x260] sm:$0xff]  ;;  %435 = vst [vmem:[%s1676_s12 + $0x120] sm:$0xff] %v434_v36  ;;  %437 = vst [vmem:[%s1676_s12 + $0x128] sm:$0xff] %v436_v37  ;;  %v440_v39 = vld [vmem:[%s1671_s11 + $0x270] sm:$0xff] }
  0x2c   : > { %439 = vst [vmem:[%s1676_s12 + $0x130] sm:$0xff] %v438_v38  ;;  %v442_v40 = vld [vmem:[%s1671_s11 + $0x280] sm:$0xff]  ;;  %v444_v41 = vld [vmem:[%s1671_s11 + $0x290] sm:$0xff]  ;;  %441 = vst [vmem:[%s1676_s12 + $0x138] sm:$0xff] %v440_v39 }
  0x2d   : > { %443 = vst [vmem:[%s1676_s12 + $0x140] sm:$0xff] %v442_v40  ;;  %445 = vst [vmem:[%s1676_s12 + $0x148] sm:$0xff] %v444_v41  ;;  %v446_v42 = vld [vmem:[%s1671_s11 + $0x2a0] sm:$0xff]  ;;  %v448_v43 = vld [vmem:[%s1671_s11 + $0x2b0] sm:$0xff] }
  0x2e   : > { %v450_v44 = vld [vmem:[%s1671_s11 + $0x2c0] sm:$0xff]  ;;  %447 = vst [vmem:[%s1676_s12 + $0x150] sm:$0xff] %v446_v42  ;;  %449 = vst [vmem:[%s1676_s12 + $0x158] sm:$0xff] %v448_v43  ;;  %v452_v45 = vld [vmem:[%s1671_s11 + $0x2d0] sm:$0xff] }
  0x2f   : > { %451 = vst [vmem:[%s1676_s12 + $0x160] sm:$0xff] %v450_v44  ;;  %v454_v46 = vld [vmem:[%s1671_s11 + $0x2e0] sm:$0xff]  ;;  %v456_v47 = vld [vmem:[%s1671_s11 + $0x2f0] sm:$0xff]  ;;  %453 = vst [vmem:[%s1676_s12 + $0x168] sm:$0xff] %v452_v45 }
  0x30   : > { %455 = vst [vmem:[%s1676_s12 + $0x170] sm:$0xff] %v454_v46  ;;  %457 = vst [vmem:[%s1676_s12 + $0x178] sm:$0xff] %v456_v47  ;;  %v458_v48 = vld [vmem:[%s1671_s11 + $0x300] sm:$0xff]  ;;  %v460_v49 = vld [vmem:[%s1671_s11 + $0x310] sm:$0xff] }
  0x31   : > { %v462_v50 = vld [vmem:[%s1671_s11 + $0x320] sm:$0xff]  ;;  %459 = vst [vmem:[%s1676_s12 + $0x180] sm:$0xff] %v458_v48  ;;  %461 = vst [vmem:[%s1676_s12 + $0x188] sm:$0xff] %v460_v49  ;;  %v464_v51 = vld [vmem:[%s1671_s11 + $0x330] sm:$0xff] }
  0x32   : > { %463 = vst [vmem:[%s1676_s12 + $0x190] sm:$0xff] %v462_v50  ;;  %v466_v52 = vld [vmem:[%s1671_s11 + $0x340] sm:$0xff]  ;;  %v468_v53 = vld [vmem:[%s1671_s11 + $0x350] sm:$0xff]  ;;  %465 = vst [vmem:[%s1676_s12 + $0x198] sm:$0xff] %v464_v51 }
  0x33   : > { %467 = vst [vmem:[%s1676_s12 + $0x1a0] sm:$0xff] %v466_v52  ;;  %469 = vst [vmem:[%s1676_s12 + $0x1a8] sm:$0xff] %v468_v53  ;;  %v470_v54 = vld [vmem:[%s1671_s11 + $0x360] sm:$0xff]  ;;  %v472_v55 = vld [vmem:[%s1671_s11 + $0x370] sm:$0xff] }
  0x34   : > { %v474_v56 = vld [vmem:[%s1671_s11 + $0x380] sm:$0xff]  ;;  %471 = vst [vmem:[%s1676_s12 + $0x1b0] sm:$0xff] %v470_v54  ;;  %473 = vst [vmem:[%s1676_s12 + $0x1b8] sm:$0xff] %v472_v55  ;;  %v476_v57 = vld [vmem:[%s1671_s11 + $0x390] sm:$0xff] }
  0x35   : > { %475 = vst [vmem:[%s1676_s12 + $0x1c0] sm:$0xff] %v474_v56  ;;  %v478_v58 = vld [vmem:[%s1671_s11 + $0x3a0] sm:$0xff]  ;;  %v480_v59 = vld [vmem:[%s1671_s11 + $0x3b0] sm:$0xff]  ;;  %477 = vst [vmem:[%s1676_s12 + $0x1c8] sm:$0xff] %v476_v57 }
  0x36   : > { %479 = vst [vmem:[%s1676_s12 + $0x1d0] sm:$0xff] %v478_v58  ;;  %481 = vst [vmem:[%s1676_s12 + $0x1d8] sm:$0xff] %v480_v59  ;;  %v482_v60 = vld [vmem:[%s1671_s11 + $0x3c0] sm:$0xff]  ;;  %v484_v61 = vld [vmem:[%s1671_s11 + $0x3d0] sm:$0xff] }
  0x37   : > { %v486_v62 = vld [vmem:[%s1671_s11 + $0x3e0] sm:$0xff]  ;;  %483 = vst [vmem:[%s1676_s12 + $0x1e0] sm:$0xff] %v482_v60  ;;  %485 = vst [vmem:[%s1676_s12 + $0x1e8] sm:$0xff] %v484_v61  ;;  %v488_v63 = vld [vmem:[%s1671_s11 + $0x3f0] sm:$0xff] }
  0x38   : > { %487 = vst [vmem:[%s1676_s12 + $0x1f0] sm:$0xff] %v486_v62  ;;  %489 = vst [vmem:[%s1676_s12 + $0x1f8] sm:$0xff] %v488_v63 }
  0x39 PF: > { %p1293_p7 = scmp.ge.s32.totalorder %s1581_s21, 1  ;;  %p510_p8 = scmp.lt.s32.totalorder %s1581_s21, 19 }
  0x3b   : > { %p511_p9 = pnand %p1293_p7, %p510_p8 }
  0x3c   : > { %s517_s13 = sand.u32 (!%p511_p9), 1, %s1557_s15   ;;  %s1295_s14 = sshll.u32 (!%p511_p9), %s1565_s17, 2 }
  0x3d   : > { %514 = sbr.rel (%p511_p9) target bundleno = 380 (0x17c), region = 70  ;;  %s1294_s24 = sshll.u32 (!%p511_p9), %s517_s13, 9 }
  0x3e   : > { %p565_p10 = scmp.lt.s32.totalorder (!%p511_p9), %s1295_s14, 35  ;;  %s1296_s25 = sshll.u32 (!%p511_p9), %s1569_s18, 1 }
  0x3f   : > { %p574_p11 = scmp.lt.s32.totalorder (!%p511_p9), %s1296_s25, 3  ;;  %s1830_s12 = scalar_lea.vmem (!%p511_p9), [#allocation3], %s1294_s24 }
  0x40   : > { %p1300_p12 = scmp.ne.s32.totalorder (!%p511_p9), %s1565_s17, 0 }
  0x44   : > { %s1959_s14 = smov (!%p565_p10, %s1295_s14), 35  ;;  %s1961_s25 = smov (!%p574_p11, %s1296_s25), 3 }
  0x45   : > { %s569_s29 = scalar_lea.vmem %s1941_s0, %s1959_s14  ;;  %s576_s15 = scalar_lea.vmem %s1943_s2, %s1961_s25  ;;  %v1583_v0 = vmov (!%p1300_p12), 0.0  }
  0x46   : > { %s581_s18 = scalar_lea.vmem %s1944_s3, %s1961_s25  ;;  %s1299_s8 = sshll.u32 %s1961_s25, 1  ;;  %597 = vst [vmem:[#allocation2] sm:$0xf] (!%p1300_p12), %v1583_v0 }
  0x47   : > { %s1828_s11 = scalar_lea.vmem %s1945_s4, %s1299_s8  ;;  %596 = sbr.rel (%p1300_p12) target bundleno = 78 (0x4e), region = 78 }
  0x4e PF: > { %v1431_v1 = vld [vmem:[%s1830_s12 + $0x4] ss:$8 sps:$4 sm:$0xff]   ;;  %v1435_v3 = vld [vmem:[%s1830_s12] ss:$8 sps:$4 sm:$0xff]   ;;  %v1437_v5 = vld [vmem:[%s1830_s12 + $0x14] ss:$8 sps:$4 sm:$0xff]   ;;  %v676_v41 = vlaneseq }
  0x4f   : > { %v1433_v2 = vld [vmem:[%s1830_s12 + $0x104] ss:$8 sps:$4 sm:$0xff]   ;;  %1013 = vmatprep.subr.bf16.mxu1 %v1431_v1  ;;  %v1436_v4 = vld [vmem:[%s1830_s12 + $0x100] ss:$8 sps:$4 sm:$0xff]   ;;  %v1439_v6 = vld [vmem:[%s1830_s12 + $0x114] ss:$8 sps:$4 sm:$0xff]  }
  0x50   : > { %1054 = vmatprep.subr.bf16.mxu0 %v1433_v2  ;;  %1014 = vmatpush1.bf16.msra.mxu1 %v1435_v3  ;;  %v1441_v7 = vld [vmem:[%s1830_s12 + $0x10] ss:$8 sps:$4 sm:$0xff]   ;;  %v1443_v9 = vld [vmem:[%s1830_s12 + $0x24] ss:$8 sps:$4 sm:$0xff]   ;;  %v1447_v11 = vld [vmem:[%s1830_s12 + $0x20] ss:$8 sps:$4 sm:$0xff]  }
  0x51   : > { %1055 = vmatpush1.bf16.msra.mxu0 %v1436_v4  ;;  %1015 = vmatprep.subr.bf16.mxu1 %v1437_v5  ;;  %v1442_v8 = vld [vmem:[%s1830_s12 + $0x110] ss:$8 sps:$4 sm:$0xff]   ;;  %v1445_v10 = vld [vmem:[%s1830_s12 + $0x124] ss:$8 sps:$4 sm:$0xff]   ;;  %v1448_v12 = vld [vmem:[%s1830_s12 + $0x120] ss:$8 sps:$4 sm:$0xff]  }
  0x52   : > { %1056 = vmatprep.subr.bf16.mxu0 %v1439_v6  ;;  %v1449_v13 = vld [vmem:[%s1830_s12 + $0x34] ss:$8 sps:$4 sm:$0xff]   ;;  %v1453_v15 = vld [vmem:[%s1830_s12 + $0x30] ss:$8 sps:$4 sm:$0xff]   ;;  %v1455_v17 = vld [vmem:[%s1830_s12 + $0x44] ss:$8 sps:$4 sm:$0xff]  }
  0x53   : > { %v1451_v14 = vld [vmem:[%s1830_s12 + $0x134] ss:$8 sps:$4 sm:$0xff]   ;;  %v1454_v16 = vld [vmem:[%s1830_s12 + $0x130] ss:$8 sps:$4 sm:$0xff]   ;;  %v1457_v18 = vld [vmem:[%s1830_s12 + $0x144] ss:$8 sps:$4 sm:$0xff]  }
  0x54   : > { %1016 = vmatpush1.bf16.msra.mxu1 %v1441_v7  ;;  %v1459_v19 = vld [vmem:[%s1830_s12 + $0x40] ss:$8 sps:$4 sm:$0xff]   ;;  %v1461_v21 = vld [vmem:[%s1830_s12 + $0x54] ss:$8 sps:$4 sm:$0xff]   ;;  %v1465_v23 = vld [vmem:[%s1830_s12 + $0x50] ss:$8 sps:$4 sm:$0xff]  }
  0x55   : > { %1057 = vmatpush1.bf16.msra.mxu0 %v1442_v8  ;;  %1017 = vmatprep.subr.bf16.mxu1 %v1443_v9  ;;  %v1460_v20 = vld [vmem:[%s1830_s12 + $0x140] ss:$8 sps:$4 sm:$0xff]   ;;  %v1463_v22 = vld [vmem:[%s1830_s12 + $0x154] ss:$8 sps:$4 sm:$0xff]   ;;  %v1466_v24 = vld [vmem:[%s1830_s12 + $0x150] ss:$8 sps:$4 sm:$0xff]  }
  0x56   : > { %1058 = vmatprep.subr.bf16.mxu0 %v1445_v10  ;;  %v1467_v25 = vld [vmem:[%s1830_s12 + $0x64] ss:$8 sps:$4 sm:$0xff]   ;;  %v1471_v27 = vld [vmem:[%s1830_s12 + $0x60] ss:$8 sps:$4 sm:$0xff]   ;;  %v1473_v29 = vld [vmem:[%s1830_s12 + $0x74] ss:$8 sps:$4 sm:$0xff]  }
  0x57   : > { %v1469_v26 = vld [vmem:[%s1830_s12 + $0x164] ss:$8 sps:$4 sm:$0xff]   ;;  %v1472_v28 = vld [vmem:[%s1830_s12 + $0x160] ss:$8 sps:$4 sm:$0xff]   ;;  %v1475_v30 = vld [vmem:[%s1830_s12 + $0x174] ss:$8 sps:$4 sm:$0xff]  }
  0x58   : > { %1018 = vmatpush1.bf16.msra.mxu1 %v1447_v11  ;;  %v1477_v31 = vld [vmem:[%s1830_s12 + $0x70] ss:$8 sps:$4 sm:$0xff]   ;;  %v1479_v33 = vld [vmem:[%s1830_s12 + $0x84] ss:$8 sps:$4 sm:$0xff]   ;;  %v1483_v35 = vld [vmem:[%s1830_s12 + $0x80] ss:$8 sps:$4 sm:$0xff]  }
  0x59   : > { %1059 = vmatpush1.bf16.msra.mxu0 %v1448_v12  ;;  %1019 = vmatprep.subr.bf16.mxu1 %v1449_v13  ;;  %v1478_v32 = vld [vmem:[%s1830_s12 + $0x170] ss:$8 sps:$4 sm:$0xff]   ;;  %v1481_v34 = vld [vmem:[%s1830_s12 + $0x184] ss:$8 sps:$4 sm:$0xff]   ;;  %v1484_v36 = vld [vmem:[%s1830_s12 + $0x180] ss:$8 sps:$4 sm:$0xff]  }
  0x5a   : > { %1060 = vmatprep.subr.bf16.mxu0 %v1451_v14  ;;  %v1485_v37 = vld [vmem:[%s1830_s12 + $0x94] ss:$8 sps:$4 sm:$0xff]   ;;  %v1584_v39 = vmov 1966171168   ;;  %v1489_v42 = vld [vmem:[%s1830_s12 + $0x90] ss:$8 sps:$4 sm:$0xff]  }
  0x5b   : > { %v1487_v38 = vld [vmem:[%s1830_s12 + $0x194] ss:$8 sps:$4 sm:$0xff]   ;;  %v674_v40 = vunpack.c.l.s4 %v1584_v39  ;;  %v1490_v43 = vld [vmem:[%s1830_s12 + $0x190] ss:$8 sps:$4 sm:$0xff]   ;;  %v1491_v44 = vld [vmem:[%s1830_s12 + $0xa4] ss:$8 sps:$4 sm:$0xff]  }
  0x5c   : > { %1020 = vmatpush1.bf16.msra.mxu1 %v1453_v15  ;;  %v1493_v45 = vld [vmem:[%s1830_s12 + $0x1a4] ss:$8 sps:$4 sm:$0xff]   ;;  %v1875_v47 = vshrl.u32 %v676_v41, 7  ;;  %v1495_v48 = vld [vmem:[%s1830_s12 + $0xa0] ss:$8 sps:$4 sm:$0xff]   ;;  %p1366_p13 = scmp.ne.s32.totalorder %s1565_s17, 8 }
  0x5d   : > { %1061 = vmatpush1.bf16.msra.mxu0 %v1454_v16  ;;  %1021 = vmatprep.subr.bf16.mxu1 %v1455_v17  ;;  %v675_v46 = vunpack.c.0.s8 %v674_v40  ;;  %v1496_v49 = vld [vmem:[%s1830_s12 + $0x1a0] ss:$8 sps:$4 sm:$0xff]   ;;  %v1497_v50 = vld [vmem:[%s1830_s12 + $0xb4] ss:$8 sps:$4 sm:$0xff]   ;;  %v1501_v54 = vld [vmem:[%s1830_s12 + $0xb0] ss:$8 sps:$4 sm:$0xff]  }
  0x5e   : > { %1062 = vmatprep.subr.bf16.mxu0 %v1457_v18  ;;  %v1499_v51 = vld [vmem:[%s1830_s12 + $0x1b4] ss:$8 sps:$4 sm:$0xff]   ;;  %v1502_v55 = vld [vmem:[%s1830_s12 + $0x1b0] ss:$8 sps:$4 sm:$0xff]   ;;  %v1503_v57 = vld [vmem:[%s1830_s12 + $0xc4] ss:$8 sps:$4 sm:$0xff]  }
  0x5f   : > { %v678_v52 = vsub.s32 %v675_v46, %v1875_v47  ;;  %v1301_v53 = vld.sshfl [vmem:[%s569_s29] sm:$0x33 pattern:$0x75316420]  ;;  %v1505_v58 = vld [vmem:[%s1830_s12 + $0x1c4] ss:$8 sps:$4 sm:$0xff]  }
  0x60   : > { %1022 = vmatpush1.bf16.msra.mxu1 %v1459_v19  ;;  %v672_v56 = vcombine.high %v1301_v53, %v1301_v53  ;;  %v1507_v60 = vld [vmem:[%s1830_s12 + $0xc0] ss:$8 sps:$4 sm:$0xff]   ;;  %v1509_v63 = vld [vmem:[%s1830_s12 + $0xd4] ss:$8 sps:$4 sm:$0xff]   ;;  %v1513_v1 = vld [vmem:[%s1830_s12 + $0xd0] ss:$8 sps:$4 sm:$0xff]  }
  0x61   : > { %1063 = vmatpush1.bf16.msra.mxu0 %v1460_v20  ;;  %1023 = vmatprep.subr.bf16.mxu1 %v1461_v21  ;;  %v1508_v61 = vld [vmem:[%s1830_s12 + $0x1c0] ss:$8 sps:$4 sm:$0xff]   ;;  %v1511_v0 = vld [vmem:[%s1830_s12 + $0x1d4] ss:$8 sps:$4 sm:$0xff]   ;;  %v1514_v2 = vld [vmem:[%s1830_s12 + $0x1d0] ss:$8 sps:$4 sm:$0xff]   ;;  %v679_v9 = vrot.slane %v1301_v53, %v678_v52 }
  0x62   : > { %1064 = vmatprep.subr.bf16.mxu0 %v1463_v22  ;;  %v686_v59 = vrot.slane %v672_v56, %v678_v52  ;;  %v1515_v3 = vld [vmem:[%s1830_s12 + $0xe4] ss:$8 sps:$4 sm:$0xff]   ;;  %v1519_v5 = vld [vmem:[%s1830_s12 + $0xe0] ss:$8 sps:$4 sm:$0xff]   ;;  %v1521_v7 = vld [vmem:[%s1830_s12 + $0xf4] ss:$8 sps:$4 sm:$0xff]  }
  0x63   : > { %v1517_v4 = vld [vmem:[%s1830_s12 + $0x1e4] ss:$8 sps:$4 sm:$0xff]   ;;  %v1520_v6 = vld [vmem:[%s1830_s12 + $0x1e0] ss:$8 sps:$4 sm:$0xff]   ;;  %v1523_v8 = vld [vmem:[%s1830_s12 + $0x1f4] ss:$8 sps:$4 sm:$0xff]   ;;  %v687_v12 = vcombine.high %v679_v9, %v679_v9 }
  0x64   : > { %1024 = vmatpush1.bf16.msra.mxu1 %v1465_v23  ;;  %v688_v62 = vcombine.high %v686_v59, %v686_v59  ;;  %1045 = vmatprep.mubr.bf16.mxu1 %v686_v59  ;;  %v1525_v10 = vld [vmem:[%s1830_s12 + $0xf0] ss:$8 sps:$4 sm:$0xff]   ;;  %v1585_v13 = vmov 1983009808  }
  0x65   : > { %1065 = vmatpush1.bf16.msra.mxu0 %v1466_v24  ;;  %1025 = vmatprep.subr.bf16.mxu1 %v1467_v25  ;;  %v1526_v11 = vld [vmem:[%s1830_s12 + $0x1f0] ss:$8 sps:$4 sm:$0xff]   ;;  %v1099_v14 = vunpack.c.l.s4 %v1585_v13 }
  0x66   : > { %1066 = vmatprep.subr.bf16.mxu0 %v1469_v26  ;;  %1086 = vmatprep.mubr.bf16.mxu0 %v688_v62 }
  0x67   : > { %v1100_v15 = vunpack.c.0.s8 %v1099_v14 }
  0x68   : > { %1026 = vmatpush1.bf16.msra.mxu1 %v1471_v27 }
  0x69   : > { %1067 = vmatpush1.bf16.msra.mxu0 %v1472_v28  ;;  %1027 = vmatprep.subr.bf16.mxu1 %v1473_v29  ;;  %v1103_v22 = vsub.s32 %v1100_v15, %v1875_v47  ;;  %v598_v28 = vld [vmem:[#allocation2] sm:$0xf] }
  0x6a   : > { %1068 = vmatprep.subr.bf16.mxu0 %v1475_v30 }
  0x6c   : > { %1028 = vmatpush1.bf16.msra.mxu1 %v1477_v31  ;;  %v1113_v31 = vld [vmem:[%s576_s15] sm:$0x3] (!%p1366_p13) }
  0x6d   : > { %1069 = vmatpush1.bf16.msra.mxu0 %v1478_v32  ;;  %1029 = vmatprep.subr.bf16.mxu1 %v1479_v33  ;;  %v1117_v32 = vsub.s32 (!%p1366_p13), 0, %v1875_v47  ;;  %v1121_v33 = vsub.s32 (!%p1366_p13), 1, %v1875_v47 }
  0x6e   : > { %1070 = vmatprep.subr.bf16.mxu0 %v1481_v34  ;;  %v1133_v34 = vld [vmem:[%s581_s18] sm:$0x3] (!%p1366_p13) }
  0x70   : > { %1030 = vmatpush1.bf16.msra.mxu1 %v1483_v35  ;;  %v1118_v35 = vrot.slane (!%p1366_p13), %v1113_v31, %v1117_v32 }
  0x71   : > { %1071 = vmatpush1.bf16.msra.mxu0 %v1484_v36  ;;  %1031 = vmatprep.subr.bf16.mxu1 %v1485_v37  ;;  %v1122_v36 = vrot.slane (!%p1366_p13), %v1113_v31, %v1121_v33  ;;  %v1138_v37 = vrot.slane (!%p1366_p13), %v1133_v34, %v1117_v32 }
  0x72   : > { %1072 = vmatprep.subr.bf16.mxu0 %v1487_v38  ;;  %v1142_v38 = vrot.slane (!%p1366_p13), %v1133_v34, %v1121_v33 }
  0x73   : > { %v1123_v39 = vcombine.low (!%p1366_p13), %v1118_v35, %v1122_v36 }
  0x74   : > { %1032 = vmatpush1.bf16.msra.mxu1 %v1489_v42  ;;  %v1143_v40 = vcombine.low (!%p1366_p13), %v1138_v37, %v1142_v38 }
  0x75   : > { %1073 = vmatpush1.bf16.msra.mxu0 %v1490_v43  ;;  %1033 = vmatprep.subr.bf16.mxu1 %v1491_v44  ;;  %v1130_v42 = vrot.slane (!%p1366_p13), %v1123_v39, %v1103_v22 }
  0x76   : > { %1074 = vmatprep.subr.bf16.mxu0 %v1493_v45  ;;  %v1150_v43 = vrot.slane (!%p1366_p13), %v1143_v40, %v1103_v22 }
  0x78   : > { %1034 = vmatpush1.bf16.msra.mxu1 %v1495_v48 }
  0x79   : > { %1075 = vmatpush1.bf16.msra.mxu0 %v1496_v49  ;;  %1035 = vmatprep.subr.bf16.mxu1 %v1497_v50 }
  0x7a   : > { %1076 = vmatprep.subr.bf16.mxu0 %v1499_v51 }
  0x7c   : > { %1036 = vmatpush1.bf16.msra.mxu1 %v1501_v54 }
  0x7d   : > { %1077 = vmatpush1.bf16.msra.mxu0 %v1502_v55  ;;  %1037 = vmatprep.subr.bf16.mxu1 %v1503_v57 }
  0x7e   : > { %1078 = vmatprep.subr.bf16.mxu0 %v1505_v58 }
  0x80   : > { %1038 = vmatpush1.bf16.msra.mxu1 %v1507_v60 }
  0x81   : > { %1079 = vmatpush1.bf16.msra.mxu0 %v1508_v61  ;;  %1039 = vmatprep.subr.bf16.mxu1 %v1509_v63 }
  0x82   : > { %1080 = vmatprep.subr.bf16.mxu0 %v1511_v0 }
  0x84   : > { %1040 = vmatpush1.bf16.msra.mxu1 %v1513_v1 }
  0x85   : > { %1081 = vmatpush1.bf16.msra.mxu0 %v1514_v2  ;;  %1041 = vmatprep.subr.bf16.mxu1 %v1515_v3 }
  0x86   : > { %1082 = vmatprep.subr.bf16.mxu0 %v1517_v4 }
  0x88   : > { %1042 = vmatpush1.bf16.msra.mxu1 %v1519_v5 }
  0x89   : > { %1083 = vmatpush1.bf16.msra.mxu0 %v1520_v6  ;;  %1043 = vmatprep.subr.bf16.mxu1 %v1521_v7 }
  0x8a   : > { %1084 = vmatprep.subr.bf16.mxu0 %v1523_v8 }
  0x8c   : > { %1044 = vmatpush1.bf16.msra.mxu1 %v1525_v10 }
  0x8d   : > { %1085 = vmatpush1.bf16.msra.mxu0 %v1526_v11 }
  0x8f   : > { %1046 = vmatmul.mubr.bf16.vlgmr.msra.gmra.mrb[0].mxu1 %v679_v9 }
  0x90   : > { %1087 = vmatmul.mubr.bf16.vlgmr.msra.gmra.mrb[0].mxu0 %v687_v12 }
 0x162   : > { %v1047_v16 = vpop.f32.mrb[0].mxu1 }
 0x163   : > { %v1088_v17 = vpop.f32.mrb[0].mxu0  ;;  %v1049_v19 = vpop.f32.mrb[1].mxu1 }
 0x164   : > { %v1089_v18 = vadd.f32 %v1088_v17, %v1047_v16  ;;  %v1090_v20 = vpop.f32.mrb[1].mxu0  ;;  %v1051_v23 = vpop.f32.mrb[2].mxu1 }
 0x165   : > { %v1091_v21 = vadd.f32 %v1090_v20, %v1049_v19  ;;  %v1092_v24 = vpop.f32.mrb[2].mxu0  ;;  %v1052_v25 = vpop.f32.mrb[3].mxu1 }
 0x166   : > { %v1093_v26 = vpop.f32.mrb[3].mxu0 }
 0x167   : > { %v1097_v27 = vcombine.low %v1089_v18, %v1091_v21  ;;  %1111 = sbr.rel (%p1366_p13) target bundleno = 380 (0x17c), region = 82 }
 0x169   : > { %v1104_v29 = vrot.slane %v1097_v27, %v1103_v22 }
 0x16b   : > { %v1106_v30 = vadd.f32 %v1104_v29, %v598_v28 }
 0x16d   : > { %1107 = vst [vmem:[#allocation2] sm:$0xf] %v1106_v30 }
 0x174   : > { %v1112_v41 = vld [vmem:[#allocation2] sm:$0xf] }
 0x175   : > { %v1132_v44 = vmul.f32 %v1130_v42, %v1112_v41 }
 0x177   : > { %v1152_v45 = vadd.f32 %v1150_v43, %v1132_v44 }
 0x179   : > { %v1153_v46 = vmax.f32 %v1152_v45, 0.0 }
 0x17b   : > { %1154 = vst [vmem:[%s1828_s11] sm:$0xf] %v1153_v46 }
 0x17c PF: > { %s14_s21 = sadd.s32 1, %s1581_s21   ;;  %s1946_s15 = smov %s1561_s16 }
 0x17d   : > { %p11_p0 = scmp.ge.s32.totalorder %s14_s21, 20   ;;  %s1947_s16 = smov %s1662_s28 }
 0x17e   : > { %s1948_s17 = smov %s1573_s19  ;;  %s1949_s18 = smov %s1577_s20 }
 0x17f   : > { %s1950_s19 = smov %s1953_s22  ;;  %s1951_s20 = smov %s1957_s23 }
 0x180   :  { %13 = sbr.rel (!%p11_p0) target bundleno = 4 (0x4), region = 126 }

// kernel: resnet18_forward.42
= control target key start
LH: loop header
LB: loop body
LE: loop exit
PB: predicated region body
PF: predicated region fallthrough
CT: control target
= control target key end

     0   :  { %s193_s6 = smov 0   ;;  %s213_s0 = inlined_call_operand.vmem [shape: f32[2,1,512], index: 0, kind: input, shape index: {}]   ;;  %s214_s1 = inlined_call_operand.vmem [shape: f32[2,1,512], index: 1, kind: output, shape index: {}]  }
   0x1 LB: > { %s172_s7 = sadd.s32 4294967295, %s195_s6   ;;  %p176_p0 = scmp.ge.s32.totalorder %s195_s6, 1  ;;  %s195_s6 = sphi %s193_s6, %s11_s6  }
   0x2   : > { %p86_p1 = scmp.lt.s32.totalorder %s195_s6, 3 }
   0x4   : > { %p87_p2 = pnand %p176_p0, %p86_p1 }
   0x5   : > { %p104_p3 = scmp.lt.s32.totalorder (!%p87_p2), %s172_s7, 1  ;;  %v114_v0 = vlaneseq (!%p87_p2) }
   0x6   : > { %90 = sbr.rel (%p87_p2) target bundleno = 18 (0x12), region = 24 }
   0x7   : > { %vm116_vm0 = vcmp.lt.s32.totalorder (!%p87_p2), %v114_v0, 512 }
   0xd   : > { %s216_s7 = smov (!%p104_p3, %s172_s7), 1 }
   0xe   : > { %s177_s8 = sshll.u32 %s216_s7, 2 }
   0xf   : > { %s107_s11 = scalar_lea.vmem %s213_s0, %s177_s8  ;;  %s111_s14 = scalar_lea.vmem %s214_s1, %s177_s8 }
  0x10   : > { %v112_v1 = vld [vmem:[%s107_s11] sm:$0xf] }
  0x11   : > { %118 = vst.msk [vmem:[%s111_s14] sm:$0xf] %vm116_vm0, %v112_v1 }
  0x12 PF: > { %s11_s6 = sadd.s32 1, %s195_s6  }
  0x13   : > { %p8_p4 = scmp.ge.s32.totalorder %s11_s6, 4  }
  0x15   :  { %10 = sbr.rel (!%p8_p4) target bundleno = 1 (0x1), region = 54 }

// kernel: resnet18_forward.43
= control target key start
LH: loop header
LB: loop body
LE: loop exit
PB: predicated region body
PF: predicated region fallthrough
CT: control target
= control target key end

     0   :  { %v103_v30 = vlaneseq  ;;  %v568_v34 = vmov 1966171168   ;;  %s716_s0 = inlined_call_operand.vmem [shape: bf16[2,512], index: 0, kind: input, shape index: {}]   ;;  %s717_s1 = inlined_call_operand.vmem [shape: bf16[512,10], index: 1, kind: input, shape index: {}]   ;;  %s718_s2 = inlined_call_operand.vmem [shape: f32[1,10], index: 2, kind: input, shape index: {}]   ;;  %s719_s3 = inlined_call_operand.vmem [shape: f32[1,10], index: 3, kind: input, shape index: {}]   ;;  %s720_s4 = inlined_call_operand.hbm [shape: f32[2,10], index: 4, kind: output, shape index: {}]  }
   0x1   :  { %v512_v0 = vld [vmem:[%s717_s1 + $0x40] sm:$0xff]   ;;  %v516_v4 = vld [vmem:[%s717_s1 + $0x48] sm:$0xff]   ;;  %v520_v8 = vld [vmem:[%s717_s1 + $0x50] sm:$0xff]   ;;  %v101_v35 = vunpack.c.l.s4 %v568_v34 }
   0x2   :  { %v513_v1 = vld [vmem:[%s717_s1 + $0xc0] sm:$0xff]   ;;  %465 = vmatprep.subr.bf16.mxu0 %v512_v0  ;;  %v517_v5 = vld [vmem:[%s717_s1 + $0xc8] sm:$0xff]   ;;  %v521_v9 = vld [vmem:[%s717_s1 + $0xd0] sm:$0xff]   ;;  %v104_v36 = vshrl.u32 %v103_v30, 7 }
   0x3   :  { %v514_v2 = vld [vmem:[%s717_s1] sm:$0xff]   ;;  %487 = vmatprep.subr.bf16.mxu1 %v513_v1  ;;  %v518_v6 = vld [vmem:[%s717_s1 + $0x8] sm:$0xff]   ;;  %v522_v10 = vld [vmem:[%s717_s1 + $0x10] sm:$0xff]  }
   0x4   :  { %v515_v3 = vld [vmem:[%s717_s1 + $0x80] sm:$0xff]   ;;  %466 = vmatpush3.bf16.msra.mxu0 %v514_v2  ;;  %v519_v7 = vld [vmem:[%s717_s1 + $0x88] sm:$0xff]   ;;  %v523_v11 = vld [vmem:[%s717_s1 + $0x90] sm:$0xff]  }
   0x5   :  { %488 = vmatpush3.bf16.msra.mxu1 %v515_v3  ;;  %467 = vmatprep.subr.bf16.mxu0 %v516_v4  ;;  %v524_v12 = vld [vmem:[%s717_s1 + $0x58] sm:$0xff]   ;;  %v528_v16 = vld [vmem:[%s717_s1 + $0x60] sm:$0xff]   ;;  %v532_v20 = vld [vmem:[%s717_s1 + $0x68] sm:$0xff]  }
   0x6   :  { %489 = vmatprep.subr.bf16.mxu1 %v517_v5  ;;  %v525_v13 = vld [vmem:[%s717_s1 + $0xd8] sm:$0xff]   ;;  %v529_v17 = vld [vmem:[%s717_s1 + $0xe0] sm:$0xff]   ;;  %v533_v21 = vld [vmem:[%s717_s1 + $0xe8] sm:$0xff]  }
   0x7   :  { %v526_v14 = vld [vmem:[%s717_s1 + $0x18] sm:$0xff]   ;;  %v530_v18 = vld [vmem:[%s717_s1 + $0x20] sm:$0xff]   ;;  %v534_v22 = vld [vmem:[%s717_s1 + $0x28] sm:$0xff]  }
   0x8   :  { %468 = vmatpush3.bf16.msra.mxu0 %v518_v6  ;;  %v527_v15 = vld [vmem:[%s717_s1 + $0x98] sm:$0xff]   ;;  %v531_v19 = vld [vmem:[%s717_s1 + $0xa0] sm:$0xff]   ;;  %v535_v23 = vld [vmem:[%s717_s1 + $0xa8] sm:$0xff]  }
   0x9   :  { %490 = vmatpush3.bf16.msra.mxu1 %v519_v7  ;;  %469 = vmatprep.subr.bf16.mxu0 %v520_v8  ;;  %v536_v24 = vld [vmem:[%s717_s1 + $0x70] sm:$0xff]   ;;  %v540_v28 = vld [vmem:[%s717_s1 + $0x78] sm:$0xff]   ;;  %v430_v33 = vld.sshfl [vmem:[%s716_s0] sm:$0x33 pattern:$0x75316420] }
   0xa   :  { %491 = vmatprep.subr.bf16.mxu1 %v521_v9  ;;  %v537_v25 = vld [vmem:[%s717_s1 + $0xf0] sm:$0xff]   ;;  %v541_v29 = vld [vmem:[%s717_s1 + $0xf8] sm:$0xff]  }
   0xb   :  { %v538_v26 = vld [vmem:[%s717_s1 + $0x30] sm:$0xff]   ;;  %v542_v31 = vld [vmem:[%s717_s1 + $0x38] sm:$0xff]  }
   0xc   :  { %470 = vmatpush3.bf16.msra.mxu0 %v522_v10  ;;  %v539_v27 = vld [vmem:[%s717_s1 + $0xb0] sm:$0xff]   ;;  %v543_v32 = vld [vmem:[%s717_s1 + $0xb8] sm:$0xff]  }
   0xd   :  { %492 = vmatpush3.bf16.msra.mxu1 %v523_v11  ;;  %471 = vmatprep.subr.bf16.mxu0 %v524_v12 }
   0xe   :  { %493 = vmatprep.subr.bf16.mxu1 %v525_v13 }
  0x10   :  { %472 = vmatpush3.bf16.msra.mxu0 %v526_v14 }
  0x11   :  { %494 = vmatpush3.bf16.msra.mxu1 %v527_v15  ;;  %473 = vmatprep.subr.bf16.mxu0 %v528_v16 }
  0x12   :  { %495 = vmatprep.subr.bf16.mxu1 %v529_v17 }
  0x14   :  { %474 = vmatpush3.bf16.msra.mxu0 %v530_v18 }
  0x15   :  { %496 = vmatpush3.bf16.msra.mxu1 %v531_v19  ;;  %475 = vmatprep.subr.bf16.mxu0 %v532_v20 }
  0x16   :  { %497 = vmatprep.subr.bf16.mxu1 %v533_v21 }
  0x18   :  { %476 = vmatpush3.bf16.msra.mxu0 %v534_v22 }
  0x19   :  { %498 = vmatpush3.bf16.msra.mxu1 %v535_v23  ;;  %477 = vmatprep.subr.bf16.mxu0 %v536_v24 }
  0x1a   :  { %499 = vmatprep.subr.bf16.mxu1 %v537_v25 }
  0x1c   :  { %478 = vmatpush3.bf16.msra.mxu0 %v538_v26 }
  0x1d   :  { %500 = vmatpush3.bf16.msra.mxu1 %v539_v27  ;;  %479 = vmatprep.subr.bf16.mxu0 %v540_v28 }
  0x1e   :  { %501 = vmatprep.subr.bf16.mxu1 %v541_v29 }
  0x20   :  { %480 = vmatpush3.bf16.msra.mxu0 %v542_v31 }
  0x21   :  { %502 = vmatpush3.bf16.msra.mxu1 %v543_v32 }
  0x22   :  { %9 = vsyncpa [#allocation4], 0  ;;  %v99_v37 = vcombine.high %v430_v33, %v430_v33  ;;  %v102_v38 = vunpack.c.0.s8 %v101_v35  ;;  %vm23_vm0 = vcmask 74752   ;;  %v569_v44 = vmov 0.0   ;;  %v463_v58 = vld [vmem:[%s718_s2] ss:$0 sm:$0xff] }
  0x23   :  { %24 = vst.msk [vmem:[#allocation2] sm:$0x3] %vm23_vm0, %v569_v44  ;;  %v464_v60 = vld [vmem:[%s719_s3] ss:$0 sm:$0xff]  ;;  %s570_s5 = smov [#allocation3]  }
  0x24   :  { %v105_v39 = vsub.s32 %v102_v38, %v104_v36  ;;  %s422_s6 = sshll.u32 %s570_s5, 4  ;;  %s423_s6 = int_to_ptr.vmem [resolvable:$true] %s422_s6 }
  0x25   :  { %s544_s7 = scalar_lea.vmem %s423_s6, 32  ;;  %p549_p1 = scmp.lt.s32.totalorder %s423_s6, %s423_s6 }
  0x26   :  { %v113_v40 = vrot.slane %v99_v37, %v105_v39  ;;  %v106_v41 = vrot.slane %v430_v33, %v105_v39  ;;  %p545_p0 = scmp.ne.s32.totalorder %s423_s6, %s544_s7  ;;  %p550_p2 = scmp.lt.s32.totalorder %s544_s7, %s544_s7 }
  0x28   :  { %344 = vmatprep.mubr.bf16.mxu0 %v113_v40  ;;  %v115_v42 = vcombine.high %v113_v40, %v113_v40  ;;  %v114_v43 = vcombine.high %v106_v41, %v106_v41  ;;  %p551_p3 = por %p550_p2, %p549_p1 }
  0x29   :  { %345 = vmatmul.mubr.bf16.vlgmr.msra.gmra.mrb[0].mxu0 %v106_v41 }
  0x2a   :  { %384 = vmatprep.mubr.bf16.mxu1 %v115_v42  ;;  %v25_v55 = vld [vmem:[#allocation2] sm:$0x3]  ;;  %p552_p4 = pnand %p551_p3, %p545_p0 }
  0x2b   :  { %385 = vmatmul.mubr.bf16.vlgmr.msra.gmra.mrb[0].mxu1 %v114_v43 }
  0xfc   :  { %v481_v45 = vpop.f32.mrb[0].mxu0 }
  0xfd   :  { %v482_v46 = vpop.f32.mrb[1].mxu0 }
  0xfe   :  { %v503_v47 = vpop.f32.mrb[0].mxu1  ;;  %v483_v48 = vadd.f32 %v482_v46, %v481_v45  ;;  %v484_v49 = vpop.f32.mrb[2].mxu0 }
  0xff   :  { %v504_v50 = vpop.f32.mrb[1].mxu1  ;;  %v485_v51 = vpop.f32.mrb[3].mxu0 }
 0x100   :  { %v505_v52 = vadd.f32 %v504_v50, %v503_v47  ;;  %v506_v53 = vpop.f32.mrb[2].mxu1 }
 0x101   :  { %v507_v54 = vpop.f32.mrb[3].mxu1 }
 0x102   :  { %v387_v56 = vadd.f32 %v505_v52, %v483_v48 }
 0x104   :  { %v392_v57 = vadd.f32 %v387_v56, %v25_v55 }
 0x106   :  { %394 = vst.msk [vmem:[#allocation2] sm:$0x3] %vm23_vm0, %v392_v57 }
 0x10d   :  { %v398_v59 = vld [vmem:[#allocation2] sm:$0x3] }
 0x10e   :  { %v406_v61 = vmul.f32 %v463_v58, %v398_v59 }
 0x110   :  { %v414_v62 = vadd.f32 %v464_v60, %v406_v61 }
 0x112   :  { %415 = vst.msk [vmem:[#allocation3] sm:$0x3] %vm23_vm0, %v414_v62 }
 0x113   :  { %555 = shalt.err (!%p552_p4)
}
 0x114   :  { %s556_s9 = scalar_lea.hbm %s720_s4, 32 }
 0x115   :  { %p557_p5 = scmp.ne.s32.totalorder %s720_s4, %s556_s9  ;;  %p560_p6 = scmp.lt.u32.totalorder %s556_s9, %s720_s4 }
 0x117   :  { %p562_p7 = pnand %p560_p6, %p557_p5 }
 0x119   :  { %565 = shalt.err (!%p562_p7)
}
 0x11a   :  { %425 = dma.vmem_to_hbm [thread:$0]  %s423_s6, 32, %s720_s4, [#allocation4]  }
 0x11b   :  { %566 = dma.done.wait [#allocation4], 32  }
 0x11c   :  { %567 = vsyncadd [#allocation4], 4294967264 }
 0x11d   :  { %429 = vsyncpa [#allocation4], 1 }

</bundles_post_ra>
